<compile_context>
chip_gen: v5e
topology: v5e:2x2
jax: 0.10.0
libtpu: 0.0.40
codegen_flags: <defaults>
</compile_context>

<pallas_src>
import functools

import jax
import jax.numpy as jnp
from jax import lax
from jax.experimental import pallas as pl
from jax.experimental.pallas import tpu as pltpu

CP = 128                          # channel padding (lane width)
VMEM_LIMIT = 32 * 1024 * 1024     # per review: <= 32 MiB (v7x has 64 MiB/TC)


def _pick_th(oh, cap=32):
    """Largest divisor of oh that is <= cap (whole image if oh <= cap)."""
    if oh <= cap:
        return oh
    best = 1
    for d in range(2, cap + 1):
        if oh % d == 0:
            best = d
    return best


# ----------------------------- conv kernel ---------------------------------

def _conv_kernel(x_ref, w_ref, b_ref, sc_ref, sh_ref,
                 y_ref, ps_ref, pss_ref, *scratch,
                 kh, kw, ow, th, apply_in_act):
    """One block of `th` output rows of a valid conv, fused im2col on the MXU.

    x_ref : (1, H, W, CP)   resident bf16 input image (channel padded)
    w_ref : (kh*kw, CP, CP) bf16 per-tap weights
    b_ref : (1, CP)         f32 conv bias
    sc/sh : (1, CP)         previous layer's BN scale/shift (only used when
                            apply_in_act: input BN+ReLU fused here)
    y_ref : (1, th, ow, CP) bf16 conv output rows
    ps/pss: (1, 1, 1, CP)   f32 per-row-block sum / sum-of-squares (BN stats)
    scratch[0] (optional)   (th+kh-1, W, CP) bf16 pre-activated input slab
    """
    rb = pl.program_id(1)
    t0 = rb * th

    if apply_in_act:
        xa_ref = scratch[0]
        sc = sc_ref[...]
        sh = sh_ref[...]
        nfill = th + kh - 1

        # Pre-apply previous layer's BN + ReLU once per row-block (not per
        # tap) into a bf16 VMEM slab; every tap then reads the slab.
        def fill_row(r, carry):
            row = x_ref[0, pl.ds(t0 + r, 1), :, :].astype(jnp.float32)
            act = jnp.maximum(row * sc + sh, 0.0)
            xa_ref[pl.ds(r, 1), :, :] = act.astype(jnp.bfloat16)
            return carry

        lax.fori_loop(0, nfill, fill_row, 0)

        def read_win(tg, j):                       # tg: global input row
            return xa_ref[pl.ds(tg - t0, 1), pl.ds(j, ow), :][0]
    else:
        def read_win(tg, j):
            return x_ref[0, pl.ds(tg, 1), pl.ds(j, ow), :][0]

    bias = b_ref[...]

    def row_body(r, carry):
        s, ss = carry
        t = t0 + r

        def tap_rows(i, acc):                      # fori over kernel rows
            for j in range(kw):                    # static unroll over kw
                win = read_win(t + i, j)           # (ow, CP) bf16
                wk = w_ref[pl.ds(i * kw + j, 1), :, :][0]
                acc = acc + jnp.dot(win, wk,
                                    preferred_element_type=jnp.float32)
            return acc

        acc = lax.fori_loop(0, kh, tap_rows,
                            jnp.zeros((ow, CP), jnp.float32))
        acc = acc + bias
        y_ref[0, pl.ds(r, 1), :, :] = acc[None, :, :].astype(jnp.bfloat16)
        s = s + jnp.sum(acc, axis=0, keepdims=True)
        ss = ss + jnp.sum(acc * acc, axis=0, keepdims=True)
        return s, ss

    zero = jnp.zeros((1, CP), jnp.float32)
    s, ss = lax.fori_loop(0, th, row_body, (zero, zero))
    ps_ref[0, 0] = s
    pss_ref[0, 0] = ss


def conv_layer(x, w, b, in_scale, in_shift, k, apply_in_act):
    n, h, wdt, _ = x.shape
    oh, ow = h - k + 1, wdt - k + 1
    th = _pick_th(oh)
    nrb = oh // th
    kk = k * k
    kernel = functools.partial(_conv_kernel, kh=k, kw=k, ow=ow, th=th,
                               apply_in_act=apply_in_act)
    scratch = ([pltpu.VMEM((th + k - 1, wdt, CP), jnp.bfloat16)]
               if apply_in_act else [])
    return pl.pallas_call(
        kernel,
        out_shape=(jax.ShapeDtypeStruct((n, oh, ow, CP), jnp.bfloat16),
                   jax.ShapeDtypeStruct((n, nrb, 1, CP), jnp.float32),
                   jax.ShapeDtypeStruct((n, nrb, 1, CP), jnp.float32)),
        grid=(n, nrb),
        in_specs=[
            pl.BlockSpec((1, h, wdt, CP), lambda i, r: (i, 0, 0, 0)),
            pl.BlockSpec((kk, CP, CP), lambda i, r: (0, 0, 0)),
            pl.BlockSpec((1, CP), lambda i, r: (0, 0)),
            pl.BlockSpec((1, CP), lambda i, r: (0, 0)),
            pl.BlockSpec((1, CP), lambda i, r: (0, 0)),
        ],
        out_specs=(
            pl.BlockSpec((1, th, ow, CP), lambda i, r: (i, r, 0, 0)),
            pl.BlockSpec((1, 1, 1, CP), lambda i, r: (i, r, 0, 0)),
            pl.BlockSpec((1, 1, 1, CP), lambda i, r: (i, r, 0, 0)),
        ),
        scratch_shapes=scratch,
        compiler_params=pltpu.CompilerParams(
            dimension_semantics=("parallel", "arbitrary"),
            vmem_limit_bytes=VMEM_LIMIT),
    )(x, w, b, in_scale, in_shift)


# --------------------------- max-pool kernel --------------------------------

def _pool_kernel(x_ref, sc_ref, sh_ref, o_ref, *, ph, pw):
    """3x3/s3 max pool (floor mode) with the previous conv's BN+ReLU fused in.

    Column subsampling is done with a constant 0/1 selection matmul (MXU), so
    no strided ref loads / reshapes are needed.
    """
    sc = sc_ref[...]
    sh = sh_ref[...]
    wlim = 3 * pw
    row_i = lax.broadcasted_iota(jnp.int32, (pw, wlim - 2), 0)
    col_i = lax.broadcasted_iota(jnp.int32, (pw, wlim - 2), 1)
    sel = (col_i == 3 * row_i).astype(jnp.bfloat16)   # sel[x, 3x] = 1

    def row_body(r, carry):
        rows = x_ref[0, pl.ds(3 * r, 3), :, :].astype(jnp.float32)  # (3,W,CP)
        act = jnp.maximum(rows * sc + sh, 0.0)          # BN + ReLU fused
        m = jnp.max(act, axis=0)                        # (W, CP) row max
        g = jnp.maximum(jnp.maximum(m[0:wlim - 2], m[1:wlim - 1]),
                        m[2:wlim])                      # 3-wide window max
        out = jnp.dot(sel, g.astype(jnp.bfloat16),
                      preferred_element_type=jnp.float32)   # pick cols 3x
        o_ref[0, pl.ds(r, 1), :, :] = out[None, :, :].astype(jnp.bfloat16)
        return carry

    lax.fori_loop(0, ph, row_body, 0)


def pool_layer(x, scale, shift):
    n, h, w, _ = x.shape
    ph, pw = h // 3, w // 3
    kernel = functools.partial(_pool_kernel, ph=ph, pw=pw)
    return pl.pallas_call(
        kernel,
        out_shape=jax.ShapeDtypeStruct((n, ph, pw, CP), jnp.bfloat16),
        grid=(n,),
        in_specs=[
            pl.BlockSpec((1, h, w, CP), lambda i: (i, 0, 0, 0)),
            pl.BlockSpec((1, CP), lambda i: (0, 0)),
            pl.BlockSpec((1, CP), lambda i: (0, 0)),
        ],
        out_specs=pl.BlockSpec((1, ph, pw, CP), lambda i: (i, 0, 0, 0)),
        compiler_params=pltpu.CompilerParams(
            dimension_semantics=("parallel",),
            vmem_limit_bytes=VMEM_LIMIT),
    )(x, scale, shift)


# ------------------------- fused FC tail kernel -----------------------------

def _fc_tail_kernel(x_ref, sc_ref, sh_ref, w1_ref, b1_ref, g1_ref, be1_ref,
                    w2_ref, b2_ref, o_ref, *, nb, eps):
    """conv5-BN+ReLU -> fc1 -> BatchNorm1d(batch stats) -> ReLU -> fc2."""
    x = x_ref[...].astype(jnp.float32)
    xa = jnp.maximum(x * sc_ref[...] + sh_ref[...], 0.0)       # conv5 BN+ReLU
    h = jnp.dot(xa.astype(jnp.bfloat16), w1_ref[...],
                preferred_element_type=jnp.float32) + b1_ref[...]
    mean = jnp.sum(h, axis=0, keepdims=True) * (1.0 / nb)
    cen = h - mean
    var = jnp.sum(cen * cen, axis=0, keepdims=True) * (1.0 / nb)
    scale = g1_ref[...] * lax.rsqrt(var + eps)
    shift = be1_ref[...] - mean * scale
    ha = jnp.maximum(h * scale + shift, 0.0)
    o_ref[...] = jnp.dot(ha.astype(jnp.bfloat16), w2_ref[...],
                         preferred_element_type=jnp.float32) + b2_ref[...]


def fc_tail(x, sc5, sh5, p1, p2):
    nb, f = x.shape
    o = p2["w"].shape[1]
    kernel = functools.partial(_fc_tail_kernel, nb=float(nb), eps=1e-5)
    return pl.pallas_call(
        kernel,
        out_shape=jax.ShapeDtypeStruct((nb, o), jnp.float32),
        grid=(1,),
        in_specs=[
            pl.BlockSpec((nb, f), lambda i: (0, 0)),
            pl.BlockSpec((1, f), lambda i: (0, 0)),
            pl.BlockSpec((1, f), lambda i: (0, 0)),
            pl.BlockSpec((f, 128), lambda i: (0, 0)),
            pl.BlockSpec((1, 128), lambda i: (0, 0)),
            pl.BlockSpec((1, 128), lambda i: (0, 0)),
            pl.BlockSpec((1, 128), lambda i: (0, 0)),
            pl.BlockSpec((128, o), lambda i: (0, 0)),
            pl.BlockSpec((1, o), lambda i: (0, 0)),
        ],
        out_specs=pl.BlockSpec((nb, o), lambda i: (0, 0)),
        compiler_params=pltpu.CompilerParams(
            dimension_semantics=("arbitrary",),
            vmem_limit_bytes=VMEM_LIMIT),
    )(x, sc5, sh5, p1["w"], p1["b"], p1["gamma"], p1["beta"], p2["w"], p2["b"])


# ------------------------------ glue / model --------------------------------

def _bn_scale_shift(ps, pss, gamma, beta, count, eps=1e-5):
    """Training-mode BatchNorm (batch stats, biased variance) -> scale/shift.

    Note: E[x^2]-E[x]^2 in f32; fine at these counts, would want a shifted /
    Welford accumulation for much larger images (see review).
    """
    c = ps.shape[-1]
    s = jnp.sum(ps.reshape(-1, c), axis=0)
    q = jnp.sum(pss.reshape(-1, c), axis=0)
    mean = s / count
    var = jnp.maximum(q / count - mean * mean, 0.0)
    scale = gamma * lax.rsqrt(var + eps)       # padded channels: gamma=0 -> 0
    shift = beta - mean * scale
    return scale.reshape(1, c), shift.reshape(1, c)


_CONV_CFG = [
    ("conv1", 1, 6, 8),
    ("conv2", 6, 12, 7),
    ("conv3", 12, 10, 8),
    ("conv4", 10, 8, 7),
    ("conv5", 8, 6, 6),
]


def _spatial_flow(s):
    s = s - 7          # conv1 k=8
    s = s - 6          # conv2 k=7
    s = s // 3         # pool1 3/3
    s = s - 7          # conv3 k=8
    s = s - 6          # conv4 k=7
    s = s // 3         # pool2 3/3
    s = s - 5          # conv5 k=6
    return s


def _xavier_normal(key, shape, fan_in, fan_out):
    std = (2.0 / (fan_in + fan_out)) ** 0.5
    return std * jax.random.normal(key, shape, dtype=jnp.float32)


def init_params(key, img_size):
    params = {}
    keys = iter(jax.random.split(key, 32))
    for name, cin, cout, k in _CONV_CFG:
        fan_in, fan_out = cin * k * k, cout * k * k
        wt = _xavier_normal(next(keys), (k * k, cin, cout), fan_in, fan_out)
        w = jnp.zeros((k * k, CP, CP), jnp.float32).at[:, :cin, :cout].set(wt)
        bound = 1.0 / (fan_in ** 0.5)
        bt = jax.random.uniform(next(keys), (cout,), minval=-bound,
                                maxval=bound, dtype=jnp.float32)
        b = jnp.zeros((1, CP), jnp.float32).at[0, :cout].set(bt)
        gamma = jnp.zeros((CP,), jnp.float32).at[:cout].set(1.0)
        beta = jnp.zeros((CP,), jnp.float32)
        params[name] = dict(w=w.astype(jnp.bfloat16), b=b, gamma=gamma,
                            beta=beta)

    # TODO(synk): the PyTorch module hardcodes fc1 in_features = 103*103*6
    # (implies 1024x1024 grayscale inputs); here it is derived from the actual
    # spatial flow so the synthetic forward pass is well-defined.
    s = _spatial_flow(img_size)
    f_true = 6 * s * s
    w1t = _xavier_normal(next(keys), (f_true, 128), f_true, 128)
    w1 = w1t.reshape(6, s, s, 128).transpose(1, 2, 0, 3)         # (h, w, c, o)
    w1 = jnp.pad(w1, ((0, 0), (0, 0), (0, CP - 6), (0, 0)))      # absorb pad
    w1 = w1.reshape(s * s * CP, 128)
    bound = 1.0 / (f_true ** 0.5)
    b1 = jax.random.uniform(next(keys), (1, 128), minval=-bound, maxval=bound,
                            dtype=jnp.float32)
    params["fc1"] = dict(w=w1.astype(jnp.bfloat16), b=b1,
                         gamma=jnp.ones((1, 128), jnp.float32),
                         beta=jnp.zeros((1, 128), jnp.float32))
    w2 = _xavier_normal(next(keys), (128, 14), 128, 14)
    b2 = jax.random.uniform(next(keys), (1, 14), minval=-1.0 / 128 ** 0.5,
                            maxval=1.0 / 128 ** 0.5, dtype=jnp.float32)
    params["fc2"] = dict(w=w2.astype(jnp.bfloat16), b=b2)
    return params


def forward(params, x_nchw):
    """CNN_Detector.forward: (N, 1, H, W) grayscale -> logits (N, 14)."""
    p = params
    n = x_nchw.shape[0]
    x = jnp.transpose(x_nchw, (0, 2, 3, 1))                      # NCHW -> NHWC
    # TODO(synk): conv1's input is 128x channel-inflated; a de-padded
    # tap-contraction conv1 kernel is the right fix for full-scale images.
    x = jnp.pad(x, ((0, 0), (0, 0), (0, 0), (0, CP - x.shape[-1])))
    x = x.astype(jnp.bfloat16)
    ident_s = jnp.ones((1, CP), jnp.float32)
    ident_b = jnp.zeros((1, CP), jnp.float32)

    def conv_bn(xin, name, k, in_scale, in_shift, fuse_in):
        y, ps, pss = conv_layer(xin, p[name]["w"], p[name]["b"],
                                in_scale, in_shift, k, fuse_in)
        count = n * y.shape[1] * y.shape[2]
        sc, sh = _bn_scale_shift(ps, pss, p[name]["gamma"], p[name]["beta"],
                                 count)
        return y, sc, sh

    y, sc1, sh1 = conv_bn(x, "conv1", 8, ident_s, ident_b, False)
    y, sc2, sh2 = conv_bn(y, "conv2", 7, sc1, sh1, True)       # BN1+ReLU fused
    y = pool_layer(y, sc2, sh2)                                # BN2+ReLU fused
    y, sc3, sh3 = conv_bn(y, "conv3", 8, ident_s, ident_b, False)
    y, sc4, sh4 = conv_bn(y, "conv4", 7, sc3, sh3, True)       # BN3+ReLU fused
    y = pool_layer(y, sc4, sh4)                                # BN4+ReLU fused
    y, sc5, sh5 = conv_bn(y, "conv5", 6, ident_s, ident_b, False)

    # Flatten the (padded) NHWC map; conv5's BN+ReLU, fc1, BN(fc1), ReLU and
    # fc2 are all fused into a single pallas_call.
    s = y.shape[1]
    xf = y.reshape(n, s * s * CP)
    sc5v = jnp.tile(sc5, (1, s * s))
    sh5v = jnp.tile(sh5, (1, s * s))
    logits = fc_tail(xf, sc5v, sh5v, p["fc1"], p["fc2"])
    return logits


if __name__ == "__main__":
    key = jax.random.PRNGKey(0)
    k_param, k_x = jax.random.split(key)
    BATCH, IMG = 2, 128                        # small grayscale test images
    params = init_params(k_param, IMG)
    x = jax.random.normal(k_x, (BATCH, 1, IMG, IMG), dtype=jnp.float32)
    fwd = jax.jit(forward)
    logits = jax.block_until_ready(fwd(params, x))
    assert logits.shape == (BATCH, 14), logits.shape
    assert bool(jnp.all(jnp.isfinite(logits)))
    print("KERNEL_OK")
</pallas_src>

<mosaic_0001>
module attributes {stable_mosaic.version = 11 : i64} {
  func.func @_conv_kernel(%arg0: i32, %arg1: i32, %arg2: memref<1x128x128x128xbf16, #tpu.memory_space<vmem>>, %arg3: memref<64x128x128xbf16, #tpu.memory_space<vmem>>, %arg4: memref<1x128xf32, #tpu.memory_space<vmem>>, %arg5: memref<1x128xf32, #tpu.memory_space<vmem>>, %arg6: memref<1x128xf32, #tpu.memory_space<vmem>>, %arg7: memref<1x11x121x128xbf16, #tpu.memory_space<vmem>>, %arg8: memref<1x1x1x128xf32, #tpu.memory_space<vmem>>, %arg9: memref<1x1x1x128xf32, #tpu.memory_space<vmem>>) attributes {dimension_semantics = [#tpu.dimension_semantics<parallel>, #tpu.dimension_semantics<arbitrary>], iteration_bounds = array<i64: 2, 11>, scalar_prefetch = 0 : i64, scratch_operands = 0 : i64, tpu.core_type = #tpu.core_type<tc>, window_params = [{transform_indices = @transform_0, window_bounds = array<i64: 1, 128, 128, 128>}, {pipeline_mode = #tpu.pipeline_mode<synchronous>, transform_indices = @transform_1, window_bounds = array<i64: 64, 128, 128>}, {pipeline_mode = #tpu.pipeline_mode<synchronous>, transform_indices = @transform_2, window_bounds = array<i64: 1, 128>}, {pipeline_mode = #tpu.pipeline_mode<synchronous>, transform_indices = @transform_3, window_bounds = array<i64: 1, 128>}, {pipeline_mode = #tpu.pipeline_mode<synchronous>, transform_indices = @transform_4, window_bounds = array<i64: 1, 128>}, {transform_indices = @transform_5, window_bounds = array<i64: 1, 11, 121, 128>}, {transform_indices = @transform_6, window_bounds = array<i64: 1, 1, 1, 128>}, {transform_indices = @transform_7, window_bounds = array<i64: 1, 1, 1, 128>}]} {
    %c11_i32 = arith.constant 11 : i32
    %0 = arith.muli %arg1, %c11_i32 : i32
    %c0 = arith.constant 0 : index
    %c0_0 = arith.constant 0 : index
    %1 = vector.load %arg4[%c0, %c0_0] : memref<1x128xf32, #tpu.memory_space<vmem>>, vector<1x128xf32>
    %cst = arith.constant 0.000000e+00 : f32
    %2 = vector.broadcast %cst : f32 to vector<1x128xf32>
    %c0_i32 = arith.constant 0 : i32
    %c11_i32_1 = arith.constant 11 : i32
    %3 = arith.addi %c0_i32, %c11_i32_1 : i32
    %c1_i32 = arith.constant 1 : i32
    %4:2 = scf.for %arg10 = %c0_i32 to %3 step %c1_i32 iter_args(%arg11 = %2, %arg12 = %2) -> (vector<1x128xf32>, vector<1x128xf32>)  : i32 {
      %11 = arith.addi %0, %arg10 : i32
      %cst_11 = arith.constant 0.000000e+00 : f32
      %12 = vector.broadcast %cst_11 : f32 to vector<121x128xf32>
      %c0_i32_12 = arith.constant 0 : i32
      %c8_i32 = arith.constant 8 : i32
      %13 = arith.addi %c0_i32_12, %c8_i32 : i32
      %c1_i32_13 = arith.constant 1 : i32
      %14 = scf.for %arg13 = %c0_i32_12 to %13 step %c1_i32_13 iter_args(%arg14 = %12) -> (vector<121x128xf32>)  : i32 {
        %30 = arith.addi %11, %arg13 : i32
        %c0_20 = arith.constant 0 : index
        %31 = arith.index_cast %30 : i32 to index
        %c0_21 = arith.constant 0 : index
        %c0_22 = arith.constant 0 : index
        %32 = vector.load %arg2[%c0_20, %31, %c0_21, %c0_22] : memref<1x128x128x128xbf16, #tpu.memory_space<vmem>>, vector<1x1x121x128xbf16>
        %33 = vector.shape_cast %32 : vector<1x1x121x128xbf16> to vector<1x121x128xbf16>
        %34 = vector.shape_cast %33 : vector<1x121x128xbf16> to vector<121x128xbf16>
        %c8_i32_23 = arith.constant 8 : i32
        %35 = arith.muli %arg13, %c8_i32_23 : i32
        %c0_i32_24 = arith.constant 0 : i32
        %36 = arith.addi %35, %c0_i32_24 : i32
        %37 = arith.index_cast %36 : i32 to index
        %c0_25 = arith.constant 0 : index
        %c0_26 = arith.constant 0 : index
        %38 = vector.load %arg3[%37, %c0_25, %c0_26] : memref<64x128x128xbf16, #tpu.memory_space<vmem>>, vector<1x128x128xbf16>
        %39 = vector.shape_cast %38 : vector<1x128x128xbf16> to vector<128x128xbf16>
        %cst_27 = arith.constant dense<0.000000e+00> : vector<121x128xf32>
        %40 = tpu.matmul %34, %39, %cst_27 {dimension_numbers = #tpu.dot_dimension_numbers<[1], [0], [0], [1], [0, 0, 1, 1], [], []>} : vector<121x128xbf16>, vector<128x128xbf16>, vector<121x128xf32> -> vector<121x128xf32>
        %41 = arith.addf %arg14, %40 : vector<121x128xf32>
        %42 = arith.addi %11, %arg13 : i32
        %c0_28 = arith.constant 0 : index
        %43 = arith.index_cast %42 : i32 to index
        %c1 = arith.constant 1 : index
        %c0_29 = arith.constant 0 : index
        %44 = vector.load %arg2[%c0_28, %43, %c1, %c0_29] : memref<1x128x128x128xbf16, #tpu.memory_space<vmem>>, vector<1x1x121x128xbf16>
        %45 = vector.shape_cast %44 : vector<1x1x121x128xbf16> to vector<1x121x128xbf16>
        %46 = vector.shape_cast %45 : vector<1x121x128xbf16> to vector<121x128xbf16>
        %c8_i32_30 = arith.constant 8 : i32
        %47 = arith.muli %arg13, %c8_i32_30 : i32
        %c1_i32_31 = arith.constant 1 : i32
        %48 = arith.addi %47, %c1_i32_31 : i32
        %49 = arith.index_cast %48 : i32 to index
        %c0_32 = arith.constant 0 : index
        %c0_33 = arith.constant 0 : index
        %50 = vector.load %arg3[%49, %c0_32, %c0_33] : memref<64x128x128xbf16, #tpu.memory_space<vmem>>, vector<1x128x128xbf16>
        %51 = vector.shape_cast %50 : vector<1x128x128xbf16> to vector<128x128xbf16>
        %cst_34 = arith.constant dense<0.000000e+00> : vector<121x128xf32>
        %52 = tpu.matmul %46, %51, %cst_34 {dimension_numbers = #tpu.dot_dimension_numbers<[1], [0], [0], [1], [0, 0, 1, 1], [], []>} : vector<121x128xbf16>, vector<128x128xbf16>, vector<121x128xf32> -> vector<121x128xf32>
        %53 = arith.addf %41, %52 : vector<121x128xf32>
        %54 = arith.addi %11, %arg13 : i32
        %c0_35 = arith.constant 0 : index
        %55 = arith.index_cast %54 : i32 to index
        %c2 = arith.constant 2 : index
        %c0_36 = arith.constant 0 : index
        %56 = vector.load %arg2[%c0_35, %55, %c2, %c0_36] : memref<1x128x128x128xbf16, #tpu.memory_space<vmem>>, vector<1x1x121x128xbf16>
        %57 = vector.shape_cast %56 : vector<1x1x121x128xbf16> to vector<1x121x128xbf16>
        %58 = vector.shape_cast %57 : vector<1x121x128xbf16> to vector<121x128xbf16>
        %c8_i32_37 = arith.constant 8 : i32
        %59 = arith.muli %arg13, %c8_i32_37 : i32
        %c2_i32 = arith.constant 2 : i32
        %60 = arith.addi %59, %c2_i32 : i32
        %61 = arith.index_cast %60 : i32 to index
        %c0_38 = arith.constant 0 : index
        %c0_39 = arith.constant 0 : index
        %62 = vector.load %arg3[%61, %c0_38, %c0_39] : memref<64x128x128xbf16, #tpu.memory_space<vmem>>, vector<1x128x128xbf16>
        %63 = vector.shape_cast %62 : vector<1x128x128xbf16> to vector<128x128xbf16>
        %cst_40 = arith.constant dense<0.000000e+00> : vector<121x128xf32>
        %64 = tpu.matmul %58, %63, %cst_40 {dimension_numbers = #tpu.dot_dimension_numbers<[1], [0], [0], [1], [0, 0, 1, 1], [], []>} : vector<121x128xbf16>, vector<128x128xbf16>, vector<121x128xf32> -> vector<121x128xf32>
        %65 = arith.addf %53, %64 : vector<121x128xf32>
        %66 = arith.addi %11, %arg13 : i32
        %c0_41 = arith.constant 0 : index
        %67 = arith.index_cast %66 : i32 to index
        %c3 = arith.constant 3 : index
        %c0_42 = arith.constant 0 : index
        %68 = vector.load %arg2[%c0_41, %67, %c3, %c0_42] : memref<1x128x128x128xbf16, #tpu.memory_space<vmem>>, vector<1x1x121x128xbf16>
        %69 = vector.shape_cast %68 : vector<1x1x121x128xbf16> to vector<1x121x128xbf16>
        %70 = vector.shape_cast %69 : vector<1x121x128xbf16> to vector<121x128xbf16>
        %c8_i32_43 = arith.constant 8 : i32
        %71 = arith.muli %arg13, %c8_i32_43 : i32
        %c3_i32 = arith.constant 3 : i32
        %72 = arith.addi %71, %c3_i32 : i32
        %73 = arith.index_cast %72 : i32 to index
        %c0_44 = arith.constant 0 : index
        %c0_45 = arith.constant 0 : index
        %74 = vector.load %arg3[%73, %c0_44, %c0_45] : memref<64x128x128xbf16, #tpu.memory_space<vmem>>, vector<1x128x128xbf16>
        %75 = vector.shape_cast %74 : vector<1x128x128xbf16> to vector<128x128xbf16>
        %cst_46 = arith.constant dense<0.000000e+00> : vector<121x128xf32>
        %76 = tpu.matmul %70, %75, %cst_46 {dimension_numbers = #tpu.dot_dimension_numbers<[1], [0], [0], [1], [0, 0, 1, 1], [], []>} : vector<121x128xbf16>, vector<128x128xbf16>, vector<121x128xf32> -> vector<121x128xf32>
        %77 = arith.addf %65, %76 : vector<121x128xf32>
        %78 = arith.addi %11, %arg13 : i32
        %c0_47 = arith.constant 0 : index
        %79 = arith.index_cast %78 : i32 to index
        %c4 = arith.constant 4 : index
        %c0_48 = arith.constant 0 : index
        %80 = vector.load %arg2[%c0_47, %79, %c4, %c0_48] : memref<1x128x128x128xbf16, #tpu.memory_space<vmem>>, vector<1x1x121x128xbf16>
        %81 = vector.shape_cast %80 : vector<1x1x121x128xbf16> to vector<1x121x128xbf16>
        %82 = vector.shape_cast %81 : vector<1x121x128xbf16> to vector<121x128xbf16>
        %c8_i32_49 = arith.constant 8 : i32
        %83 = arith.muli %arg13, %c8_i32_49 : i32
        %c4_i32 = arith.constant 4 : i32
        %84 = arith.addi %83, %c4_i32 : i32
        %85 = arith.index_cast %84 : i32 to index
        %c0_50 = arith.constant 0 : index
        %c0_51 = arith.constant 0 : index
        %86 = vector.load %arg3[%85, %c0_50, %c0_51] : memref<64x128x128xbf16, #tpu.memory_space<vmem>>, vector<1x128x128xbf16>
        %87 = vector.shape_cast %86 : vector<1x128x128xbf16> to vector<128x128xbf16>
        %cst_52 = arith.constant dense<0.000000e+00> : vector<121x128xf32>
        %88 = tpu.matmul %82, %87, %cst_52 {dimension_numbers = #tpu.dot_dimension_numbers<[1], [0], [0], [1], [0, 0, 1, 1], [], []>} : vector<121x128xbf16>, vector<128x128xbf16>, vector<121x128xf32> -> vector<121x128xf32>
        %89 = arith.addf %77, %88 : vector<121x128xf32>
        %90 = arith.addi %11, %arg13 : i32
        %c0_53 = arith.constant 0 : index
        %91 = arith.index_cast %90 : i32 to index
        %c5 = arith.constant 5 : index
        %c0_54 = arith.constant 0 : index
        %92 = vector.load %arg2[%c0_53, %91, %c5, %c0_54] : memref<1x128x128x128xbf16, #tpu.memory_space<vmem>>, vector<1x1x121x128xbf16>
        %93 = vector.shape_cast %92 : vector<1x1x121x128xbf16> to vector<1x121x128xbf16>
        %94 = vector.shape_cast %93 : vector<1x121x128xbf16> to vector<121x128xbf16>
        %c8_i32_55 = arith.constant 8 : i32
        %95 = arith.muli %arg13, %c8_i32_55 : i32
        %c5_i32 = arith.constant 5 : i32
        %96 = arith.addi %95, %c5_i32 : i32
        %97 = arith.index_cast %96 : i32 to index
        %c0_56 = arith.constant 0 : index
        %c0_57 = arith.constant 0 : index
        %98 = vector.load %arg3[%97, %c0_56, %c0_57] : memref<64x128x128xbf16, #tpu.memory_space<vmem>>, vector<1x128x128xbf16>
        %99 = vector.shape_cast %98 : vector<1x128x128xbf16> to vector<128x128xbf16>
        %cst_58 = arith.constant dense<0.000000e+00> : vector<121x128xf32>
        %100 = tpu.matmul %94, %99, %cst_58 {dimension_numbers = #tpu.dot_dimension_numbers<[1], [0], [0], [1], [0, 0, 1, 1], [], []>} : vector<121x128xbf16>, vector<128x128xbf16>, vector<121x128xf32> -> vector<121x128xf32>
        %101 = arith.addf %89, %100 : vector<121x128xf32>
        %102 = arith.addi %11, %arg13 : i32
        %c0_59 = arith.constant 0 : index
        %103 = arith.index_cast %102 : i32 to index
        %c6 = arith.constant 6 : index
        %c0_60 = arith.constant 0 : index
        %104 = vector.load %arg2[%c0_59, %103, %c6, %c0_60] : memref<1x128x128x128xbf16, #tpu.memory_space<vmem>>, vector<1x1x121x128xbf16>
        %105 = vector.shape_cast %104 : vector<1x1x121x128xbf16> to vector<1x121x128xbf16>
        %106 = vector.shape_cast %105 : vector<1x121x128xbf16> to vector<121x128xbf16>
        %c8_i32_61 = arith.constant 8 : i32
        %107 = arith.muli %arg13, %c8_i32_61 : i32
        %c6_i32 = arith.constant 6 : i32
        %108 = arith.addi %107, %c6_i32 : i32
        %109 = arith.index_cast %108 : i32 to index
        %c0_62 = arith.constant 0 : index
        %c0_63 = arith.constant 0 : index
        %110 = vector.load %arg3[%109, %c0_62, %c0_63] : memref<64x128x128xbf16, #tpu.memory_space<vmem>>, vector<1x128x128xbf16>
        %111 = vector.shape_cast %110 : vector<1x128x128xbf16> to vector<128x128xbf16>
        %cst_64 = arith.constant dense<0.000000e+00> : vector<121x128xf32>
        %112 = tpu.matmul %106, %111, %cst_64 {dimension_numbers = #tpu.dot_dimension_numbers<[1], [0], [0], [1], [0, 0, 1, 1], [], []>} : vector<121x128xbf16>, vector<128x128xbf16>, vector<121x128xf32> -> vector<121x128xf32>
        %113 = arith.addf %101, %112 : vector<121x128xf32>
        %114 = arith.addi %11, %arg13 : i32
        %c0_65 = arith.constant 0 : index
        %115 = arith.index_cast %114 : i32 to index
        %c7 = arith.constant 7 : index
        %c0_66 = arith.constant 0 : index
        %116 = vector.load %arg2[%c0_65, %115, %c7, %c0_66] : memref<1x128x128x128xbf16, #tpu.memory_space<vmem>>, vector<1x1x121x128xbf16>
        %117 = vector.shape_cast %116 : vector<1x1x121x128xbf16> to vector<1x121x128xbf16>
        %118 = vector.shape_cast %117 : vector<1x121x128xbf16> to vector<121x128xbf16>
        %c8_i32_67 = arith.constant 8 : i32
        %119 = arith.muli %arg13, %c8_i32_67 : i32
        %c7_i32 = arith.constant 7 : i32
        %120 = arith.addi %119, %c7_i32 : i32
        %121 = arith.index_cast %120 : i32 to index
        %c0_68 = arith.constant 0 : index
        %c0_69 = arith.constant 0 : index
        %122 = vector.load %arg3[%121, %c0_68, %c0_69] : memref<64x128x128xbf16, #tpu.memory_space<vmem>>, vector<1x128x128xbf16>
        %123 = vector.shape_cast %122 : vector<1x128x128xbf16> to vector<128x128xbf16>
        %cst_70 = arith.constant dense<0.000000e+00> : vector<121x128xf32>
        %124 = tpu.matmul %118, %123, %cst_70 {dimension_numbers = #tpu.dot_dimension_numbers<[1], [0], [0], [1], [0, 0, 1, 1], [], []>} : vector<121x128xbf16>, vector<128x128xbf16>, vector<121x128xf32> -> vector<121x128xf32>
        %125 = arith.addf %113, %124 : vector<121x128xf32>
        scf.yield %125 : vector<121x128xf32>
      }
      %c8_i32_14 = arith.constant 8 : i32
      %15 = vector.broadcast %1 : vector<1x128xf32> to vector<121x128xf32>
      %16 = arith.addf %14, %15 : vector<121x128xf32>
      %17 = vector.shape_cast %16 : vector<121x128xf32> to vector<1x121x128xf32>
      %18 = arith.truncf %17 : vector<1x121x128xf32> to vector<1x121x128xbf16>
      %c0_15 = arith.constant 0 : index
      %19 = arith.index_cast %arg10 : i32 to index
      %c0_16 = arith.constant 0 : index
      %c0_17 = arith.constant 0 : index
      %20 = vector.load %arg7[%c0_15, %19, %c0_16, %c0_17] : memref<1x11x121x128xbf16, #tpu.memory_space<vmem>>, vector<1x1x121x128xbf16>
      %21 = vector.shape_cast %20 : vector<1x1x121x128xbf16> to vector<1x121x128xbf16>
      %22 = vector.shape_cast %18 : vector<1x121x128xbf16> to vector<1x1x121x128xbf16>
      tpu.vector_store %arg7[%c0_15, %19, %c0_16, %c0_17], %22 {strides = array<i32>} : memref<1x11x121x128xbf16, #tpu.memory_space<vmem>>, vector<1x1x121x128xbf16>,
      %cst_18 = arith.constant dense<0.000000e+00> : vector<128xf32>
      %23 = vector.multi_reduction <add>, %16, %cst_18 [0] : vector<121x128xf32> to vector<128xf32>
      %24 = vector.shape_cast %23 : vector<128xf32> to vector<1x128xf32>
      %25 = arith.addf %arg11, %24 : vector<1x128xf32>
      %26 = arith.mulf %16, %16 : vector<121x128xf32>
      %cst_19 = arith.constant dense<0.000000e+00> : vector<128xf32>
      %27 = vector.multi_reduction <add>, %26, %cst_19 [0] : vector<121x128xf32> to vector<128xf32>
      %28 = vector.shape_cast %27 : vector<128xf32> to vector<1x128xf32>
      %29 = arith.addf %arg12, %28 : vector<1x128xf32>
      scf.yield %25, %29 : vector<1x128xf32>, vector<1x128xf32>
    }
    %c11_i32_2 = arith.constant 11 : i32
    %c0_3 = arith.constant 0 : index
    %c0_4 = arith.constant 0 : index
    %c0_5 = arith.constant 0 : index
    %c0_6 = arith.constant 0 : index
    %5 = vector.load %arg8[%c0_3, %c0_4, %c0_5, %c0_6] : memref<1x1x1x128xf32, #tpu.memory_space<vmem>>, vector<1x1x1x128xf32>
    %6 = vector.shape_cast %5 : vector<1x1x1x128xf32> to vector<1x128xf32>
    %7 = vector.shape_cast %4#0 : vector<1x128xf32> to vector<1x1x1x128xf32>
    tpu.vector_store %arg8[%c0_3, %c0_4, %c0_5, %c0_6], %7 {strides = array<i32>} : memref<1x1x1x128xf32, #tpu.memory_space<vmem>>, vector<1x1x1x128xf32>,
    %c0_7 = arith.constant 0 : index
    %c0_8 = arith.constant 0 : index
    %c0_9 = arith.constant 0 : index
    %c0_10 = arith.constant 0 : index
    %8 = vector.load %arg9[%c0_7, %c0_8, %c0_9, %c0_10] : memref<1x1x1x128xf32, #tpu.memory_space<vmem>>, vector<1x1x1x128xf32>
    %9 = vector.shape_cast %8 : vector<1x1x1x128xf32> to vector<1x128xf32>
    %10 = vector.shape_cast %4#1 : vector<1x128xf32> to vector<1x1x1x128xf32>
    tpu.vector_store %arg9[%c0_7, %c0_8, %c0_9, %c0_10], %10 {strides = array<i32>} : memref<1x1x1x128xf32, #tpu.memory_space<vmem>>, vector<1x1x1x128xf32>,
    return
  }
  func.func @transform_0(%arg0: i32, %arg1: i32) -> (i32, i32, i32, i32) {
    %c0_i32 = arith.constant 0 : i32
    %c0_i32_0 = arith.constant 0 : i32
    %c0_i32_1 = arith.constant 0 : i32
    %c0_i32_2 = arith.constant 0 : i32
    return %arg0, %c0_i32, %c0_i32_0, %c0_i32_1 : i32, i32, i32, i32
  }
  func.func @transform_1(%arg0: i32, %arg1: i32) -> (i32, i32, i32) {
    %c0_i32 = arith.constant 0 : i32
    %c0_i32_0 = arith.constant 0 : i32
    %c0_i32_1 = arith.constant 0 : i32
    %c0_i32_2 = arith.constant 0 : i32
    return %c0_i32, %c0_i32_0, %c0_i32_1 : i32, i32, i32
  }
  func.func @transform_2(%arg0: i32, %arg1: i32) -> (i32, i32) {
    %c0_i32 = arith.constant 0 : i32
    %c0_i32_0 = arith.constant 0 : i32
    %c0_i32_1 = arith.constant 0 : i32
    return %c0_i32, %c0_i32_0 : i32, i32
  }
  func.func @transform_3(%arg0: i32, %arg1: i32) -> (i32, i32) {
    %c0_i32 = arith.constant 0 : i32
    %c0_i32_0 = arith.constant 0 : i32
    %c0_i32_1 = arith.constant 0 : i32
    return %c0_i32, %c0_i32_0 : i32, i32
  }
  func.func @transform_4(%arg0: i32, %arg1: i32) -> (i32, i32) {
    %c0_i32 = arith.constant 0 : i32
    %c0_i32_0 = arith.constant 0 : i32
    %c0_i32_1 = arith.constant 0 : i32
    return %c0_i32, %c0_i32_0 : i32, i32
  }
  func.func @transform_5(%arg0: i32, %arg1: i32) -> (i32, i32, i32, i32) {
    %c0_i32 = arith.constant 0 : i32
    %c0_i32_0 = arith.constant 0 : i32
    %c0_i32_1 = arith.constant 0 : i32
    return %arg0, %arg1, %c0_i32, %c0_i32_0 : i32, i32, i32, i32
  }
  func.func @transform_6(%arg0: i32, %arg1: i32) -> (i32, i32, i32, i32) {
    %c0_i32 = arith.constant 0 : i32
    %c0_i32_0 = arith.constant 0 : i32
    %c0_i32_1 = arith.constant 0 : i32
    return %arg0, %arg1, %c0_i32, %c0_i32_0 : i32, i32, i32, i32
  }
  func.func @transform_7(%arg0: i32, %arg1: i32) -> (i32, i32, i32, i32) {
    %c0_i32 = arith.constant 0 : i32
    %c0_i32_0 = arith.constant 0 : i32
    %c0_i32_1 = arith.constant 0 : i32
    return %arg0, %arg1, %c0_i32, %c0_i32_0 : i32, i32, i32, i32
  }
}

module attributes {stable_mosaic.version = 11 : i64} {
  func.func @_pool_kernel(%arg0: i32, %arg1: memref<1x115x115x128xbf16, #tpu.memory_space<vmem>>, %arg2: memref<1x128xf32, #tpu.memory_space<vmem>>, %arg3: memref<1x128xf32, #tpu.memory_space<vmem>>, %arg4: memref<1x38x38x128xbf16, #tpu.memory_space<vmem>>) attributes {dimension_semantics = [#tpu.dimension_semantics<parallel>], iteration_bounds = array<i64: 2>, scalar_prefetch = 0 : i64, scratch_operands = 0 : i64, tpu.core_type = #tpu.core_type<tc>, window_params = [{transform_indices = @transform_0, window_bounds = array<i64: 1, 115, 115, 128>}, {pipeline_mode = #tpu.pipeline_mode<synchronous>, transform_indices = @transform_1, window_bounds = array<i64: 1, 128>}, {pipeline_mode = #tpu.pipeline_mode<synchronous>, transform_indices = @transform_2, window_bounds = array<i64: 1, 128>}, {transform_indices = @transform_3, window_bounds = array<i64: 1, 38, 38, 128>}]} {
    %c0 = arith.constant 0 : index
    %c0_0 = arith.constant 0 : index
    %0 = vector.load %arg2[%c0, %c0_0] : memref<1x128xf32, #tpu.memory_space<vmem>>, vector<1x128xf32>
    %c0_1 = arith.constant 0 : index
    %c0_2 = arith.constant 0 : index
    %1 = vector.load %arg3[%c0_1, %c0_2] : memref<1x128xf32, #tpu.memory_space<vmem>>, vector<1x128xf32>
    %2 = tpu.iota {dimensions = array<i32: 0>} : vector<38x112xi32>
    %3 = tpu.iota {dimensions = array<i32: 1>} : vector<38x112xi32>
    %c3_i32 = arith.constant 3 : i32
    %4 = vector.broadcast %c3_i32 : i32 to vector<38x112xi32>
    %5 = arith.muli %4, %2 : vector<38x112xi32>
    %6 = arith.cmpi eq, %3, %5 : vector<38x112xi32>
    %7 = arith.extui %6 : vector<38x112xi1> to vector<38x112xi32>
    %8 = arith.sitofp %7 : vector<38x112xi32> to vector<38x112xf32>
    %9 = arith.truncf %8 : vector<38x112xf32> to vector<38x112xbf16>
    %c0_i32 = arith.constant 0 : i32
    %c38_i32 = arith.constant 38 : i32
    %10 = arith.addi %c0_i32, %c38_i32 : i32
    %c1_i32 = arith.constant 1 : i32
    scf.for %arg5 = %c0_i32 to %10 step %c1_i32  : i32 {
      %c3_i32_4 = arith.constant 3 : i32
      %11 = arith.muli %c3_i32_4, %arg5 : i32
      %c0_5 = arith.constant 0 : index
      %12 = arith.index_cast %11 : i32 to index
      %c0_6 = arith.constant 0 : index
      %c0_7 = arith.constant 0 : index
      %13 = vector.load %arg1[%c0_5, %12, %c0_6, %c0_7] : memref<1x115x115x128xbf16, #tpu.memory_space<vmem>>, vector<1x3x115x128xbf16>
      %14 = vector.shape_cast %13 : vector<1x3x115x128xbf16> to vector<3x115x128xbf16>
      %15 = arith.extf %14 : vector<3x115x128xbf16> to vector<3x115x128xf32>
      %16 = vector.shape_cast %0 : vector<1x128xf32> to vector<1x1x128xf32>
      %17 = vector.broadcast %16 : vector<1x1x128xf32> to vector<3x115x128xf32>
      %18 = arith.mulf %15, %17 : vector<3x115x128xf32>
      %19 = vector.shape_cast %1 : vector<1x128xf32> to vector<1x1x128xf32>
      %20 = vector.broadcast %19 : vector<1x1x128xf32> to vector<3x115x128xf32>
      %21 = arith.addf %18, %20 : vector<3x115x128xf32>
      %cst = arith.constant 0.000000e+00 : f32
      %22 = vector.broadcast %cst : f32 to vector<3x115x128xf32>
      %23 = arith.maximumf %21, %22 : vector<3x115x128xf32>
      %cst_8 = arith.constant dense<0xFF800000> : vector<115x128xf32>
      %24 = vector.multi_reduction <maximumf>, %23, %cst_8 [0] : vector<3x115x128xf32> to vector<115x128xf32>
      %25 = vector.extract_strided_slice %24 {offsets = [0, 0], sizes = [112, 128], strides = [1, 1]} : vector<115x128xf32> to vector<112x128xf32>
      %26 = vector.extract_strided_slice %24 {offsets = [1, 0], sizes = [112, 128], strides = [1, 1]} : vector<115x128xf32> to vector<112x128xf32>
      %27 = arith.maximumf %25, %26 : vector<112x128xf32>
      %28 = vector.extract_strided_slice %24 {offsets = [2, 0], sizes = [112, 128], strides = [1, 1]} : vector<115x128xf32> to vector<112x128xf32>
      %29 = arith.maximumf %27, %28 : vector<112x128xf32>
      %30 = arith.truncf %29 : vector<112x128xf32> to vector<112x128xbf16>
      %cst_9 = arith.constant dense<0.000000e+00> : vector<38x128xf32>
      %31 = tpu.matmul %9, %30, %cst_9 {dimension_numbers = #tpu.dot_dimension_numbers<[1], [0], [0], [1], [0, 0, 1, 1], [], []>} : vector<38x112xbf16>, vector<112x128xbf16>, vector<38x128xf32> -> vector<38x128xf32>
      %32 = vector.shape_cast %31 : vector<38x128xf32> to vector<1x38x128xf32>
      %33 = arith.truncf %32 : vector<1x38x128xf32> to vector<1x38x128xbf16>
      %c0_10 = arith.constant 0 : index
      %34 = arith.index_cast %arg5 : i32 to index
      %c0_11 = arith.constant 0 : index
      %c0_12 = arith.constant 0 : index
      %35 = vector.load %arg4[%c0_10, %34, %c0_11, %c0_12] : memref<1x38x38x128xbf16, #tpu.memory_space<vmem>>, vector<1x1x38x128xbf16>
      %36 = vector.shape_cast %35 : vector<1x1x38x128xbf16> to vector<1x38x128xbf16>
      %37 = vector.shape_cast %33 : vector<1x38x128xbf16> to vector<1x1x38x128xbf16>
      tpu.vector_store %arg4[%c0_10, %34, %c0_11, %c0_12], %37 {strides = array<i32>} : memref<1x38x38x128xbf16, #tpu.memory_space<vmem>>, vector<1x1x38x128xbf16>,
    }
    %c38_i32_3 = arith.constant 38 : i32
    return
  }
  func.func @transform_0(%arg0: i32) -> (i32, i32, i32, i32) {
    %c0_i32 = arith.constant 0 : i32
    %c0_i32_0 = arith.constant 0 : i32
    %c0_i32_1 = arith.constant 0 : i32
    %c0_i32_2 = arith.constant 0 : i32
    return %arg0, %c0_i32, %c0_i32_0, %c0_i32_1 : i32, i32, i32, i32
  }
  func.func @transform_1(%arg0: i32) -> (i32, i32) {
    %c0_i32 = arith.constant 0 : i32
    %c0_i32_0 = arith.constant 0 : i32
    %c0_i32_1 = arith.constant 0 : i32
    return %c0_i32, %c0_i32_0 : i32, i32
  }
  func.func @transform_2(%arg0: i32) -> (i32, i32) {
    %c0_i32 = arith.constant 0 : i32
    %c0_i32_0 = arith.constant 0 : i32
    %c0_i32_1 = arith.constant 0 : i32
    return %c0_i32, %c0_i32_0 : i32, i32
  }
  func.func @transform_3(%arg0: i32) -> (i32, i32, i32, i32) {
    %c0_i32 = arith.constant 0 : i32
    %c0_i32_0 = arith.constant 0 : i32
    %c0_i32_1 = arith.constant 0 : i32
    %c0_i32_2 = arith.constant 0 : i32
    return %arg0, %c0_i32, %c0_i32_0, %c0_i32_1 : i32, i32, i32, i32
  }
}

module attributes {stable_mosaic.version = 11 : i64} {
  func.func @_conv_kernel(%arg0: i32, %arg1: i32, %arg2: memref<1x121x121x128xbf16, #tpu.memory_space<vmem>>, %arg3: memref<49x128x128xbf16, #tpu.memory_space<vmem>>, %arg4: memref<1x128xf32, #tpu.memory_space<vmem>>, %arg5: memref<1x128xf32, #tpu.memory_space<vmem>>, %arg6: memref<1x128xf32, #tpu.memory_space<vmem>>, %arg7: memref<1x23x115x128xbf16, #tpu.memory_space<vmem>>, %arg8: memref<1x1x1x128xf32, #tpu.memory_space<vmem>>, %arg9: memref<1x1x1x128xf32, #tpu.memory_space<vmem>>, %arg10: memref<29x121x128xbf16, #tpu.memory_space<vmem>>) attributes {dimension_semantics = [#tpu.dimension_semantics<parallel>, #tpu.dimension_semantics<arbitrary>], iteration_bounds = array<i64: 2, 5>, scalar_prefetch = 0 : i64, scratch_operands = 1 : i64, tpu.core_type = #tpu.core_type<tc>, window_params = [{transform_indices = @transform_0, window_bounds = array<i64: 1, 121, 121, 128>}, {pipeline_mode = #tpu.pipeline_mode<synchronous>, transform_indices = @transform_1, window_bounds = array<i64: 49, 128, 128>}, {pipeline_mode = #tpu.pipeline_mode<synchronous>, transform_indices = @transform_2, window_bounds = array<i64: 1, 128>}, {pipeline_mode = #tpu.pipeline_mode<synchronous>, transform_indices = @transform_3, window_bounds = array<i64: 1, 128>}, {pipeline_mode = #tpu.pipeline_mode<synchronous>, transform_indices = @transform_4, window_bounds = array<i64: 1, 128>}, {transform_indices = @transform_5, window_bounds = array<i64: 1, 23, 115, 128>}, {transform_indices = @transform_6, window_bounds = array<i64: 1, 1, 1, 128>}, {transform_indices = @transform_7, window_bounds = array<i64: 1, 1, 1, 128>}]} {
    %c23_i32 = arith.constant 23 : i32
    %0 = arith.muli %arg1, %c23_i32 : i32
    %c0 = arith.constant 0 : index
    %c0_0 = arith.constant 0 : index
    %1 = vector.load %arg5[%c0, %c0_0] : memref<1x128xf32, #tpu.memory_space<vmem>>, vector<1x128xf32>
    %c0_1 = arith.constant 0 : index
    %c0_2 = arith.constant 0 : index
    %2 = vector.load %arg6[%c0_1, %c0_2] : memref<1x128xf32, #tpu.memory_space<vmem>>, vector<1x128xf32>
    %c0_i32 = arith.constant 0 : i32
    %c29_i32 = arith.constant 29 : i32
    %3 = arith.addi %c0_i32, %c29_i32 : i32
    %c1_i32 = arith.constant 1 : i32
    scf.for %arg11 = %c0_i32 to %3 step %c1_i32  : i32 {
      %14 = arith.addi %0, %arg11 : i32
      %c0_18 = arith.constant 0 : index
      %15 = arith.index_cast %14 : i32 to index
      %c0_19 = arith.constant 0 : index
      %c0_20 = arith.constant 0 : index
      %16 = vector.load %arg2[%c0_18, %15, %c0_19, %c0_20] : memref<1x121x121x128xbf16, #tpu.memory_space<vmem>>, vector<1x1x121x128xbf16>
      %17 = vector.shape_cast %16 : vector<1x1x121x128xbf16> to vector<1x121x128xbf16>
      %18 = arith.extf %17 : vector<1x121x128xbf16> to vector<1x121x128xf32>
      %19 = vector.shape_cast %1 : vector<1x128xf32> to vector<1x1x128xf32>
      %20 = vector.broadcast %19 : vector<1x1x128xf32> to vector<1x121x128xf32>
      %21 = arith.mulf %18, %20 : vector<1x121x128xf32>
      %22 = vector.shape_cast %2 : vector<1x128xf32> to vector<1x1x128xf32>
      %23 = vector.broadcast %22 : vector<1x1x128xf32> to vector<1x121x128xf32>
      %24 = arith.addf %21, %23 : vector<1x121x128xf32>
      %cst_21 = arith.constant 0.000000e+00 : f32
      %25 = vector.broadcast %cst_21 : f32 to vector<1x121x128xf32>
      %26 = arith.maximumf %24, %25 : vector<1x121x128xf32>
      %27 = arith.truncf %26 : vector<1x121x128xf32> to vector<1x121x128xbf16>
      %28 = arith.index_cast %arg11 : i32 to index
      %c0_22 = arith.constant 0 : index
      %c0_23 = arith.constant 0 : index
      %29 = vector.load %arg10[%28, %c0_22, %c0_23] : memref<29x121x128xbf16, #tpu.memory_space<vmem>>, vector<1x121x128xbf16>
      tpu.vector_store %arg10[%28, %c0_22, %c0_23], %27 {strides = array<i32>} : memref<29x121x128xbf16, #tpu.memory_space<vmem>>, vector<1x121x128xbf16>,
    }
    %c29_i32_3 = arith.constant 29 : i32
    %c0_4 = arith.constant 0 : index
    %c0_5 = arith.constant 0 : index
    %4 = vector.load %arg4[%c0_4, %c0_5] : memref<1x128xf32, #tpu.memory_space<vmem>>, vector<1x128xf32>
    %cst = arith.constant 0.000000e+00 : f32
    %5 = vector.broadcast %cst : f32 to vector<1x128xf32>
    %c0_i32_6 = arith.constant 0 : i32
    %c23_i32_7 = arith.constant 23 : i32
    %6 = arith.addi %c0_i32_6, %c23_i32_7 : i32
    %c1_i32_8 = arith.constant 1 : i32
    %7:2 = scf.for %arg11 = %c0_i32_6 to %6 step %c1_i32_8 iter_args(%arg12 = %5, %arg13 = %5) -> (vector<1x128xf32>, vector<1x128xf32>)  : i32 {
      %14 = arith.addi %0, %arg11 : i32
      %cst_18 = arith.constant 0.000000e+00 : f32
      %15 = vector.broadcast %cst_18 : f32 to vector<115x128xf32>
      %c0_i32_19 = arith.constant 0 : i32
      %c7_i32 = arith.constant 7 : i32
      %16 = arith.addi %c0_i32_19, %c7_i32 : i32
      %c1_i32_20 = arith.constant 1 : i32
      %17 = scf.for %arg14 = %c0_i32_19 to %16 step %c1_i32_20 iter_args(%arg15 = %15) -> (vector<115x128xf32>)  : i32 {
        %33 = arith.addi %14, %arg14 : i32
        %34 = arith.subi %33, %0 : i32
        %35 = arith.index_cast %34 : i32 to index
        %c0_27 = arith.constant 0 : index
        %c0_28 = arith.constant 0 : index
        %36 = vector.load %arg10[%35, %c0_27, %c0_28] : memref<29x121x128xbf16, #tpu.memory_space<vmem>>, vector<1x115x128xbf16>
        %37 = vector.shape_cast %36 : vector<1x115x128xbf16> to vector<115x128xbf16>
        %c7_i32_29 = arith.constant 7 : i32
        %38 = arith.muli %arg14, %c7_i32_29 : i32
        %c0_i32_30 = arith.constant 0 : i32
        %39 = arith.addi %38, %c0_i32_30 : i32
        %40 = arith.index_cast %39 : i32 to index
        %c0_31 = arith.constant 0 : index
        %c0_32 = arith.constant 0 : index
        %41 = vector.load %arg3[%40, %c0_31, %c0_32] : memref<49x128x128xbf16, #tpu.memory_space<vmem>>, vector<1x128x128xbf16>
        %42 = vector.shape_cast %41 : vector<1x128x128xbf16> to vector<128x128xbf16>
        %cst_33 = arith.constant dense<0.000000e+00> : vector<115x128xf32>
        %43 = tpu.matmul %37, %42, %cst_33 {dimension_numbers = #tpu.dot_dimension_numbers<[1], [0], [0], [1], [0, 0, 1, 1], [], []>} : vector<115x128xbf16>, vector<128x128xbf16>, vector<115x128xf32> -> vector<115x128xf32>
        %44 = arith.addf %arg15, %43 : vector<115x128xf32>
        %45 = arith.addi %14, %arg14 : i32
        %46 = arith.subi %45, %0 : i32
        %47 = arith.index_cast %46 : i32 to index
        %c1 = arith.constant 1 : index
        %c0_34 = arith.constant 0 : index
        %48 = vector.load %arg10[%47, %c1, %c0_34] : memref<29x121x128xbf16, #tpu.memory_space<vmem>>, vector<1x115x128xbf16>
        %49 = vector.shape_cast %48 : vector<1x115x128xbf16> to vector<115x128xbf16>
        %c7_i32_35 = arith.constant 7 : i32
        %50 = arith.muli %arg14, %c7_i32_35 : i32
        %c1_i32_36 = arith.constant 1 : i32
        %51 = arith.addi %50, %c1_i32_36 : i32
        %52 = arith.index_cast %51 : i32 to index
        %c0_37 = arith.constant 0 : index
        %c0_38 = arith.constant 0 : index
        %53 = vector.load %arg3[%52, %c0_37, %c0_38] : memref<49x128x128xbf16, #tpu.memory_space<vmem>>, vector<1x128x128xbf16>
        %54 = vector.shape_cast %53 : vector<1x128x128xbf16> to vector<128x128xbf16>
        %cst_39 = arith.constant dense<0.000000e+00> : vector<115x128xf32>
        %55 = tpu.matmul %49, %54, %cst_39 {dimension_numbers = #tpu.dot_dimension_numbers<[1], [0], [0], [1], [0, 0, 1, 1], [], []>} : vector<115x128xbf16>, vector<128x128xbf16>, vector<115x128xf32> -> vector<115x128xf32>
        %56 = arith.addf %44, %55 : vector<115x128xf32>
        %57 = arith.addi %14, %arg14 : i32
        %58 = arith.subi %57, %0 : i32
        %59 = arith.index_cast %58 : i32 to index
        %c2 = arith.constant 2 : index
        %c0_40 = arith.constant 0 : index
        %60 = vector.load %arg10[%59, %c2, %c0_40] : memref<29x121x128xbf16, #tpu.memory_space<vmem>>, vector<1x115x128xbf16>
        %61 = vector.shape_cast %60 : vector<1x115x128xbf16> to vector<115x128xbf16>
        %c7_i32_41 = arith.constant 7 : i32
        %62 = arith.muli %arg14, %c7_i32_41 : i32
        %c2_i32 = arith.constant 2 : i32
        %63 = arith.addi %62, %c2_i32 : i32
        %64 = arith.index_cast %63 : i32 to index
        %c0_42 = arith.constant 0 : index
        %c0_43 = arith.constant 0 : index
        %65 = vector.load %arg3[%64, %c0_42, %c0_43] : memref<49x128x128xbf16, #tpu.memory_space<vmem>>, vector<1x128x128xbf16>
        %66 = vector.shape_cast %65 : vector<1x128x128xbf16> to vector<128x128xbf16>
        %cst_44 = arith.constant dense<0.000000e+00> : vector<115x128xf32>
        %67 = tpu.matmul %61, %66, %cst_44 {dimension_numbers = #tpu.dot_dimension_numbers<[1], [0], [0], [1], [0, 0, 1, 1], [], []>} : vector<115x128xbf16>, vector<128x128xbf16>, vector<115x128xf32> -> vector<115x128xf32>
        %68 = arith.addf %56, %67 : vector<115x128xf32>
        %69 = arith.addi %14, %arg14 : i32
        %70 = arith.subi %69, %0 : i32
        %71 = arith.index_cast %70 : i32 to index
        %c3 = arith.constant 3 : index
        %c0_45 = arith.constant 0 : index
        %72 = vector.load %arg10[%71, %c3, %c0_45] : memref<29x121x128xbf16, #tpu.memory_space<vmem>>, vector<1x115x128xbf16>
        %73 = vector.shape_cast %72 : vector<1x115x128xbf16> to vector<115x128xbf16>
        %c7_i32_46 = arith.constant 7 : i32
        %74 = arith.muli %arg14, %c7_i32_46 : i32
        %c3_i32 = arith.constant 3 : i32
        %75 = arith.addi %74, %c3_i32 : i32
        %76 = arith.index_cast %75 : i32 to index
        %c0_47 = arith.constant 0 : index
        %c0_48 = arith.constant 0 : index
        %77 = vector.load %arg3[%76, %c0_47, %c0_48] : memref<49x128x128xbf16, #tpu.memory_space<vmem>>, vector<1x128x128xbf16>
        %78 = vector.shape_cast %77 : vector<1x128x128xbf16> to vector<128x128xbf16>
        %cst_49 = arith.constant dense<0.000000e+00> : vector<115x128xf32>
        %79 = tpu.matmul %73, %78, %cst_49 {dimension_numbers = #tpu.dot_dimension_numbers<[1], [0], [0], [1], [0, 0, 1, 1], [], []>} : vector<115x128xbf16>, vector<128x128xbf16>, vector<115x128xf32> -> vector<115x128xf32>
        %80 = arith.addf %68, %79 : vector<115x128xf32>
        %81 = arith.addi %14, %arg14 : i32
        %82 = arith.subi %81, %0 : i32
        %83 = arith.index_cast %82 : i32 to index
        %c4 = arith.constant 4 : index
        %c0_50 = arith.constant 0 : index
        %84 = vector.load %arg10[%83, %c4, %c0_50] : memref<29x121x128xbf16, #tpu.memory_space<vmem>>, vector<1x115x128xbf16>
        %85 = vector.shape_cast %84 : vector<1x115x128xbf16> to vector<115x128xbf16>
        %c7_i32_51 = arith.constant 7 : i32
        %86 = arith.muli %arg14, %c7_i32_51 : i32
        %c4_i32 = arith.constant 4 : i32
        %87 = arith.addi %86, %c4_i32 : i32
        %88 = arith.index_cast %87 : i32 to index
        %c0_52 = arith.constant 0 : index
        %c0_53 = arith.constant 0 : index
        %89 = vector.load %arg3[%88, %c0_52, %c0_53] : memref<49x128x128xbf16, #tpu.memory_space<vmem>>, vector<1x128x128xbf16>
        %90 = vector.shape_cast %89 : vector<1x128x128xbf16> to vector<128x128xbf16>
        %cst_54 = arith.constant dense<0.000000e+00> : vector<115x128xf32>
        %91 = tpu.matmul %85, %90, %cst_54 {dimension_numbers = #tpu.dot_dimension_numbers<[1], [0], [0], [1], [0, 0, 1, 1], [], []>} : vector<115x128xbf16>, vector<128x128xbf16>, vector<115x128xf32> -> vector<115x128xf32>
        %92 = arith.addf %80, %91 : vector<115x128xf32>
        %93 = arith.addi %14, %arg14 : i32
        %94 = arith.subi %93, %0 : i32
        %95 = arith.index_cast %94 : i32 to index
        %c5 = arith.constant 5 : index
        %c0_55 = arith.constant 0 : index
        %96 = vector.load %arg10[%95, %c5, %c0_55] : memref<29x121x128xbf16, #tpu.memory_space<vmem>>, vector<1x115x128xbf16>
        %97 = vector.shape_cast %96 : vector<1x115x128xbf16> to vector<115x128xbf16>
        %c7_i32_56 = arith.constant 7 : i32
        %98 = arith.muli %arg14, %c7_i32_56 : i32
        %c5_i32 = arith.constant 5 : i32
        %99 = arith.addi %98, %c5_i32 : i32
        %100 = arith.index_cast %99 : i32 to index
        %c0_57 = arith.constant 0 : index
        %c0_58 = arith.constant 0 : index
        %101 = vector.load %arg3[%100, %c0_57, %c0_58] : memref<49x128x128xbf16, #tpu.memory_space<vmem>>, vector<1x128x128xbf16>
        %102 = vector.shape_cast %101 : vector<1x128x128xbf16> to vector<128x128xbf16>
        %cst_59 = arith.constant dense<0.000000e+00> : vector<115x128xf32>
        %103 = tpu.matmul %97, %102, %cst_59 {dimension_numbers = #tpu.dot_dimension_numbers<[1], [0], [0], [1], [0, 0, 1, 1], [], []>} : vector<115x128xbf16>, vector<128x128xbf16>, vector<115x128xf32> -> vector<115x128xf32>
        %104 = arith.addf %92, %103 : vector<115x128xf32>
        %105 = arith.addi %14, %arg14 : i32
        %106 = arith.subi %105, %0 : i32
        %107 = arith.index_cast %106 : i32 to index
        %c6 = arith.constant 6 : index
        %c0_60 = arith.constant 0 : index
        %108 = vector.load %arg10[%107, %c6, %c0_60] : memref<29x121x128xbf16, #tpu.memory_space<vmem>>, vector<1x115x128xbf16>
        %109 = vector.shape_cast %108 : vector<1x115x128xbf16> to vector<115x128xbf16>
        %c7_i32_61 = arith.constant 7 : i32
        %110 = arith.muli %arg14, %c7_i32_61 : i32
        %c6_i32 = arith.constant 6 : i32
        %111 = arith.addi %110, %c6_i32 : i32
        %112 = arith.index_cast %111 : i32 to index
        %c0_62 = arith.constant 0 : index
        %c0_63 = arith.constant 0 : index
        %113 = vector.load %arg3[%112, %c0_62, %c0_63] : memref<49x128x128xbf16, #tpu.memory_space<vmem>>, vector<1x128x128xbf16>
        %114 = vector.shape_cast %113 : vector<1x128x128xbf16> to vector<128x128xbf16>
        %cst_64 = arith.constant dense<0.000000e+00> : vector<115x128xf32>
        %115 = tpu.matmul %109, %114, %cst_64 {dimension_numbers = #tpu.dot_dimension_numbers<[1], [0], [0], [1], [0, 0, 1, 1], [], []>} : vector<115x128xbf16>, vector<128x128xbf16>, vector<115x128xf32> -> vector<115x128xf32>
        %116 = arith.addf %104, %115 : vector<115x128xf32>
        scf.yield %116 : vector<115x128xf32>
      }
      %c7_i32_21 = arith.constant 7 : i32
      %18 = vector.broadcast %4 : vector<1x128xf32> to vector<115x128xf32>
      %19 = arith.addf %17, %18 : vector<115x128xf32>
      %20 = vector.shape_cast %19 : vector<115x128xf32> to vector<1x115x128xf32>
      %21 = arith.truncf %20 : vector<1x115x128xf32> to vector<1x115x128xbf16>
      %c0_22 = arith.constant 0 : index
      %22 = arith.index_cast %arg11 : i32 to index
      %c0_23 = arith.constant 0 : index
      %c0_24 = arith.constant 0 : index
      %23 = vector.load %arg7[%c0_22, %22, %c0_23, %c0_24] : memref<1x23x115x128xbf16, #tpu.memory_space<vmem>>, vector<1x1x115x128xbf16>
      %24 = vector.shape_cast %23 : vector<1x1x115x128xbf16> to vector<1x115x128xbf16>
      %25 = vector.shape_cast %21 : vector<1x115x128xbf16> to vector<1x1x115x128xbf16>
      tpu.vector_store %arg7[%c0_22, %22, %c0_23, %c0_24], %25 {strides = array<i32>} : memref<1x23x115x128xbf16, #tpu.memory_space<vmem>>, vector<1x1x115x128xbf16>,
      %cst_25 = arith.constant dense<0.000000e+00> : vector<128xf32>
      %26 = vector.multi_reduction <add>, %19, %cst_25 [0] : vector<115x128xf32> to vector<128xf32>
      %27 = vector.shape_cast %26 : vector<128xf32> to vector<1x128xf32>
      %28 = arith.addf %arg12, %27 : vector<1x128xf32>
      %29 = arith.mulf %19, %19 : vector<115x128xf32>
      %cst_26 = arith.constant dense<0.000000e+00> : vector<128xf32>
      %30 = vector.multi_reduction <add>, %29, %cst_26 [0] : vector<115x128xf32> to vector<128xf32>
      %31 = vector.shape_cast %30 : vector<128xf32> to vector<1x128xf32>
      %32 = arith.addf %arg13, %31 : vector<1x128xf32>
      scf.yield %28, %32 : vector<1x128xf32>, vector<1x128xf32>
    }
    %c23_i32_9 = arith.constant 23 : i32
    %c0_10 = arith.constant 0 : index
    %c0_11 = arith.constant 0 : index
    %c0_12 = arith.constant 0 : index
    %c0_13 = arith.constant 0 : index
    %8 = vector.load %arg8[%c0_10, %c0_11, %c0_12, %c0_13] : memref<1x1x1x128xf32, #tpu.memory_space<vmem>>, vector<1x1x1x128xf32>
    %9 = vector.shape_cast %8 : vector<1x1x1x128xf32> to vector<1x128xf32>
    %10 = vector.shape_cast %7#0 : vector<1x128xf32> to vector<1x1x1x128xf32>
    tpu.vector_store %arg8[%c0_10, %c0_11, %c0_12, %c0_13], %10 {strides = array<i32>} : memref<1x1x1x128xf32, #tpu.memory_space<vmem>>, vector<1x1x1x128xf32>,
    %c0_14 = arith.constant 0 : index
    %c0_15 = arith.constant 0 : index
    %c0_16 = arith.constant 0 : index
    %c0_17 = arith.constant 0 : index
    %11 = vector.load %arg9[%c0_14, %c0_15, %c0_16, %c0_17] : memref<1x1x1x128xf32, #tpu.memory_space<vmem>>, vector<1x1x1x128xf32>
    %12 = vector.shape_cast %11 : vector<1x1x1x128xf32> to vector<1x128xf32>
    %13 = vector.shape_cast %7#1 : vector<1x128xf32> to vector<1x1x1x128xf32>
    tpu.vector_store %arg9[%c0_14, %c0_15, %c0_16, %c0_17], %13 {strides = array<i32>} : memref<1x1x1x128xf32, #tpu.memory_space<vmem>>, vector<1x1x1x128xf32>,
    return
  }
  func.func @transform_0(%arg0: i32, %arg1: i32) -> (i32, i32, i32, i32) {
    %c0_i32 = arith.constant 0 : i32
    %c0_i32_0 = arith.constant 0 : i32
    %c0_i32_1 = arith.constant 0 : i32
    %c0_i32_2 = arith.constant 0 : i32
    return %arg0, %c0_i32, %c0_i32_0, %c0_i32_1 : i32, i32, i32, i32
  }
  func.func @transform_1(%arg0: i32, %arg1: i32) -> (i32, i32, i32) {
    %c0_i32 = arith.constant 0 : i32
    %c0_i32_0 = arith.constant 0 : i32
    %c0_i32_1 = arith.constant 0 : i32
    %c0_i32_2 = arith.constant 0 : i32
    return %c0_i32, %c0_i32_0, %c0_i32_1 : i32, i32, i32
  }
  func.func @transform_2(%arg0: i32, %arg1: i32) -> (i32, i32) {
    %c0_i32 = arith.constant 0 : i32
    %c0_i32_0 = arith.constant 0 : i32
    %c0_i32_1 = arith.constant 0 : i32
    return %c0_i32, %c0_i32_0 : i32, i32
  }
  func.func @transform_3(%arg0: i32, %arg1: i32) -> (i32, i32) {
    %c0_i32 = arith.constant 0 : i32
    %c0_i32_0 = arith.constant 0 : i32
    %c0_i32_1 = arith.constant 0 : i32
    return %c0_i32, %c0_i32_0 : i32, i32
  }
  func.func @transform_4(%arg0: i32, %arg1: i32) -> (i32, i32) {
    %c0_i32 = arith.constant 0 : i32
    %c0_i32_0 = arith.constant 0 : i32
    %c0_i32_1 = arith.constant 0 : i32
    return %c0_i32, %c0_i32_0 : i32, i32
  }
  func.func @transform_5(%arg0: i32, %arg1: i32) -> (i32, i32, i32, i32) {
    %c0_i32 = arith.constant 0 : i32
    %c0_i32_0 = arith.constant 0 : i32
    %c0_i32_1 = arith.constant 0 : i32
    return %arg0, %arg1, %c0_i32, %c0_i32_0 : i32, i32, i32, i32
  }
  func.func @transform_6(%arg0: i32, %arg1: i32) -> (i32, i32, i32, i32) {
    %c0_i32 = arith.constant 0 : i32
    %c0_i32_0 = arith.constant 0 : i32
    %c0_i32_1 = arith.constant 0 : i32
    return %arg0, %arg1, %c0_i32, %c0_i32_0 : i32, i32, i32, i32
  }
  func.func @transform_7(%arg0: i32, %arg1: i32) -> (i32, i32, i32, i32) {
    %c0_i32 = arith.constant 0 : i32
    %c0_i32_0 = arith.constant 0 : i32
    %c0_i32_1 = arith.constant 0 : i32
    return %arg0, %arg1, %c0_i32, %c0_i32_0 : i32, i32, i32, i32
  }
}

module attributes {stable_mosaic.version = 11 : i64} {
  func.func @_conv_kernel(%arg0: i32, %arg1: i32, %arg2: memref<1x38x38x128xbf16, #tpu.memory_space<vmem>>, %arg3: memref<64x128x128xbf16, #tpu.memory_space<vmem>>, %arg4: memref<1x128xf32, #tpu.memory_space<vmem>>, %arg5: memref<1x128xf32, #tpu.memory_space<vmem>>, %arg6: memref<1x128xf32, #tpu.memory_space<vmem>>, %arg7: memref<1x31x31x128xbf16, #tpu.memory_space<vmem>>, %arg8: memref<1x1x1x128xf32, #tpu.memory_space<vmem>>, %arg9: memref<1x1x1x128xf32, #tpu.memory_space<vmem>>) attributes {dimension_semantics = [#tpu.dimension_semantics<parallel>, #tpu.dimension_semantics<arbitrary>], iteration_bounds = array<i64: 2, 1>, scalar_prefetch = 0 : i64, scratch_operands = 0 : i64, tpu.core_type = #tpu.core_type<tc>, window_params = [{transform_indices = @transform_0, window_bounds = array<i64: 1, 38, 38, 128>}, {pipeline_mode = #tpu.pipeline_mode<synchronous>, transform_indices = @transform_1, window_bounds = array<i64: 64, 128, 128>}, {pipeline_mode = #tpu.pipeline_mode<synchronous>, transform_indices = @transform_2, window_bounds = array<i64: 1, 128>}, {pipeline_mode = #tpu.pipeline_mode<synchronous>, transform_indices = @transform_3, window_bounds = array<i64: 1, 128>}, {pipeline_mode = #tpu.pipeline_mode<synchronous>, transform_indices = @transform_4, window_bounds = array<i64: 1, 128>}, {transform_indices = @transform_5, window_bounds = array<i64: 1, 31, 31, 128>}, {transform_indices = @transform_6, window_bounds = array<i64: 1, 1, 1, 128>}, {transform_indices = @transform_7, window_bounds = array<i64: 1, 1, 1, 128>}]} {
    %c31_i32 = arith.constant 31 : i32
    %0 = arith.muli %arg1, %c31_i32 : i32
    %c0 = arith.constant 0 : index
    %c0_0 = arith.constant 0 : index
    %1 = vector.load %arg4[%c0, %c0_0] : memref<1x128xf32, #tpu.memory_space<vmem>>, vector<1x128xf32>
    %cst = arith.constant 0.000000e+00 : f32
    %2 = vector.broadcast %cst : f32 to vector<1x128xf32>
    %c0_i32 = arith.constant 0 : i32
    %c31_i32_1 = arith.constant 31 : i32
    %3 = arith.addi %c0_i32, %c31_i32_1 : i32
    %c1_i32 = arith.constant 1 : i32
    %4:2 = scf.for %arg10 = %c0_i32 to %3 step %c1_i32 iter_args(%arg11 = %2, %arg12 = %2) -> (vector<1x128xf32>, vector<1x128xf32>)  : i32 {
      %11 = arith.addi %0, %arg10 : i32
      %cst_11 = arith.constant 0.000000e+00 : f32
      %12 = vector.broadcast %cst_11 : f32 to vector<31x128xf32>
      %c0_i32_12 = arith.constant 0 : i32
      %c8_i32 = arith.constant 8 : i32
      %13 = arith.addi %c0_i32_12, %c8_i32 : i32
      %c1_i32_13 = arith.constant 1 : i32
      %14 = scf.for %arg13 = %c0_i32_12 to %13 step %c1_i32_13 iter_args(%arg14 = %12) -> (vector<31x128xf32>)  : i32 {
        %30 = arith.addi %11, %arg13 : i32
        %c0_20 = arith.constant 0 : index
        %31 = arith.index_cast %30 : i32 to index
        %c0_21 = arith.constant 0 : index
        %c0_22 = arith.constant 0 : index
        %32 = vector.load %arg2[%c0_20, %31, %c0_21, %c0_22] : memref<1x38x38x128xbf16, #tpu.memory_space<vmem>>, vector<1x1x31x128xbf16>
        %33 = vector.shape_cast %32 : vector<1x1x31x128xbf16> to vector<1x31x128xbf16>
        %34 = vector.shape_cast %33 : vector<1x31x128xbf16> to vector<31x128xbf16>
        %c8_i32_23 = arith.constant 8 : i32
        %35 = arith.muli %arg13, %c8_i32_23 : i32
        %c0_i32_24 = arith.constant 0 : i32
        %36 = arith.addi %35, %c0_i32_24 : i32
        %37 = arith.index_cast %36 : i32 to index
        %c0_25 = arith.constant 0 : index
        %c0_26 = arith.constant 0 : index
        %38 = vector.load %arg3[%37, %c0_25, %c0_26] : memref<64x128x128xbf16, #tpu.memory_space<vmem>>, vector<1x128x128xbf16>
        %39 = vector.shape_cast %38 : vector<1x128x128xbf16> to vector<128x128xbf16>
        %cst_27 = arith.constant dense<0.000000e+00> : vector<31x128xf32>
        %40 = tpu.matmul %34, %39, %cst_27 {dimension_numbers = #tpu.dot_dimension_numbers<[1], [0], [0], [1], [0, 0, 1, 1], [], []>} : vector<31x128xbf16>, vector<128x128xbf16>, vector<31x128xf32> -> vector<31x128xf32>
        %41 = arith.addf %arg14, %40 : vector<31x128xf32>
        %42 = arith.addi %11, %arg13 : i32
        %c0_28 = arith.constant 0 : index
        %43 = arith.index_cast %42 : i32 to index
        %c1 = arith.constant 1 : index
        %c0_29 = arith.constant 0 : index
        %44 = vector.load %arg2[%c0_28, %43, %c1, %c0_29] : memref<1x38x38x128xbf16, #tpu.memory_space<vmem>>, vector<1x1x31x128xbf16>
        %45 = vector.shape_cast %44 : vector<1x1x31x128xbf16> to vector<1x31x128xbf16>
        %46 = vector.shape_cast %45 : vector<1x31x128xbf16> to vector<31x128xbf16>
        %c8_i32_30 = arith.constant 8 : i32
        %47 = arith.muli %arg13, %c8_i32_30 : i32
        %c1_i32_31 = arith.constant 1 : i32
        %48 = arith.addi %47, %c1_i32_31 : i32
        %49 = arith.index_cast %48 : i32 to index
        %c0_32 = arith.constant 0 : index
        %c0_33 = arith.constant 0 : index
        %50 = vector.load %arg3[%49, %c0_32, %c0_33] : memref<64x128x128xbf16, #tpu.memory_space<vmem>>, vector<1x128x128xbf16>
        %51 = vector.shape_cast %50 : vector<1x128x128xbf16> to vector<128x128xbf16>
        %cst_34 = arith.constant dense<0.000000e+00> : vector<31x128xf32>
        %52 = tpu.matmul %46, %51, %cst_34 {dimension_numbers = #tpu.dot_dimension_numbers<[1], [0], [0], [1], [0, 0, 1, 1], [], []>} : vector<31x128xbf16>, vector<128x128xbf16>, vector<31x128xf32> -> vector<31x128xf32>
        %53 = arith.addf %41, %52 : vector<31x128xf32>
        %54 = arith.addi %11, %arg13 : i32
        %c0_35 = arith.constant 0 : index
        %55 = arith.index_cast %54 : i32 to index
        %c2 = arith.constant 2 : index
        %c0_36 = arith.constant 0 : index
        %56 = vector.load %arg2[%c0_35, %55, %c2, %c0_36] : memref<1x38x38x128xbf16, #tpu.memory_space<vmem>>, vector<1x1x31x128xbf16>
        %57 = vector.shape_cast %56 : vector<1x1x31x128xbf16> to vector<1x31x128xbf16>
        %58 = vector.shape_cast %57 : vector<1x31x128xbf16> to vector<31x128xbf16>
        %c8_i32_37 = arith.constant 8 : i32
        %59 = arith.muli %arg13, %c8_i32_37 : i32
        %c2_i32 = arith.constant 2 : i32
        %60 = arith.addi %59, %c2_i32 : i32
        %61 = arith.index_cast %60 : i32 to index
        %c0_38 = arith.constant 0 : index
        %c0_39 = arith.constant 0 : index
        %62 = vector.load %arg3[%61, %c0_38, %c0_39] : memref<64x128x128xbf16, #tpu.memory_space<vmem>>, vector<1x128x128xbf16>
        %63 = vector.shape_cast %62 : vector<1x128x128xbf16> to vector<128x128xbf16>
        %cst_40 = arith.constant dense<0.000000e+00> : vector<31x128xf32>
        %64 = tpu.matmul %58, %63, %cst_40 {dimension_numbers = #tpu.dot_dimension_numbers<[1], [0], [0], [1], [0, 0, 1, 1], [], []>} : vector<31x128xbf16>, vector<128x128xbf16>, vector<31x128xf32> -> vector<31x128xf32>
        %65 = arith.addf %53, %64 : vector<31x128xf32>
        %66 = arith.addi %11, %arg13 : i32
        %c0_41 = arith.constant 0 : index
        %67 = arith.index_cast %66 : i32 to index
        %c3 = arith.constant 3 : index
        %c0_42 = arith.constant 0 : index
        %68 = vector.load %arg2[%c0_41, %67, %c3, %c0_42] : memref<1x38x38x128xbf16, #tpu.memory_space<vmem>>, vector<1x1x31x128xbf16>
        %69 = vector.shape_cast %68 : vector<1x1x31x128xbf16> to vector<1x31x128xbf16>
        %70 = vector.shape_cast %69 : vector<1x31x128xbf16> to vector<31x128xbf16>
        %c8_i32_43 = arith.constant 8 : i32
        %71 = arith.muli %arg13, %c8_i32_43 : i32
        %c3_i32 = arith.constant 3 : i32
        %72 = arith.addi %71, %c3_i32 : i32
        %73 = arith.index_cast %72 : i32 to index
        %c0_44 = arith.constant 0 : index
        %c0_45 = arith.constant 0 : index
        %74 = vector.load %arg3[%73, %c0_44, %c0_45] : memref<64x128x128xbf16, #tpu.memory_space<vmem>>, vector<1x128x128xbf16>
        %75 = vector.shape_cast %74 : vector<1x128x128xbf16> to vector<128x128xbf16>
        %cst_46 = arith.constant dense<0.000000e+00> : vector<31x128xf32>
        %76 = tpu.matmul %70, %75, %cst_46 {dimension_numbers = #tpu.dot_dimension_numbers<[1], [0], [0], [1], [0, 0, 1, 1], [], []>} : vector<31x128xbf16>, vector<128x128xbf16>, vector<31x128xf32> -> vector<31x128xf32>
        %77 = arith.addf %65, %76 : vector<31x128xf32>
        %78 = arith.addi %11, %arg13 : i32
        %c0_47 = arith.constant 0 : index
        %79 = arith.index_cast %78 : i32 to index
        %c4 = arith.constant 4 : index
        %c0_48 = arith.constant 0 : index
        %80 = vector.load %arg2[%c0_47, %79, %c4, %c0_48] : memref<1x38x38x128xbf16, #tpu.memory_space<vmem>>, vector<1x1x31x128xbf16>
        %81 = vector.shape_cast %80 : vector<1x1x31x128xbf16> to vector<1x31x128xbf16>
        %82 = vector.shape_cast %81 : vector<1x31x128xbf16> to vector<31x128xbf16>
        %c8_i32_49 = arith.constant 8 : i32
        %83 = arith.muli %arg13, %c8_i32_49 : i32
        %c4_i32 = arith.constant 4 : i32
        %84 = arith.addi %83, %c4_i32 : i32
        %85 = arith.index_cast %84 : i32 to index
        %c0_50 = arith.constant 0 : index
        %c0_51 = arith.constant 0 : index
        %86 = vector.load %arg3[%85, %c0_50, %c0_51] : memref<64x128x128xbf16, #tpu.memory_space<vmem>>, vector<1x128x128xbf16>
        %87 = vector.shape_cast %86 : vector<1x128x128xbf16> to vector<128x128xbf16>
        %cst_52 = arith.constant dense<0.000000e+00> : vector<31x128xf32>
        %88 = tpu.matmul %82, %87, %cst_52 {dimension_numbers = #tpu.dot_dimension_numbers<[1], [0], [0], [1], [0, 0, 1, 1], [], []>} : vector<31x128xbf16>, vector<128x128xbf16>, vector<31x128xf32> -> vector<31x128xf32>
        %89 = arith.addf %77, %88 : vector<31x128xf32>
        %90 = arith.addi %11, %arg13 : i32
        %c0_53 = arith.constant 0 : index
        %91 = arith.index_cast %90 : i32 to index
        %c5 = arith.constant 5 : index
        %c0_54 = arith.constant 0 : index
        %92 = vector.load %arg2[%c0_53, %91, %c5, %c0_54] : memref<1x38x38x128xbf16, #tpu.memory_space<vmem>>, vector<1x1x31x128xbf16>
        %93 = vector.shape_cast %92 : vector<1x1x31x128xbf16> to vector<1x31x128xbf16>
        %94 = vector.shape_cast %93 : vector<1x31x128xbf16> to vector<31x128xbf16>
        %c8_i32_55 = arith.constant 8 : i32
        %95 = arith.muli %arg13, %c8_i32_55 : i32
        %c5_i32 = arith.constant 5 : i32
        %96 = arith.addi %95, %c5_i32 : i32
        %97 = arith.index_cast %96 : i32 to index
        %c0_56 = arith.constant 0 : index
        %c0_57 = arith.constant 0 : index
        %98 = vector.load %arg3[%97, %c0_56, %c0_57] : memref<64x128x128xbf16, #tpu.memory_space<vmem>>, vector<1x128x128xbf16>
        %99 = vector.shape_cast %98 : vector<1x128x128xbf16> to vector<128x128xbf16>
        %cst_58 = arith.constant dense<0.000000e+00> : vector<31x128xf32>
        %100 = tpu.matmul %94, %99, %cst_58 {dimension_numbers = #tpu.dot_dimension_numbers<[1], [0], [0], [1], [0, 0, 1, 1], [], []>} : vector<31x128xbf16>, vector<128x128xbf16>, vector<31x128xf32> -> vector<31x128xf32>
        %101 = arith.addf %89, %100 : vector<31x128xf32>
        %102 = arith.addi %11, %arg13 : i32
        %c0_59 = arith.constant 0 : index
        %103 = arith.index_cast %102 : i32 to index
        %c6 = arith.constant 6 : index
        %c0_60 = arith.constant 0 : index
        %104 = vector.load %arg2[%c0_59, %103, %c6, %c0_60] : memref<1x38x38x128xbf16, #tpu.memory_space<vmem>>, vector<1x1x31x128xbf16>
        %105 = vector.shape_cast %104 : vector<1x1x31x128xbf16> to vector<1x31x128xbf16>
        %106 = vector.shape_cast %105 : vector<1x31x128xbf16> to vector<31x128xbf16>
        %c8_i32_61 = arith.constant 8 : i32
        %107 = arith.muli %arg13, %c8_i32_61 : i32
        %c6_i32 = arith.constant 6 : i32
        %108 = arith.addi %107, %c6_i32 : i32
        %109 = arith.index_cast %108 : i32 to index
        %c0_62 = arith.constant 0 : index
        %c0_63 = arith.constant 0 : index
        %110 = vector.load %arg3[%109, %c0_62, %c0_63] : memref<64x128x128xbf16, #tpu.memory_space<vmem>>, vector<1x128x128xbf16>
        %111 = vector.shape_cast %110 : vector<1x128x128xbf16> to vector<128x128xbf16>
        %cst_64 = arith.constant dense<0.000000e+00> : vector<31x128xf32>
        %112 = tpu.matmul %106, %111, %cst_64 {dimension_numbers = #tpu.dot_dimension_numbers<[1], [0], [0], [1], [0, 0, 1, 1], [], []>} : vector<31x128xbf16>, vector<128x128xbf16>, vector<31x128xf32> -> vector<31x128xf32>
        %113 = arith.addf %101, %112 : vector<31x128xf32>
        %114 = arith.addi %11, %arg13 : i32
        %c0_65 = arith.constant 0 : index
        %115 = arith.index_cast %114 : i32 to index
        %c7 = arith.constant 7 : index
        %c0_66 = arith.constant 0 : index
        %116 = vector.load %arg2[%c0_65, %115, %c7, %c0_66] : memref<1x38x38x128xbf16, #tpu.memory_space<vmem>>, vector<1x1x31x128xbf16>
        %117 = vector.shape_cast %116 : vector<1x1x31x128xbf16> to vector<1x31x128xbf16>
        %118 = vector.shape_cast %117 : vector<1x31x128xbf16> to vector<31x128xbf16>
        %c8_i32_67 = arith.constant 8 : i32
        %119 = arith.muli %arg13, %c8_i32_67 : i32
        %c7_i32 = arith.constant 7 : i32
        %120 = arith.addi %119, %c7_i32 : i32
        %121 = arith.index_cast %120 : i32 to index
        %c0_68 = arith.constant 0 : index
        %c0_69 = arith.constant 0 : index
        %122 = vector.load %arg3[%121, %c0_68, %c0_69] : memref<64x128x128xbf16, #tpu.memory_space<vmem>>, vector<1x128x128xbf16>
        %123 = vector.shape_cast %122 : vector<1x128x128xbf16> to vector<128x128xbf16>
        %cst_70 = arith.constant dense<0.000000e+00> : vector<31x128xf32>
        %124 = tpu.matmul %118, %123, %cst_70 {dimension_numbers = #tpu.dot_dimension_numbers<[1], [0], [0], [1], [0, 0, 1, 1], [], []>} : vector<31x128xbf16>, vector<128x128xbf16>, vector<31x128xf32> -> vector<31x128xf32>
        %125 = arith.addf %113, %124 : vector<31x128xf32>
        scf.yield %125 : vector<31x128xf32>
      }
      %c8_i32_14 = arith.constant 8 : i32
      %15 = vector.broadcast %1 : vector<1x128xf32> to vector<31x128xf32>
      %16 = arith.addf %14, %15 : vector<31x128xf32>
      %17 = vector.shape_cast %16 : vector<31x128xf32> to vector<1x31x128xf32>
      %18 = arith.truncf %17 : vector<1x31x128xf32> to vector<1x31x128xbf16>
      %c0_15 = arith.constant 0 : index
      %19 = arith.index_cast %arg10 : i32 to index
      %c0_16 = arith.constant 0 : index
      %c0_17 = arith.constant 0 : index
      %20 = vector.load %arg7[%c0_15, %19, %c0_16, %c0_17] : memref<1x31x31x128xbf16, #tpu.memory_space<vmem>>, vector<1x1x31x128xbf16>
      %21 = vector.shape_cast %20 : vector<1x1x31x128xbf16> to vector<1x31x128xbf16>
      %22 = vector.shape_cast %18 : vector<1x31x128xbf16> to vector<1x1x31x128xbf16>
      tpu.vector_store %arg7[%c0_15, %19, %c0_16, %c0_17], %22 {strides = array<i32>} : memref<1x31x31x128xbf16, #tpu.memory_space<vmem>>, vector<1x1x31x128xbf16>,
      %cst_18 = arith.constant dense<0.000000e+00> : vector<128xf32>
      %23 = vector.multi_reduction <add>, %16, %cst_18 [0] : vector<31x128xf32> to vector<128xf32>
      %24 = vector.shape_cast %23 : vector<128xf32> to vector<1x128xf32>
      %25 = arith.addf %arg11, %24 : vector<1x128xf32>
      %26 = arith.mulf %16, %16 : vector<31x128xf32>
      %cst_19 = arith.constant dense<0.000000e+00> : vector<128xf32>
      %27 = vector.multi_reduction <add>, %26, %cst_19 [0] : vector<31x128xf32> to vector<128xf32>
      %28 = vector.shape_cast %27 : vector<128xf32> to vector<1x128xf32>
      %29 = arith.addf %arg12, %28 : vector<1x128xf32>
      scf.yield %25, %29 : vector<1x128xf32>, vector<1x128xf32>
    }
    %c31_i32_2 = arith.constant 31 : i32
    %c0_3 = arith.constant 0 : index
    %c0_4 = arith.constant 0 : index
    %c0_5 = arith.constant 0 : index
    %c0_6 = arith.constant 0 : index
    %5 = vector.load %arg8[%c0_3, %c0_4, %c0_5, %c0_6] : memref<1x1x1x128xf32, #tpu.memory_space<vmem>>, vector<1x1x1x128xf32>
    %6 = vector.shape_cast %5 : vector<1x1x1x128xf32> to vector<1x128xf32>
    %7 = vector.shape_cast %4#0 : vector<1x128xf32> to vector<1x1x1x128xf32>
    tpu.vector_store %arg8[%c0_3, %c0_4, %c0_5, %c0_6], %7 {strides = array<i32>} : memref<1x1x1x128xf32, #tpu.memory_space<vmem>>, vector<1x1x1x128xf32>,
    %c0_7 = arith.constant 0 : index
    %c0_8 = arith.constant 0 : index
    %c0_9 = arith.constant 0 : index
    %c0_10 = arith.constant 0 : index
    %8 = vector.load %arg9[%c0_7, %c0_8, %c0_9, %c0_10] : memref<1x1x1x128xf32, #tpu.memory_space<vmem>>, vector<1x1x1x128xf32>
    %9 = vector.shape_cast %8 : vector<1x1x1x128xf32> to vector<1x128xf32>
    %10 = vector.shape_cast %4#1 : vector<1x128xf32> to vector<1x1x1x128xf32>
    tpu.vector_store %arg9[%c0_7, %c0_8, %c0_9, %c0_10], %10 {strides = array<i32>} : memref<1x1x1x128xf32, #tpu.memory_space<vmem>>, vector<1x1x1x128xf32>,
    return
  }
  func.func @transform_0(%arg0: i32, %arg1: i32) -> (i32, i32, i32, i32) {
    %c0_i32 = arith.constant 0 : i32
    %c0_i32_0 = arith.constant 0 : i32
    %c0_i32_1 = arith.constant 0 : i32
    %c0_i32_2 = arith.constant 0 : i32
    return %arg0, %c0_i32, %c0_i32_0, %c0_i32_1 : i32, i32, i32, i32
  }
  func.func @transform_1(%arg0: i32, %arg1: i32) -> (i32, i32, i32) {
    %c0_i32 = arith.constant 0 : i32
    %c0_i32_0 = arith.constant 0 : i32
    %c0_i32_1 = arith.constant 0 : i32
    %c0_i32_2 = arith.constant 0 : i32
    return %c0_i32, %c0_i32_0, %c0_i32_1 : i32, i32, i32
  }
  func.func @transform_2(%arg0: i32, %arg1: i32) -> (i32, i32) {
    %c0_i32 = arith.constant 0 : i32
    %c0_i32_0 = arith.constant 0 : i32
    %c0_i32_1 = arith.constant 0 : i32
    return %c0_i32, %c0_i32_0 : i32, i32
  }
  func.func @transform_3(%arg0: i32, %arg1: i32) -> (i32, i32) {
    %c0_i32 = arith.constant 0 : i32
    %c0_i32_0 = arith.constant 0 : i32
    %c0_i32_1 = arith.constant 0 : i32
    return %c0_i32, %c0_i32_0 : i32, i32
  }
  func.func @transform_4(%arg0: i32, %arg1: i32) -> (i32, i32) {
    %c0_i32 = arith.constant 0 : i32
    %c0_i32_0 = arith.constant 0 : i32
    %c0_i32_1 = arith.constant 0 : i32
    return %c0_i32, %c0_i32_0 : i32, i32
  }
  func.func @transform_5(%arg0: i32, %arg1: i32) -> (i32, i32, i32, i32) {
    %c0_i32 = arith.constant 0 : i32
    %c0_i32_0 = arith.constant 0 : i32
    %c0_i32_1 = arith.constant 0 : i32
    return %arg0, %arg1, %c0_i32, %c0_i32_0 : i32, i32, i32, i32
  }
  func.func @transform_6(%arg0: i32, %arg1: i32) -> (i32, i32, i32, i32) {
    %c0_i32 = arith.constant 0 : i32
    %c0_i32_0 = arith.constant 0 : i32
    %c0_i32_1 = arith.constant 0 : i32
    return %arg0, %arg1, %c0_i32, %c0_i32_0 : i32, i32, i32, i32
  }
  func.func @transform_7(%arg0: i32, %arg1: i32) -> (i32, i32, i32, i32) {
    %c0_i32 = arith.constant 0 : i32
    %c0_i32_0 = arith.constant 0 : i32
    %c0_i32_1 = arith.constant 0 : i32
    return %arg0, %arg1, %c0_i32, %c0_i32_0 : i32, i32, i32, i32
  }
}

module attributes {stable_mosaic.version = 11 : i64} {
  func.func @_conv_kernel(%arg0: i32, %arg1: i32, %arg2: memref<1x31x31x128xbf16, #tpu.memory_space<vmem>>, %arg3: memref<49x128x128xbf16, #tpu.memory_space<vmem>>, %arg4: memref<1x128xf32, #tpu.memory_space<vmem>>, %arg5: memref<1x128xf32, #tpu.memory_space<vmem>>, %arg6: memref<1x128xf32, #tpu.memory_space<vmem>>, %arg7: memref<1x25x25x128xbf16, #tpu.memory_space<vmem>>, %arg8: memref<1x1x1x128xf32, #tpu.memory_space<vmem>>, %arg9: memref<1x1x1x128xf32, #tpu.memory_space<vmem>>, %arg10: memref<31x31x128xbf16, #tpu.memory_space<vmem>>) attributes {dimension_semantics = [#tpu.dimension_semantics<parallel>, #tpu.dimension_semantics<arbitrary>], iteration_bounds = array<i64: 2, 1>, scalar_prefetch = 0 : i64, scratch_operands = 1 : i64, tpu.core_type = #tpu.core_type<tc>, window_params = [{transform_indices = @transform_0, window_bounds = array<i64: 1, 31, 31, 128>}, {pipeline_mode = #tpu.pipeline_mode<synchronous>, transform_indices = @transform_1, window_bounds = array<i64: 49, 128, 128>}, {pipeline_mode = #tpu.pipeline_mode<synchronous>, transform_indices = @transform_2, window_bounds = array<i64: 1, 128>}, {pipeline_mode = #tpu.pipeline_mode<synchronous>, transform_indices = @transform_3, window_bounds = array<i64: 1, 128>}, {pipeline_mode = #tpu.pipeline_mode<synchronous>, transform_indices = @transform_4, window_bounds = array<i64: 1, 128>}, {transform_indices = @transform_5, window_bounds = array<i64: 1, 25, 25, 128>}, {transform_indices = @transform_6, window_bounds = array<i64: 1, 1, 1, 128>}, {transform_indices = @transform_7, window_bounds = array<i64: 1, 1, 1, 128>}]} {
    %c25_i32 = arith.constant 25 : i32
    %0 = arith.muli %arg1, %c25_i32 : i32
    %c0 = arith.constant 0 : index
    %c0_0 = arith.constant 0 : index
    %1 = vector.load %arg5[%c0, %c0_0] : memref<1x128xf32, #tpu.memory_space<vmem>>, vector<1x128xf32>
    %c0_1 = arith.constant 0 : index
    %c0_2 = arith.constant 0 : index
    %2 = vector.load %arg6[%c0_1, %c0_2] : memref<1x128xf32, #tpu.memory_space<vmem>>, vector<1x128xf32>
    %c0_i32 = arith.constant 0 : i32
    %c31_i32 = arith.constant 31 : i32
    %3 = arith.addi %c0_i32, %c31_i32 : i32
    %c1_i32 = arith.constant 1 : i32
    scf.for %arg11 = %c0_i32 to %3 step %c1_i32  : i32 {
      %14 = arith.addi %0, %arg11 : i32
      %c0_18 = arith.constant 0 : index
      %15 = arith.index_cast %14 : i32 to index
      %c0_19 = arith.constant 0 : index
      %c0_20 = arith.constant 0 : index
      %16 = vector.load %arg2[%c0_18, %15, %c0_19, %c0_20] : memref<1x31x31x128xbf16, #tpu.memory_space<vmem>>, vector<1x1x31x128xbf16>
      %17 = vector.shape_cast %16 : vector<1x1x31x128xbf16> to vector<1x31x128xbf16>
      %18 = arith.extf %17 : vector<1x31x128xbf16> to vector<1x31x128xf32>
      %19 = vector.shape_cast %1 : vector<1x128xf32> to vector<1x1x128xf32>
      %20 = vector.broadcast %19 : vector<1x1x128xf32> to vector<1x31x128xf32>
      %21 = arith.mulf %18, %20 : vector<1x31x128xf32>
      %22 = vector.shape_cast %2 : vector<1x128xf32> to vector<1x1x128xf32>
      %23 = vector.broadcast %22 : vector<1x1x128xf32> to vector<1x31x128xf32>
      %24 = arith.addf %21, %23 : vector<1x31x128xf32>
      %cst_21 = arith.constant 0.000000e+00 : f32
      %25 = vector.broadcast %cst_21 : f32 to vector<1x31x128xf32>
      %26 = arith.maximumf %24, %25 : vector<1x31x128xf32>
      %27 = arith.truncf %26 : vector<1x31x128xf32> to vector<1x31x128xbf16>
      %28 = arith.index_cast %arg11 : i32 to index
      %c0_22 = arith.constant 0 : index
      %c0_23 = arith.constant 0 : index
      %29 = vector.load %arg10[%28, %c0_22, %c0_23] : memref<31x31x128xbf16, #tpu.memory_space<vmem>>, vector<1x31x128xbf16>
      tpu.vector_store %arg10[%28, %c0_22, %c0_23], %27 {strides = array<i32>} : memref<31x31x128xbf16, #tpu.memory_space<vmem>>, vector<1x31x128xbf16>,
    }
    %c31_i32_3 = arith.constant 31 : i32
    %c0_4 = arith.constant 0 : index
    %c0_5 = arith.constant 0 : index
    %4 = vector.load %arg4[%c0_4, %c0_5] : memref<1x128xf32, #tpu.memory_space<vmem>>, vector<1x128xf32>
    %cst = arith.constant 0.000000e+00 : f32
    %5 = vector.broadcast %cst : f32 to vector<1x128xf32>
    %c0_i32_6 = arith.constant 0 : i32
    %c25_i32_7 = arith.constant 25 : i32
    %6 = arith.addi %c0_i32_6, %c25_i32_7 : i32
    %c1_i32_8 = arith.constant 1 : i32
    %7:2 = scf.for %arg11 = %c0_i32_6 to %6 step %c1_i32_8 iter_args(%arg12 = %5, %arg13 = %5) -> (vector<1x128xf32>, vector<1x128xf32>)  : i32 {
      %14 = arith.addi %0, %arg11 : i32
      %cst_18 = arith.constant 0.000000e+00 : f32
      %15 = vector.broadcast %cst_18 : f32 to vector<25x128xf32>
      %c0_i32_19 = arith.constant 0 : i32
      %c7_i32 = arith.constant 7 : i32
      %16 = arith.addi %c0_i32_19, %c7_i32 : i32
      %c1_i32_20 = arith.constant 1 : i32
      %17 = scf.for %arg14 = %c0_i32_19 to %16 step %c1_i32_20 iter_args(%arg15 = %15) -> (vector<25x128xf32>)  : i32 {
        %33 = arith.addi %14, %arg14 : i32
        %34 = arith.subi %33, %0 : i32
        %35 = arith.index_cast %34 : i32 to index
        %c0_27 = arith.constant 0 : index
        %c0_28 = arith.constant 0 : index
        %36 = vector.load %arg10[%35, %c0_27, %c0_28] : memref<31x31x128xbf16, #tpu.memory_space<vmem>>, vector<1x25x128xbf16>
        %37 = vector.shape_cast %36 : vector<1x25x128xbf16> to vector<25x128xbf16>
        %c7_i32_29 = arith.constant 7 : i32
        %38 = arith.muli %arg14, %c7_i32_29 : i32
        %c0_i32_30 = arith.constant 0 : i32
        %39 = arith.addi %38, %c0_i32_30 : i32
        %40 = arith.index_cast %39 : i32 to index
        %c0_31 = arith.constant 0 : index
        %c0_32 = arith.constant 0 : index
        %41 = vector.load %arg3[%40, %c0_31, %c0_32] : memref<49x128x128xbf16, #tpu.memory_space<vmem>>, vector<1x128x128xbf16>
        %42 = vector.shape_cast %41 : vector<1x128x128xbf16> to vector<128x128xbf16>
        %cst_33 = arith.constant dense<0.000000e+00> : vector<25x128xf32>
        %43 = tpu.matmul %37, %42, %cst_33 {dimension_numbers = #tpu.dot_dimension_numbers<[1], [0], [0], [1], [0, 0, 1, 1], [], []>} : vector<25x128xbf16>, vector<128x128xbf16>, vector<25x128xf32> -> vector<25x128xf32>
        %44 = arith.addf %arg15, %43 : vector<25x128xf32>
        %45 = arith.addi %14, %arg14 : i32
        %46 = arith.subi %45, %0 : i32
        %47 = arith.index_cast %46 : i32 to index
        %c1 = arith.constant 1 : index
        %c0_34 = arith.constant 0 : index
        %48 = vector.load %arg10[%47, %c1, %c0_34] : memref<31x31x128xbf16, #tpu.memory_space<vmem>>, vector<1x25x128xbf16>
        %49 = vector.shape_cast %48 : vector<1x25x128xbf16> to vector<25x128xbf16>
        %c7_i32_35 = arith.constant 7 : i32
        %50 = arith.muli %arg14, %c7_i32_35 : i32
        %c1_i32_36 = arith.constant 1 : i32
        %51 = arith.addi %50, %c1_i32_36 : i32
        %52 = arith.index_cast %51 : i32 to index
        %c0_37 = arith.constant 0 : index
        %c0_38 = arith.constant 0 : index
        %53 = vector.load %arg3[%52, %c0_37, %c0_38] : memref<49x128x128xbf16, #tpu.memory_space<vmem>>, vector<1x128x128xbf16>
        %54 = vector.shape_cast %53 : vector<1x128x128xbf16> to vector<128x128xbf16>
        %cst_39 = arith.constant dense<0.000000e+00> : vector<25x128xf32>
        %55 = tpu.matmul %49, %54, %cst_39 {dimension_numbers = #tpu.dot_dimension_numbers<[1], [0], [0], [1], [0, 0, 1, 1], [], []>} : vector<25x128xbf16>, vector<128x128xbf16>, vector<25x128xf32> -> vector<25x128xf32>
        %56 = arith.addf %44, %55 : vector<25x128xf32>
        %57 = arith.addi %14, %arg14 : i32
        %58 = arith.subi %57, %0 : i32
        %59 = arith.index_cast %58 : i32 to index
        %c2 = arith.constant 2 : index
        %c0_40 = arith.constant 0 : index
        %60 = vector.load %arg10[%59, %c2, %c0_40] : memref<31x31x128xbf16, #tpu.memory_space<vmem>>, vector<1x25x128xbf16>
        %61 = vector.shape_cast %60 : vector<1x25x128xbf16> to vector<25x128xbf16>
        %c7_i32_41 = arith.constant 7 : i32
        %62 = arith.muli %arg14, %c7_i32_41 : i32
        %c2_i32 = arith.constant 2 : i32
        %63 = arith.addi %62, %c2_i32 : i32
        %64 = arith.index_cast %63 : i32 to index
        %c0_42 = arith.constant 0 : index
        %c0_43 = arith.constant 0 : index
        %65 = vector.load %arg3[%64, %c0_42, %c0_43] : memref<49x128x128xbf16, #tpu.memory_space<vmem>>, vector<1x128x128xbf16>
        %66 = vector.shape_cast %65 : vector<1x128x128xbf16> to vector<128x128xbf16>
        %cst_44 = arith.constant dense<0.000000e+00> : vector<25x128xf32>
        %67 = tpu.matmul %61, %66, %cst_44 {dimension_numbers = #tpu.dot_dimension_numbers<[1], [0], [0], [1], [0, 0, 1, 1], [], []>} : vector<25x128xbf16>, vector<128x128xbf16>, vector<25x128xf32> -> vector<25x128xf32>
        %68 = arith.addf %56, %67 : vector<25x128xf32>
        %69 = arith.addi %14, %arg14 : i32
        %70 = arith.subi %69, %0 : i32
        %71 = arith.index_cast %70 : i32 to index
        %c3 = arith.constant 3 : index
        %c0_45 = arith.constant 0 : index
        %72 = vector.load %arg10[%71, %c3, %c0_45] : memref<31x31x128xbf16, #tpu.memory_space<vmem>>, vector<1x25x128xbf16>
        %73 = vector.shape_cast %72 : vector<1x25x128xbf16> to vector<25x128xbf16>
        %c7_i32_46 = arith.constant 7 : i32
        %74 = arith.muli %arg14, %c7_i32_46 : i32
        %c3_i32 = arith.constant 3 : i32
        %75 = arith.addi %74, %c3_i32 : i32
        %76 = arith.index_cast %75 : i32 to index
        %c0_47 = arith.constant 0 : index
        %c0_48 = arith.constant 0 : index
        %77 = vector.load %arg3[%76, %c0_47, %c0_48] : memref<49x128x128xbf16, #tpu.memory_space<vmem>>, vector<1x128x128xbf16>
        %78 = vector.shape_cast %77 : vector<1x128x128xbf16> to vector<128x128xbf16>
        %cst_49 = arith.constant dense<0.000000e+00> : vector<25x128xf32>
        %79 = tpu.matmul %73, %78, %cst_49 {dimension_numbers = #tpu.dot_dimension_numbers<[1], [0], [0], [1], [0, 0, 1, 1], [], []>} : vector<25x128xbf16>, vector<128x128xbf16>, vector<25x128xf32> -> vector<25x128xf32>
        %80 = arith.addf %68, %79 : vector<25x128xf32>
        %81 = arith.addi %14, %arg14 : i32
        %82 = arith.subi %81, %0 : i32
        %83 = arith.index_cast %82 : i32 to index
        %c4 = arith.constant 4 : index
        %c0_50 = arith.constant 0 : index
        %84 = vector.load %arg10[%83, %c4, %c0_50] : memref<31x31x128xbf16, #tpu.memory_space<vmem>>, vector<1x25x128xbf16>
        %85 = vector.shape_cast %84 : vector<1x25x128xbf16> to vector<25x128xbf16>
        %c7_i32_51 = arith.constant 7 : i32
        %86 = arith.muli %arg14, %c7_i32_51 : i32
        %c4_i32 = arith.constant 4 : i32
        %87 = arith.addi %86, %c4_i32 : i32
        %88 = arith.index_cast %87 : i32 to index
        %c0_52 = arith.constant 0 : index
        %c0_53 = arith.constant 0 : index
        %89 = vector.load %arg3[%88, %c0_52, %c0_53] : memref<49x128x128xbf16, #tpu.memory_space<vmem>>, vector<1x128x128xbf16>
        %90 = vector.shape_cast %89 : vector<1x128x128xbf16> to vector<128x128xbf16>
        %cst_54 = arith.constant dense<0.000000e+00> : vector<25x128xf32>
        %91 = tpu.matmul %85, %90, %cst_54 {dimension_numbers = #tpu.dot_dimension_numbers<[1], [0], [0], [1], [0, 0, 1, 1], [], []>} : vector<25x128xbf16>, vector<128x128xbf16>, vector<25x128xf32> -> vector<25x128xf32>
        %92 = arith.addf %80, %91 : vector<25x128xf32>
        %93 = arith.addi %14, %arg14 : i32
        %94 = arith.subi %93, %0 : i32
        %95 = arith.index_cast %94 : i32 to index
        %c5 = arith.constant 5 : index
        %c0_55 = arith.constant 0 : index
        %96 = vector.load %arg10[%95, %c5, %c0_55] : memref<31x31x128xbf16, #tpu.memory_space<vmem>>, vector<1x25x128xbf16>
        %97 = vector.shape_cast %96 : vector<1x25x128xbf16> to vector<25x128xbf16>
        %c7_i32_56 = arith.constant 7 : i32
        %98 = arith.muli %arg14, %c7_i32_56 : i32
        %c5_i32 = arith.constant 5 : i32
        %99 = arith.addi %98, %c5_i32 : i32
        %100 = arith.index_cast %99 : i32 to index
        %c0_57 = arith.constant 0 : index
        %c0_58 = arith.constant 0 : index
        %101 = vector.load %arg3[%100, %c0_57, %c0_58] : memref<49x128x128xbf16, #tpu.memory_space<vmem>>, vector<1x128x128xbf16>
        %102 = vector.shape_cast %101 : vector<1x128x128xbf16> to vector<128x128xbf16>
        %cst_59 = arith.constant dense<0.000000e+00> : vector<25x128xf32>
        %103 = tpu.matmul %97, %102, %cst_59 {dimension_numbers = #tpu.dot_dimension_numbers<[1], [0], [0], [1], [0, 0, 1, 1], [], []>} : vector<25x128xbf16>, vector<128x128xbf16>, vector<25x128xf32> -> vector<25x128xf32>
        %104 = arith.addf %92, %103 : vector<25x128xf32>
        %105 = arith.addi %14, %arg14 : i32
        %106 = arith.subi %105, %0 : i32
        %107 = arith.index_cast %106 : i32 to index
        %c6 = arith.constant 6 : index
        %c0_60 = arith.constant 0 : index
        %108 = vector.load %arg10[%107, %c6, %c0_60] : memref<31x31x128xbf16, #tpu.memory_space<vmem>>, vector<1x25x128xbf16>
        %109 = vector.shape_cast %108 : vector<1x25x128xbf16> to vector<25x128xbf16>
        %c7_i32_61 = arith.constant 7 : i32
        %110 = arith.muli %arg14, %c7_i32_61 : i32
        %c6_i32 = arith.constant 6 : i32
        %111 = arith.addi %110, %c6_i32 : i32
        %112 = arith.index_cast %111 : i32 to index
        %c0_62 = arith.constant 0 : index
        %c0_63 = arith.constant 0 : index
        %113 = vector.load %arg3[%112, %c0_62, %c0_63] : memref<49x128x128xbf16, #tpu.memory_space<vmem>>, vector<1x128x128xbf16>
        %114 = vector.shape_cast %113 : vector<1x128x128xbf16> to vector<128x128xbf16>
        %cst_64 = arith.constant dense<0.000000e+00> : vector<25x128xf32>
        %115 = tpu.matmul %109, %114, %cst_64 {dimension_numbers = #tpu.dot_dimension_numbers<[1], [0], [0], [1], [0, 0, 1, 1], [], []>} : vector<25x128xbf16>, vector<128x128xbf16>, vector<25x128xf32> -> vector<25x128xf32>
        %116 = arith.addf %104, %115 : vector<25x128xf32>
        scf.yield %116 : vector<25x128xf32>
      }
      %c7_i32_21 = arith.constant 7 : i32
      %18 = vector.broadcast %4 : vector<1x128xf32> to vector<25x128xf32>
      %19 = arith.addf %17, %18 : vector<25x128xf32>
      %20 = vector.shape_cast %19 : vector<25x128xf32> to vector<1x25x128xf32>
      %21 = arith.truncf %20 : vector<1x25x128xf32> to vector<1x25x128xbf16>
      %c0_22 = arith.constant 0 : index
      %22 = arith.index_cast %arg11 : i32 to index
      %c0_23 = arith.constant 0 : index
      %c0_24 = arith.constant 0 : index
      %23 = vector.load %arg7[%c0_22, %22, %c0_23, %c0_24] : memref<1x25x25x128xbf16, #tpu.memory_space<vmem>>, vector<1x1x25x128xbf16>
      %24 = vector.shape_cast %23 : vector<1x1x25x128xbf16> to vector<1x25x128xbf16>
      %25 = vector.shape_cast %21 : vector<1x25x128xbf16> to vector<1x1x25x128xbf16>
      tpu.vector_store %arg7[%c0_22, %22, %c0_23, %c0_24], %25 {strides = array<i32>} : memref<1x25x25x128xbf16, #tpu.memory_space<vmem>>, vector<1x1x25x128xbf16>,
      %cst_25 = arith.constant dense<0.000000e+00> : vector<128xf32>
      %26 = vector.multi_reduction <add>, %19, %cst_25 [0] : vector<25x128xf32> to vector<128xf32>
      %27 = vector.shape_cast %26 : vector<128xf32> to vector<1x128xf32>
      %28 = arith.addf %arg12, %27 : vector<1x128xf32>
      %29 = arith.mulf %19, %19 : vector<25x128xf32>
      %cst_26 = arith.constant dense<0.000000e+00> : vector<128xf32>
      %30 = vector.multi_reduction <add>, %29, %cst_26 [0] : vector<25x128xf32> to vector<128xf32>
      %31 = vector.shape_cast %30 : vector<128xf32> to vector<1x128xf32>
      %32 = arith.addf %arg13, %31 : vector<1x128xf32>
      scf.yield %28, %32 : vector<1x128xf32>, vector<1x128xf32>
    }
    %c25_i32_9 = arith.constant 25 : i32
    %c0_10 = arith.constant 0 : index
    %c0_11 = arith.constant 0 : index
    %c0_12 = arith.constant 0 : index
    %c0_13 = arith.constant 0 : index
    %8 = vector.load %arg8[%c0_10, %c0_11, %c0_12, %c0_13] : memref<1x1x1x128xf32, #tpu.memory_space<vmem>>, vector<1x1x1x128xf32>
    %9 = vector.shape_cast %8 : vector<1x1x1x128xf32> to vector<1x128xf32>
    %10 = vector.shape_cast %7#0 : vector<1x128xf32> to vector<1x1x1x128xf32>
    tpu.vector_store %arg8[%c0_10, %c0_11, %c0_12, %c0_13], %10 {strides = array<i32>} : memref<1x1x1x128xf32, #tpu.memory_space<vmem>>, vector<1x1x1x128xf32>,
    %c0_14 = arith.constant 0 : index
    %c0_15 = arith.constant 0 : index
    %c0_16 = arith.constant 0 : index
    %c0_17 = arith.constant 0 : index
    %11 = vector.load %arg9[%c0_14, %c0_15, %c0_16, %c0_17] : memref<1x1x1x128xf32, #tpu.memory_space<vmem>>, vector<1x1x1x128xf32>
    %12 = vector.shape_cast %11 : vector<1x1x1x128xf32> to vector<1x128xf32>
    %13 = vector.shape_cast %7#1 : vector<1x128xf32> to vector<1x1x1x128xf32>
    tpu.vector_store %arg9[%c0_14, %c0_15, %c0_16, %c0_17], %13 {strides = array<i32>} : memref<1x1x1x128xf32, #tpu.memory_space<vmem>>, vector<1x1x1x128xf32>,
    return
  }
  func.func @transform_0(%arg0: i32, %arg1: i32) -> (i32, i32, i32, i32) {
    %c0_i32 = arith.constant 0 : i32
    %c0_i32_0 = arith.constant 0 : i32
    %c0_i32_1 = arith.constant 0 : i32
    %c0_i32_2 = arith.constant 0 : i32
    return %arg0, %c0_i32, %c0_i32_0, %c0_i32_1 : i32, i32, i32, i32
  }
  func.func @transform_1(%arg0: i32, %arg1: i32) -> (i32, i32, i32) {
    %c0_i32 = arith.constant 0 : i32
    %c0_i32_0 = arith.constant 0 : i32
    %c0_i32_1 = arith.constant 0 : i32
    %c0_i32_2 = arith.constant 0 : i32
    return %c0_i32, %c0_i32_0, %c0_i32_1 : i32, i32, i32
  }
  func.func @transform_2(%arg0: i32, %arg1: i32) -> (i32, i32) {
    %c0_i32 = arith.constant 0 : i32
    %c0_i32_0 = arith.constant 0 : i32
    %c0_i32_1 = arith.constant 0 : i32
    return %c0_i32, %c0_i32_0 : i32, i32
  }
  func.func @transform_3(%arg0: i32, %arg1: i32) -> (i32, i32) {
    %c0_i32 = arith.constant 0 : i32
    %c0_i32_0 = arith.constant 0 : i32
    %c0_i32_1 = arith.constant 0 : i32
    return %c0_i32, %c0_i32_0 : i32, i32
  }
  func.func @transform_4(%arg0: i32, %arg1: i32) -> (i32, i32) {
    %c0_i32 = arith.constant 0 : i32
    %c0_i32_0 = arith.constant 0 : i32
    %c0_i32_1 = arith.constant 0 : i32
    return %c0_i32, %c0_i32_0 : i32, i32
  }
  func.func @transform_5(%arg0: i32, %arg1: i32) -> (i32, i32, i32, i32) {
    %c0_i32 = arith.constant 0 : i32
    %c0_i32_0 = arith.constant 0 : i32
    %c0_i32_1 = arith.constant 0 : i32
    return %arg0, %arg1, %c0_i32, %c0_i32_0 : i32, i32, i32, i32
  }
  func.func @transform_6(%arg0: i32, %arg1: i32) -> (i32, i32, i32, i32) {
    %c0_i32 = arith.constant 0 : i32
    %c0_i32_0 = arith.constant 0 : i32
    %c0_i32_1 = arith.constant 0 : i32
    return %arg0, %arg1, %c0_i32, %c0_i32_0 : i32, i32, i32, i32
  }
  func.func @transform_7(%arg0: i32, %arg1: i32) -> (i32, i32, i32, i32) {
    %c0_i32 = arith.constant 0 : i32
    %c0_i32_0 = arith.constant 0 : i32
    %c0_i32_1 = arith.constant 0 : i32
    return %arg0, %arg1, %c0_i32, %c0_i32_0 : i32, i32, i32, i32
  }
}

module attributes {stable_mosaic.version = 11 : i64} {
  func.func @_pool_kernel(%arg0: i32, %arg1: memref<1x25x25x128xbf16, #tpu.memory_space<vmem>>, %arg2: memref<1x128xf32, #tpu.memory_space<vmem>>, %arg3: memref<1x128xf32, #tpu.memory_space<vmem>>, %arg4: memref<1x8x8x128xbf16, #tpu.memory_space<vmem>>) attributes {dimension_semantics = [#tpu.dimension_semantics<parallel>], iteration_bounds = array<i64: 2>, scalar_prefetch = 0 : i64, scratch_operands = 0 : i64, tpu.core_type = #tpu.core_type<tc>, window_params = [{transform_indices = @transform_0, window_bounds = array<i64: 1, 25, 25, 128>}, {pipeline_mode = #tpu.pipeline_mode<synchronous>, transform_indices = @transform_1, window_bounds = array<i64: 1, 128>}, {pipeline_mode = #tpu.pipeline_mode<synchronous>, transform_indices = @transform_2, window_bounds = array<i64: 1, 128>}, {transform_indices = @transform_3, window_bounds = array<i64: 1, 8, 8, 128>}]} {
    %c0 = arith.constant 0 : index
    %c0_0 = arith.constant 0 : index
    %0 = vector.load %arg2[%c0, %c0_0] : memref<1x128xf32, #tpu.memory_space<vmem>>, vector<1x128xf32>
    %c0_1 = arith.constant 0 : index
    %c0_2 = arith.constant 0 : index
    %1 = vector.load %arg3[%c0_1, %c0_2] : memref<1x128xf32, #tpu.memory_space<vmem>>, vector<1x128xf32>
    %2 = tpu.iota {dimensions = array<i32: 0>} : vector<8x22xi32>
    %3 = tpu.iota {dimensions = array<i32: 1>} : vector<8x22xi32>
    %c3_i32 = arith.constant 3 : i32
    %4 = vector.broadcast %c3_i32 : i32 to vector<8x22xi32>
    %5 = arith.muli %4, %2 : vector<8x22xi32>
    %6 = arith.cmpi eq, %3, %5 : vector<8x22xi32>
    %7 = arith.extui %6 : vector<8x22xi1> to vector<8x22xi32>
    %8 = arith.sitofp %7 : vector<8x22xi32> to vector<8x22xf32>
    %9 = arith.truncf %8 : vector<8x22xf32> to vector<8x22xbf16>
    %c0_i32 = arith.constant 0 : i32
    %c8_i32 = arith.constant 8 : i32
    %10 = arith.addi %c0_i32, %c8_i32 : i32
    %c1_i32 = arith.constant 1 : i32
    scf.for %arg5 = %c0_i32 to %10 step %c1_i32  : i32 {
      %c3_i32_4 = arith.constant 3 : i32
      %11 = arith.muli %c3_i32_4, %arg5 : i32
      %c0_5 = arith.constant 0 : index
      %12 = arith.index_cast %11 : i32 to index
      %c0_6 = arith.constant 0 : index
      %c0_7 = arith.constant 0 : index
      %13 = vector.load %arg1[%c0_5, %12, %c0_6, %c0_7] : memref<1x25x25x128xbf16, #tpu.memory_space<vmem>>, vector<1x3x25x128xbf16>
      %14 = vector.shape_cast %13 : vector<1x3x25x128xbf16> to vector<3x25x128xbf16>
      %15 = arith.extf %14 : vector<3x25x128xbf16> to vector<3x25x128xf32>
      %16 = vector.shape_cast %0 : vector<1x128xf32> to vector<1x1x128xf32>
      %17 = vector.broadcast %16 : vector<1x1x128xf32> to vector<3x25x128xf32>
      %18 = arith.mulf %15, %17 : vector<3x25x128xf32>
      %19 = vector.shape_cast %1 : vector<1x128xf32> to vector<1x1x128xf32>
      %20 = vector.broadcast %19 : vector<1x1x128xf32> to vector<3x25x128xf32>
      %21 = arith.addf %18, %20 : vector<3x25x128xf32>
      %cst = arith.constant 0.000000e+00 : f32
      %22 = vector.broadcast %cst : f32 to vector<3x25x128xf32>
      %23 = arith.maximumf %21, %22 : vector<3x25x128xf32>
      %cst_8 = arith.constant dense<0xFF800000> : vector<25x128xf32>
      %24 = vector.multi_reduction <maximumf>, %23, %cst_8 [0] : vector<3x25x128xf32> to vector<25x128xf32>
      %25 = vector.extract_strided_slice %24 {offsets = [0, 0], sizes = [22, 128], strides = [1, 1]} : vector<25x128xf32> to vector<22x128xf32>
      %26 = vector.extract_strided_slice %24 {offsets = [1, 0], sizes = [22, 128], strides = [1, 1]} : vector<25x128xf32> to vector<22x128xf32>
      %27 = arith.maximumf %25, %26 : vector<22x128xf32>
      %28 = vector.extract_strided_slice %24 {offsets = [2, 0], sizes = [22, 128], strides = [1, 1]} : vector<25x128xf32> to vector<22x128xf32>
      %29 = arith.maximumf %27, %28 : vector<22x128xf32>
      %30 = arith.truncf %29 : vector<22x128xf32> to vector<22x128xbf16>
      %cst_9 = arith.constant dense<0.000000e+00> : vector<8x128xf32>
      %31 = tpu.matmul %9, %30, %cst_9 {dimension_numbers = #tpu.dot_dimension_numbers<[1], [0], [0], [1], [0, 0, 1, 1], [], []>} : vector<8x22xbf16>, vector<22x128xbf16>, vector<8x128xf32> -> vector<8x128xf32>
      %32 = vector.shape_cast %31 : vector<8x128xf32> to vector<1x8x128xf32>
      %33 = arith.truncf %32 : vector<1x8x128xf32> to vector<1x8x128xbf16>
      %c0_10 = arith.constant 0 : index
      %34 = arith.index_cast %arg5 : i32 to index
      %c0_11 = arith.constant 0 : index
      %c0_12 = arith.constant 0 : index
      %35 = vector.load %arg4[%c0_10, %34, %c0_11, %c0_12] : memref<1x8x8x128xbf16, #tpu.memory_space<vmem>>, vector<1x1x8x128xbf16>
      %36 = vector.shape_cast %35 : vector<1x1x8x128xbf16> to vector<1x8x128xbf16>
      %37 = vector.shape_cast %33 : vector<1x8x128xbf16> to vector<1x1x8x128xbf16>
      tpu.vector_store %arg4[%c0_10, %34, %c0_11, %c0_12], %37 {strides = array<i32>} : memref<1x8x8x128xbf16, #tpu.memory_space<vmem>>, vector<1x1x8x128xbf16>,
    }
    %c8_i32_3 = arith.constant 8 : i32
    return
  }
  func.func @transform_0(%arg0: i32) -> (i32, i32, i32, i32) {
    %c0_i32 = arith.constant 0 : i32
    %c0_i32_0 = arith.constant 0 : i32
    %c0_i32_1 = arith.constant 0 : i32
    %c0_i32_2 = arith.constant 0 : i32
    return %arg0, %c0_i32, %c0_i32_0, %c0_i32_1 : i32, i32, i32, i32
  }
  func.func @transform_1(%arg0: i32) -> (i32, i32) {
    %c0_i32 = arith.constant 0 : i32
    %c0_i32_0 = arith.constant 0 : i32
    %c0_i32_1 = arith.constant 0 : i32
    return %c0_i32, %c0_i32_0 : i32, i32
  }
  func.func @transform_2(%arg0: i32) -> (i32, i32) {
    %c0_i32 = arith.constant 0 : i32
    %c0_i32_0 = arith.constant 0 : i32
    %c0_i32_1 = arith.constant 0 : i32
    return %c0_i32, %c0_i32_0 : i32, i32
  }
  func.func @transform_3(%arg0: i32) -> (i32, i32, i32, i32) {
    %c0_i32 = arith.constant 0 : i32
    %c0_i32_0 = arith.constant 0 : i32
    %c0_i32_1 = arith.constant 0 : i32
    %c0_i32_2 = arith.constant 0 : i32
    return %arg0, %c0_i32, %c0_i32_0, %c0_i32_1 : i32, i32, i32, i32
  }
}

module attributes {stable_mosaic.version = 11 : i64} {
  func.func @_conv_kernel(%arg0: i32, %arg1: i32, %arg2: memref<1x8x8x128xbf16, #tpu.memory_space<vmem>>, %arg3: memref<36x128x128xbf16, #tpu.memory_space<vmem>>, %arg4: memref<1x128xf32, #tpu.memory_space<vmem>>, %arg5: memref<1x128xf32, #tpu.memory_space<vmem>>, %arg6: memref<1x128xf32, #tpu.memory_space<vmem>>, %arg7: memref<1x3x3x128xbf16, #tpu.memory_space<vmem>>, %arg8: memref<1x1x1x128xf32, #tpu.memory_space<vmem>>, %arg9: memref<1x1x1x128xf32, #tpu.memory_space<vmem>>) attributes {dimension_semantics = [#tpu.dimension_semantics<parallel>, #tpu.dimension_semantics<arbitrary>], iteration_bounds = array<i64: 2, 1>, scalar_prefetch = 0 : i64, scratch_operands = 0 : i64, tpu.core_type = #tpu.core_type<tc>, window_params = [{transform_indices = @transform_0, window_bounds = array<i64: 1, 8, 8, 128>}, {pipeline_mode = #tpu.pipeline_mode<synchronous>, transform_indices = @transform_1, window_bounds = array<i64: 36, 128, 128>}, {pipeline_mode = #tpu.pipeline_mode<synchronous>, transform_indices = @transform_2, window_bounds = array<i64: 1, 128>}, {pipeline_mode = #tpu.pipeline_mode<synchronous>, transform_indices = @transform_3, window_bounds = array<i64: 1, 128>}, {pipeline_mode = #tpu.pipeline_mode<synchronous>, transform_indices = @transform_4, window_bounds = array<i64: 1, 128>}, {transform_indices = @transform_5, window_bounds = array<i64: 1, 3, 3, 128>}, {transform_indices = @transform_6, window_bounds = array<i64: 1, 1, 1, 128>}, {transform_indices = @transform_7, window_bounds = array<i64: 1, 1, 1, 128>}]} {
    %c3_i32 = arith.constant 3 : i32
    %0 = arith.muli %arg1, %c3_i32 : i32
    %c0 = arith.constant 0 : index
    %c0_0 = arith.constant 0 : index
    %1 = vector.load %arg4[%c0, %c0_0] : memref<1x128xf32, #tpu.memory_space<vmem>>, vector<1x128xf32>
    %cst = arith.constant 0.000000e+00 : f32
    %2 = vector.broadcast %cst : f32 to vector<1x128xf32>
    %c0_i32 = arith.constant 0 : i32
    %c3_i32_1 = arith.constant 3 : i32
    %3 = arith.addi %c0_i32, %c3_i32_1 : i32
    %c1_i32 = arith.constant 1 : i32
    %4:2 = scf.for %arg10 = %c0_i32 to %3 step %c1_i32 iter_args(%arg11 = %2, %arg12 = %2) -> (vector<1x128xf32>, vector<1x128xf32>)  : i32 {
      %11 = arith.addi %0, %arg10 : i32
      %cst_11 = arith.constant 0.000000e+00 : f32
      %12 = vector.broadcast %cst_11 : f32 to vector<3x128xf32>
      %c0_i32_12 = arith.constant 0 : i32
      %c6_i32 = arith.constant 6 : i32
      %13 = arith.addi %c0_i32_12, %c6_i32 : i32
      %c1_i32_13 = arith.constant 1 : i32
      %14 = scf.for %arg13 = %c0_i32_12 to %13 step %c1_i32_13 iter_args(%arg14 = %12) -> (vector<3x128xf32>)  : i32 {
        %30 = arith.addi %11, %arg13 : i32
        %c0_20 = arith.constant 0 : index
        %31 = arith.index_cast %30 : i32 to index
        %c0_21 = arith.constant 0 : index
        %c0_22 = arith.constant 0 : index
        %32 = vector.load %arg2[%c0_20, %31, %c0_21, %c0_22] : memref<1x8x8x128xbf16, #tpu.memory_space<vmem>>, vector<1x1x3x128xbf16>
        %33 = vector.shape_cast %32 : vector<1x1x3x128xbf16> to vector<1x3x128xbf16>
        %34 = vector.shape_cast %33 : vector<1x3x128xbf16> to vector<3x128xbf16>
        %c6_i32_23 = arith.constant 6 : i32
        %35 = arith.muli %arg13, %c6_i32_23 : i32
        %c0_i32_24 = arith.constant 0 : i32
        %36 = arith.addi %35, %c0_i32_24 : i32
        %37 = arith.index_cast %36 : i32 to index
        %c0_25 = arith.constant 0 : index
        %c0_26 = arith.constant 0 : index
        %38 = vector.load %arg3[%37, %c0_25, %c0_26] : memref<36x128x128xbf16, #tpu.memory_space<vmem>>, vector<1x128x128xbf16>
        %39 = vector.shape_cast %38 : vector<1x128x128xbf16> to vector<128x128xbf16>
        %cst_27 = arith.constant dense<0.000000e+00> : vector<3x128xf32>
        %40 = tpu.matmul %34, %39, %cst_27 {dimension_numbers = #tpu.dot_dimension_numbers<[1], [0], [0], [1], [0, 0, 1, 1], [], []>} : vector<3x128xbf16>, vector<128x128xbf16>, vector<3x128xf32> -> vector<3x128xf32>
        %41 = arith.addf %arg14, %40 : vector<3x128xf32>
        %42 = arith.addi %11, %arg13 : i32
        %c0_28 = arith.constant 0 : index
        %43 = arith.index_cast %42 : i32 to index
        %c1 = arith.constant 1 : index
        %c0_29 = arith.constant 0 : index
        %44 = vector.load %arg2[%c0_28, %43, %c1, %c0_29] : memref<1x8x8x128xbf16, #tpu.memory_space<vmem>>, vector<1x1x3x128xbf16>
        %45 = vector.shape_cast %44 : vector<1x1x3x128xbf16> to vector<1x3x128xbf16>
        %46 = vector.shape_cast %45 : vector<1x3x128xbf16> to vector<3x128xbf16>
        %c6_i32_30 = arith.constant 6 : i32
        %47 = arith.muli %arg13, %c6_i32_30 : i32
        %c1_i32_31 = arith.constant 1 : i32
        %48 = arith.addi %47, %c1_i32_31 : i32
        %49 = arith.index_cast %48 : i32 to index
        %c0_32 = arith.constant 0 : index
        %c0_33 = arith.constant 0 : index
        %50 = vector.load %arg3[%49, %c0_32, %c0_33] : memref<36x128x128xbf16, #tpu.memory_space<vmem>>, vector<1x128x128xbf16>
        %51 = vector.shape_cast %50 : vector<1x128x128xbf16> to vector<128x128xbf16>
        %cst_34 = arith.constant dense<0.000000e+00> : vector<3x128xf32>
        %52 = tpu.matmul %46, %51, %cst_34 {dimension_numbers = #tpu.dot_dimension_numbers<[1], [0], [0], [1], [0, 0, 1, 1], [], []>} : vector<3x128xbf16>, vector<128x128xbf16>, vector<3x128xf32> -> vector<3x128xf32>
        %53 = arith.addf %41, %52 : vector<3x128xf32>
        %54 = arith.addi %11, %arg13 : i32
        %c0_35 = arith.constant 0 : index
        %55 = arith.index_cast %54 : i32 to index
        %c2 = arith.constant 2 : index
        %c0_36 = arith.constant 0 : index
        %56 = vector.load %arg2[%c0_35, %55, %c2, %c0_36] : memref<1x8x8x128xbf16, #tpu.memory_space<vmem>>, vector<1x1x3x128xbf16>
        %57 = vector.shape_cast %56 : vector<1x1x3x128xbf16> to vector<1x3x128xbf16>
        %58 = vector.shape_cast %57 : vector<1x3x128xbf16> to vector<3x128xbf16>
        %c6_i32_37 = arith.constant 6 : i32
        %59 = arith.muli %arg13, %c6_i32_37 : i32
        %c2_i32 = arith.constant 2 : i32
        %60 = arith.addi %59, %c2_i32 : i32
        %61 = arith.index_cast %60 : i32 to index
        %c0_38 = arith.constant 0 : index
        %c0_39 = arith.constant 0 : index
        %62 = vector.load %arg3[%61, %c0_38, %c0_39] : memref<36x128x128xbf16, #tpu.memory_space<vmem>>, vector<1x128x128xbf16>
        %63 = vector.shape_cast %62 : vector<1x128x128xbf16> to vector<128x128xbf16>
        %cst_40 = arith.constant dense<0.000000e+00> : vector<3x128xf32>
        %64 = tpu.matmul %58, %63, %cst_40 {dimension_numbers = #tpu.dot_dimension_numbers<[1], [0], [0], [1], [0, 0, 1, 1], [], []>} : vector<3x128xbf16>, vector<128x128xbf16>, vector<3x128xf32> -> vector<3x128xf32>
        %65 = arith.addf %53, %64 : vector<3x128xf32>
        %66 = arith.addi %11, %arg13 : i32
        %c0_41 = arith.constant 0 : index
        %67 = arith.index_cast %66 : i32 to index
        %c3 = arith.constant 3 : index
        %c0_42 = arith.constant 0 : index
        %68 = vector.load %arg2[%c0_41, %67, %c3, %c0_42] : memref<1x8x8x128xbf16, #tpu.memory_space<vmem>>, vector<1x1x3x128xbf16>
        %69 = vector.shape_cast %68 : vector<1x1x3x128xbf16> to vector<1x3x128xbf16>
        %70 = vector.shape_cast %69 : vector<1x3x128xbf16> to vector<3x128xbf16>
        %c6_i32_43 = arith.constant 6 : i32
        %71 = arith.muli %arg13, %c6_i32_43 : i32
        %c3_i32_44 = arith.constant 3 : i32
        %72 = arith.addi %71, %c3_i32_44 : i32
        %73 = arith.index_cast %72 : i32 to index
        %c0_45 = arith.constant 0 : index
        %c0_46 = arith.constant 0 : index
        %74 = vector.load %arg3[%73, %c0_45, %c0_46] : memref<36x128x128xbf16, #tpu.memory_space<vmem>>, vector<1x128x128xbf16>
        %75 = vector.shape_cast %74 : vector<1x128x128xbf16> to vector<128x128xbf16>
        %cst_47 = arith.constant dense<0.000000e+00> : vector<3x128xf32>
        %76 = tpu.matmul %70, %75, %cst_47 {dimension_numbers = #tpu.dot_dimension_numbers<[1], [0], [0], [1], [0, 0, 1, 1], [], []>} : vector<3x128xbf16>, vector<128x128xbf16>, vector<3x128xf32> -> vector<3x128xf32>
        %77 = arith.addf %65, %76 : vector<3x128xf32>
        %78 = arith.addi %11, %arg13 : i32
        %c0_48 = arith.constant 0 : index
        %79 = arith.index_cast %78 : i32 to index
        %c4 = arith.constant 4 : index
        %c0_49 = arith.constant 0 : index
        %80 = vector.load %arg2[%c0_48, %79, %c4, %c0_49] : memref<1x8x8x128xbf16, #tpu.memory_space<vmem>>, vector<1x1x3x128xbf16>
        %81 = vector.shape_cast %80 : vector<1x1x3x128xbf16> to vector<1x3x128xbf16>
        %82 = vector.shape_cast %81 : vector<1x3x128xbf16> to vector<3x128xbf16>
        %c6_i32_50 = arith.constant 6 : i32
        %83 = arith.muli %arg13, %c6_i32_50 : i32
        %c4_i32 = arith.constant 4 : i32
        %84 = arith.addi %83, %c4_i32 : i32
        %85 = arith.index_cast %84 : i32 to index
        %c0_51 = arith.constant 0 : index
        %c0_52 = arith.constant 0 : index
        %86 = vector.load %arg3[%85, %c0_51, %c0_52] : memref<36x128x128xbf16, #tpu.memory_space<vmem>>, vector<1x128x128xbf16>
        %87 = vector.shape_cast %86 : vector<1x128x128xbf16> to vector<128x128xbf16>
        %cst_53 = arith.constant dense<0.000000e+00> : vector<3x128xf32>
        %88 = tpu.matmul %82, %87, %cst_53 {dimension_numbers = #tpu.dot_dimension_numbers<[1], [0], [0], [1], [0, 0, 1, 1], [], []>} : vector<3x128xbf16>, vector<128x128xbf16>, vector<3x128xf32> -> vector<3x128xf32>
        %89 = arith.addf %77, %88 : vector<3x128xf32>
        %90 = arith.addi %11, %arg13 : i32
        %c0_54 = arith.constant 0 : index
        %91 = arith.index_cast %90 : i32 to index
        %c5 = arith.constant 5 : index
        %c0_55 = arith.constant 0 : index
        %92 = vector.load %arg2[%c0_54, %91, %c5, %c0_55] : memref<1x8x8x128xbf16, #tpu.memory_space<vmem>>, vector<1x1x3x128xbf16>
        %93 = vector.shape_cast %92 : vector<1x1x3x128xbf16> to vector<1x3x128xbf16>
        %94 = vector.shape_cast %93 : vector<1x3x128xbf16> to vector<3x128xbf16>
        %c6_i32_56 = arith.constant 6 : i32
        %95 = arith.muli %arg13, %c6_i32_56 : i32
        %c5_i32 = arith.constant 5 : i32
        %96 = arith.addi %95, %c5_i32 : i32
        %97 = arith.index_cast %96 : i32 to index
        %c0_57 = arith.constant 0 : index
        %c0_58 = arith.constant 0 : index
        %98 = vector.load %arg3[%97, %c0_57, %c0_58] : memref<36x128x128xbf16, #tpu.memory_space<vmem>>, vector<1x128x128xbf16>
        %99 = vector.shape_cast %98 : vector<1x128x128xbf16> to vector<128x128xbf16>
        %cst_59 = arith.constant dense<0.000000e+00> : vector<3x128xf32>
        %100 = tpu.matmul %94, %99, %cst_59 {dimension_numbers = #tpu.dot_dimension_numbers<[1], [0], [0], [1], [0, 0, 1, 1], [], []>} : vector<3x128xbf16>, vector<128x128xbf16>, vector<3x128xf32> -> vector<3x128xf32>
        %101 = arith.addf %89, %100 : vector<3x128xf32>
        scf.yield %101 : vector<3x128xf32>
      }
      %c6_i32_14 = arith.constant 6 : i32
      %15 = vector.broadcast %1 : vector<1x128xf32> to vector<3x128xf32>
      %16 = arith.addf %14, %15 : vector<3x128xf32>
      %17 = vector.shape_cast %16 : vector<3x128xf32> to vector<1x3x128xf32>
      %18 = arith.truncf %17 : vector<1x3x128xf32> to vector<1x3x128xbf16>
      %c0_15 = arith.constant 0 : index
      %19 = arith.index_cast %arg10 : i32 to index
      %c0_16 = arith.constant 0 : index
      %c0_17 = arith.constant 0 : index
      %20 = vector.load %arg7[%c0_15, %19, %c0_16, %c0_17] : memref<1x3x3x128xbf16, #tpu.memory_space<vmem>>, vector<1x1x3x128xbf16>
      %21 = vector.shape_cast %20 : vector<1x1x3x128xbf16> to vector<1x3x128xbf16>
      %22 = vector.shape_cast %18 : vector<1x3x128xbf16> to vector<1x1x3x128xbf16>
      tpu.vector_store %arg7[%c0_15, %19, %c0_16, %c0_17], %22 {strides = array<i32>} : memref<1x3x3x128xbf16, #tpu.memory_space<vmem>>, vector<1x1x3x128xbf16>,
      %cst_18 = arith.constant dense<0.000000e+00> : vector<128xf32>
      %23 = vector.multi_reduction <add>, %16, %cst_18 [0] : vector<3x128xf32> to vector<128xf32>
      %24 = vector.shape_cast %23 : vector<128xf32> to vector<1x128xf32>
      %25 = arith.addf %arg11, %24 : vector<1x128xf32>
      %26 = arith.mulf %16, %16 : vector<3x128xf32>
      %cst_19 = arith.constant dense<0.000000e+00> : vector<128xf32>
      %27 = vector.multi_reduction <add>, %26, %cst_19 [0] : vector<3x128xf32> to vector<128xf32>
      %28 = vector.shape_cast %27 : vector<128xf32> to vector<1x128xf32>
      %29 = arith.addf %arg12, %28 : vector<1x128xf32>
      scf.yield %25, %29 : vector<1x128xf32>, vector<1x128xf32>
    }
    %c3_i32_2 = arith.constant 3 : i32
    %c0_3 = arith.constant 0 : index
    %c0_4 = arith.constant 0 : index
    %c0_5 = arith.constant 0 : index
    %c0_6 = arith.constant 0 : index
    %5 = vector.load %arg8[%c0_3, %c0_4, %c0_5, %c0_6] : memref<1x1x1x128xf32, #tpu.memory_space<vmem>>, vector<1x1x1x128xf32>
    %6 = vector.shape_cast %5 : vector<1x1x1x128xf32> to vector<1x128xf32>
    %7 = vector.shape_cast %4#0 : vector<1x128xf32> to vector<1x1x1x128xf32>
    tpu.vector_store %arg8[%c0_3, %c0_4, %c0_5, %c0_6], %7 {strides = array<i32>} : memref<1x1x1x128xf32, #tpu.memory_space<vmem>>, vector<1x1x1x128xf32>,
    %c0_7 = arith.constant 0 : index
    %c0_8 = arith.constant 0 : index
    %c0_9 = arith.constant 0 : index
    %c0_10 = arith.constant 0 : index
    %8 = vector.load %arg9[%c0_7, %c0_8, %c0_9, %c0_10] : memref<1x1x1x128xf32, #tpu.memory_space<vmem>>, vector<1x1x1x128xf32>
    %9 = vector.shape_cast %8 : vector<1x1x1x128xf32> to vector<1x128xf32>
    %10 = vector.shape_cast %4#1 : vector<1x128xf32> to vector<1x1x1x128xf32>
    tpu.vector_store %arg9[%c0_7, %c0_8, %c0_9, %c0_10], %10 {strides = array<i32>} : memref<1x1x1x128xf32, #tpu.memory_space<vmem>>, vector<1x1x1x128xf32>,
    return
  }
  func.func @transform_0(%arg0: i32, %arg1: i32) -> (i32, i32, i32, i32) {
    %c0_i32 = arith.constant 0 : i32
    %c0_i32_0 = arith.constant 0 : i32
    %c0_i32_1 = arith.constant 0 : i32
    %c0_i32_2 = arith.constant 0 : i32
    return %arg0, %c0_i32, %c0_i32_0, %c0_i32_1 : i32, i32, i32, i32
  }
  func.func @transform_1(%arg0: i32, %arg1: i32) -> (i32, i32, i32) {
    %c0_i32 = arith.constant 0 : i32
    %c0_i32_0 = arith.constant 0 : i32
    %c0_i32_1 = arith.constant 0 : i32
    %c0_i32_2 = arith.constant 0 : i32
    return %c0_i32, %c0_i32_0, %c0_i32_1 : i32, i32, i32
  }
  func.func @transform_2(%arg0: i32, %arg1: i32) -> (i32, i32) {
    %c0_i32 = arith.constant 0 : i32
    %c0_i32_0 = arith.constant 0 : i32
    %c0_i32_1 = arith.constant 0 : i32
    return %c0_i32, %c0_i32_0 : i32, i32
  }
  func.func @transform_3(%arg0: i32, %arg1: i32) -> (i32, i32) {
    %c0_i32 = arith.constant 0 : i32
    %c0_i32_0 = arith.constant 0 : i32
    %c0_i32_1 = arith.constant 0 : i32
    return %c0_i32, %c0_i32_0 : i32, i32
  }
  func.func @transform_4(%arg0: i32, %arg1: i32) -> (i32, i32) {
    %c0_i32 = arith.constant 0 : i32
    %c0_i32_0 = arith.constant 0 : i32
    %c0_i32_1 = arith.constant 0 : i32
    return %c0_i32, %c0_i32_0 : i32, i32
  }
  func.func @transform_5(%arg0: i32, %arg1: i32) -> (i32, i32, i32, i32) {
    %c0_i32 = arith.constant 0 : i32
    %c0_i32_0 = arith.constant 0 : i32
    %c0_i32_1 = arith.constant 0 : i32
    return %arg0, %arg1, %c0_i32, %c0_i32_0 : i32, i32, i32, i32
  }
  func.func @transform_6(%arg0: i32, %arg1: i32) -> (i32, i32, i32, i32) {
    %c0_i32 = arith.constant 0 : i32
    %c0_i32_0 = arith.constant 0 : i32
    %c0_i32_1 = arith.constant 0 : i32
    return %arg0, %arg1, %c0_i32, %c0_i32_0 : i32, i32, i32, i32
  }
  func.func @transform_7(%arg0: i32, %arg1: i32) -> (i32, i32, i32, i32) {
    %c0_i32 = arith.constant 0 : i32
    %c0_i32_0 = arith.constant 0 : i32
    %c0_i32_1 = arith.constant 0 : i32
    return %arg0, %arg1, %c0_i32, %c0_i32_0 : i32, i32, i32, i32
  }
}

module attributes {stable_mosaic.version = 11 : i64} {
  func.func @_fc_tail_kernel(%arg0: i32, %arg1: memref<2x1152xbf16, #tpu.memory_space<vmem>>, %arg2: memref<1x1152xf32, #tpu.memory_space<vmem>>, %arg3: memref<1x1152xf32, #tpu.memory_space<vmem>>, %arg4: memref<1152x128xbf16, #tpu.memory_space<vmem>>, %arg5: memref<1x128xf32, #tpu.memory_space<vmem>>, %arg6: memref<1x128xf32, #tpu.memory_space<vmem>>, %arg7: memref<1x128xf32, #tpu.memory_space<vmem>>, %arg8: memref<128x14xbf16, #tpu.memory_space<vmem>>, %arg9: memref<1x14xf32, #tpu.memory_space<vmem>>, %arg10: memref<2x14xf32, #tpu.memory_space<vmem>>) attributes {dimension_semantics = [#tpu.dimension_semantics<arbitrary>], iteration_bounds = array<i64: 1>, scalar_prefetch = 0 : i64, scratch_operands = 0 : i64, tpu.core_type = #tpu.core_type<tc>, window_params = [{pipeline_mode = #tpu.pipeline_mode<synchronous>, transform_indices = @transform_0, window_bounds = array<i64: 2, 1152>}, {pipeline_mode = #tpu.pipeline_mode<synchronous>, transform_indices = @transform_1, window_bounds = array<i64: 1, 1152>}, {pipeline_mode = #tpu.pipeline_mode<synchronous>, transform_indices = @transform_2, window_bounds = array<i64: 1, 1152>}, {pipeline_mode = #tpu.pipeline_mode<synchronous>, transform_indices = @transform_3, window_bounds = array<i64: 1152, 128>}, {pipeline_mode = #tpu.pipeline_mode<synchronous>, transform_indices = @transform_4, window_bounds = array<i64: 1, 128>}, {pipeline_mode = #tpu.pipeline_mode<synchronous>, transform_indices = @transform_5, window_bounds = array<i64: 1, 128>}, {pipeline_mode = #tpu.pipeline_mode<synchronous>, transform_indices = @transform_6, window_bounds = array<i64: 1, 128>}, {pipeline_mode = #tpu.pipeline_mode<synchronous>, transform_indices = @transform_7, window_bounds = array<i64: 128, 14>}, {pipeline_mode = #tpu.pipeline_mode<synchronous>, transform_indices = @transform_8, window_bounds = array<i64: 1, 14>}, {pipeline_mode = #tpu.pipeline_mode<synchronous>, transform_indices = @transform_9, window_bounds = array<i64: 2, 14>}]} {
    %c0 = arith.constant 0 : index
    %c0_0 = arith.constant 0 : index
    %0 = vector.load %arg1[%c0, %c0_0] : memref<2x1152xbf16, #tpu.memory_space<vmem>>, vector<2x1152xbf16>
    %1 = arith.extf %0 : vector<2x1152xbf16> to vector<2x1152xf32>
    %c0_1 = arith.constant 0 : index
    %c0_2 = arith.constant 0 : index
    %2 = vector.load %arg2[%c0_1, %c0_2] : memref<1x1152xf32, #tpu.memory_space<vmem>>, vector<1x1152xf32>
    %3 = vector.broadcast %2 : vector<1x1152xf32> to vector<2x1152xf32>
    %4 = arith.mulf %1, %3 : vector<2x1152xf32>
    %c0_3 = arith.constant 0 : index
    %c0_4 = arith.constant 0 : index
    %5 = vector.load %arg3[%c0_3, %c0_4] : memref<1x1152xf32, #tpu.memory_space<vmem>>, vector<1x1152xf32>
    %6 = vector.broadcast %5 : vector<1x1152xf32> to vector<2x1152xf32>
    %7 = arith.addf %4, %6 : vector<2x1152xf32>
    %cst = arith.constant 0.000000e+00 : f32
    %8 = vector.broadcast %cst : f32 to vector<2x1152xf32>
    %9 = arith.maximumf %7, %8 : vector<2x1152xf32>
    %10 = arith.truncf %9 : vector<2x1152xf32> to vector<2x1152xbf16>
    %c0_5 = arith.constant 0 : index
    %c0_6 = arith.constant 0 : index
    %11 = vector.load %arg4[%c0_5, %c0_6] : memref<1152x128xbf16, #tpu.memory_space<vmem>>, vector<1152x128xbf16>
    %cst_7 = arith.constant dense<0.000000e+00> : vector<2x128xf32>
    %12 = tpu.matmul %10, %11, %cst_7 {dimension_numbers = #tpu.dot_dimension_numbers<[1], [0], [0], [1], [0, 0, 1, 1], [], []>} : vector<2x1152xbf16>, vector<1152x128xbf16>, vector<2x128xf32> -> vector<2x128xf32>
    %c0_8 = arith.constant 0 : index
    %c0_9 = arith.constant 0 : index
    %13 = vector.load %arg5[%c0_8, %c0_9] : memref<1x128xf32, #tpu.memory_space<vmem>>, vector<1x128xf32>
    %14 = vector.broadcast %13 : vector<1x128xf32> to vector<2x128xf32>
    %15 = arith.addf %12, %14 : vector<2x128xf32>
    %cst_10 = arith.constant dense<0.000000e+00> : vector<128xf32>
    %16 = vector.multi_reduction <add>, %15, %cst_10 [0] : vector<2x128xf32> to vector<128xf32>
    %17 = vector.shape_cast %16 : vector<128xf32> to vector<1x128xf32>
    %cst_11 = arith.constant 5.000000e-01 : f32
    %18 = vector.broadcast %cst_11 : f32 to vector<1x128xf32>
    %19 = arith.mulf %17, %18 : vector<1x128xf32>
    %20 = vector.broadcast %19 : vector<1x128xf32> to vector<2x128xf32>
    %21 = arith.subf %15, %20 : vector<2x128xf32>
    %22 = arith.mulf %21, %21 : vector<2x128xf32>
    %cst_12 = arith.constant dense<0.000000e+00> : vector<128xf32>
    %23 = vector.multi_reduction <add>, %22, %cst_12 [0] : vector<2x128xf32> to vector<128xf32>
    %24 = vector.shape_cast %23 : vector<128xf32> to vector<1x128xf32>
    %cst_13 = arith.constant 5.000000e-01 : f32
    %25 = vector.broadcast %cst_13 : f32 to vector<1x128xf32>
    %26 = arith.mulf %24, %25 : vector<1x128xf32>
    %c0_14 = arith.constant 0 : index
    %c0_15 = arith.constant 0 : index
    %27 = vector.load %arg6[%c0_14, %c0_15] : memref<1x128xf32, #tpu.memory_space<vmem>>, vector<1x128xf32>
    %cst_16 = arith.constant 9.99999974E-6 : f32
    %28 = vector.broadcast %cst_16 : f32 to vector<1x128xf32>
    %29 = arith.addf %26, %28 : vector<1x128xf32>
    %30 = math.rsqrt %29 : vector<1x128xf32>
    %31 = arith.mulf %27, %30 : vector<1x128xf32>
    %c0_17 = arith.constant 0 : index
    %c0_18 = arith.constant 0 : index
    %32 = vector.load %arg7[%c0_17, %c0_18] : memref<1x128xf32, #tpu.memory_space<vmem>>, vector<1x128xf32>
    %33 = arith.mulf %19, %31 : vector<1x128xf32>
    %34 = arith.subf %32, %33 : vector<1x128xf32>
    %35 = vector.broadcast %31 : vector<1x128xf32> to vector<2x128xf32>
    %36 = arith.mulf %15, %35 : vector<2x128xf32>
    %37 = vector.broadcast %34 : vector<1x128xf32> to vector<2x128xf32>
    %38 = arith.addf %36, %37 : vector<2x128xf32>
    %cst_19 = arith.constant 0.000000e+00 : f32
    %39 = vector.broadcast %cst_19 : f32 to vector<2x128xf32>
    %40 = arith.maximumf %38, %39 : vector<2x128xf32>
    %41 = arith.truncf %40 : vector<2x128xf32> to vector<2x128xbf16>
    %c0_20 = arith.constant 0 : index
    %c0_21 = arith.constant 0 : index
    %42 = vector.load %arg8[%c0_20, %c0_21] : memref<128x14xbf16, #tpu.memory_space<vmem>>, vector<128x14xbf16>
    %cst_22 = arith.constant dense<0.000000e+00> : vector<2x14xf32>
    %43 = tpu.matmul %41, %42, %cst_22 {dimension_numbers = #tpu.dot_dimension_numbers<[1], [0], [0], [1], [0, 0, 1, 1], [], []>} : vector<2x128xbf16>, vector<128x14xbf16>, vector<2x14xf32> -> vector<2x14xf32>
    %c0_23 = arith.constant 0 : index
    %c0_24 = arith.constant 0 : index
    %44 = vector.load %arg9[%c0_23, %c0_24] : memref<1x14xf32, #tpu.memory_space<vmem>>, vector<1x14xf32>
    %45 = vector.broadcast %44 : vector<1x14xf32> to vector<2x14xf32>
    %46 = arith.addf %43, %45 : vector<2x14xf32>
    %c0_25 = arith.constant 0 : index
    %c0_26 = arith.constant 0 : index
    %47 = vector.load %arg10[%c0_25, %c0_26] : memref<2x14xf32, #tpu.memory_space<vmem>>, vector<2x14xf32>
    tpu.vector_store %arg10[%c0_25, %c0_26], %46 {strides = array<i32>} : memref<2x14xf32, #tpu.memory_space<vmem>>, vector<2x14xf32>,
    return
  }
  func.func @transform_0(%arg0: i32) -> (i32, i32) {
    %c0_i32 = arith.constant 0 : i32
    %c0_i32_0 = arith.constant 0 : i32
    %c0_i32_1 = arith.constant 0 : i32
    return %c0_i32, %c0_i32_0 : i32, i32
  }
  func.func @transform_1(%arg0: i32) -> (i32, i32) {
    %c0_i32 = arith.constant 0 : i32
    %c0_i32_0 = arith.constant 0 : i32
    %c0_i32_1 = arith.constant 0 : i32
    return %c0_i32, %c0_i32_0 : i32, i32
  }
  func.func @transform_2(%arg0: i32) -> (i32, i32) {
    %c0_i32 = arith.constant 0 : i32
    %c0_i32_0 = arith.constant 0 : i32
    %c0_i32_1 = arith.constant 0 : i32
    return %c0_i32, %c0_i32_0 : i32, i32
  }
  func.func @transform_3(%arg0: i32) -> (i32, i32) {
    %c0_i32 = arith.constant 0 : i32
    %c0_i32_0 = arith.constant 0 : i32
    %c0_i32_1 = arith.constant 0 : i32
    return %c0_i32, %c0_i32_0 : i32, i32
  }
  func.func @transform_4(%arg0: i32) -> (i32, i32) {
    %c0_i32 = arith.constant 0 : i32
    %c0_i32_0 = arith.constant 0 : i32
    %c0_i32_1 = arith.constant 0 : i32
    return %c0_i32, %c0_i32_0 : i32, i32
  }
  func.func @transform_5(%arg0: i32) -> (i32, i32) {
    %c0_i32 = arith.constant 0 : i32
    %c0_i32_0 = arith.constant 0 : i32
    %c0_i32_1 = arith.constant 0 : i32
    return %c0_i32, %c0_i32_0 : i32, i32
  }
  func.func @transform_6(%arg0: i32) -> (i32, i32) {
    %c0_i32 = arith.constant 0 : i32
    %c0_i32_0 = arith.constant 0 : i32
    %c0_i32_1 = arith.constant 0 : i32
    return %c0_i32, %c0_i32_0 : i32, i32
  }
  func.func @transform_7(%arg0: i32) -> (i32, i32) {
    %c0_i32 = arith.constant 0 : i32
    %c0_i32_0 = arith.constant 0 : i32
    %c0_i32_1 = arith.constant 0 : i32
    return %c0_i32, %c0_i32_0 : i32, i32
  }
  func.func @transform_8(%arg0: i32) -> (i32, i32) {
    %c0_i32 = arith.constant 0 : i32
    %c0_i32_0 = arith.constant 0 : i32
    %c0_i32_1 = arith.constant 0 : i32
    return %c0_i32, %c0_i32_0 : i32, i32
  }
  func.func @transform_9(%arg0: i32) -> (i32, i32) {
    %c0_i32 = arith.constant 0 : i32
    %c0_i32_0 = arith.constant 0 : i32
    %c0_i32_1 = arith.constant 0 : i32
    return %c0_i32, %c0_i32_0 : i32, i32
  }
}

</mosaic_0001>

<bundles_post_ra>
// kernel: forward.10
= control target key start
LH: loop header
LB: loop body
LE: loop exit
PB: predicated region body
PF: predicated region fallthrough
CT: control target
= control target key end

     0   :  { %s930_s12 = smov 0   ;;  %s1209_s0 = inlined_call_operand.vmem [shape: bf16[2,115,115,128], index: 0, kind: input, shape index: {}]   ;;  %s1210_s1 = inlined_call_operand.vmem [shape: f32[1,128], index: 1, kind: input, shape index: {}]   ;;  %s1211_s2 = inlined_call_operand.vmem [shape: f32[1,128], index: 2, kind: input, shape index: {}]   ;;  %s1212_s3 = inlined_call_operand.vmem [shape: bf16[2,38,38,128], index: 3, kind: output, shape index: {}]  }
   0x1 LB: > { %s728_s13 = sadd.s32 4294967295, %s903_s12   ;;  %p732_p0 = scmp.ge.s32.totalorder %s903_s12, 1  ;;  %s903_s12 = sphi %s930_s12, %s13_s12  }
   0x2   : > { %p137_p1 = scmp.lt.s32.totalorder %s903_s12, 3 }
   0x4   : > { %p138_p2 = pnand %p732_p0, %p137_p1 }
   0x5   : > { %p161_p3 = scmp.lt.s32.totalorder (!%p138_p2), %s728_s13, 1  ;;  %s974_s26 = smov (!%p138_p2), 0  }
   0x6   : > { %141 = sbr.rel (%p138_p2) target bundleno = 257 (0x101), region = 32 }
   0xb   : > { %v941_v0 = vld [vmem:[%s1210_s1] sm:$0x1]  ;;  %v174_v2 = vlaneseq  ;;  %s1214_s13 = smov (!%p161_p3, %s728_s13), 1  ;;  %v909_v14 = vmov 0.0  }
   0xc   : > { %v946_v1 = vld [vmem:[%s1211_s2] sm:$0x1]  ;;  %s874_s18 = smul.u32 6900, %s1214_s13 }
   0xd   : > { %v175_v3 = vshrl.u32 %v174_v2, 7  ;;  %v181_v4 = vand.u32 127, %v174_v2  ;;  %s875_s19 = smul.u32 760, %s1214_s13 }
   0xe   : > { %s951_s22 = scalar_lea.vmem %s1209_s0, %s874_s18 }
   0xf   : > { %v176_v5 = vadd.s32 8, %v175_v3  ;;  %v177_v6 = vadd.s32 16, %v175_v3  ;;  %v178_v7 = vadd.s32 24, %v175_v3  ;;  %v179_v8 = vadd.s32 32, %v175_v3  ;;  %s956_s25 = scalar_lea.vmem %s1212_s3, %s875_s19 }
  0x10   : > { %v182_v9 = vmul.u32 3, %v175_v3 }
  0x11   : > { %v183_v10 = vmul.u32 3, %v176_v5  ;;  %v184_v11 = vmul.u32 3, %v177_v6  ;;  %v185_v12 = vmul.u32 3, %v178_v7  ;;  %v186_v13 = vmul.u32 3, %v179_v8 }
  0x12   : > { %vm187_vm0 = vcmp.eq.s32.totalorder %v181_v4, %v182_v9 }
  0x13   : > { %vm188_vm1 = vcmp.eq.s32.totalorder %v181_v4, %v183_v10  ;;  %vm189_vm2 = vcmp.eq.s32.totalorder %v181_v4, %v184_v11  ;;  %vm190_vm3 = vcmp.eq.s32.totalorder %v181_v4, %v185_v12  ;;  %vm191_vm4 = vcmp.eq.s32.totalorder %v181_v4, %v186_v13 }
  0x14   : > { %v958_v15 = vsel %vm187_vm0, 1.0, %v909_v14  ;;  %v960_v16 = vsel %vm188_vm1, 1.0, %v909_v14  ;;  %v962_v17 = vsel %vm189_vm2, 1.0, %v909_v14  ;;  %v964_v18 = vsel %vm190_vm3, 1.0, %v909_v14 }
  0x15   : > { %v966_v19 = vsel %vm191_vm4, 1.0, %v909_v14  ;;  %v202_v20 = vpack.c.bf16 %v960_v16, %v958_v15  ;;  %v203_v21 = vpack.c.bf16 %v964_v18, %v962_v17 }
  0x16   : > { %v204_v22 = vpack.c.bf16 %v966_v19, %v966_v19 }
  0x17 LB: >> { %s748_s27 = smul.u32 180, %s907_s26  ;;  %v984_v23 = vperm.slane %v941_v0, 0  ;;  %v992_v27 = vperm.slane %v946_v1, 0  ;;  %vm474_vm5 = vcmask 1042432   ;;  %vm495_vm6 = vcmask 1046528   ;;  %s907_s26 = sphi %s974_s26, %s210_s26  }
  0x18   : >> { %vm553_vm7 = vcmask 1045504   ;;  %vm618_vm8 = vcmask 916480   ;;  %s749_s29 = smul.u32 20, %s907_s26  ;;  %s210_s26 = sadd.s32 1, %s907_s26  }
  0x19   : >> { %s981_s28 = scalar_lea.vmem %s951_s22, %s748_s27  ;;  %p207_p4 = scmp.ge.s32.totalorder %s210_s26, 38  }
  0x1a   : >> { %v845_v24 = vld [vmem:[%s981_s28 + $0x30] sm:$0xff]   ;;  %v229_v25 = vld [vmem:[%s981_s28 + $0x38] sm:$0x3]  ;;  %v989_v26 = vld [vmem:[%s981_s28 + $0x68] sm:$0xff]   ;;  %s658_s30 = scalar_lea.vmem %s956_s25, %s749_s29 }
  0x1b   : >> { %v776_v28 = vunpack.c.l.bf16 %v845_v24  ;;  %v777_v29 = vunpack.c.h.bf16 %v845_v24  ;;  %v801_v30 = vunpack.c.h.bf16 %v989_v26  ;;  %v243_v31 = vld [vmem:[%s981_s28 + $0x70] sm:$0xf]  ;;  %v244_v32 = vld [vmem:[%s981_s28 + $0x74] sm:$0x3]  ;;  %v858_v33 = vld [vmem:[%s981_s28 + $0xa8] sm:$0xff]   ;;  %v274_v34 = vunpack.c.l.bf16 %v229_v25 }
  0x1c   : >> { %v828_v35 = vunpack.c.l.bf16 %v858_v33  ;;  %v829_v36 = vunpack.c.h.bf16 %v858_v33  ;;  %v259_v37 = vld [vmem:[%s981_s28 + $0xb0] sm:$0x3]  ;;  %v288_v38 = vunpack.c.l.bf16 %v243_v31  ;;  %v289_v39 = vunpack.c.l.bf16 %v244_v32  ;;  %v844_v60 = vld [vmem:[%s981_s28 + $0x28] sm:$0xff]   ;;  %v1019_v3 = vld [vmem:[%s981_s28 + $0x60] sm:$0xff]  }
  0x1d   : >> { %v304_v40 = vunpack.c.l.bf16 %v259_v37  ;;  %v320_v41 = vmul.f32 %v776_v28, %v984_v23  ;;  %v321_v42 = vmul.f32 %v777_v29, %v984_v23  ;;  %v322_v43 = vmul.f32 %v984_v23, %v274_v34  ;;  %v857_v12 = vld [vmem:[%s981_s28 + $0xa0] sm:$0xff]  }
  0x1e   : >> { %v335_v44 = vmul.f32 %v801_v30, %v984_v23  ;;  %v336_v45 = vmul.f32 %v984_v23, %v288_v38  ;;  %v337_v46 = vmul.f32 %v984_v23, %v289_v39  ;;  %v350_v47 = vmul.f32 %v828_v35, %v984_v23 }
  0x1f   : >> { %v351_v48 = vmul.f32 %v829_v36, %v984_v23  ;;  %v352_v49 = vmul.f32 %v984_v23, %v304_v40  ;;  %v368_v50 = vadd.f32 %v992_v27, %v320_v41  ;;  %v369_v51 = vadd.f32 %v992_v27, %v321_v42 }
  0x20   : >> { %v370_v52 = vadd.f32 %v992_v27, %v322_v43  ;;  %v383_v53 = vadd.f32 %v992_v27, %v335_v44  ;;  %v384_v54 = vadd.f32 %v992_v27, %v336_v45  ;;  %v385_v55 = vadd.f32 %v992_v27, %v337_v46 }
  0x21   : >> { %v398_v56 = vadd.f32 %v992_v27, %v350_v47  ;;  %v399_v57 = vadd.f32 %v992_v27, %v351_v48  ;;  %v400_v58 = vadd.f32 %v992_v27, %v352_v49  ;;  %v413_v59 = vmax.f32 %v368_v50, 0.0 }
  0x22   : >> { %v414_v61 = vmax.f32 %v369_v51, 0.0  ;;  %v415_v62 = vmax.f32 %v370_v52, 0.0  ;;  %v428_v63 = vmax.f32 %v383_v53, 0.0  ;;  %v429_v2 = vmax.f32 %v384_v54, 0.0 }
  0x23   : >> { %v430_v4 = vmax.f32 %v385_v55, 0.0  ;;  %v443_v5 = vmax.f32 %v398_v56, 0.0  ;;  %v444_v6 = vmax.f32 %v399_v57, 0.0  ;;  %v445_v7 = vmax.f32 %v400_v58, 0.0  ;;  %v843_v55 = vld [vmem:[%s981_s28 + $0x20] sm:$0xff]  }
  0x24   : >> { %v470_v8 = vmax.f32 %v413_v59, %v428_v63  ;;  %v472_v9 = vmax.f32 %v414_v61, %v429_v2  ;;  %v475_v10 = vsel %vm474_vm5, %v415_v62, -inf  ;;  %v772_v11 = vunpack.c.l.bf16 %v844_v60 }
  0x25   : >> { %v476_v13 = vsel %vm474_vm5, %v430_v4, -inf  ;;  %v478_v14 = vsel %vm474_vm5, %v445_v7, -inf  ;;  %v773_v24 = vunpack.c.h.bf16 %v844_v60  ;;  %v797_v25 = vunpack.c.h.bf16 %v1019_v3  ;;  %v1054_v60 = vld [vmem:[%s981_s28 + $0x58] sm:$0xff]  }
  0x26   : >> { %v1026_v28 = vmax.f32 %v470_v8, %v443_v5  ;;  %v473_v29 = vmax.f32 %v472_v9, %v444_v6  ;;  %v477_v30 = vmax.f32 %v475_v10, %v476_v13  ;;  %v800_v31 = vunpack.c.l.bf16 %v989_v26  ;;  %v856_v4 = vld [vmem:[%s981_s28 + $0x98] sm:$0xff]  }
  0x27   : >> { %v824_v32 = vunpack.c.l.bf16 %v857_v12  ;;  %v825_v33 = vunpack.c.h.bf16 %v857_v12  ;;  %v318_v34 = vmul.f32 %v772_v11, %v984_v23  ;;  %v319_v35 = vmul.f32 %v773_v24, %v984_v23  ;;  %v842_v13 = vld [vmem:[%s981_s28 + $0x18] sm:$0xff]  }
  0x28   : >> { %v479_v36 = vmax.f32 %v477_v30, %v478_v14  ;;  %v519_v37 = vrot.slane %v1026_v28, 1  ;;  %v521_v38 = vrot.slane %v473_v29, 1  ;;  %v577_v39 = vrot.slane %v1026_v28, 2 }
  0x29   : >> { %v579_v40 = vrot.slane %v473_v29, 2  ;;  %v333_v41 = vmul.f32 %v797_v25, %v984_v23  ;;  %v334_v42 = vmul.f32 %v800_v31, %v984_v23  ;;  %v348_v26 = vmul.f32 %v824_v32, %v984_v23 }
  0x2a   : >> { %v522_v43 = vsel %vm495_vm6, %v519_v37, %v521_v38  ;;  %v523_v44 = vrot.slane %v479_v36, 1  ;;  %v581_v45 = vrot.slane %v479_v36, 2  ;;  %v349_v46 = vmul.f32 %v825_v33, %v984_v23 }
  0x2b   : >> { %v551_v47 = vmax.f32 %v1026_v28, %v522_v43  ;;  %v580_v48 = vsel %vm553_vm7, %v577_v39, %v579_v40  ;;  %v366_v49 = vadd.f32 %v992_v27, %v318_v34  ;;  %v367_v50 = vadd.f32 %v992_v27, %v319_v35 }
  0x2c   : >> { %v524_v51 = vsel %vm495_vm6, %v521_v38, %v523_v44  ;;  %v582_v52 = vsel %vm553_vm7, %v579_v40, %v581_v45  ;;  %v381_v53 = vadd.f32 %v992_v27, %v333_v41  ;;  %v382_v54 = vadd.f32 %v992_v27, %v334_v42 }
  0x2d   : >> { %v552_v56 = vmax.f32 %v473_v29, %v524_v51  ;;  %v609_v57 = vmax.f32 %v551_v47, %v580_v48  ;;  %v396_v58 = vadd.f32 %v992_v27, %v348_v26  ;;  %v397_v59 = vadd.f32 %v992_v27, %v349_v46 }
  0x2e   : >> { %v411_v61 = vmax.f32 %v366_v49, 0.0  ;;  %v412_v62 = vmax.f32 %v367_v50, 0.0  ;;  %v426_v63 = vmax.f32 %v381_v53, 0.0  ;;  %v427_v2 = vmax.f32 %v382_v54, 0.0  ;;  %v1085_v54 = vld [vmem:[%s981_s28 + $0x50] sm:$0xff]  }
  0x2f   : >> { %v610_v5 = vmax.f32 %v552_v56, %v582_v52  ;;  %v441_v6 = vmax.f32 %v396_v58, 0.0  ;;  %v442_v7 = vmax.f32 %v397_v59, 0.0  ;;  %v768_v8 = vunpack.c.l.bf16 %v843_v55  ;;  %v855_v58 = vld [vmem:[%s981_s28 + $0x90] sm:$0xff]  }
  0x30   : >> { %v466_v9 = vmax.f32 %v411_v61, %v426_v63  ;;  %v468_v10 = vmax.f32 %v412_v62, %v427_v2  ;;  %v769_v11 = vunpack.c.h.bf16 %v843_v55  ;;  %v793_v12 = vunpack.c.h.bf16 %v1054_v60 }
  0x31   : >> { %v617_v14 = vpack.c.bf16 %v610_v5, %v609_v57  ;;  %v796_v24 = vunpack.c.l.bf16 %v1019_v3  ;;  %v820_v25 = vunpack.c.l.bf16 %v856_v4  ;;  %v821_v29 = vunpack.c.h.bf16 %v856_v4  ;;  %v841_v5 = vld [vmem:[%s981_s28 + $0x10] sm:$0xff]  }
  0x32   : >> { %v1060_v30 = vmax.f32 %v466_v9, %v441_v6  ;;  %v469_v31 = vmax.f32 %v468_v10, %v442_v7  ;;  %v316_v32 = vmul.f32 %v768_v8, %v984_v23  ;;  %v317_v33 = vmul.f32 %v769_v11, %v984_v23 }
  0x33   : >> { %629 = vmatpush.bf16.msra.mxu0 %v617_v14  ;;  %860 = vmatpush.bf16.msra.mxu1 %v617_v14  ;;  %v331_v34 = vmul.f32 %v793_v12, %v984_v23  ;;  %v332_v35 = vmul.f32 %v796_v24, %v984_v23  ;;  %v346_v36 = vmul.f32 %v820_v25, %v984_v23  ;;  %v764_v38 = vunpack.c.l.bf16 %v842_v13 }
  0x34   : >> { %861 = vmatpush.bf16.msra.mxu2 %v617_v14  ;;  %v515_v3 = vrot.slane %v1060_v30, 1  ;;  %v517_v40 = vrot.slane %v469_v31, 1  ;;  %v573_v41 = vrot.slane %v1060_v30, 2  ;;  %v575_v42 = vrot.slane %v469_v31, 2 }
  0x35   : >> { %v347_v26 = vmul.f32 %v821_v29, %v984_v23  ;;  %v364_v43 = vadd.f32 %v992_v27, %v316_v32  ;;  %v365_v44 = vadd.f32 %v992_v27, %v317_v33  ;;  %v379_v45 = vadd.f32 %v992_v27, %v331_v34 }
  0x36   : >> { %v518_v46 = vsel %vm495_vm6, %v515_v3, %v517_v40  ;;  %v520_v47 = vsel %vm495_vm6, %v517_v40, %v519_v37  ;;  %v576_v48 = vsel %vm553_vm7, %v573_v41, %v575_v42  ;;  %v578_v49 = vsel %vm553_vm7, %v575_v42, %v577_v39 }
  0x37   : >> { %v549_v50 = vmax.f32 %v1060_v30, %v518_v46  ;;  %v550_v51 = vmax.f32 %v469_v31, %v520_v47  ;;  %v380_v52 = vadd.f32 %v992_v27, %v332_v35  ;;  %v394_v53 = vadd.f32 %v992_v27, %v346_v36  ;;  %v1113_v47 = vld [vmem:[%s981_s28 + $0x48] sm:$0xff]  }
  0x38   : >> { %v395_v55 = vadd.f32 %v992_v27, %v347_v26  ;;  %v409_v56 = vmax.f32 %v364_v43, 0.0  ;;  %v410_v37 = vmax.f32 %v365_v44, 0.0  ;;  %v424_v57 = vmax.f32 %v379_v45, 0.0 }
  0x39   : >> { %v607_v59 = vmax.f32 %v549_v50, %v576_v48  ;;  %v608_v28 = vmax.f32 %v550_v51, %v578_v49  ;;  %v425_v61 = vmax.f32 %v380_v52, 0.0  ;;  %v439_v39 = vmax.f32 %v394_v53, 0.0  ;;  %v854_v52 = vld [vmem:[%s981_s28 + $0x88] sm:$0xff]  }
  0x3a   : >> { %v440_v62 = vmax.f32 %v395_v55, 0.0  ;;  %v462_v63 = vmax.f32 %v409_v56, %v424_v57  ;;  %v765_v2 = vunpack.c.h.bf16 %v842_v13  ;;  %v789_v4 = vunpack.c.h.bf16 %v1085_v54 }
  0x3b   : >> { %v616_v6 = vpack.c.bf16 %v608_v28, %v607_v59  ;;  %v464_v7 = vmax.f32 %v410_v37, %v425_v61  ;;  %v792_v8 = vunpack.c.l.bf16 %v1054_v60  ;;  %v816_v9 = vunpack.c.l.bf16 %v855_v58 }
  0x3c   : >> { %v1092_v10 = vmax.f32 %v462_v63, %v439_v39  ;;  %v817_v11 = vunpack.c.h.bf16 %v855_v58  ;;  %v314_v12 = vmul.f32 %v764_v38, %v984_v23  ;;  %v315_v14 = vmul.f32 %v765_v2, %v984_v23 }
  0x3d   : >> { %630 = vmatpush.bf16.msra.mxu0 %v616_v6  ;;  %862 = vmatpush.bf16.msra.mxu1 %v616_v6  ;;  %v465_v24 = vmax.f32 %v464_v7, %v440_v62  ;;  %v329_v13 = vmul.f32 %v789_v4, %v984_v23  ;;  %v330_v25 = vmul.f32 %v792_v8, %v984_v23  ;;  %v760_v29 = vunpack.c.l.bf16 %v841_v5  ;;  %v840_v62 = vld [vmem:[%s981_s28 + $0x8] sm:$0xff]  }
  0x3e   : >> { %863 = vmatpush.bf16.msra.mxu2 %v616_v6  ;;  %v511_v30 = vrot.slane %v1092_v10, 1  ;;  %v569_v60 = vrot.slane %v1092_v10, 2  ;;  %v344_v31 = vmul.f32 %v816_v9, %v984_v23  ;;  %v345_v32 = vmul.f32 %v817_v11, %v984_v23 }
  0x3f   : >> { %v513_v33 = vrot.slane %v465_v24, 1  ;;  %v571_v34 = vrot.slane %v465_v24, 2  ;;  %v362_v35 = vadd.f32 %v992_v27, %v314_v12  ;;  %v363_v36 = vadd.f32 %v992_v27, %v315_v14 }
  0x40   : >> { %v377_v38 = vadd.f32 %v992_v27, %v329_v13  ;;  %v378_v40 = vadd.f32 %v992_v27, %v330_v25  ;;  %v392_v42 = vadd.f32 %v992_v27, %v344_v31  ;;  %v393_v26 = vadd.f32 %v992_v27, %v345_v32 }
  0x41   : >> { %v514_v43 = vsel %vm495_vm6, %v511_v30, %v513_v33  ;;  %v516_v44 = vsel %vm495_vm6, %v513_v33, %v515_v3  ;;  %v572_v45 = vsel %vm553_vm7, %v569_v60, %v571_v34  ;;  %v574_v46 = vsel %vm553_vm7, %v571_v34, %v573_v41 }
  0x42   : >> { %v547_v48 = vmax.f32 %v1092_v10, %v514_v43  ;;  %v548_v49 = vmax.f32 %v465_v24, %v516_v44  ;;  %v407_v50 = vmax.f32 %v362_v35, 0.0  ;;  %v408_v51 = vmax.f32 %v363_v36, 0.0  ;;  %v1142_v44 = vld [vmem:[%s981_s28 + $0x40] sm:$0xff]  }
  0x43   : >> { %v422_v53 = vmax.f32 %v377_v38, 0.0  ;;  %v423_v55 = vmax.f32 %v378_v40, 0.0  ;;  %v437_v56 = vmax.f32 %v392_v42, 0.0  ;;  %v438_v37 = vmax.f32 %v393_v26, 0.0 }
  0x44   : >> { %v605_v57 = vmax.f32 %v547_v48, %v572_v45  ;;  %v606_v58 = vmax.f32 %v548_v49, %v574_v46  ;;  %v761_v3 = vunpack.c.h.bf16 %v841_v5  ;;  %v785_v59 = vunpack.c.h.bf16 %v1113_v47 }
  0x45   : >> { %v458_v28 = vmax.f32 %v407_v50, %v422_v53  ;;  %v460_v41 = vmax.f32 %v408_v51, %v423_v55  ;;  %v788_v61 = vunpack.c.l.bf16 %v1085_v54  ;;  %v812_v39 = vunpack.c.l.bf16 %v854_v52  ;;  %v853_v50 = vld [vmem:[%s981_s28 + $0x80] sm:$0xff]  }
  0x46   : >> { %v615_v63 = vpack.c.bf16 %v606_v58, %v605_v57  ;;  %v813_v2 = vunpack.c.h.bf16 %v854_v52  ;;  %v312_v4 = vmul.f32 %v760_v29, %v984_v23  ;;  %v313_v6 = vmul.f32 %v761_v3, %v984_v23  ;;  %v751_v57 = vld [vmem:[%s981_s28] sm:$0xff]  }
  0x47   : >> { %v1122_v7 = vmax.f32 %v458_v28, %v437_v56  ;;  %v461_v8 = vmax.f32 %v460_v41, %v438_v37  ;;  %v327_v9 = vmul.f32 %v785_v59, %v984_v23  ;;  %v328_v5 = vmul.f32 %v788_v61, %v984_v23 }
  0x48   : >> { %631 = vmatpush.bf16.msra.mxu0 %v615_v63  ;;  %864 = vmatpush.bf16.msra.mxu1 %v615_v63  ;;  %v342_v10 = vmul.f32 %v812_v39, %v984_v23  ;;  %v343_v54 = vmul.f32 %v813_v2, %v984_v23  ;;  %v360_v11 = vadd.f32 %v992_v27, %v312_v4  ;;  %v756_v12 = vunpack.c.l.bf16 %v840_v62 }
  0x49   : >> { %865 = vmatpush.bf16.msra.mxu2 %v615_v63  ;;  %v507_v14 = vrot.slane %v1122_v7, 1  ;;  %v509_v24 = vrot.slane %v461_v8, 1  ;;  %v565_v13 = vrot.slane %v1122_v7, 2  ;;  %v567_v25 = vrot.slane %v461_v8, 2 }
  0x4a   : >> { %v361_v29 = vadd.f32 %v992_v27, %v313_v6  ;;  %v375_v31 = vadd.f32 %v992_v27, %v327_v9  ;;  %v376_v32 = vadd.f32 %v992_v27, %v328_v5  ;;  %v390_v33 = vadd.f32 %v992_v27, %v342_v10 }
  0x4b   : >> { %v510_v34 = vsel %vm495_vm6, %v507_v14, %v509_v24  ;;  %v512_v35 = vsel %vm495_vm6, %v509_v24, %v511_v30  ;;  %v568_v36 = vsel %vm553_vm7, %v565_v13, %v567_v25  ;;  %v570_v38 = vsel %vm553_vm7, %v567_v25, %v569_v60 }
  0x4c   : >> { %v545_v40 = vmax.f32 %v1122_v7, %v510_v34  ;;  %v546_v42 = vmax.f32 %v461_v8, %v512_v35  ;;  %v391_v26 = vadd.f32 %v992_v27, %v343_v54  ;;  %v405_v43 = vmax.f32 %v360_v11, 0.0  ;;  %v230_v35 = vld [vmem:[%s981_s28 + $0x3c] sm:$0xf] }
  0x4d   : >> { %v406_v45 = vmax.f32 %v361_v29, 0.0  ;;  %v420_v46 = vmax.f32 %v375_v31, 0.0  ;;  %v421_v48 = vmax.f32 %v376_v32, 0.0  ;;  %v435_v49 = vmax.f32 %v390_v33, 0.0 }
  0x4e   : >> { %v603_v51 = vmax.f32 %v545_v40, %v568_v36  ;;  %v604_v30 = vmax.f32 %v546_v42, %v570_v38  ;;  %v436_v52 = vmax.f32 %v391_v26, 0.0  ;;  %v757_v53 = vunpack.c.h.bf16 %v840_v62  ;;  %v852_v26 = vld [vmem:[%s981_s28 + $0x78] sm:$0xff]  }
  0x4f   : >> { %v454_v55 = vmax.f32 %v405_v43, %v420_v46  ;;  %v456_v60 = vmax.f32 %v406_v45, %v421_v48  ;;  %v781_v56 = vunpack.c.h.bf16 %v1142_v44  ;;  %v784_v37 = vunpack.c.l.bf16 %v1113_v47 }
  0x50   : >> { %v614_v58 = vpack.c.bf16 %v604_v30, %v603_v51  ;;  %v808_v3 = vunpack.c.l.bf16 %v853_v50  ;;  %v809_v59 = vunpack.c.h.bf16 %v853_v50  ;;  %v310_v28 = vmul.f32 %v756_v12, %v984_v23 }
  0x51   : >> { %v1149_v41 = vmax.f32 %v454_v55, %v435_v49  ;;  %v457_v61 = vmax.f32 %v456_v60, %v436_v52  ;;  %v311_v39 = vmul.f32 %v757_v53, %v984_v23  ;;  %v325_v63 = vmul.f32 %v781_v56, %v984_v23 }
  0x52   : >> { %632 = vmatpush.bf16.msra.mxu0 %v614_v58  ;;  %866 = vmatpush.bf16.msra.mxu1 %v614_v58  ;;  %v326_v62 = vmul.f32 %v784_v37, %v984_v23  ;;  %v340_v2 = vmul.f32 %v808_v3, %v984_v23  ;;  %v341_v47 = vmul.f32 %v809_v59, %v984_v23  ;;  %v752_v4 = vunpack.c.l.bf16 %v751_v57 }
  0x53   : >> { %867 = vmatpush.bf16.msra.mxu2 %v614_v58  ;;  %v503_v6 = vrot.slane %v1149_v41, 1  ;;  %v505_v7 = vrot.slane %v457_v61, 1  ;;  %v561_v8 = vrot.slane %v1149_v41, 2  ;;  %v563_v9 = vrot.slane %v457_v61, 2 }
  0x54   : >> { %v358_v5 = vadd.f32 %v992_v27, %v310_v28  ;;  %v359_v10 = vadd.f32 %v992_v27, %v311_v39  ;;  %v373_v54 = vadd.f32 %v992_v27, %v325_v63  ;;  %v374_v11 = vadd.f32 %v992_v27, %v326_v62 }
  0x55   : >> { %v506_v12 = vsel %vm495_vm6, %v503_v6, %v505_v7  ;;  %v508_v24 = vsel %vm495_vm6, %v505_v7, %v507_v14  ;;  %v564_v25 = vsel %vm553_vm7, %v561_v8, %v563_v9  ;;  %v566_v29 = vsel %vm553_vm7, %v563_v9, %v565_v13 }
  0x56   : >> { %v543_v31 = vmax.f32 %v1149_v41, %v506_v12  ;;  %v544_v32 = vmax.f32 %v457_v61, %v508_v24  ;;  %v388_v33 = vadd.f32 %v992_v27, %v340_v2  ;;  %v389_v34 = vadd.f32 %v992_v27, %v341_v47 }
  0x57   : >> { %v403_v36 = vmax.f32 %v358_v5, 0.0  ;;  %v404_v38 = vmax.f32 %v359_v10, 0.0  ;;  %v418_v40 = vmax.f32 %v373_v54, 0.0  ;;  %v419_v42 = vmax.f32 %v374_v11, 0.0 }
  0x58   : >> { %v601_v43 = vmax.f32 %v543_v31, %v564_v25  ;;  %v602_v45 = vmax.f32 %v544_v32, %v566_v29  ;;  %v433_v14 = vmax.f32 %v388_v33, 0.0  ;;  %v434_v46 = vmax.f32 %v389_v34, 0.0 }
  0x59   : >> { %v450_v48 = vmax.f32 %v403_v36, %v418_v40  ;;  %v452_v49 = vmax.f32 %v404_v38, %v419_v42  ;;  %v753_v13 = vunpack.c.h.bf16 %v751_v57  ;;  %v780_v50 = vunpack.c.l.bf16 %v1142_v44 }
  0x5a   : >> { %v613_v51 = vpack.c.bf16 %v602_v45, %v601_v43  ;;  %v804_v30 = vunpack.c.l.bf16 %v852_v26  ;;  %v805_v52 = vunpack.c.h.bf16 %v852_v26  ;;  %v275_v53 = vunpack.c.l.bf16 %v230_v35 }
  0x5b   : >> { %v451_v55 = vmax.f32 %v450_v48, %v433_v14  ;;  %v453_v60 = vmax.f32 %v452_v49, %v434_v46  ;;  %v308_v56 = vmul.f32 %v752_v4, %v984_v23  ;;  %v309_v37 = vmul.f32 %v753_v13, %v984_v23 }
  0x5c   : >> { %633 = vmatpush.bf16.msra.mxu0 %v613_v51  ;;  %868 = vmatpush.bf16.msra.mxu1 %v613_v51  ;;  %v323_v58 = vmul.f32 %v984_v23, %v275_v53  ;;  %v324_v3 = vmul.f32 %v780_v50, %v984_v23  ;;  %v338_v57 = vmul.f32 %v804_v30, %v984_v23 }
  0x5d   : >> { %869 = vmatpush.bf16.msra.mxu2 %v613_v51  ;;  %v499_v44 = vrot.slane %v451_v55, 1  ;;  %v501_v59 = vrot.slane %v453_v60, 1  ;;  %v557_v28 = vrot.slane %v451_v55, 2  ;;  %v559_v41 = vrot.slane %v453_v60, 2 }
  0x5e   : >> { %v339_v61 = vmul.f32 %v805_v52, %v984_v23  ;;  %v356_v39 = vadd.f32 %v992_v27, %v308_v56  ;;  %v357_v63 = vadd.f32 %v992_v27, %v309_v37  ;;  %v371_v62 = vadd.f32 %v992_v27, %v323_v58 }
  0x5f   : >> { %v502_v2 = vsel %vm495_vm6, %v499_v44, %v501_v59  ;;  %v504_v47 = vsel %vm495_vm6, %v501_v59, %v503_v6  ;;  %v560_v4 = vsel %vm553_vm7, %v557_v28, %v559_v41  ;;  %v562_v7 = vsel %vm553_vm7, %v559_v41, %v561_v8 }
  0x60   : >> { %v541_v9 = vmax.f32 %v451_v55, %v502_v2  ;;  %v542_v5 = vmax.f32 %v453_v60, %v504_v47  ;;  %v372_v10 = vadd.f32 %v992_v27, %v324_v3  ;;  %v386_v23 = vadd.f32 %v992_v27, %v338_v57 }
  0x61   : >> { %v387_v54 = vadd.f32 %v992_v27, %v339_v61  ;;  %v401_v11 = vmax.f32 %v356_v39, 0.0  ;;  %v402_v12 = vmax.f32 %v357_v63, 0.0  ;;  %v416_v24 = vmax.f32 %v371_v62, 0.0 }
  0x62   : >> { %v599_v25 = vmax.f32 %v541_v9, %v560_v4  ;;  %v600_v29 = vmax.f32 %v542_v5, %v562_v7  ;;  %v417_v31 = vmax.f32 %v372_v10, 0.0  ;;  %v431_v32 = vmax.f32 %v386_v23, 0.0 }
  0x63   : >> { %v432_v6 = vmax.f32 %v387_v54, 0.0  ;;  %v446_v33 = vmax.f32 %v401_v11, %v416_v24 }
  0x64   : >> { %v612_v34 = vpack.c.bf16 %v600_v29, %v599_v25  ;;  %v448_v35 = vmax.f32 %v402_v12, %v417_v31 }
  0x65   : >> { %v447_v8 = vmax.f32 %v446_v33, %v431_v32 }
  0x66   : >> { %634 = vmatpush.bf16.msra.mxu0 %v612_v34  ;;  %870 = vmatpush.bf16.msra.mxu1 %v612_v34  ;;  %v449_v36 = vmax.f32 %v448_v35, %v432_v6 }
  0x67   : >> { %871 = vmatpush.bf16.msra.mxu2 %v612_v34  ;;  %v496_v38 = vrot.slane %v447_v8, 1  ;;  %v554_v40 = vrot.slane %v447_v8, 2 }
  0x68   : >> { %v497_v42 = vrot.slane %v449_v36, 1  ;;  %v555_v27 = vrot.slane %v449_v36, 2 }
  0x6a   : >> { %v498_v26 = vsel %vm495_vm6, %v496_v38, %v497_v42  ;;  %v500_v43 = vsel %vm495_vm6, %v497_v42, %v499_v44  ;;  %v556_v45 = vsel %vm553_vm7, %v554_v40, %v555_v27  ;;  %v558_v14 = vsel %vm553_vm7, %v555_v27, %v557_v28 }
  0x6b   : >> { %v539_v46 = vmax.f32 %v447_v8, %v498_v26  ;;  %v540_v48 = vmax.f32 %v449_v36, %v500_v43 }
  0x6d   : >> { %v597_v49 = vmax.f32 %v539_v46, %v556_v45  ;;  %v598_v13 = vmax.f32 %v540_v48, %v558_v14 }
  0x6f   : >> { %v611_v50 = vpack.c.bf16 %v598_v13, %v597_v49 }
  0x71   : >> { %635 = vmatpush.bf16.msra.mxu0 %v611_v50  ;;  %872 = vmatpush.bf16.msra.mxu1 %v611_v50 }
  0x72   : >> { %873 = vmatpush.bf16.msra.mxu2 %v611_v50 }
  0x74   : >> { %742 = vmatmul.msk.bf16.vlgmr.msra.gmra.mxu0 %vm618_vm8, %v202_v20  ;;  %743 = vmatmul.msk.bf16.vlgmr.msra.gmra.mxu1 %vm618_vm8, %v203_v21 }
  0x75   : >> { %744 = vmatmul.msk.bf16.vlgmr.msra.gmra.mxu2 %vm618_vm8, %v204_v22 }
  0xf1   : >> { %v637_v51 = vpop.f32.mrf.mxu0  ;;  %v642_v30 = vpop.f32.mrf.mxu1 }
  0xf8   : >> { %v647_v52 = vpop.f32.mrf.mxu2 }
  0xf9   : >> { %v655_v53 = vpack.c.bf16 %v647_v52, %v647_v52  ;;  %v639_v55 = vpop.f32.mrf.mxu0  ;;  %v644_v60 = vpop.f32.mrf.mxu1 }
  0xfa   : >> { %v833_v56 = vpack.c.bf16 %v639_v55, %v637_v51  ;;  %v838_v37 = vpack.c.bf16 %v644_v60, %v642_v30 }
  0xfb   : >> { %663 = vst [vmem:[%s658_s30 + $0x10] sm:$0x7] %v655_v53 }
  0xfc   : >> { %834 = vst [vmem:[%s658_s30] sm:$0xff] %v833_v56   ;;  %209 = sbr.rel (!%p207_p4) target bundleno = 23 (0x17), region = 71 }
  0xfd   : >> { %859 = vst [vmem:[%s658_s30 + $0x8] sm:$0xff] %v838_v37  }
 0x100   : >> { %v649_v58 = vpop.f32.mrf.mxu2 }
 0x101 PF: > { %s13_s12 = sadd.s32 1, %s903_s12  }
 0x102   : > { %p10_p5 = scmp.ge.s32.totalorder %s13_s12, 4  }
 0x104   :  { %12 = sbr.rel (!%p10_p5) target bundleno = 1 (0x1), region = 82 }

// kernel: forward.8
= control target key start
LH: loop header
LB: loop body
LE: loop exit
PB: predicated region body
PF: predicated region fallthrough
CT: control target
= control target key end

     0   :  { %s3214_s24 = smov 0   ;;  %s3216_s25 = smov 0   ;;  %s3879_s0 = inlined_call_operand.vmem [shape: bf16[2,128,128,128], index: 0, kind: input, shape index: {}]   ;;  %s3880_s1 = inlined_call_operand.vmem [shape: bf16[64,128,128], index: 1, kind: input, shape index: {}]   ;;  %s3881_s2 = inlined_call_operand.vmem [shape: f32[1,128], index: 2, kind: input, shape index: {}]   ;;  %s3882_s3 = inlined_call_operand.vmem [shape: f32[1,128], index: 3, kind: input, shape index: {}]   ;;  %s3883_s4 = inlined_call_operand.vmem [shape: f32[1,128], index: 4, kind: input, shape index: {}]   ;;  %s3884_s5 = inlined_call_operand.vmem [shape: bf16[2,121,121,128], index: 5, kind: output, shape index: {0}]   ;;  %s3885_s6 = inlined_call_operand.vmem [shape: f32[2,11,1,128], index: 6, kind: output, shape index: {1}]   ;;  %s3886_s7 = inlined_call_operand.vmem [shape: f32[2,11,1,128], index: 7, kind: output, shape index: {2}]  }
   0x1   :  { %s3218_s26 = smov 0   ;;  %s3220_s27 = smov 0  }
   0x2   :  { %s3222_s3 = smov 0  }
   0x3 LB: > { %s27_s4 = sadd.s32 1, %s3084_s26  ;;  %s30_s28 = sadd.s32 1, %s3088_s27  ;;  %s3092_s3 = sphi %s3222_s3, %s18_s3   ;;  %s3088_s27 = sphi %s3220_s27, %s3921_s27   ;;  %s3084_s26 = sphi %s3218_s26, %s3920_s26   ;;  %s3080_s25 = sphi %s3216_s25, %s3919_s25   ;;  %s3076_s24 = sphi %s3214_s24, %s3918_s24  }
   0x4   : > { %p28_p0 = scmp.ge.s32.totalorder %s27_s4, 11  ;;  %p2225_p1 = scmp.ge.s32.totalorder %s3092_s3, 1 }
   0x5   : > { %p260_p2 = scmp.lt.s32.totalorder %s3092_s3, 23 }
   0x6   : > { %s3923_s4 = smov (%p28_p0, %s27_s4), 0  ;;  %s3925_s28 = smov (!%p28_p0, %s30_s28), %s3088_s27 }
   0x7   : > { %p261_p3 = pnand %p2225_p1, %p260_p2  ;;  %p32_p4 = scmp.ge.s32.totalorder %s3925_s28, 2 }
   0x8   : > { %p311_p5 = scmp.lt.s32.totalorder (!%p261_p3), %s3080_s25, 1  ;;  %s3244_s29 = smul.u32 (!%p261_p3), 11, %s3076_s24 }
   0x9   : > { %s3927_s28 = smov (%p32_p4, %s3925_s28), 0  ;;  %264 = sbr.rel (%p261_p3) target bundleno = 488 (0x1e8), region = 40 }
   0xa   : > { %p319_p6 = scmp.lt.s32.totalorder (!%p261_p3), %s3244_s29, 120  ;;  %p329_p7 = scmp.lt.s32.totalorder (!%p261_p3), %s3076_s24, 10 }
   0xe   : > { %v3249_v0 = vld [vmem:[%s3881_s2] sm:$0x1]  ;;  %s3929_s25 = smov (!%p311_p5, %s3080_s25), 1  ;;  %s3931_s24 = smov (!%p329_p7, %s3076_s24), 10  ;;  %v3273_v1 = vmov 0.0   ;;  %v3275_v2 = vmov 0.0  }
   0xf   : > { %s2645_s9 = sshll.u32 %s3929_s25, 13  ;;  %s2772_s10 = smul.u32 1936, %s3929_s25 }
  0x10   : > { %s3255_s13 = scalar_lea.vmem %s3879_s0, %s2645_s9  ;;  %s2773_s14 = smul.u32 11, %s3929_s25 }
  0x11   : > { %s320_s15 = scalar_select %p319_p6, %s3244_s29, 120 }
  0x12   : > { %s3258_s18 = sadd.s32 %s2773_s14, %s3931_s24  ;;  %s3277_s24 = smov 0  }
  0x13   : > { %s2228_s16 = sshll.u32 %s320_s15, 4  ;;  %s333_s22 = scalar_lea.vmem %s3885_s6, %s3258_s18 }
  0x14   : > { %s323_s17 = sadd.s32 %s2772_s10, %s2228_s16  ;;  %s340_s11 = scalar_lea.vmem %s3886_s7, %s3258_s18 }
  0x15   : > { %s2229_s19 = sshll.u32 %s323_s17, 2 }
  0x16   : > { %s3267_s8 = scalar_lea.vmem %s3884_s5, %s2229_s19 }
  0x17 LB: >> { %s351_s10 = sadd.s32 %s3104_s24, %s3244_s29  ;;  %v3290_v3 = vmov 0.0   ;;  %v3292_v4 = vmov 0.0   ;;  %v3294_v5 = vmov 0.0   ;;  %v3296_v6 = vmov 0.0   ;;  %s3322_s12 = smov 0   ;;  %s3104_s24 = sphi %s3277_s24, %s348_s24   ;;  %v3100_v2 = vphi %v3275_v2, %v3917_v2   ;;  %v3096_v1 = vphi %v3273_v1, %v3916_v1  }
  0x18   : >> { %v3298_v7 = vmov 0.0   ;;  %v3300_v8 = vmov 0.0   ;;  %v3302_v9 = vmov 0.0   ;;  %v3304_v10 = vmov 0.0  }
  0x19   : >> { %v3306_v11 = vmov 0.0   ;;  %v3308_v12 = vmov 0.0   ;;  %v3310_v13 = vmov 0.0   ;;  %v3312_v14 = vmov 0.0  }
  0x1a   : >> { %v3314_v15 = vmov 0.0   ;;  %v3316_v16 = vmov 0.0   ;;  %v3318_v17 = vmov 0.0   ;;  %v3320_v18 = vmov 0.0  }
  0x1b LB: >>> { %s2654_s14 = sshll.u32 %s3172_s12, 9  ;;  %s374_s19 = sadd.s32 %s3172_s12, %s351_s10  ;;  %vm595_vm0 = vsmask.f32 7424  ;;  %vm808_vm1 = vcmask 1046528   ;;  %vm965_vm2 = vsmask.f32 6400  ;;  %s3172_s12 = sphi %s3322_s12, %s357_s12   ;;  %v3168_v18 = vphi %v3320_v18, %v3915_v18   ;;  %v3164_v17 = vphi %v3318_v17, %v3914_v17   ;;  %v3160_v16 = vphi %v3316_v16, %v3913_v16   ;;  %v3156_v15 = vphi %v3314_v15, %v3912_v15   ;;  %v3152_v14 = vphi %v3312_v14, %v3911_v14   ;;  %v3148_v13 = vphi %v3310_v13, %v3910_v13   ;;  %v3144_v12 = vphi %v3308_v12, %v3909_v12   ;;  %v3140_v11 = vphi %v3306_v11, %v3908_v11   ;;  %v3136_v10 = vphi %v3304_v10, %v3907_v10   ;;  %v3132_v9 = vphi %v3302_v9, %v3906_v9   ;;  %v3128_v8 = vphi %v3300_v8, %v3905_v8   ;;  %v3124_v7 = vphi %v3298_v7, %v3904_v7   ;;  %v3120_v6 = vphi %v3296_v6, %v3903_v6   ;;  %v3116_v5 = vphi %v3294_v5, %v3902_v5   ;;  %v3112_v4 = vphi %v3292_v4, %v3901_v4   ;;  %v3108_v3 = vphi %v3290_v3, %v3900_v3  }
  0x1c   : >>> { %s3379_s17 = scalar_lea.vmem %s3880_s1, %s2654_s14  ;;  %s2646_s20 = sshll.u32 %s374_s19, 6  ;;  %vm1156_vm3 = vcmask 1045504   ;;  %vm1313_vm4 = vsmask.f32 5376  ;;  %vm1504_vm5 = vcmask 1044480  }
  0x1d   : >>> { %v2662_v19 = vld [vmem:[%s3379_s17 + $0x38] sm:$0xff]  ;;  %v2661_v23 = vld [vmem:[%s3379_s17 + $0x30] sm:$0xff]  ;;  %v2660_v27 = vld [vmem:[%s3379_s17 + $0x28] sm:$0xff]  ;;  %s3398_s21 = scalar_lea.vmem %s3255_s13, %s2646_s20  ;;  %vm1661_vm6 = vsmask.f32 4352  ;;  %s357_s12 = sadd.s32 1, %s3172_s12  }
  0x1e   : >>> { %v2671_v20 = vld [vmem:[%s3379_s17 + $0x78] sm:$0xff]  ;;  %510 = vmatpush.bf16.msra.mxu0 %v2662_v19  ;;  %v2670_v24 = vld [vmem:[%s3379_s17 + $0x70] sm:$0xff]  ;;  %v2669_v28 = vld [vmem:[%s3379_s17 + $0x68] sm:$0xff]  ;;  %p3755_p8 = scmp.ge.s32.totalorder %s357_s12, 8  }
  0x1f   : >>> { %v2680_v21 = vld [vmem:[%s3379_s17 + $0xb8] sm:$0xff]  ;;  %715 = vmatpush.bf16.msra.mxu1 %v2671_v20  ;;  %v2679_v25 = vld [vmem:[%s3379_s17 + $0xb0] sm:$0xff]  ;;  %v2678_v29 = vld [vmem:[%s3379_s17 + $0xa8] sm:$0xff]  ;;  %s2726_s30 = sshll.u32 (%p3755_p8), %s3104_s24, 6  ;;  %vm1878_vm7 = vsmask.f32 (%p3755_p8), 256 }
  0x20   : >>> { %v2689_v22 = vld [vmem:[%s3379_s17 + $0xf8] sm:$0xff]  ;;  %880 = vmatpush.bf16.msra.mxu2 %v2680_v21  ;;  %v2688_v26 = vld [vmem:[%s3379_s17 + $0xf0] sm:$0xff]  ;;  %v2687_v30 = vld [vmem:[%s3379_s17 + $0xe8] sm:$0xff]  ;;  %s3821_s9 = scalar_lea.vmem (%p3755_p8), %s3267_s8, %s2726_s30  ;;  %vm1877_vm8 = vcmask (%p3755_p8), 1040384   ;;  %s348_s24 = sadd.s32 (%p3755_p8), 1, %s3104_s24  }
  0x21   : >>> { %1063 = vmatpush.bf16.msra.mxu3 %v2689_v22  ;;  %v2659_v31 = vld [vmem:[%s3379_s17 + $0x20] sm:$0xff]  ;;  %v2658_v39 = vld [vmem:[%s3379_s17 + $0x18] sm:$0xff]  ;;  %v3416_v43 = vld [vmem:[%s3398_s21 + $0x8] sm:$0xff]  ;;  %p345_p9 = scmp.ge.s32.totalorder (%p3755_p8), %s348_s24, 11  }
  0x22   : >>> { %511 = vmatpush.bf16.msra.mxu0 %v2661_v23  ;;  %v2668_v32 = vld [vmem:[%s3379_s17 + $0x60] sm:$0xff]  ;;  %v2667_v40 = vld [vmem:[%s3379_s17 + $0x58] sm:$0xff]  ;;  %v2657_v45 = vld [vmem:[%s3379_s17 + $0x10] sm:$0xff]  ;;  %v3425_v50 = vshll.u32 %v3416_v43, 16  ;;  %v3428_v51 = vshrl.u32 %v3416_v43, 16 }
  0x23   : >>> { %716 = vmatpush.bf16.msra.mxu1 %v2670_v24  ;;  %v3403_v33 = vld [vmem:[%s3398_s21] sm:$0xff]   ;;  %v2676_v41 = vld [vmem:[%s3379_s17 + $0x98] sm:$0xff]  ;;  %v2666_v46 = vld [vmem:[%s3379_s17 + $0x50] sm:$0xff] }
  0x24   : >>> { %881 = vmatpush.bf16.msra.mxu2 %v2679_v25  ;;  %v2677_v34 = vld [vmem:[%s3379_s17 + $0xa0] sm:$0xff]  ;;  %v3408_v36 = vunpack.c.h.b16 %v3403_v33  ;;  %v2685_v42 = vld [vmem:[%s3379_s17 + $0xd8] sm:$0xff]  ;;  %v599_v47 = vshll.u32 %v3403_v33, 16  ;;  %v2675_v48 = vld [vmem:[%s3379_s17 + $0x90] sm:$0xff]  ;;  %v597_v56 = vshrl.u32 %v3403_v33, 16  ;;  %v974_v62 = vrot.slane %v3428_v51, 1 }
  0x25   : >>> { %1064 = vmatpush.bf16.msra.mxu3 %v2688_v26  ;;  %v2686_v35 = vld [vmem:[%s3379_s17 + $0xe0] sm:$0xff]  ;;  %v2684_v49 = vld [vmem:[%s3379_s17 + $0xd0] sm:$0xff]  ;;  %v2656_v54 = vld [vmem:[%s3379_s17 + $0x8] sm:$0xff]  ;;  %v975_v63 = vrot.slane %v3425_v50, 2  ;;  %v606_v22 = vrot.slane %v3425_v50, 1  ;;  %v810_v26 = vrot.slane %v3416_v43, 1 }
  0x26   : >>> { %512 = vmatpush.bf16.msra.mxu0 %v2660_v27  ;;  %v780_v37 = vld [vmem:[%s3398_s21] sm:$0xe]  ;;  %v2665_v55 = vld [vmem:[%s3379_s17 + $0x48] sm:$0xff]  ;;  %v601_v57 = vrot.slane %v599_v47, 1  ;;  %vm1879_vm9 = vmand (%p3755_p8), %vm1877_vm8, %vm1878_vm7 }
  0x27   : >>> { %717 = vmatpush.bf16.msra.mxu1 %v2669_v28  ;;  %v804_v38 = vunpack.c.l.b16 %v780_v37  ;;  %v2674_v58 = vld [vmem:[%s3379_s17 + $0x88] sm:$0xff]  ;;  %v2655_v19 = vld [vmem:[%s3379_s17] sm:$0xff]  ;;  %v976_v28 = vor.u32 %v975_v63, %v974_v62  ;;  %v2707_v37 = vld [vmem:[%s3379_s17 + $0x178] sm:$0xff] }
  0x28   : >>> { %882 = vmatpush.bf16.msra.mxu2 %v2678_v29  ;;  %v2683_v59 = vld [vmem:[%s3379_s17 + $0xc8] sm:$0xff]  ;;  %v2664_v20 = vld [vmem:[%s3379_s17 + $0x40] sm:$0xff]  ;;  %v602_v21 = vor.u32 %v601_v57, %v597_v56  ;;  %v2716_v29 = vld [vmem:[%s3379_s17 + $0x1b8] sm:$0xff] }
  0x29   : >>> { %1065 = vmatpush.bf16.msra.mxu3 %v2687_v30  ;;  %v806_v44 = vpack.c.b16 %v3408_v36, %v804_v38  ;;  %v2673_v23 = vld [vmem:[%s3379_s17 + $0x80] sm:$0xff]  ;;  %v2698_v30 = vld [vmem:[%s3379_s17 + $0x138] sm:$0xff]  ;;  %v3451_v38 = vld [vmem:[%s3398_s21 + $0x10] sm:$0xff] }
  0x2a   : >>> { %513 = vmatpush.bf16.msra.mxu0 %v2659_v31  ;;  %v2682_v24 = vld [vmem:[%s3379_s17 + $0xc0] sm:$0xff]  ;;  %v607_v31 = vsel %vm595_vm0, %v602_v21, %v606_v22  ;;  %v2696_v47 = vld [vmem:[%s3379_s17 + $0x128] sm:$0xff] }
  0x2b   : >>> { %718 = vmatpush.bf16.msra.mxu1 %v2668_v32  ;;  %v967_v52 = vshrl.u32 %v806_v44, 16  ;;  %v970_v53 = vshll.u32 %v806_v44, 16  ;;  %v809_v25 = vrot.slane %v806_v44, 1  ;;  %v2724_v44 = vld [vmem:[%s3379_s17 + $0x1f0] sm:$0xff]  ;;  %v2695_v62 = vld [vmem:[%s3379_s17 + $0x120] sm:$0xff] }
  0x2c   : >>> { %883 = vmatpush.bf16.msra.mxu2 %v2677_v34  ;;  %v2722_v63 = vld [vmem:[%s3379_s17 + $0x1e0] sm:$0xff] }
  0x2d   : >>> { %1066 = vmatpush.bf16.msra.mxu3 %v2686_v35  ;;  %v969_v60 = vrot.slane %v967_v52, 1  ;;  %v972_v61 = vrot.slane %v970_v53, 2  ;;  %v811_v32 = vsel %vm808_vm1, %v809_v25, %v810_v26  ;;  %v2725_v35 = vld [vmem:[%s3379_s17 + $0x1f8] sm:$0xff]  ;;  %v2705_v52 = vld [vmem:[%s3379_s17 + $0x168] sm:$0xff]  ;;  %v610_v53 = vor.u32 %v3428_v51, %v606_v22  ;;  %v2704_v21 = vld [vmem:[%s3379_s17 + $0x160] sm:$0xff] }
  0x2e   : >>> { %514 = vmatpush.bf16.msra.mxu0 %v2658_v39  ;;  %v2715_v39 = vld [vmem:[%s3379_s17 + $0x1b0] sm:$0xff] }
  0x2f   : >>> { %719 = vmatpush.bf16.msra.mxu1 %v2667_v40  ;;  %v973_v27 = vor.u32 %v972_v61, %v969_v60  ;;  %v2697_v40 = vld [vmem:[%s3379_s17 + $0x130] sm:$0xff]  ;;  %v3477_v60 = vld [vmem:[%s3398_s21 + $0x18] sm:$0xff]  ;;  %v2713_v61 = vld [vmem:[%s3379_s17 + $0x1a0] sm:$0xff] }
  0x30   : >>> { %884 = vmatpush.bf16.msra.mxu2 %v2676_v41  ;;  %v3457_v41 = vshll.u32 %v3451_v38, 16 }
  0x31   : >>> { %1067 = vmatpush.bf16.msra.mxu3 %v2685_v42  ;;  %v977_v34 = vsel %vm965_vm2, %v973_v27, %v976_v28  ;;  %v3460_v42 = vshrl.u32 %v3451_v38, 16 }
  0x32   : >>> { %515 = vmatpush.bf16.msra.mxu0 %v2657_v45  ;;  %v2706_v45 = vld [vmem:[%s3379_s17 + $0x170] sm:$0xff] }
  0x33   : >>> { %720 = vmatpush.bf16.msra.mxu1 %v2666_v46  ;;  %v2714_v46 = vld [vmem:[%s3379_s17 + $0x1a8] sm:$0xff] }
  0x34   : >>> { %885 = vmatpush.bf16.msra.mxu2 %v2675_v48  ;;  %v979_v48 = vrot.slane %v3457_v41, 2 }
  0x35   : >>> { %1068 = vmatpush.bf16.msra.mxu3 %v2684_v49  ;;  %v2723_v49 = vld [vmem:[%s3379_s17 + $0x1e8] sm:$0xff] }
  0x36   : >>> { %516 = vmatpush.bf16.msra.mxu0 %v2656_v54  ;;  %v614_v54 = vrot.slane %v3457_v41, 1 }
  0x37   : >>> { %721 = vmatpush.bf16.msra.mxu1 %v2665_v55  ;;  %v812_v55 = vrot.slane %v3451_v38, 1 }
  0x38   : >>> { %886 = vmatpush.bf16.msra.mxu2 %v2674_v58  ;;  %v615_v57 = vsel %vm595_vm0, %v610_v53, %v614_v54 }
  0x39   : >>> { %1069 = vmatpush.bf16.msra.mxu3 %v2683_v59  ;;  %v813_v58 = vsel %vm808_vm1, %v810_v26, %v812_v55  ;;  %v814_v26 = vrot.slane %v3477_v60, 1 }
  0x3a   : >>> { %517 = vmatpush.bf16.msra.mxu0 %v2655_v19  ;;  %v3484_v19 = vshll.u32 %v3477_v60, 16 }
  0x3b   : >>> { %722 = vmatpush.bf16.msra.mxu1 %v2664_v20  ;;  %v3487_v20 = vshrl.u32 %v3477_v60, 16 }
  0x3c   : >>> { %887 = vmatpush.bf16.msra.mxu2 %v2673_v23  ;;  %v983_v23 = vrot.slane %v3484_v19, 2  ;;  %v622_v25 = vrot.slane %v3484_v19, 1 }
  0x3d   : >>> { %1070 = vmatpush.bf16.msra.mxu3 %v2682_v24  ;;  %518 = vmatmul.bf16.vlgmr.msra.gmra.mxu0 %v3403_v33  ;;  %v978_v33 = vrot.slane %v3460_v42, 1  ;;  %v982_v22 = vrot.slane %v3487_v20, 1  ;;  %v618_v24 = vor.u32 %v3460_v42, %v614_v54  ;;  %v3521_v54 = vld [vmem:[%s3398_s21 + $0x28] sm:$0xff] }
  0x3e   : >>> { %1228 = vmatpush.bf16.msrb.mxu0 %v2698_v30  ;;  %723 = vmatmul.bf16.vlgmr.msra.gmra.mxu1 %v607_v31  ;;  %v3499_v31 = vld [vmem:[%s3398_s21 + $0x20] sm:$0xff] }
  0x3f   : >>> { %888 = vmatmul.bf16.vlgmr.msra.gmra.mxu2 %v811_v32  ;;  %1411 = vmatpush.bf16.msrb.mxu1 %v2707_v37  ;;  %v980_v56 = vor.u32 %v979_v48, %v978_v33  ;;  %v984_v27 = vor.u32 %v983_v23, %v982_v22  ;;  %v2712_v32 = vld [vmem:[%s3379_s17 + $0x198] sm:$0xff]  ;;  %v3506_v37 = vshll.u32 %v3499_v31, 16  ;;  %v816_v33 = vrot.slane %v3499_v31, 1 }
  0x40   : >>> { %1576 = vmatpush.bf16.msrb.mxu2 %v2716_v29  ;;  %1071 = vmatmul.bf16.vlgmr.msra.gmra.mxu3 %v977_v34  ;;  %v815_v29 = vsel %vm808_vm1, %v812_v55, %v814_v26  ;;  %v2694_v34 = vld [vmem:[%s3379_s17 + $0x118] sm:$0xff]  ;;  %v2711_v55 = vld [vmem:[%s3379_s17 + $0x190] sm:$0xff]  ;;  %v818_v23 = vrot.slane %v3521_v54, 1 }
  0x41   : >>> { %1759 = vmatpush.bf16.msrb.mxu3 %v2725_v35  ;;  %v981_v59 = vsel %vm965_vm2, %v976_v28, %v980_v56  ;;  %v623_v28 = vsel %vm595_vm0, %v618_v24, %v622_v25  ;;  %v985_v30 = vsel %vm965_vm2, %v980_v56, %v984_v27  ;;  %v2721_v35 = vld [vmem:[%s3379_s17 + $0x1d8] sm:$0xff]  ;;  %v2693_v56 = vld [vmem:[%s3379_s17 + $0x110] sm:$0xff] }
  0x42   : >>> { %1229 = vmatpush.bf16.msrb.mxu0 %v2697_v40  ;;  %v2703_v40 = vld [vmem:[%s3379_s17 + $0x158] sm:$0xff] }
  0x43   : >>> { %1412 = vmatpush.bf16.msrb.mxu1 %v2706_v45  ;;  %v987_v45 = vrot.slane %v3506_v37, 2 }
  0x44   : >>> { %1577 = vmatpush.bf16.msrb.mxu2 %v2715_v39  ;;  %v3509_v39 = vshrl.u32 %v3499_v31, 16 }
  0x45   : >>> { %1760 = vmatpush.bf16.msrb.mxu3 %v2724_v44 }
  0x46   : >>> { %1230 = vmatpush.bf16.msrb.mxu0 %v2696_v47  ;;  %v986_v44 = vrot.slane %v3509_v39, 1  ;;  %v630_v47 = vrot.slane %v3506_v37, 1 }
  0x47   : >>> { %1413 = vmatpush.bf16.msrb.mxu1 %v2705_v52  ;;  %v817_v52 = vsel %vm808_vm1, %v814_v26, %v816_v33  ;;  %v819_v26 = vsel %vm808_vm1, %v816_v33, %v818_v23 }
  0x48   : >>> { %1578 = vmatpush.bf16.msrb.mxu2 %v2714_v46  ;;  %v626_v46 = vor.u32 %v3487_v20, %v622_v25  ;;  %v988_v48 = vor.u32 %v987_v45, %v986_v44 }
  0x49   : >>> { %1761 = vmatpush.bf16.msrb.mxu3 %v2723_v49 }
  0x4a   : >>> { %1231 = vmatpush.bf16.msrb.mxu0 %v2695_v62  ;;  %v631_v49 = vsel %vm595_vm0, %v626_v46, %v630_v47  ;;  %v989_v53 = vsel %vm965_vm2, %v984_v27, %v988_v48  ;;  %v392_v46 = vld [vmem:[%s3398_s21 + $0x38] sm:$0xf] }
  0x4b   : >>> { %1414 = vmatpush.bf16.msrb.mxu1 %v2704_v21  ;;  %v634_v21 = vor.u32 %v3509_v39, %v630_v47  ;;  %v781_v47 = vld [vmem:[%s3398_s21 + $0x3c] sm:$0x3] }
  0x4c   : >>> { %1579 = vmatpush.bf16.msrb.mxu2 %v2713_v61  ;;  %v2702_v61 = vld [vmem:[%s3379_s17 + $0x150] sm:$0xff] }
  0x4d   : >>> { %523 = vmatmul.bf16.gmra.mxu0 %v3416_v43  ;;  %1762 = vmatpush.bf16.msrb.mxu3 %v2722_v63 }
  0x4e   : >>> { %728 = vmatmul.bf16.gmra.mxu1 %v615_v57  ;;  %1232 = vmatpush.bf16.msrb.mxu0 %v2694_v34  ;;  %v2720_v57 = vld [vmem:[%s3379_s17 + $0x1d0] sm:$0xff] }
  0x4f   : >>> { %893 = vmatmul.bf16.gmra.mxu2 %v813_v58  ;;  %1415 = vmatpush.bf16.msrb.mxu1 %v2703_v40  ;;  %v3528_v58 = vshll.u32 %v3521_v54, 16  ;;  %v2701_v40 = vld [vmem:[%s3379_s17 + $0x148] sm:$0xff] }
  0x50   : >>> { %1076 = vmatmul.bf16.gmra.mxu3 %v981_v59  ;;  %1580 = vmatpush.bf16.msrb.mxu2 %v2712_v32  ;;  %v3531_v59 = vshrl.u32 %v3521_v54, 16  ;;  %v2719_v32 = vld [vmem:[%s3379_s17 + $0x1c8] sm:$0xff] }
  0x51   : >>> { %1763 = vmatpush.bf16.msrb.mxu3 %v2721_v35  ;;  %v991_v63 = vrot.slane %v3528_v58, 2  ;;  %v638_v22 = vrot.slane %v3528_v58, 1 }
  0x52   : >>> { %1233 = vmatpush.bf16.msrb.mxu0 %v2693_v56  ;;  %v990_v62 = vrot.slane %v3531_v59, 1  ;;  %v805_v56 = vunpack.c.l.b16 %v781_v47 }
  0x53   : >>> { %1416 = vmatpush.bf16.msrb.mxu1 %v2702_v61  ;;  %v639_v25 = vsel %vm595_vm0, %v634_v21, %v638_v22  ;;  %v642_v33 = vor.u32 %v3531_v59, %v638_v22 }
  0x54   : >>> { %1581 = vmatpush.bf16.msrb.mxu2 %v2711_v55  ;;  %v992_v24 = vor.u32 %v991_v63, %v990_v62  ;;  %v3564_v55 = vunpack.c.l.b16 %v392_v46 }
  0x55   : >>> { %1764 = vmatpush.bf16.msrb.mxu3 %v2720_v57 }
  0x56   : >>> { %v993_v27 = vsel %vm965_vm2, %v988_v48, %v992_v24  ;;  %v807_v21 = vpack.c.b16 %v805_v56, %v3564_v55 }
  0x57   : >>> { %1417 = vmatpush.bf16.msrb.mxu1 %v2701_v40 }
  0x58   : >>> { %v822_v46 = vrot.slane %v807_v21, 1 }
  0x59   : >>> { %1765 = vmatpush.bf16.msrb.mxu3 %v2719_v32  ;;  %v2700_v32 = vld [vmem:[%s3379_s17 + $0x140] sm:$0xff] }
  0x5b   : >>> { %1418 = vmatpush.bf16.msrb.mxu1 %v2700_v32 }
  0x5d   : >>> { %528 = vmatmul.bf16.gmra.mxu0 %v3451_v38 }
  0x5e   : >>> { %733 = vmatmul.bf16.gmra.mxu1 %v623_v28  ;;  %v3543_v28 = vld [vmem:[%s3398_s21 + $0x30] sm:$0xff] }
  0x5f   : >>> { %898 = vmatmul.bf16.gmra.mxu2 %v815_v29  ;;  %v2710_v29 = vld [vmem:[%s3379_s17 + $0x188] sm:$0xff]  ;;  %v3550_v34 = vshll.u32 %v3543_v28, 16  ;;  %v3553_v35 = vshrl.u32 %v3543_v28, 16 }
  0x60   : >>> { %1081 = vmatmul.bf16.gmra.mxu3 %v985_v30  ;;  %v2692_v30 = vld [vmem:[%s3379_s17 + $0x108] sm:$0xff]  ;;  %1582 = vmatpush.bf16.msrb.mxu2 %v2710_v29  ;;  %v999_v29 = vshrl.u32 %v807_v21, 16 }
  0x61   : >>> { %1234 = vmatpush.bf16.msrb.mxu0 %v2692_v30  ;;  %v994_v44 = vrot.slane %v3553_v35, 1  ;;  %v995_v45 = vrot.slane %v3550_v34, 2  ;;  %v646_v48 = vrot.slane %v3550_v34, 1  ;;  %v1002_v30 = vshll.u32 %v807_v21, 16 }
  0x63   : >>> { %v647_v57 = vsel %vm595_vm0, %v642_v33, %v646_v48  ;;  %v1004_v40 = vrot.slane %v1002_v30, 2 }
  0x6d   : >>> { %533 = vmatmul.bf16.gmra.mxu0 %v3477_v60 }
  0x6e   : >>> { %738 = vmatmul.bf16.gmra.mxu1 %v631_v49  ;;  %v820_v49 = vrot.slane %v3543_v28, 1 }
  0x6f   : >>> { %903 = vmatmul.bf16.gmra.mxu2 %v817_v52  ;;  %v996_v52 = vor.u32 %v995_v45, %v994_v44  ;;  %v650_v44 = vor.u32 %v3553_v35, %v646_v48 }
  0x70   : >>> { %1086 = vmatmul.bf16.gmra.mxu3 %v989_v53  ;;  %v393_v53 = vld [vmem:[%s3398_s21 + $0x3c] sm:$0x1]  ;;  %v821_v62 = vsel %vm808_vm1, %v818_v23, %v820_v49 }
  0x71   : >>> { %v445_v61 = vunpack.c.l.b16 %v393_v53  ;;  %v997_v63 = vsel %vm965_vm2, %v992_v24, %v996_v52  ;;  %v1001_v24 = vrot.slane %v999_v29, 1  ;;  %v823_v53 = vsel %vm808_vm1, %v820_v49, %v822_v46 }
  0x73   : >>> { %v453_v22 = vpack.c.b16 %v445_v61, %v3564_v55  ;;  %v1005_v47 = vor.u32 %v1004_v40, %v1001_v24  ;;  %v1476_v61 = vld [vmem:[%s3398_s21] sm:$0x8]  ;;  %v1323_v24 = vrot.slane %v3425_v50, 3 }
  0x75   : >>> { %v652_v23 = vshll.u32 %v453_v22, 16  ;;  %v1006_v56 = vsel %vm965_vm2, %v996_v52, %v1005_v47 }
  0x77   : >>> { %v654_v45 = vrot.slane %v652_v23, 1  ;;  %v1322_v23 = vrot.slane %v3428_v51, 2 }
  0x79   : >>> { %v655_v33 = vsel %vm595_vm0, %v650_v44, %v654_v45 }
  0x7d   : >>> { %538 = vmatmul.bf16.gmra.mxu0 %v3499_v31 }
  0x7e   : >>> { %743 = vmatmul.bf16.gmra.mxu1 %v639_v25  ;;  %v2709_v25 = vld [vmem:[%s3379_s17 + $0x180] sm:$0xff] }
  0x7f   : >>> { %908 = vmatmul.bf16.gmra.mxu2 %v819_v26  ;;  %v2691_v26 = vld [vmem:[%s3379_s17 + $0x100] sm:$0xff] }
  0x80   : >>> { %1091 = vmatmul.bf16.gmra.mxu3 %v993_v27  ;;  %v2718_v27 = vld [vmem:[%s3379_s17 + $0x1c0] sm:$0xff]  ;;  %1583 = vmatpush.bf16.msrb.mxu2 %v2709_v25  ;;  %v1500_v25 = vunpack.c.l.b16 %v1476_v61 }
  0x81   : >>> { %1235 = vmatpush.bf16.msrb.mxu0 %v2691_v26  ;;  %1766 = vmatpush.bf16.msrb.mxu3 %v2718_v27 }
  0x82   : >>> { %v1502_v26 = vpack.c.b16 %v3408_v36, %v1500_v25 }
  0x84   : >>> { %v1663_v27 = vshrl.u32 %v1502_v26, 16  ;;  %v1666_v29 = vshll.u32 %v1502_v26, 16 }
  0x86   : >>> { %v1665_v40 = vrot.slane %v1663_v27, 3  ;;  %v1668_v44 = vrot.slane %v1666_v29, 4 }
  0x8d   : >>> { %543 = vmatmul.bf16.gmra.mxu0 %v3521_v54 }
  0x8e   : >>> { %748 = vmatmul.bf16.gmra.mxu1 %v647_v57  ;;  %v1128_v57 = vld [vmem:[%s3398_s21] sm:$0xc] }
  0x8f   : >>> { %913 = vmatmul.bf16.gmra.mxu2 %v821_v62  ;;  %v656_v62 = vshrl.u32 %v453_v22, 16 }
  0x90   : >>> { %1096 = vmatmul.bf16.gmra.mxu3 %v997_v63  ;;  %v1152_v63 = vunpack.c.l.b16 %v1128_v57  ;;  %v1669_v57 = vor.u32 %v1668_v44, %v1665_v40 }
  0x91   : >>> { %v658_v48 = vor.u32 %v656_v62, %v654_v45  ;;  %v1670_v45 = vrot.slane %v3428_v51, 3 }
  0x92   : >>> { %v1154_v21 = vpack.c.b16 %v3408_v36, %v1152_v63  ;;  %v1671_v36 = vrot.slane %v3425_v50, 4 }
  0x94   : >>> { %v1315_v49 = vshrl.u32 %v1154_v21, 16  ;;  %v1318_v52 = vshll.u32 %v1154_v21, 16  ;;  %v1672_v61 = vor.u32 %v1671_v36, %v1670_v45  ;;  %v1160_v45 = vrot.slane %v3451_v38, 2 }
  0x96   : >>> { %v1317_v30 = vrot.slane %v1315_v49, 2  ;;  %v1320_v32 = vrot.slane %v1318_v52, 3 }
  0x9d   : >>> { %548 = vmatmul.bf16.gmra.mxu0 %v3543_v28 }
  0x9e   : >>> { %753 = vmatmul.bf16.gmra.mxu1 %v655_v33  ;;  %v1324_v33 = vor.u32 %v1323_v24, %v1322_v23  ;;  %v1674_v23 = vrot.slane %v3460_v42, 3  ;;  %v1675_v24 = vrot.slane %v3457_v41, 4 }
  0x9f   : >>> { %918 = vmatmul.bf16.gmra.mxu2 %v823_v53  ;;  %v1505_v53 = vrot.slane %v1502_v26, 3 }
  0xa0   : >>> { %1101 = vmatmul.bf16.gmra.mxu3 %v1006_v56  ;;  %v1506_v56 = vrot.slane %v3416_v43, 3 }
  0xad   : >>> { %553 = vmatmul.bf16.gmra.mxu0 %v453_v22  ;;  %v1157_v22 = vrot.slane %v1154_v21, 2  ;;  %v1673_v21 = vsel %vm1661_vm6, %v1669_v57, %v1672_v61 }
  0xae   : >>> { %758 = vmatmul.bf16.gmra.mxu1 %v658_v48  ;;  %v1507_v48 = vsel %vm1504_vm5, %v1505_v53, %v1506_v56 }
  0xaf   : >>> { %923 = vmatmul.bf16.gmra.mxu2 %v822_v46  ;;  %v1158_v46 = vrot.slane %v3416_v43, 2 }
  0xb0   : >>> { %1106 = vmatmul.bf16.gmra.mxu3 %v1005_v47  ;;  %v1321_v47 = vor.u32 %v1320_v32, %v1317_v30  ;;  %v1326_v30 = vrot.slane %v3460_v42, 2  ;;  %v1327_v32 = vrot.slane %v3457_v41, 3 }
  0xb1   : >>> { %v1159_v51 = vsel %vm1156_vm3, %v1157_v22, %v1158_v46  ;;  %v1508_v22 = vrot.slane %v3451_v38, 3 }
  0xb2   : >>> { %v1325_v50 = vsel %vm1313_vm4, %v1321_v47, %v1324_v33  ;;  %v1328_v36 = vor.u32 %v1327_v32, %v1326_v30  ;;  %v1676_v47 = vor.u32 %v1675_v24, %v1674_v23  ;;  %v1162_v30 = vrot.slane %v3477_v60, 2 }
  0xb4   : >>> { %v1329_v42 = vsel %vm1313_vm4, %v1324_v33, %v1328_v36  ;;  %v1330_v33 = vrot.slane %v3487_v20, 2 }
  0xba   : >>> { %v519_v62 = vpop.f32.mrf.mxu0 }
  0xbb   : >>> { %v724_v63 = vpop.f32.mrf.mxu1  ;;  %v559_v25 = vadd.f32 %v3168_v18, %v519_v62 }
  0xbd   : >>> { %v764_v49 = vadd.f32 %v724_v63, %v559_v25  ;;  %1236 = vmatmul.bf16.vlgmr.msrb.gmra.mxu0 %v1159_v51  ;;  %v1677_v25 = vsel %vm1661_vm6, %v1672_v61, %v1676_v47  ;;  %v1678_v61 = vrot.slane %v3487_v20, 3 }
  0xbe   : >>> { %1419 = vmatmul.bf16.vlgmr.msrb.gmra.mxu1 %v1325_v50  ;;  %v1509_v50 = vsel %vm1504_vm5, %v1506_v56, %v1508_v22 }
  0xbf   : >>> { %1584 = vmatmul.bf16.vlgmr.msrb.gmra.mxu2 %v1507_v48 }
  0xc0   : >>> { %1767 = vmatmul.bf16.vlgmr.msrb.gmra.mxu3 %v1673_v21 }
  0xc2   : >>> { %v889_v43 = vpop.f32.mrf.mxu2  ;;  %v521_v27 = vpop.f32.mrf.mxu0 }
  0xc3   : >>> { %v1072_v26 = vpop.f32.mrf.mxu3  ;;  %v929_v52 = vadd.f32 %v889_v43, %v764_v49  ;;  %v726_v29 = vpop.f32.mrf.mxu1  ;;  %v560_v18 = vadd.f32 %v3164_v17, %v521_v27  ;;  %v1161_v17 = vsel %vm1156_vm3, %v1158_v46, %v1160_v45 }
  0xc5   : >>> { %v3601_v40 = vadd.f32 %v1072_v26, %v929_v52  ;;  %v765_v44 = vadd.f32 %v726_v29, %v560_v18  ;;  %v1679_v52 = vrot.slane %v3484_v19, 4  ;;  %v1510_v18 = vrot.slane %v3477_v60, 3 }
  0xc7   : >>> { %v1680_v23 = vor.u32 %v1679_v52, %v1678_v61 }
  0xca   : >>> { %v891_v53 = vpop.f32.mrf.mxu2  ;;  %v524_v63 = vpop.f32.mrf.mxu0 }
  0xcb   : >>> { %v1074_v57 = vpop.f32.mrf.mxu3  ;;  %v930_v62 = vadd.f32 %v891_v53, %v765_v44  ;;  %v729_v51 = vpop.f32.mrf.mxu1  ;;  %v561_v41 = vadd.f32 %v3160_v16, %v524_v63  ;;  %v1331_v16 = vrot.slane %v3484_v19, 3  ;;  %v1511_v63 = vsel %vm1504_vm5, %v1508_v22, %v1510_v18 }
  0xcd   : >>> { %v3610_v48 = vadd.f32 %v1074_v57, %v930_v62  ;;  %v766_v21 = vadd.f32 %v729_v51, %v561_v41  ;;  %1241 = vmatmul.bf16.gmra.mxu0 %v1161_v17  ;;  %v1332_v32 = vor.u32 %v1331_v16, %v1330_v33  ;;  %v1681_v51 = vsel %vm1661_vm6, %v1676_v47, %v1680_v23 }
  0xce   : >>> { %1424 = vmatmul.bf16.gmra.mxu1 %v1329_v42  ;;  %v1682_v47 = vrot.slane %v3509_v39, 3 }
  0xcf   : >>> { %1589 = vmatmul.bf16.gmra.mxu2 %v1509_v50  ;;  %v1333_v20 = vsel %vm1313_vm4, %v1328_v36, %v1332_v32  ;;  %v1334_v36 = vrot.slane %v3509_v39, 2 }
  0xd0   : >>> { %1772 = vmatmul.bf16.gmra.mxu3 %v1677_v25 }
  0xd2   : >>> { %v894_v38 = vpop.f32.mrf.mxu2  ;;  %v526_v26 = vpop.f32.mrf.mxu0 }
  0xd3   : >>> { %v1077_v49 = vpop.f32.mrf.mxu3  ;;  %v931_v43 = vadd.f32 %v894_v38, %v766_v21  ;;  %v731_v46 = vpop.f32.mrf.mxu1  ;;  %v562_v56 = vadd.f32 %v3156_v15, %v526_v26  ;;  %v1163_v15 = vsel %vm1156_vm3, %v1160_v45, %v1162_v30  ;;  %v1683_v21 = vrot.slane %v3506_v37, 4 }
  0xd5   : >>> { %v3617_v27 = vadd.f32 %v1077_v49, %v931_v43  ;;  %v767_v29 = vadd.f32 %v731_v46, %v562_v56  ;;  %v1164_v43 = vrot.slane %v3499_v31, 2  ;;  %v1512_v46 = vrot.slane %v3499_v31, 3 }
  0xd6   : >>> { %v1684_v33 = vor.u32 %v1683_v21, %v1682_v47 }
  0xda   : >>> { %v896_v24 = vpop.f32.mrf.mxu2  ;;  %v529_v57 = vpop.f32.mrf.mxu0 }
  0xdb   : >>> { %v1079_v44 = vpop.f32.mrf.mxu3  ;;  %v932_v53 = vadd.f32 %v896_v24, %v767_v29  ;;  %v734_v62 = vpop.f32.mrf.mxu1  ;;  %v563_v19 = vadd.f32 %v3152_v14, %v529_v57  ;;  %v1335_v14 = vrot.slane %v3506_v37, 3  ;;  %v1513_v24 = vsel %vm1504_vm5, %v1510_v18, %v1512_v46 }
  0xdd   : >>> { %v3626_v17 = vadd.f32 %v1079_v44, %v932_v53  ;;  %v768_v42 = vadd.f32 %v734_v62, %v563_v19  ;;  %1246 = vmatmul.bf16.gmra.mxu0 %v1163_v15  ;;  %v1336_v26 = vor.u32 %v1335_v14, %v1334_v36  ;;  %v1685_v44 = vsel %vm1661_vm6, %v1680_v23, %v1684_v33 }
  0xde   : >>> { %1429 = vmatmul.bf16.gmra.mxu1 %v1333_v20  ;;  %v1686_v23 = vrot.slane %v3531_v59, 3  ;;  %v1687_v19 = vrot.slane %v3528_v58, 4 }
  0xdf   : >>> { %1594 = vmatmul.bf16.gmra.mxu2 %v1511_v63  ;;  %v1337_v39 = vsel %vm1313_vm4, %v1332_v32, %v1336_v26  ;;  %v1338_v32 = vrot.slane %v3531_v59, 2 }
  0xe0   : >>> { %1777 = vmatmul.bf16.gmra.mxu3 %v1681_v51 }
  0xe2   : >>> { %v899_v60 = vpop.f32.mrf.mxu2  ;;  %v531_v25 = vpop.f32.mrf.mxu0 }
  0xe3   : >>> { %v1082_v41 = vpop.f32.mrf.mxu3  ;;  %v933_v50 = vadd.f32 %v899_v60, %v768_v42  ;;  %v736_v45 = vpop.f32.mrf.mxu1  ;;  %v564_v22 = vadd.f32 %v3148_v13, %v531_v25  ;;  %v1165_v13 = vsel %vm1156_vm3, %v1162_v30, %v1164_v43  ;;  %v1166_v42 = vrot.slane %v3521_v54, 2 }
  0xe5   : >>> { %v3633_v38 = vadd.f32 %v1082_v41, %v933_v50  ;;  %v769_v49 = vadd.f32 %v736_v45, %v564_v22  ;;  %v1514_v41 = vrot.slane %v3521_v54, 3  ;;  %v1688_v50 = vor.u32 %v1687_v19, %v1686_v23 }
  0xe7   : >>> { %v1515_v47 = vsel %vm1504_vm5, %v1512_v46, %v1514_v41  ;;  %v1689_v21 = vsel %vm1661_vm6, %v1684_v33, %v1688_v50  ;;  %v1343_v46 = vrot.slane %v3550_v34, 3 }
  0xea   : >>> { %v901_v16 = vpop.f32.mrf.mxu2  ;;  %v534_v52 = vpop.f32.mrf.mxu0 }
  0xeb   : >>> { %v1084_v56 = vpop.f32.mrf.mxu3  ;;  %v934_v61 = vadd.f32 %v901_v16, %v769_v49  ;;  %v739_v29 = vpop.f32.mrf.mxu1  ;;  %v565_v37 = vadd.f32 %v3144_v12, %v534_v52  ;;  %v1339_v12 = vrot.slane %v3528_v58, 3  ;;  %v1690_v52 = vrot.slane %v3553_v35, 3 }
  0xed   : >>> { %v3642_v53 = vadd.f32 %v1084_v56, %v934_v61  ;;  %v770_v57 = vadd.f32 %v739_v29, %v565_v37  ;;  %1251 = vmatmul.bf16.gmra.mxu0 %v1165_v13  ;;  %v1340_v60 = vor.u32 %v1339_v12, %v1338_v32  ;;  %v1691_v29 = vrot.slane %v3550_v34, 4  ;;  %v1129_v13 = vld [vmem:[%s3398_s21 + $0x3c] sm:$0x7] }
  0xee   : >>> { %1434 = vmatmul.bf16.gmra.mxu1 %v1337_v39  ;;  %v1477_v37 = vld [vmem:[%s3398_s21 + $0x3c] sm:$0xf] }
  0xef   : >>> { %1599 = vmatmul.bf16.gmra.mxu2 %v1513_v24  ;;  %v1341_v59 = vsel %vm1313_vm4, %v1336_v26, %v1340_v60 }
  0xf0   : >>> { %1782 = vmatmul.bf16.gmra.mxu3 %v1685_v44  ;;  %v1168_v44 = vrot.slane %v3543_v28, 2 }
  0xf2   : >>> { %v904_v31 = vpop.f32.mrf.mxu2  ;;  %v536_v20 = vpop.f32.mrf.mxu0  ;;  %v1169_v34 = vsel %vm1156_vm3, %v1166_v42, %v1168_v44 }
  0xf3   : >>> { %v1087_v62 = vpop.f32.mrf.mxu3  ;;  %v935_v15 = vadd.f32 %v904_v31, %v770_v57  ;;  %v741_v30 = vpop.f32.mrf.mxu1  ;;  %v566_v18 = vadd.f32 %v3140_v11, %v536_v20  ;;  %v1167_v11 = vsel %vm1156_vm3, %v1164_v43, %v1166_v42  ;;  %v1153_v31 = vunpack.c.l.b16 %v1129_v13 }
  0xf4   : >>> { %v1501_v20 = vunpack.c.l.b16 %v1477_v37 }
  0xf5   : >>> { %v3649_v63 = vadd.f32 %v1087_v62, %v935_v15  ;;  %v771_v51 = vadd.f32 %v741_v30, %v566_v18  ;;  %v1516_v62 = vrot.slane %v3543_v28, 3  ;;  %v1692_v15 = vor.u32 %v1691_v29, %v1690_v52 }
  0xf6   : >>> { %v3674_v23 = vpack.c.b16 %v1153_v31, %v3564_v55 }
  0xf7   : >>> { %v1693_v28 = vsel %vm1661_vm6, %v1688_v50, %v1692_v15 }
  0xf8   : >>> { %v1347_v42 = vshrl.u32 %v3674_v23, 16 }
  0xfa   : >>> { %v906_v25 = vpop.f32.mrf.mxu2  ;;  %v539_v14 = vpop.f32.mrf.mxu0 }
  0xfb   : >>> { %v1089_v45 = vpop.f32.mrf.mxu3  ;;  %v936_v36 = vadd.f32 %v906_v25, %v771_v51  ;;  %v744_v22 = vpop.f32.mrf.mxu1  ;;  %v567_v58 = vadd.f32 %v3136_v10, %v539_v14  ;;  %v1342_v10 = vrot.slane %v3553_v35, 2  ;;  %v1517_v51 = vsel %vm1504_vm5, %v1514_v41, %v1516_v62 }
  0xfc   : >>> { %v1503_v25 = vpack.c.b16 %v1501_v20, %v3564_v55 }
  0xfd   : >>> { %v3658_v49 = vadd.f32 %v1089_v45, %v936_v36  ;;  %v772_v54 = vadd.f32 %v744_v22, %v567_v58  ;;  %1256 = vmatmul.bf16.gmra.mxu0 %v1167_v11  ;;  %v1344_v57 = vor.u32 %v1343_v46, %v1342_v10  ;;  %v1349_v58 = vrot.slane %v1347_v42, 2 }
  0xfe   : >>> { %1439 = vmatmul.bf16.gmra.mxu1 %v1341_v59  ;;  %v1695_v14 = vshrl.u32 %v1503_v25, 16  ;;  %v1698_v22 = vshll.u32 %v1503_v25, 16 }
  0xff   : >>> { %1604 = vmatmul.bf16.gmra.mxu2 %v1515_v47  ;;  %v1345_v18 = vsel %vm1313_vm4, %v1340_v60, %v1344_v57  ;;  %v1350_v60 = vshll.u32 %v3674_v23, 16 }
 0x100   : >>> { %1787 = vmatmul.bf16.gmra.mxu3 %v1689_v21  ;;  %v1697_v21 = vrot.slane %v1695_v14, 3 }
 0x101   : >>> { %v1352_v55 = vrot.slane %v1350_v60, 3 }
 0x102   : >>> { %v909_v16 = vpop.f32.mrf.mxu2  ;;  %v541_v61 = vpop.f32.mrf.mxu0 }
 0x103   : >>> { %v1092_v56 = vpop.f32.mrf.mxu3  ;;  %v937_v43 = vadd.f32 %v909_v16, %v772_v54  ;;  %v746_v26 = vpop.f32.mrf.mxu1  ;;  %v568_v33 = vadd.f32 %v3132_v9, %v541_v61  ;;  %v1700_v54 = vrot.slane %v1698_v22, 4  ;;  %v1353_v61 = vor.u32 %v1352_v55, %v1349_v58 }
 0x105   : >>> { %v3666_v39 = vadd.f32 %v1092_v56, %v937_v43  ;;  %v773_v24 = vadd.f32 %v746_v26, %v568_v33  ;;  %v1170_v43 = vrot.slane %v3674_v23, 2  ;;  %v1518_v26 = vrot.slane %v1503_v25, 3 }
 0x106   : >>> { %v1701_v10 = vor.u32 %v1700_v54, %v1697_v21 }
 0x107   : >>> { %v1171_v37 = vsel %vm1156_vm3, %v1168_v44, %v1170_v43  ;;  %v1519_v31 = vsel %vm1504_vm5, %v1516_v62, %v1518_v26 }
 0x108   : >>> { %v1702_v20 = vsel %vm1661_vm6, %v1692_v15, %v1701_v10 }
 0x10a   : >>> { %v911_v30 = vpop.f32.mrf.mxu2  ;;  %v544_v12 = vpop.f32.mrf.mxu0 }
 0x10b   : >>> { %v1094_v32 = vpop.f32.mrf.mxu3  ;;  %v938_v9 = vadd.f32 %v911_v30, %v773_v24  ;;  %v749_v35 = vpop.f32.mrf.mxu1  ;;  %v569_v19 = vadd.f32 %v3128_v8, %v544_v12  ;;  %v1354_v24 = vsel %vm1313_vm4, %v1344_v57, %v1353_v61 }
 0x10d   : >>> { %v3680_v45 = vadd.f32 %v1094_v32, %v938_v9  ;;  %v774_v36 = vadd.f32 %v749_v35, %v569_v19  ;;  %1261 = vmatmul.bf16.gmra.mxu0 %v1169_v34 }
 0x10e   : >>> { %1444 = vmatmul.bf16.gmra.mxu1 %v1345_v18 }
 0x10f   : >>> { %1609 = vmatmul.bf16.gmra.mxu2 %v1517_v51 }
 0x110   : >>> { %1792 = vmatmul.bf16.gmra.mxu3 %v1693_v28 }
 0x112   : >>> { %v914_v8 = vpop.f32.mrf.mxu2  ;;  %v546_v59 = vpop.f32.mrf.mxu0 }
 0x113   : >>> { %v1097_v11 = vpop.f32.mrf.mxu3  ;;  %v939_v41 = vadd.f32 %v914_v8, %v774_v36  ;;  %v751_v50 = vpop.f32.mrf.mxu1  ;;  %v570_v47 = vadd.f32 %v3124_v7, %v546_v59 }
 0x115   : >>> { %v3685_v16 = vadd.f32 %v1097_v11, %v939_v41  ;;  %v775_v56 = vadd.f32 %v751_v50, %v570_v47 }
 0x11a   : >>> { %v916_v46 = vpop.f32.mrf.mxu2  ;;  %v549_v29 = vpop.f32.mrf.mxu0 }
 0x11b   : >>> { %v1099_v33 = vpop.f32.mrf.mxu3  ;;  %v940_v52 = vadd.f32 %v916_v46, %v775_v56  ;;  %v754_v13 = vpop.f32.mrf.mxu1  ;;  %v571_v7 = vadd.f32 %v3120_v6, %v549_v29 }
 0x11d   : >>> { %v3693_v30 = vadd.f32 %v1099_v33, %v940_v52  ;;  %v776_v32 = vadd.f32 %v754_v13, %v571_v7  ;;  %1266 = vmatmul.bf16.gmra.mxu0 %v1171_v37 }
 0x11e   : >>> { %1449 = vmatmul.bf16.gmra.mxu1 %v1354_v24 }
 0x11f   : >>> { %1614 = vmatmul.bf16.gmra.mxu2 %v1519_v31 }
 0x120   : >>> { %1797 = vmatmul.bf16.gmra.mxu3 %v1702_v20 }
 0x122   : >>> { %v919_v9 = vpop.f32.mrf.mxu2  ;;  %v551_v34 = vpop.f32.mrf.mxu0 }
 0x123   : >>> { %v1102_v12 = vpop.f32.mrf.mxu3  ;;  %v941_v35 = vadd.f32 %v919_v9, %v776_v32  ;;  %v756_v44 = vpop.f32.mrf.mxu1  ;;  %v572_v57 = vadd.f32 %v3116_v5, %v551_v34 }
 0x125   : >>> { %v3696_v18 = vadd.f32 %v1102_v12, %v941_v35  ;;  %v777_v6 = vadd.f32 %v756_v44, %v572_v57 }
 0x12a   : >>> { %v921_v62 = vpop.f32.mrf.mxu2  ;;  %v554_v19 = vpop.f32.mrf.mxu0 }
 0x12b   : >>> { %v1104_v23 = vpop.f32.mrf.mxu3  ;;  %v942_v15 = vadd.f32 %v921_v62, %v777_v6  ;;  %v759_v51 = vpop.f32.mrf.mxu1  ;;  %v573_v28 = vadd.f32 %v3112_v4, %v554_v19 }
 0x12d   : >>> { %v3699_v25 = vadd.f32 %v1104_v23, %v942_v15  ;;  %v778_v36 = vadd.f32 %v759_v51, %v573_v28  ;;  %1271 = vmatmul.bf16.gmra.mxu0 %v1170_v43 }
 0x12e   : >>> { %1454 = vmatmul.bf16.gmra.mxu1 %v1353_v61 }
 0x12f   : >>> { %1619 = vmatmul.bf16.gmra.mxu2 %v1518_v26 }
 0x130   : >>> { %1802 = vmatmul.bf16.gmra.mxu3 %v1701_v10 }
 0x132   : >>> { %v924_v42 = vpop.f32.mrf.mxu2  ;;  %v556_v14 = vpop.f32.mrf.mxu0 }
 0x133   : >>> { %v1107_v60 = vpop.f32.mrf.mxu3  ;;  %v943_v5 = vadd.f32 %v924_v42, %v778_v36  ;;  %v761_v22 = vpop.f32.mrf.mxu1  ;;  %v574_v8 = vadd.f32 %v3108_v3, %v556_v14 }
 0x135   : >>> { %v3702_v11 = vadd.f32 %v1107_v60, %v943_v5  ;;  %v779_v41 = vadd.f32 %v761_v22, %v574_v8 }
 0x13a   : >>> { %v926_v59 = vpop.f32.mrf.mxu2  ;;  %v1237_v58 = vpop.f32.mrf.mxu0 }
 0x13b   : >>> { %v1109_v50 = vpop.f32.mrf.mxu3  ;;  %v944_v4 = vadd.f32 %v926_v59, %v779_v41  ;;  %v1420_v55 = vpop.f32.mrf.mxu1  ;;  %v1277_v47 = vadd.f32 %v1237_v58, %v3601_v40 }
 0x13d   : >>> { %v3705_v21 = vadd.f32 %v1109_v50, %v944_v4  ;;  %v1460_v54 = vadd.f32 %v1420_v55, %v1277_v47 }
 0x142   : >>> { %v1585_v56 = vpop.f32.mrf.mxu2  ;;  %v1239_v26 = vpop.f32.mrf.mxu0 }
 0x143   : >>> { %v1768_v43 = vpop.f32.mrf.mxu3  ;;  %v1625_v61 = vadd.f32 %v1585_v56, %v1460_v54  ;;  %v1422_v10 = vpop.f32.mrf.mxu1  ;;  %v1278_v3 = vadd.f32 %v1239_v26, %v3610_v48 }
 0x145   : >>> { %v3708_v46 = vadd.f32 %v1768_v43, %v1625_v61   ;;  %v1461_v33 = vadd.f32 %v1422_v10, %v1278_v3 }
 0x14a   : >>> { %v1587_v52 = vpop.f32.mrf.mxu2  ;;  %v1242_v37 = vpop.f32.mrf.mxu0 }
 0x14b   : >>> { %v1770_v29 = vpop.f32.mrf.mxu3  ;;  %v1626_v13 = vadd.f32 %v1587_v52, %v1461_v33  ;;  %v1425_v24 = vpop.f32.mrf.mxu1  ;;  %v1279_v40 = vadd.f32 %v1242_v37, %v3617_v27 }
 0x14d   : >>> { %v3711_v7 = vadd.f32 %v1770_v29, %v1626_v13   ;;  %v1462_v20 = vadd.f32 %v1425_v24, %v1279_v40 }
 0x14f   : >>> { %v3887_v31 = vmov %v3711_v7 }
 0x152   : >>> { %v1590_v32 = vpop.f32.mrf.mxu2  ;;  %v1244_v35 = vpop.f32.mrf.mxu0 }
 0x153   : >>> { %v1773_v9 = vpop.f32.mrf.mxu3  ;;  %v1627_v12 = vadd.f32 %v1590_v32, %v1462_v20  ;;  %v1427_v34 = vpop.f32.mrf.mxu1  ;;  %v1280_v48 = vadd.f32 %v1244_v35, %v3626_v17 }
 0x155   : >>> { %v3714_v44 = vadd.f32 %v1773_v9, %v1627_v12   ;;  %v1463_v57 = vadd.f32 %v1427_v34, %v1280_v48 }
 0x15a   : >>> { %v1592_v6 = vpop.f32.mrf.mxu2  ;;  %v1247_v15 = vpop.f32.mrf.mxu0 }
 0x15b   : >>> { %v1775_v62 = vpop.f32.mrf.mxu3  ;;  %v1628_v23 = vadd.f32 %v1592_v6, %v1463_v57  ;;  %v1430_v19 = vpop.f32.mrf.mxu1  ;;  %v1281_v27 = vadd.f32 %v1247_v15, %v3633_v38 }
 0x15d   : >>> { %v3717_v15 = vadd.f32 %v1775_v62, %v1628_v23   ;;  %v1464_v28 = vadd.f32 %v1430_v19, %v1281_v27 }
 0x15f   : >>> { %v3888_v51 = vmov %v3717_v15 }
 0x162   : >>> { %v1595_v36 = vpop.f32.mrf.mxu2  ;;  %v1249_v5 = vpop.f32.mrf.mxu0 }
 0x163   : >>> { %v1778_v42 = vpop.f32.mrf.mxu3  ;;  %v1629_v60 = vadd.f32 %v1595_v36, %v1464_v28  ;;  %v1432_v14 = vpop.f32.mrf.mxu1  ;;  %v1282_v17 = vadd.f32 %v1249_v5, %v3642_v53 }
 0x165   : >>> { %v3720_v22 = vadd.f32 %v1778_v42, %v1629_v60   ;;  %v1465_v8 = vadd.f32 %v1432_v14, %v1282_v17 }
 0x16a   : >>> { %v1597_v41 = vpop.f32.mrf.mxu2  ;;  %v1252_v4 = vpop.f32.mrf.mxu0 }
 0x16b   : >>> { %v1780_v59 = vpop.f32.mrf.mxu3  ;;  %v1630_v50 = vadd.f32 %v1597_v41, %v1465_v8  ;;  %v1435_v58 = vpop.f32.mrf.mxu1  ;;  %v1283_v38 = vadd.f32 %v1252_v4, %v3649_v63 }
 0x16d   : >>> { %v3723_v13 = vadd.f32 %v1780_v59, %v1630_v50   ;;  %v1466_v47 = vadd.f32 %v1435_v58, %v1283_v38 }
 0x16f   : >>> { %v3889_v55 = vmov %v3723_v13 }
 0x172   : >>> { %v1600_v54 = vpop.f32.mrf.mxu2  ;;  %v1254_v61 = vpop.f32.mrf.mxu0 }
 0x173   : >>> { %v1783_v56 = vpop.f32.mrf.mxu3  ;;  %v1631_v43 = vadd.f32 %v1600_v54, %v1466_v47  ;;  %v1437_v26 = vpop.f32.mrf.mxu1  ;;  %v1284_v53 = vadd.f32 %v1254_v61, %v3658_v49 }
 0x175   : >>> { %v3726_v12 = vadd.f32 %v1783_v56, %v1631_v43   ;;  %v1467_v10 = vadd.f32 %v1437_v26, %v1284_v53 }
 0x177   : >>> { %v3890_v33 = vmov %v3726_v12 }
 0x17a   : >>> { %v1602_v3 = vpop.f32.mrf.mxu2  ;;  %v1257_v37 = vpop.f32.mrf.mxu0 }
 0x17b   : >>> { %v1785_v52 = vpop.f32.mrf.mxu3  ;;  %v1632_v29 = vadd.f32 %v1602_v3, %v1467_v10  ;;  %v1440_v24 = vpop.f32.mrf.mxu1  ;;  %v1285_v63 = vadd.f32 %v1257_v37, %v3666_v39 }
 0x17d   : >>> { %v3728_v40 = vadd.f32 %v1785_v52, %v1632_v29   ;;  %v1468_v13 = vadd.f32 %v1440_v24, %v1285_v63 }
 0x182   : >>> { %v1605_v7 = vpop.f32.mrf.mxu2  ;;  %v1259_v9 = vpop.f32.mrf.mxu0 }
 0x183   : >>> { %v1788_v20 = vpop.f32.mrf.mxu3  ;;  %v1633_v32 = vadd.f32 %v1605_v7, %v1468_v13  ;;  %v1442_v35 = vpop.f32.mrf.mxu1  ;;  %v1286_v12 = vadd.f32 %v1259_v9, %v3680_v45 }
 0x185   : >>> { %v3731_v10 = vadd.f32 %v1788_v20, %v1633_v32   ;;  %v1469_v34 = vadd.f32 %v1442_v35, %v1286_v12 }
 0x187   : >>> { %v3891_v49 = vmov %v3731_v10 }
 0x18a   : >>> { %v1607_v48 = vpop.f32.mrf.mxu2  ;;  %v1262_v62 = vpop.f32.mrf.mxu0 }
 0x18b   : >>> { %v1790_v57 = vpop.f32.mrf.mxu3  ;;  %v1634_v6 = vadd.f32 %v1607_v48, %v1469_v34  ;;  %v1445_v23 = vpop.f32.mrf.mxu1  ;;  %v1287_v39 = vadd.f32 %v1262_v62, %v3685_v16 }
 0x18d   : >>> { %v3734_v9 = vadd.f32 %v1790_v57, %v1634_v6   ;;  %v1470_v15 = vadd.f32 %v1445_v23, %v1287_v39 }
 0x18f   : >>> { %v3892_v19 = vmov %v3734_v9 }
 0x192   : >>> { %v1610_v27 = vpop.f32.mrf.mxu2  ;;  %v1264_v42 = vpop.f32.mrf.mxu0 }
 0x193   : >>> { %v1793_v28 = vpop.f32.mrf.mxu3  ;;  %v1635_v36 = vadd.f32 %v1610_v27, %v1470_v15  ;;  %v1447_v60 = vpop.f32.mrf.mxu1  ;;  %v1288_v45 = vadd.f32 %v1264_v42, %v3693_v30  ;;  %v3912_v15 = vmov %v3888_v51 }
 0x195   : >>> { %v3737_v8 = vadd.f32 %v1793_v28, %v1635_v36   ;;  %v1471_v5 = vadd.f32 %v1447_v60, %v1288_v45 }
 0x197   : >>> { %v3893_v41 = vmov %v3737_v8 }
 0x19a   : >>> { %v1612_v14 = vpop.f32.mrf.mxu2  ;;  %v1267_v50 = vpop.f32.mrf.mxu0 }
 0x19b   : >>> { %v1795_v17 = vpop.f32.mrf.mxu3  ;;  %v1636_v59 = vadd.f32 %v1612_v14, %v1471_v5  ;;  %v1450_v4 = vpop.f32.mrf.mxu1  ;;  %v1289_v16 = vadd.f32 %v1267_v50, %v3696_v18  ;;  %v3911_v14 = vmov %v3720_v22 }
 0x19d   : >>> { %v3740_v7 = vadd.f32 %v1795_v17, %v1636_v59   ;;  %v1472_v38 = vadd.f32 %v1450_v4, %v1289_v16  ;;  %v3913_v16 = vmov %v3714_v44  ;;  %v3914_v17 = vmov %v3887_v31 }
 0x19f   : >>> { %v3894_v58 = vmov %v3740_v7 }
 0x1a2   : >>> { %v1615_v47 = vpop.f32.mrf.mxu2  ;;  %v1269_v43 = vpop.f32.mrf.mxu0 }
 0x1a3   : >>> { %v1798_v54 = vpop.f32.mrf.mxu3  ;;  %v1637_v56 = vadd.f32 %v1615_v47, %v1472_v38  ;;  %v1452_v61 = vpop.f32.mrf.mxu1  ;;  %v1290_v30 = vadd.f32 %v1269_v43, %v3699_v25 }
 0x1a5   : >>> { %v3743_v6 = vadd.f32 %v1798_v54, %v1637_v56   ;;  %v1473_v8 = vadd.f32 %v1452_v61, %v1290_v30 }
 0x1a7   : >>> { %v3895_v26 = vmov %v3743_v6 }
 0x1a8   : >>> { %v3903_v6 = vmov %v3895_v26 }
 0x1aa   : >>> { %v1617_v53 = vpop.f32.mrf.mxu2  ;;  %v1272_v52 = vpop.f32.mrf.mxu0 }
 0x1ab   : >>> { %v1800_v10 = vpop.f32.mrf.mxu3  ;;  %v1638_v3 = vadd.f32 %v1617_v53, %v1473_v8  ;;  %v1291_v37 = vadd.f32 %v1272_v52, %v3702_v11  ;;  %v1455_v18 = vpop.f32.mrf.mxu1  ;;  %v3905_v8 = vmov %v3893_v41  ;;  %v3908_v11 = vmov %v3728_v40 }
 0x1ad   : >>> { %v3746_v5 = vadd.f32 %v1800_v10, %v1638_v3   ;;  %v1474_v24 = vadd.f32 %v1455_v18, %v1291_v37  ;;  %v3907_v10 = vmov %v3891_v49  ;;  %v3915_v18 = vmov %v3708_v46 }
 0x1af   : >>> { %v3896_v29 = vmov %v3746_v5 }
 0x1b0   : >>> { %v3902_v5 = vmov %v3896_v29 }
 0x1b2   : >>> { %v1620_v63 = vpop.f32.mrf.mxu2  ;;  %v1274_v20 = vpop.f32.mrf.mxu0 }
 0x1b3   : >>> { %v1803_v13 = vpop.f32.mrf.mxu3  ;;  %v1639_v7 = vadd.f32 %v1620_v63, %v1474_v24  ;;  %v1292_v9 = vadd.f32 %v1274_v20, %v3705_v21  ;;  %v1457_v25 = vpop.f32.mrf.mxu1  ;;  %v1825_v21 = vperm.slane (%p3755_p8), %v3249_v0, 0 }
 0x1b5   : >>> { %v3749_v4 = vadd.f32 %v1803_v13, %v1639_v7   ;;  %v1475_v35 = vadd.f32 %v1457_v25, %v1292_v9  ;;  %v3904_v7 = vmov %v3894_v58  ;;  %v3906_v9 = vmov %v3892_v19 }
 0x1b6   : >>> { %v3910_v13 = vmov %v3889_v55  ;;  %v1827_v62 = vadd.f32 (%p3755_p8), %v1825_v21, %v3708_v46  ;;  %v1828_v23 = vadd.f32 (%p3755_p8), %v1825_v21, %v3887_v31  ;;  %v1829_v39 = vadd.f32 (%p3755_p8), %v1825_v21, %v3714_v44 }
 0x1b7   : >>> { %v3897_v32 = vmov %v3749_v4  ;;  %v1830_v27 = vadd.f32 (%p3755_p8), %v1825_v21, %v3888_v51  ;;  %v1831_v28 = vadd.f32 (%p3755_p8), %v1825_v21, %v3720_v22  ;;  %v1832_v36 = vadd.f32 (%p3755_p8), %v1825_v21, %v3889_v55 }
 0x1b8   : >>> { %v3901_v4 = vmov %v3897_v32  ;;  %v1833_v42 = vadd.f32 (%p3755_p8), %v1825_v21, %v3890_v33  ;;  %v2734_v60 = vpack.c.bf16 (%p3755_p8), %v1828_v23, %v1827_v62  ;;  %v1883_v11 = vadd.f32 (%p3755_p8), %v1828_v23, %v1827_v62 }
 0x1b9   : >> { %v1907_v6 = vmul.f32 (%p3755_p8), %v1827_v62, %v1827_v62  ;;  %v1908_v15 = vmul.f32 (%p3755_p8), %v1828_v23, %v1828_v23  ;;  %v2739_v46 = vpack.c.bf16 (%p3755_p8), %v1830_v27, %v1829_v39  ;;  %v1909_v31 = vmul.f32 (%p3755_p8), %v1829_v39, %v1829_v39 }
 0x1ba   : >>> { %v1622_v12 = vpop.f32.mrf.mxu2  ;;  %v2744_v44 = vpack.c.bf16 (%p3755_p8), %v1832_v36, %v1831_v28  ;;  %v1834_v51 = vadd.f32 (%p3755_p8), %v1825_v21, %v3728_v40  ;;  %2735 = vst [vmem:[%s3821_s9] sm:$0xff] (%p3755_p8), %v2734_v60   ;;  %v1884_v55 = vadd.f32 (%p3755_p8), %v1883_v11, %v1829_v39  ;;  %v1910_v45 = vmul.f32 (%p3755_p8), %v1830_v27, %v1830_v27 }
 0x1bb   : >>> { %v1640_v34 = vadd.f32 %v1622_v12, %v1475_v35  ;;  %v1805_v48 = vpop.f32.mrf.mxu3  ;;  %v3909_v12 = vmov %v3890_v33  ;;  %v1923_v22 = vadd.f32 (%p3755_p8), %v1908_v15, %v1907_v6  ;;  %2766 = vst [vmem:[%s3821_s9 + $0x8] sm:$0xff] (%p3755_p8), %v2739_v46   ;;  %v1911_v33 = vmul.f32 (%p3755_p8), %v1831_v28, %v1831_v28 }
 0x1bc   : >> { %356 = sbr.rel (!%p3755_p8) target bundleno = 27 (0x1b), region = 118  ;;  %v2749_v5 = vpack.c.bf16 (%p3755_p8), %v1834_v51, %v1833_v42  ;;  %v1885_v14 = vadd.f32 (%p3755_p8), %v1884_v55, %v1830_v27  ;;  %2767 = vst [vmem:[%s3821_s9 + $0x10] sm:$0xff] (%p3755_p8), %v2744_v44   ;;  %v1835_v59 = vadd.f32 (%p3755_p8), %v1825_v21, %v3891_v49  ;;  %v1836_v50 = vadd.f32 (%p3755_p8), %v1825_v21, %v3892_v19 }
 0x1bd   : >>> { %v3752_v3 = vadd.f32 %v1805_v48, %v1640_v34   ;;  %v1924_v17 = vadd.f32 (%p3755_p8), %v1923_v22, %v1909_v31  ;;  %v1837_v4 = vadd.f32 (%p3755_p8), %v1825_v21, %v3893_v41  ;;  %v1838_v40 = vadd.f32 (%p3755_p8), %v1825_v21, %v3894_v58 }
 0x1be   : >> { %2768 = vst [vmem:[%s3821_s9 + $0x18] sm:$0xff] (%p3755_p8), %v2749_v5   ;;  %v1839_v16 = vadd.f32 (%p3755_p8), %v1825_v21, %v3895_v26  ;;  %v1840_v38 = vadd.f32 (%p3755_p8), %v1825_v21, %v3896_v29  ;;  %v1886_v54 = vadd.f32 (%p3755_p8), %v1885_v14, %v1831_v28  ;;  %v1912_v56 = vmul.f32 (%p3755_p8), %v1832_v36, %v1832_v36 }
 0x1bf   : >>> { %v3898_v57 = vmov %v3752_v3  ;;  %v1925_v47 = vadd.f32 (%p3755_p8), %v1924_v17, %v1910_v45  ;;  %v2754_v43 = vpack.c.bf16 (%p3755_p8), %v1836_v50, %v1835_v59  ;;  %v2759_v61 = vpack.c.bf16 (%p3755_p8), %v1838_v40, %v1837_v4 }
 0x1c0   : >>> { %v3900_v3 = vmov %v3898_v57  ;;  %v2764_v49 = vpack.c.bf16 (%p3755_p8), %v1840_v38, %v1839_v16  ;;  %v1887_v19 = vadd.f32 (%p3755_p8), %v1886_v54, %v1832_v36  ;;  %v1913_v8 = vmul.f32 (%p3755_p8), %v1833_v42, %v1833_v42 }
 0x1c1   : >> { %v1926_v30 = vadd.f32 %v1925_v47, %v1911_v33  ;;  %2769 = vst [vmem:[%s3821_s9 + $0x20] sm:$0xff] %v2754_v43   ;;  %v1841_v41 = vadd.f32 %v1825_v21, %v3897_v32  ;;  %v1842_v58 = vadd.f32 %v1825_v21, %v3898_v57  ;;  %v1914_v10 = vmul.f32 %v1834_v51, %v1834_v51  ;;  %v1880_v3 = vld [vmem:[%s3821_s9 + $0x3c] sm:$0x1] }
 0x1c2   : >> { %2770 = vst [vmem:[%s3821_s9 + $0x28] sm:$0xff] %v2759_v61   ;;  %v1888_v53 = vadd.f32 %v1887_v19, %v1833_v42  ;;  %v1915_v24 = vmul.f32 %v1835_v59, %v1835_v59  ;;  %v1916_v20 = vmul.f32 %v1836_v50, %v1836_v50  ;;  %v1917_v25 = vmul.f32 %v1837_v4, %v1837_v4 }
 0x1c3   : >> { %v1927_v26 = vadd.f32 %v1926_v30, %v1912_v56  ;;  %2771 = vst [vmem:[%s3821_s9 + $0x30] sm:$0xff] %v2764_v49   ;;  %v1857_v52 = vpack.c.bf16 %v1841_v41, %v1841_v41  ;;  %v1858_v29 = vpack.c.bf16 %v1842_v58, %v1842_v58  ;;  %v1918_v34 = vmul.f32 %v1838_v40, %v1838_v40 }
 0x1c4   : >> { %v1889_v37 = vadd.f32 %v1888_v53, %v1834_v51  ;;  %v1919_v21 = vmul.f32 %v1839_v16, %v1839_v16  ;;  %v1920_v39 = vmul.f32 %v1840_v38, %v1840_v38  ;;  %v1922_v27 = vmul.f32 %v1842_v58, %v1842_v58 }
 0x1c5   : >> { %v1928_v18 = vadd.f32 %v1927_v26, %v1913_v8  ;;  %1876 = vst [vmem:[%s3821_s9 + $0x38] sm:$0xf] %v1857_v52  ;;  %v1881_v63 = vsel %vm1879_vm9, %v1858_v29, %v1880_v3  ;;  %v1921_v42 = vmul.f32 %v1841_v41, %v1841_v41  ;;  %v1898_v60 = vsel %vm1877_vm8, %v1842_v58, 0.0 }
 0x1c6   : >> { %v1890_v7 = vadd.f32 %v1889_v37, %v1835_v59  ;;  %1882 = vst [vmem:[%s3821_s9 + $0x3c] sm:$0x1] %v1881_v63  ;;  %v1937_v15 = vsel %vm1877_vm8, %v1922_v27, 0.0 }
 0x1c7   : >> { %v1929_v13 = vadd.f32 %v1928_v18, %v1914_v10 }
 0x1c8   : >> { %v1891_v32 = vadd.f32 %v1890_v7, %v1836_v50 }
 0x1c9   : >> { %v1930_v9 = vadd.f32 %v1929_v13, %v1915_v24 }
 0x1ca   : >> { %v1892_v12 = vadd.f32 %v1891_v32, %v1837_v4 }
 0x1cb   : >> { %v1931_v35 = vadd.f32 %v1930_v9, %v1916_v20 }
 0x1cc   : >> { %v1893_v48 = vadd.f32 %v1892_v12, %v1838_v40 }
 0x1cd   : >> { %v1932_v57 = vadd.f32 %v1931_v35, %v1917_v25 }
 0x1ce   : >> { %v1894_v23 = vadd.f32 %v1893_v48, %v1839_v16 }
 0x1cf   : >> { %v1933_v62 = vadd.f32 %v1932_v57, %v1918_v34 }
 0x1d0   : >> { %v1895_v28 = vadd.f32 %v1894_v23, %v1840_v38 }
 0x1d1   : >> { %v1934_v36 = vadd.f32 %v1933_v62, %v1919_v21 }
 0x1d2   : >> { %v1896_v6 = vadd.f32 %v1895_v28, %v1841_v41 }
 0x1d3   : >> { %v1935_v11 = vadd.f32 %v1934_v36, %v1920_v39 }
 0x1d4   : >> { %v1899_v46 = vadd.f32 %v1898_v60, %v1896_v6 }
 0x1d5   : >> { %v1936_v31 = vadd.f32 %v1935_v11, %v1921_v42 }
 0x1d6   : >> { %v1900_v44 = vrot.slane %v1899_v46, 4 }
 0x1d7   : >> { %v1938_v51 = vadd.f32 %v1937_v15, %v1936_v31 }
 0x1d8   : >> { %v1901_v22 = vadd.f32 %v1900_v44, %v1899_v46 }
 0x1d9   : >> { %v1939_v55 = vrot.slane %v1938_v51, 4 }
 0x1da   : >> { %v1902_v45 = vrot.slane %v1901_v22, 2 }
 0x1db   : >> { %v1940_v33 = vadd.f32 %v1939_v55, %v1938_v51 }
 0x1dc   : >> { %v1903_v5 = vadd.f32 %v1902_v45, %v1901_v22 }
 0x1dd   : >> { %v1941_v14 = vrot.slane %v1940_v33, 2 }
 0x1de   : >> { %v1904_v17 = vrot.slane %v1903_v5, 1 }
 0x1df   : >> { %v1942_v59 = vadd.f32 %v1941_v14, %v1940_v33 }
 0x1e0   : >> { %v1905_v50 = vadd.f32 %v1904_v17, %v1903_v5 }
 0x1e1   : >> { %v1943_v4 = vrot.slane %v1942_v59, 1 }
 0x1e2   : >> { %v1906_v40 = vadd.f32 %v3100_v2, %v1905_v50  }
 0x1e3   : >> { %v1944_v16 = vadd.f32 %v1943_v4, %v1942_v59  ;;  %347 = sbr.rel (!%p345_p9) target bundleno = 23 (0x17), region = 129 }
 0x1e4   : >> { %v3917_v2 = vmov %v1906_v40  ;;  %1946 = vst [vmem:[%s333_s22] sm:$0x1] (%p345_p9), %v1906_v40 }
 0x1e5   : >> { %v1945_v38 = vadd.f32 %v3096_v1, %v1944_v16  }
 0x1e7   : >> { %v3916_v1 = vmov %v1945_v38  ;;  %1947 = vst [vmem:[%s340_s11] sm:$0x1] (%p345_p9), %v1945_v38 }
 0x1e8 PF: > { %s18_s3 = sadd.s32 1, %s3092_s3   ;;  %s3918_s24 = smov %s3084_s26 }
 0x1e9   : > { %p15_p10 = scmp.ge.s32.totalorder %s18_s3, 24   ;;  %s3919_s25 = smov %s3088_s27 }
 0x1ea   : > { %s3920_s26 = smov %s3923_s4  ;;  %s3921_s27 = smov %s3927_s28 }
 0x1eb   :  { %17 = sbr.rel (!%p15_p10) target bundleno = 3 (0x3), region = 140 }

// kernel: forward.9
= control target key start
LH: loop header
LB: loop body
LE: loop exit
PB: predicated region body
PF: predicated region fallthrough
CT: control target
= control target key end

     0   :  { %s3265_s24 = smov 0   ;;  %s3267_s25 = smov 0   ;;  %s4039_s0 = inlined_call_operand.vmem [shape: bf16[2,121,121,128], index: 0, kind: input, shape index: {}]   ;;  %s4040_s1 = inlined_call_operand.vmem [shape: bf16[49,128,128], index: 1, kind: input, shape index: {}]   ;;  %s4041_s2 = inlined_call_operand.vmem [shape: f32[1,128], index: 2, kind: input, shape index: {}]   ;;  %s4042_s3 = inlined_call_operand.vmem [shape: f32[1,128], index: 3, kind: input, shape index: {}]   ;;  %s4043_s4 = inlined_call_operand.vmem [shape: f32[1,128], index: 4, kind: input, shape index: {}]   ;;  %s4044_s5 = inlined_call_operand.vmem [shape: bf16[2,115,115,128], index: 5, kind: output, shape index: {0}]   ;;  %s4045_s6 = inlined_call_operand.vmem [shape: f32[2,5,1,128], index: 6, kind: output, shape index: {1}]   ;;  %s4046_s7 = inlined_call_operand.vmem [shape: f32[2,5,1,128], index: 7, kind: output, shape index: {2}]  }
   0x1   :  { %4047 = sst [smem:[#allocation3_spill]] %s4042_s3  ;;  %s3269_s26 = smov 0  }
   0x2   :  { %s3271_s27 = smov 0   ;;  %s3273_s28 = smov 0  }
   0x3 LB: > { %s27_s29 = sadd.s32 1, %s3135_s26  ;;  %s30_s30 = sadd.s32 1, %s3139_s27  ;;  %s3143_s28 = sphi %s3273_s28, %s18_s28   ;;  %s3139_s27 = sphi %s3271_s27, %s4085_s27   ;;  %s3135_s26 = sphi %s3269_s26, %s4084_s26   ;;  %s3131_s25 = sphi %s3267_s25, %s4083_s25   ;;  %s3127_s24 = sphi %s3265_s24, %s4082_s24  }
   0x4   : > { %p28_p0 = scmp.ge.s32.totalorder %s27_s29, 5  ;;  %p2206_p1 = scmp.ge.s32.totalorder %s3143_s28, 1 }
   0x5   : > { %p260_p2 = scmp.lt.s32.totalorder %s3143_s28, 11 }
   0x6   : > { %s4087_s29 = smov (%p28_p0, %s27_s29), 0  ;;  %s4089_s30 = smov (!%p28_p0, %s30_s30), %s3139_s27 }
   0x7   : > { %p261_p3 = pnand %p2206_p1, %p260_p2  ;;  %p32_p4 = scmp.ge.s32.totalorder %s4089_s30, 2 }
   0x8   : > { %p311_p5 = scmp.lt.s32.totalorder (!%p261_p3), %s3131_s25, 1  ;;  %s3295_s8 = smul.u32 (!%p261_p3), 23, %s3127_s24 }
   0x9   : > { %s4091_s30 = smov (%p32_p4, %s4089_s30), 0  ;;  %264 = sbr.rel (%p261_p3) target bundleno = 475 (0x1db), region = 40 }
   0xa   : > { %s4048_s3 = sld [smem:[#allocation3_spill]] (!%p261_p3)  ;;  %p319_p6 = scmp.lt.s32.totalorder (!%p261_p3), %s3295_s8, 114 }
   0xb   : > { %p329_p7 = scmp.lt.s32.totalorder (!%p261_p3), %s3127_s24, 4 }
   0xe   : > { %v3305_v1 = vld [vmem:[%s4043_s4] sm:$0x1]  ;;  %s4093_s25 = smov (!%p311_p5, %s3131_s25), 1  ;;  %s4095_s24 = smov (!%p329_p7, %s3127_s24), 4 }
   0xf   : > { %s2821_s13 = smul.u32 7744, %s4093_s25 }
  0x10   : > { %v3300_v0 = vld [vmem:[%s4048_s3] sm:$0x1]  ;;  %s320_s14 = scalar_select %p319_p6, %s3295_s8, 114 }
  0x11   : > { %s3312_s17 = scalar_lea.vmem %s4039_s0, %s2821_s13  ;;  %s2823_s18 = smul.u32 1725, %s4093_s25 }
  0x12   : > { %s2822_s19 = smul.u32 15, %s320_s14 }
  0x13   : > { %s2824_s21 = smul.u32 5, %s4093_s25 }
  0x14   : > { %s323_s20 = sadd.s32 %s2823_s18, %s2822_s19  ;;  %s3329_s18 = smov 0  }
  0x15   : > { %s2208_s22 = sshll.u32 %s323_s20, 2  ;;  %s3319_s11 = sadd.s32 %s2824_s21, %s4095_s24 }
  0x16   : > { %s3317_s10 = scalar_lea.vmem %s4044_s5, %s2208_s22  ;;  %s333_s13 = scalar_lea.vmem %s4045_s6, %s3319_s11 }
  0x17   : > { %s340_s14 = scalar_lea.vmem %s4046_s7, %s3319_s11 }
  0x18 LB: >> { %s350_s24 = sadd.s32 %s3147_s18, %s3295_s8  ;;  %v3340_v2 = vperm.slane %v3300_v0, 0  ;;  %v3344_v4 = vperm.slane %v3305_v1, 0  ;;  %s2603_s3 = sshll.u32 %s3147_s18, 6  ;;  %vm474_vm0 = vcmask 1040384   ;;  %vm475_vm1 = vsmask.f32 256  ;;  %s3147_s18 = sphi %s3329_s18, %s349_s18  }
  0x19   : >> { %s2602_s25 = sshll.u32 %s350_s24, 6  ;;  %s3371_s20 = scalar_lea.vmem [#allocation2], %s2603_s3  ;;  %vm476_vm2 = vmand %vm474_vm0, %vm475_vm1 }
  0x1a   : >> { %s3337_s19 = scalar_lea.vmem %s3312_s17, %s2602_s25  ;;  %s349_s18 = sadd.s32 1, %s3147_s18  }
  0x1b   : >> { %v2678_v3 = vld [vmem:[%s3337_s19] sm:$0xff]   ;;  %v2779_v5 = vld [vmem:[%s3337_s19 + $0x8] sm:$0xff]   ;;  %v2780_v6 = vld [vmem:[%s3337_s19 + $0x10] sm:$0xff]   ;;  %p346_p8 = scmp.ge.s32.totalorder %s349_s18, 29  }
  0x1c   : >> { %v2679_v7 = vunpack.c.l.bf16 %v2678_v3  ;;  %v2680_v8 = vunpack.c.h.bf16 %v2678_v3  ;;  %v2683_v9 = vunpack.c.l.bf16 %v2779_v5  ;;  %v2684_v10 = vunpack.c.h.bf16 %v2779_v5  ;;  %v2781_v11 = vld [vmem:[%s3337_s19 + $0x18] sm:$0xff]   ;;  %v2782_v32 = vld [vmem:[%s3337_s19 + $0x20] sm:$0xff]   ;;  %v2783_v37 = vld [vmem:[%s3337_s19 + $0x28] sm:$0xff]   ;;  %s3413_s23 = smov (%p346_p8), 0  }
  0x1d   : >> { %v2687_v12 = vunpack.c.l.bf16 %v2780_v6  ;;  %v2688_v13 = vunpack.c.h.bf16 %v2780_v6  ;;  %v2691_v14 = vunpack.c.l.bf16 %v2781_v11  ;;  %v2692_v15 = vunpack.c.h.bf16 %v2781_v11  ;;  %v2784_v42 = vld [vmem:[%s3337_s19 + $0x30] sm:$0xff]   ;;  %v368_v47 = vld [vmem:[%s3337_s19 + $0x38] sm:$0xf]  ;;  %v369_v48 = vld [vmem:[%s3337_s19 + $0x3c] sm:$0x1] }
  0x1e   : >> { %v389_v16 = vmul.f32 %v2679_v7, %v3340_v2  ;;  %v390_v17 = vmul.f32 %v2680_v8, %v3340_v2  ;;  %v391_v18 = vmul.f32 %v2683_v9, %v3340_v2  ;;  %v392_v19 = vmul.f32 %v2684_v10, %v3340_v2 }
  0x1f   : >> { %v393_v20 = vmul.f32 %v2687_v12, %v3340_v2  ;;  %v394_v21 = vmul.f32 %v2688_v13, %v3340_v2  ;;  %v395_v22 = vmul.f32 %v2691_v14, %v3340_v2  ;;  %v396_v23 = vmul.f32 %v2692_v15, %v3340_v2 }
  0x20   : >> { %v408_v24 = vadd.f32 %v3344_v4, %v389_v16  ;;  %v409_v25 = vadd.f32 %v3344_v4, %v390_v17  ;;  %v410_v26 = vadd.f32 %v3344_v4, %v391_v18  ;;  %v411_v27 = vadd.f32 %v3344_v4, %v392_v19 }
  0x21   : >> { %v412_v28 = vadd.f32 %v3344_v4, %v393_v20  ;;  %v413_v29 = vadd.f32 %v3344_v4, %v394_v21  ;;  %v414_v30 = vadd.f32 %v3344_v4, %v395_v22  ;;  %v415_v31 = vadd.f32 %v3344_v4, %v396_v23  ;;  %v477_v23 = vld [vmem:[%s3371_s20 + $0x3c] sm:$0x1] }
  0x22   : >> { %v424_v33 = vmax.f32 %v408_v24, 0.0  ;;  %v425_v34 = vmax.f32 %v409_v25, 0.0  ;;  %v426_v35 = vmax.f32 %v410_v26, 0.0  ;;  %v427_v36 = vmax.f32 %v411_v27, 0.0 }
  0x23   : >> { %v428_v38 = vmax.f32 %v412_v28, 0.0  ;;  %v429_v39 = vmax.f32 %v413_v29, 0.0  ;;  %v430_v40 = vmax.f32 %v414_v30, 0.0  ;;  %v431_v41 = vmax.f32 %v415_v31, 0.0 }
  0x24   : >> { %v2708_v43 = vpack.c.bf16 %v425_v34, %v424_v33  ;;  %v2713_v44 = vpack.c.bf16 %v427_v36, %v426_v35  ;;  %v2695_v45 = vunpack.c.l.bf16 %v2782_v32  ;;  %v2696_v46 = vunpack.c.h.bf16 %v2782_v32 }
  0x25   : >> { %v2718_v49 = vpack.c.bf16 %v429_v39, %v428_v38  ;;  %v2723_v50 = vpack.c.bf16 %v431_v41, %v430_v40  ;;  %v2699_v51 = vunpack.c.l.bf16 %v2783_v37  ;;  %v2700_v52 = vunpack.c.h.bf16 %v2783_v37 }
  0x26   : >> { %2709 = vst [vmem:[%s3371_s20] sm:$0xff] %v2708_v43   ;;  %v397_v53 = vmul.f32 %v2695_v45, %v3340_v2  ;;  %v398_v54 = vmul.f32 %v2696_v46, %v3340_v2  ;;  %v2703_v55 = vunpack.c.l.bf16 %v2784_v42  ;;  %v2704_v56 = vunpack.c.h.bf16 %v2784_v42 }
  0x27   : >> { %2785 = vst [vmem:[%s3371_s20 + $0x8] sm:$0xff] %v2713_v44   ;;  %v399_v57 = vmul.f32 %v2699_v51, %v3340_v2  ;;  %v400_v58 = vmul.f32 %v2700_v52, %v3340_v2  ;;  %v384_v59 = vunpack.c.l.bf16 %v368_v47  ;;  %v385_v60 = vunpack.c.l.bf16 %v369_v48 }
  0x28   : >> { %2786 = vst [vmem:[%s3371_s20 + $0x10] sm:$0xff] %v2718_v49   ;;  %v416_v61 = vadd.f32 %v3344_v4, %v397_v53  ;;  %v417_v62 = vadd.f32 %v3344_v4, %v398_v54  ;;  %v401_v63 = vmul.f32 %v2703_v55, %v3340_v2  ;;  %v402_v3 = vmul.f32 %v2704_v56, %v3340_v2 }
  0x29   : >> { %2787 = vst [vmem:[%s3371_s20 + $0x18] sm:$0xff] %v2723_v50   ;;  %v418_v5 = vadd.f32 %v3344_v4, %v399_v57  ;;  %v419_v6 = vadd.f32 %v3344_v4, %v400_v58  ;;  %v403_v7 = vmul.f32 %v3340_v2, %v384_v59  ;;  %v404_v8 = vmul.f32 %v3340_v2, %v385_v60 }
  0x2a   : >> { %v432_v9 = vmax.f32 %v416_v61, 0.0  ;;  %v433_v10 = vmax.f32 %v417_v62, 0.0  ;;  %v420_v11 = vadd.f32 %v3344_v4, %v401_v63  ;;  %v421_v12 = vadd.f32 %v3344_v4, %v402_v3 }
  0x2b   : >> { %v434_v13 = vmax.f32 %v418_v5, 0.0  ;;  %v435_v14 = vmax.f32 %v419_v6, 0.0  ;;  %v422_v15 = vadd.f32 %v3344_v4, %v403_v7  ;;  %v423_v16 = vadd.f32 %v3344_v4, %v404_v8  ;;  %v3407_v4 = vld [vmem:[%s4041_s2] sm:$0x1] (%p346_p8) }
  0x2c   : >> { %v2728_v17 = vpack.c.bf16 %v433_v10, %v432_v9  ;;  %v436_v18 = vmax.f32 %v420_v11, 0.0  ;;  %v437_v2 = vmax.f32 %v421_v12, 0.0  ;;  %v3409_v27 = vmov (%p346_p8), 0.0  }
  0x2d   : >> { %v2733_v19 = vpack.c.bf16 %v435_v14, %v434_v13  ;;  %v438_v20 = vmax.f32 %v422_v15, 0.0  ;;  %v439_v21 = vmax.f32 %v423_v16, 0.0  ;;  %v3411_v28 = vmov (%p346_p8), 0.0  }
  0x2e   : >> { %2788 = vst [vmem:[%s3371_s20 + $0x20] sm:$0xff] %v2728_v17   ;;  %v2738_v22 = vpack.c.bf16 %v437_v2, %v436_v18  ;;  %348 = sbr.rel (!%p346_p8) target bundleno = 24 (0x18), region = 126 }
  0x2f   : >> { %2789 = vst [vmem:[%s3371_s20 + $0x28] sm:$0xff] %v2733_v19   ;;  %v454_v24 = vpack.c.bf16 %v438_v20, %v438_v20  ;;  %v455_v25 = vpack.c.bf16 %v439_v21, %v439_v21 }
  0x30   : >> { %2790 = vst [vmem:[%s3371_s20 + $0x30] sm:$0xff] %v2738_v22  }
  0x31   : >> { %473 = vst [vmem:[%s3371_s20 + $0x38] sm:$0xf] %v454_v24  ;;  %v478_v26 = vsel %vm476_vm2, %v455_v25, %v477_v23 }
  0x32   : >> { %479 = vst [vmem:[%s3371_s20 + $0x3c] sm:$0x1] %v478_v26 }
  0x33 LB: >> { %s489_s17 = sadd.s32 %s3159_s23, %s3295_s8  ;;  %v3426_v0 = vmov 0.0   ;;  %v3428_v1 = vmov 0.0   ;;  %v3430_v29 = vmov 0.0   ;;  %v3432_v30 = vmov 0.0   ;;  %s3456_s9 = smov 0   ;;  %s3159_s23 = sphi %s3413_s23, %s486_s23   ;;  %v3155_v28 = vphi %v3411_v28, %v4081_v28   ;;  %v3151_v27 = vphi %v3409_v27, %v4080_v27  }
  0x34   : >> { %v3434_v31 = vmov 0.0   ;;  %v3436_v32 = vmov 0.0   ;;  %v3438_v33 = vmov 0.0   ;;  %v3440_v34 = vmov 0.0  }
  0x35   : >> { %v3442_v35 = vmov 0.0   ;;  %v3444_v36 = vmov 0.0   ;;  %v3446_v37 = vmov 0.0   ;;  %v3448_v38 = vmov 0.0  }
  0x36   : >> { %v3450_v39 = vmov 0.0   ;;  %v3452_v40 = vmov 0.0   ;;  %v3454_v41 = vmov 0.0  }
  0x37 LB: >>> { %s2611_s12 = smul.u32 448, %s3223_s9  ;;  %s511_s24 = sadd.s32 %s3223_s9, %s489_s17  ;;  %vm728_vm3 = vsmask.f32 7424  ;;  %vm939_vm4 = vcmask 1046528   ;;  %vm1094_vm5 = vsmask.f32 6400  ;;  %s3223_s9 = sphi %s3456_s9, %s495_s9   ;;  %v3219_v41 = vphi %v3454_v41, %v4079_v41   ;;  %v3215_v40 = vphi %v3452_v40, %v4078_v40   ;;  %v3211_v39 = vphi %v3450_v39, %v4077_v39   ;;  %v3207_v38 = vphi %v3448_v38, %v4076_v38   ;;  %v3203_v37 = vphi %v3446_v37, %v4075_v37   ;;  %v3199_v36 = vphi %v3444_v36, %v4074_v36   ;;  %v3195_v35 = vphi %v3442_v35, %v4073_v35   ;;  %v3191_v34 = vphi %v3440_v34, %v4072_v34   ;;  %v3187_v33 = vphi %v3438_v33, %v4071_v33   ;;  %v3183_v32 = vphi %v3436_v32, %v4070_v32   ;;  %v3179_v31 = vphi %v3434_v31, %v4069_v31   ;;  %v3175_v30 = vphi %v3432_v30, %v4068_v30   ;;  %v3171_v29 = vphi %v3430_v29, %v4067_v29   ;;  %v3167_v1 = vphi %v3428_v1, %v4066_v1   ;;  %v3163_v0 = vphi %v3426_v0, %v4065_v0  }
  0x38   : >>> { %s512_s25 = ssub.s32 %s511_s24, %s3295_s8  ;;  %vm1283_vm6 = vcmask 1045504   ;;  %vm1438_vm7 = vsmask.f32 5376  ;;  %vm1675_vm8 = vcmask 1044480   ;;  %s495_s9 = sadd.s32 1, %s3223_s9  }
  0x39   : >>> { %s3510_s18 = scalar_lea.vmem %s4040_s1, %s2611_s12  ;;  %s2604_s19 = sshll.u32 %s512_s25, 6 }
  0x3a   : >>> { %v2619_v42 = vld [vmem:[%s3510_s18 + $0x38] sm:$0xff]  ;;  %v2618_v45 = vld [vmem:[%s3510_s18 + $0x30] sm:$0xff]  ;;  %v2617_v48 = vld [vmem:[%s3510_s18 + $0x28] sm:$0xff]  ;;  %s3560_s3 = scalar_lea.vmem [#allocation2], %s2604_s19  ;;  %p3923_p9 = scmp.ge.s32.totalorder %s495_s9, 7  }
  0x3b   : >>> { %v3514_v43 = vld [vmem:[%s3510_s18 + $0x78] sm:$0xff]  ;;  %645 = vmatpush.bf16.msra.mxu0 %v2619_v42  ;;  %2797 = vmatpush.bf16.msra.mxu3 %v2619_v42  ;;  %v3523_v46 = vld [vmem:[%s3510_s18 + $0x70] sm:$0xff]  ;;  %v3537_v49 = vld [vmem:[%s3510_s18 + $0x68] sm:$0xff]  ;;  %s2676_s21 = smul.u32 (%p3923_p9), 60, %s3159_s23  ;;  %vm1860_vm9 = vcmask (%p3923_p9), 1041408   ;;  %vm1879_vm12 = vcmask (%p3923_p9), 1042432  }
  0x3c   : >>> { %v3517_v44 = vld [vmem:[%s3510_s18 + $0xb8] sm:$0xff]  ;;  %2805 = vmatpush.bf16.msra.mxu1 %v3514_v43  ;;  %v3526_v47 = vld [vmem:[%s3510_s18 + $0xb0] sm:$0xff]  ;;  %v3540_v50 = vld [vmem:[%s3510_s18 + $0xa8] sm:$0xff]  ;;  %vm1861_vm10 = vsmask.f32 (%p3923_p9), 1280  ;;  %s486_s23 = sadd.s32 (%p3923_p9), 1, %s3159_s23  }
  0x3d   : >>> { %2813 = vmatpush.bf16.msra.mxu2 %v3517_v44  ;;  %v2616_v51 = vld [vmem:[%s3510_s18 + $0x20] sm:$0xff]  ;;  %v2615_v54 = vld [vmem:[%s3510_s18 + $0x18] sm:$0xff]  ;;  %v3563_v57 = vld [vmem:[%s3560_s3 + $0x10] sm:$0xff]  ;;  %s3986_s22 = scalar_lea.vmem (%p3923_p9), %s3317_s10, %s2676_s21  ;;  %p483_p10 = scmp.ge.s32.totalorder (%p3923_p9), %s486_s23, 23  }
  0x3e   : >>> { %v3546_v52 = vld [vmem:[%s3510_s18 + $0x60] sm:$0xff]  ;;  %v3555_v55 = vld [vmem:[%s3510_s18 + $0x58] sm:$0xff]  ;;  %v2614_v58 = vld [vmem:[%s3510_s18 + $0x10] sm:$0xff]  ;;  %v3578_v62 = vshll.u32 %v3563_v57, 16  ;;  %v3591_v7 = vshrl.u32 %v3563_v57, 16  ;;  %v943_v14 = vrot.slane %v3563_v57, 1 }
  0x3f   : >>> { %646 = vmatpush.bf16.msra.mxu0 %v2618_v45  ;;  %2798 = vmatpush.bf16.msra.mxu3 %v2618_v45  ;;  %v3549_v53 = vld [vmem:[%s3510_s18 + $0xa0] sm:$0xff]  ;;  %v3558_v56 = vld [vmem:[%s3510_s18 + $0x98] sm:$0xff]  ;;  %v3569_v59 = vld [vmem:[%s3510_s18 + $0x50] sm:$0xff] }
  0x40   : >>> { %2806 = vmatpush.bf16.msra.mxu1 %v3523_v46  ;;  %v3572_v60 = vld [vmem:[%s3510_s18 + $0x90] sm:$0xff]  ;;  %v3575_v61 = vld [vmem:[%s3560_s3 + $0x18] sm:$0xff]  ;;  %v2613_v63 = vld [vmem:[%s3510_s18 + $0x8] sm:$0xff]  ;;  %v747_v6 = vrot.slane %v3578_v62, 1 }
  0x41   : >>> { %2814 = vmatpush.bf16.msra.mxu2 %v3526_v47  ;;  %v3584_v3 = vld [vmem:[%s3510_s18 + $0x48] sm:$0xff]  ;;  %v3594_v8 = vshll.u32 %v3575_v61, 16  ;;  %v2612_v9 = vld [vmem:[%s3510_s18] sm:$0xff]  ;;  %v945_v15 = vrot.slane %v3575_v61, 1  ;;  %v2643_v16 = vld [vmem:[%s3510_s18 + $0xf8] sm:$0xff]  ;;  %v3636_v42 = vshrl.u32 %v3575_v61, 16 }
  0x42   : >>> { %v3587_v5 = vld [vmem:[%s3510_s18 + $0x88] sm:$0xff]  ;;  %v3600_v10 = vld [vmem:[%s3510_s18 + $0x40] sm:$0xff]  ;;  %v751_v12 = vor.u32 %v3591_v7, %v747_v6  ;;  %v2675_v17 = vld [vmem:[%s3510_s18 + $0x1b8] sm:$0xff] }
  0x43   : >>> { %647 = vmatpush.bf16.msra.mxu0 %v2617_v48  ;;  %2799 = vmatpush.bf16.msra.mxu3 %v2617_v48  ;;  %v3603_v11 = vld [vmem:[%s3510_s18 + $0x80] sm:$0xff]  ;;  %v755_v13 = vrot.slane %v3594_v8, 1  ;;  %v946_v19 = vsel %vm939_vm4, %v943_v14, %v945_v15  ;;  %v2659_v20 = vld [vmem:[%s3510_s18 + $0x178] sm:$0xff]  ;;  %v2642_v21 = vld [vmem:[%s3510_s18 + $0xf0] sm:$0xff] }
  0x44   : >>> { %2807 = vmatpush.bf16.msra.mxu1 %v3537_v49  ;;  %v3614_v18 = vld [vmem:[%s3560_s3] sm:$0xff]   ;;  %v2674_v22 = vld [vmem:[%s3510_s18 + $0x1b0] sm:$0xff]  ;;  %v2641_v25 = vld [vmem:[%s3510_s18 + $0xe8] sm:$0xff] }
  0x45   : >>> { %2815 = vmatpush.bf16.msra.mxu2 %v3540_v50  ;;  %v756_v2 = vsel %vm728_vm3, %v751_v12, %v755_v13  ;;  %v3629_v23 = vld [vmem:[%s3560_s3 + $0x20] sm:$0xff]  ;;  %v2658_v24 = vld [vmem:[%s3510_s18 + $0x170] sm:$0xff]  ;;  %v2673_v26 = vld [vmem:[%s3510_s18 + $0x1a8] sm:$0xff] }
  0x46   : >>> { %v3639_v45 = vshll.u32 %v3629_v23, 16  ;;  %v2640_v48 = vld [vmem:[%s3510_s18 + $0xe0] sm:$0xff]  ;;  %vm1862_vm11 = vmand (%p3923_p9), %vm1860_vm9, %vm1861_vm10 }
  0x47   : >>> { %648 = vmatpush.bf16.msra.mxu0 %v2616_v51  ;;  %2800 = vmatpush.bf16.msra.mxu3 %v2616_v51  ;;  %v2672_v51 = vld [vmem:[%s3510_s18 + $0x1a0] sm:$0xff] }
  0x48   : >>> { %2808 = vmatpush.bf16.msra.mxu1 %v3546_v52 }
  0x49   : >>> { %2816 = vmatpush.bf16.msra.mxu2 %v3549_v53 }
  0x4b   : >>> { %649 = vmatpush.bf16.msra.mxu0 %v2615_v54  ;;  %2801 = vmatpush.bf16.msra.mxu3 %v2615_v54  ;;  %v759_v54 = vor.u32 %v3636_v42, %v755_v13  ;;  %v732_v13 = vshll.u32 %v3614_v18, 16 }
  0x4c   : >>> { %2809 = vmatpush.bf16.msra.mxu1 %v3555_v55 }
  0x4d   : >>> { %2817 = vmatpush.bf16.msra.mxu2 %v3558_v56 }
  0x4f   : >>> { %650 = vmatpush.bf16.msra.mxu0 %v2614_v58  ;;  %2802 = vmatpush.bf16.msra.mxu3 %v2614_v58  ;;  %v763_v58 = vrot.slane %v3639_v45, 1 }
  0x50   : >>> { %2810 = vmatpush.bf16.msra.mxu1 %v3569_v59 }
  0x51   : >>> { %2818 = vmatpush.bf16.msra.mxu2 %v3572_v60 }
  0x53   : >>> { %651 = vmatpush.bf16.msra.mxu0 %v2613_v63  ;;  %2803 = vmatpush.bf16.msra.mxu3 %v2613_v63  ;;  %v2656_v63 = vld [vmem:[%s3510_s18 + $0x160] sm:$0xff] }
  0x54   : >>> { %2811 = vmatpush.bf16.msra.mxu1 %v3584_v3 }
  0x55   : >>> { %2819 = vmatpush.bf16.msra.mxu2 %v3587_v5 }
  0x57   : >>> { %652 = vmatpush.bf16.msra.mxu0 %v2612_v9  ;;  %2804 = vmatpush.bf16.msra.mxu3 %v2612_v9  ;;  %v3650_v9 = vld [vmem:[%s3560_s3 + $0x8] sm:$0xff] }
  0x58   : >>> { %2812 = vmatpush.bf16.msra.mxu1 %v3600_v10 }
  0x59   : >>> { %2820 = vmatpush.bf16.msra.mxu2 %v3603_v11 }
  0x5a   : >>> { %653 = vmatmul.bf16.vlgmr.msra.gmra.mxu0 %v3614_v18  ;;  %663 = vmatmul.bf16.vlgmr.msra.gmra.mxu3 %v3563_v57 }
  0x5b   : >>> { %1192 = vmatpush.bf16.msrb.mxu3 %v2643_v16  ;;  %866 = vmatmul.bf16.vlgmr.msra.gmra.mxu1 %v756_v2  ;;  %v3660_v16 = vld [vmem:[%s3560_s3 + $0x28] sm:$0xff]  ;;  %v2655_v2 = vld [vmem:[%s3510_s18 + $0x158] sm:$0xff] }
  0x5c   : >>> { %1029 = vmatmul.bf16.vlgmr.msra.gmra.mxu2 %v946_v19  ;;  %848 = vmatpush.bf16.msrb.mxu0 %v3514_v43  ;;  %v2657_v43 = vld [vmem:[%s3510_s18 + $0x168] sm:$0xff]  ;;  %v734_v19 = vrot.slane %v732_v13, 1 }
  0x5d   : >>> { %1747 = vmatpush.bf16.msrb.mxu2 %v2675_v17  ;;  %1536 = vmatpush.bf16.msrb.mxu1 %v2659_v20  ;;  %v2671_v17 = vld [vmem:[%s3510_s18 + $0x198] sm:$0xff]  ;;  %v3668_v20 = vshll.u32 %v3650_v9, 16  ;;  %v2653_v13 = vld [vmem:[%s3510_s18 + $0x148] sm:$0xff] }
  0x5f   : >>> { %1193 = vmatpush.bf16.msrb.mxu3 %v2642_v21  ;;  %v3671_v21 = vshrl.u32 %v3629_v23, 16 }
  0x60   : >>> { %849 = vmatpush.bf16.msrb.mxu0 %v3523_v46  ;;  %v947_v46 = vrot.slane %v3629_v23, 1 }
  0x61   : >>> { %1748 = vmatpush.bf16.msrb.mxu2 %v2674_v22  ;;  %1537 = vmatpush.bf16.msrb.mxu1 %v2658_v24  ;;  %v2638_v22 = vld [vmem:[%s3510_s18 + $0xd0] sm:$0xff] }
  0x62   : >>> { %v948_v12 = vsel %vm939_vm4, %v945_v15, %v947_v46  ;;  %v730_v15 = vshrl.u32 %v3614_v18, 16  ;;  %v2670_v24 = vld [vmem:[%s3510_s18 + $0x190] sm:$0xff] }
  0x63   : >>> { %1194 = vmatpush.bf16.msrb.mxu3 %v2641_v25 }
  0x64   : >>> { %850 = vmatpush.bf16.msrb.mxu0 %v3537_v49  ;;  %v764_v49 = vsel %vm728_vm3, %v759_v54, %v763_v58  ;;  %v735_v25 = vor.u32 %v734_v19, %v730_v15  ;;  %v530_v15 = vld [vmem:[%s3560_s3 + $0x38] sm:$0x3] }
  0x65   : >>> { %1749 = vmatpush.bf16.msrb.mxu2 %v2673_v26  ;;  %1538 = vmatpush.bf16.msrb.mxu1 %v2657_v43  ;;  %v767_v26 = vor.u32 %v3671_v21, %v763_v58  ;;  %v3690_v58 = vld [vmem:[%s3560_s3 + $0x30] sm:$0xff] }
  0x67   : >>> { %1195 = vmatpush.bf16.msrb.mxu3 %v2640_v48  ;;  %v949_v48 = vrot.slane %v3660_v16, 1 }
  0x68   : >>> { %851 = vmatpush.bf16.msrb.mxu0 %v3546_v52  ;;  %v2639_v52 = vld [vmem:[%s3510_s18 + $0xd8] sm:$0xff] }
  0x69   : >>> { %1750 = vmatpush.bf16.msrb.mxu2 %v2672_v51  ;;  %1539 = vmatpush.bf16.msrb.mxu1 %v2656_v63  ;;  %v2654_v63 = vld [vmem:[%s3510_s18 + $0x150] sm:$0xff] }
  0x6a   : >>> { %658 = vmatmul.bf16.gmra.mxu0 %v3650_v9  ;;  %668 = vmatmul.bf16.gmra.mxu3 %v3575_v61 }
  0x6b   : >>> { %871 = vmatmul.bf16.gmra.mxu1 %v764_v49  ;;  %1196 = vmatpush.bf16.msrb.mxu3 %v2639_v52  ;;  %v2637_v49 = vld [vmem:[%s3510_s18 + $0xc8] sm:$0xff] }
  0x6c   : >>> { %1034 = vmatmul.bf16.gmra.mxu2 %v948_v12  ;;  %852 = vmatpush.bf16.msrb.mxu0 %v3555_v55  ;;  %v3674_v55 = vshll.u32 %v3660_v16, 16  ;;  %v3703_v12 = vshll.u32 %v3690_v58, 16 }
  0x6d   : >>> { %1751 = vmatpush.bf16.msrb.mxu2 %v2671_v17  ;;  %1540 = vmatpush.bf16.msrb.mxu1 %v2655_v2  ;;  %v951_v2 = vrot.slane %v3690_v58, 1 }
  0x6e   : >>> { %v771_v43 = vrot.slane %v3674_v55, 1  ;;  %v779_v17 = vrot.slane %v3703_v12, 1 }
  0x6f   : >>> { %1197 = vmatpush.bf16.msrb.mxu3 %v2638_v22  ;;  %v580_v22 = vunpack.c.l.b16 %v530_v15  ;;  %v2650_v15 = vld [vmem:[%s3510_s18 + $0x130] sm:$0xff] }
  0x70   : >>> { %853 = vmatpush.bf16.msrb.mxu0 %v3569_v59  ;;  %v739_v59 = vrot.slane %v3668_v20, 1  ;;  %v772_v54 = vsel %vm728_vm3, %v767_v26, %v771_v43 }
  0x71   : >>> { %1752 = vmatpush.bf16.msrb.mxu2 %v2670_v24  ;;  %1541 = vmatpush.bf16.msrb.mxu1 %v2654_v63  ;;  %v911_v24 = vld [vmem:[%s3560_s3] sm:$0xe] }
  0x72   : >>> { %v740_v51 = vsel %vm728_vm3, %v735_v25, %v739_v59  ;;  %v952_v25 = vsel %vm939_vm4, %v949_v48, %v951_v2  ;;  %v935_v26 = vunpack.c.l.b16 %v911_v24  ;;  %v2647_v24 = vld [vmem:[%s3510_s18 + $0x118] sm:$0xff] }
  0x73   : >>> { %1198 = vmatpush.bf16.msrb.mxu3 %v2637_v49  ;;  %v2651_v49 = vld [vmem:[%s3510_s18 + $0x138] sm:$0xff] }
  0x74   : >>> { %854 = vmatpush.bf16.msrb.mxu0 %v3584_v3  ;;  %v950_v3 = vsel %vm939_vm4, %v947_v46, %v949_v48  ;;  %v3700_v46 = vshrl.u32 %v3660_v16, 16 }
  0x75   : >>> { %1542 = vmatpush.bf16.msrb.mxu1 %v2653_v13 }
  0x76   : >>> { %v775_v52 = vor.u32 %v3700_v46, %v771_v43  ;;  %v2636_v43 = vld [vmem:[%s3510_s18 + $0xc0] sm:$0xff] }
  0x77   : >>> { %1199 = vmatpush.bf16.msrb.mxu3 %v2636_v43 }
  0x78   : >>> { %855 = vmatpush.bf16.msrb.mxu0 %v3600_v10  ;;  %v2669_v10 = vld [vmem:[%s3510_s18 + $0x188] sm:$0xff]  ;;  %v780_v19 = vsel %vm728_vm3, %v775_v52, %v779_v17 }
  0x79   : >>> { %1753 = vmatpush.bf16.msrb.mxu2 %v2669_v10 }
  0x7a   : >>> { %673 = vmatmul.bf16.gmra.mxu3 %v3629_v23 }
  0x7b   : >>> { %856 = vmatmul.bf16.vlgmr.msrb.gmra.mxu0 %v740_v51  ;;  %876 = vmatmul.bf16.gmra.mxu1 %v772_v54  ;;  %v2668_v51 = vld [vmem:[%s3510_s18 + $0x180] sm:$0xff] }
  0x7c   : >>> { %1011 = vmatpush.bf16.msra.mxu0 %v3517_v44  ;;  %1039 = vmatmul.bf16.gmra.mxu2 %v950_v3  ;;  %v3697_v44 = vshrl.u32 %v3650_v9, 16  ;;  %v3728_v3 = vshrl.u32 %v3690_v58, 16 }
  0x7d   : >>> { %1754 = vmatpush.bf16.msrb.mxu2 %v2668_v51 }
  0x7e   : >>> { %v783_v10 = vor.u32 %v3728_v3, %v779_v17 }
  0x80   : >>> { %1012 = vmatpush.bf16.msra.mxu0 %v3526_v47  ;;  %v743_v47 = vor.u32 %v3697_v44, %v739_v59  ;;  %v2743_v59 = vunpack.c.h.b16 %v3614_v18 }
  0x82   : >>> { %v937_v48 = vpack.c.b16 %v2743_v59, %v935_v26  ;;  %v2646_v26 = vld [vmem:[%s3510_s18 + $0x110] sm:$0xff] }
  0x84   : >>> { %1013 = vmatpush.bf16.msra.mxu0 %v3540_v50  ;;  %v748_v50 = vsel %vm728_vm3, %v743_v47, %v747_v6  ;;  %v588_v6 = vpack.c.b16 %v580_v22, %v580_v22  ;;  %v940_v13 = vrot.slane %v937_v48, 1  ;;  %v941_v47 = vrot.slane %v3650_v9, 1  ;;  %v1255_v22 = vld [vmem:[%s3560_s3] sm:$0xc] }
  0x86   : >>> { %v785_v63 = vshll.u32 %v588_v6, 16  ;;  %v944_v51 = vsel %vm939_vm4, %v941_v47, %v943_v14  ;;  %v1104_v14 = vrot.slane %v3668_v20, 2 }
  0x88   : >>> { %1014 = vmatpush.bf16.msra.mxu0 %v3549_v53  ;;  %v912_v53 = vld [vmem:[%s3560_s3 + $0x38] sm:$0x7] }
  0x89   : >>> { %v936_v54 = vunpack.c.l.b16 %v912_v53  ;;  %v1279_v53 = vunpack.c.l.b16 %v1255_v22 }
  0x8a   : >>> { %678 = vmatmul.bf16.gmra.mxu3 %v3660_v16 }
  0x8b   : >>> { %861 = vmatmul.bf16.gmra.mxu0 %v748_v50  ;;  %881 = vmatmul.bf16.gmra.mxu1 %v780_v19  ;;  %v3731_v18 = vpack.c.b16 %v936_v54, %v936_v54  ;;  %v942_v50 = vsel %vm939_vm4, %v940_v13, %v941_v47  ;;  %v2649_v19 = vld [vmem:[%s3510_s18 + $0x128] sm:$0xff]  ;;  %v1281_v43 = vpack.c.b16 %v2743_v59, %v1279_v53  ;;  %v2644_v13 = vld [vmem:[%s3510_s18 + $0x100] sm:$0xff] }
  0x8c   : >>> { %1015 = vmatpush.bf16.msra.mxu0 %v3558_v56  ;;  %1044 = vmatmul.bf16.gmra.mxu2 %v952_v25  ;;  %v2652_v56 = vld [vmem:[%s3510_s18 + $0x140] sm:$0xff]  ;;  %v789_v25 = vshrl.u32 %v588_v6, 16  ;;  %v2645_v54 = vld [vmem:[%s3510_s18 + $0x108] sm:$0xff] }
  0x8d   : >>> { %1543 = vmatpush.bf16.msrb.mxu1 %v2652_v56  ;;  %v953_v52 = vrot.slane %v3731_v18, 1  ;;  %v1096_v56 = vshrl.u32 %v937_v48, 16 }
  0x8f   : >>> { %v954_v17 = vsel %vm939_vm4, %v951_v2, %v953_v52  ;;  %v1098_v59 = vrot.slane %v1096_v56, 1 }
  0x90   : >>> { %1016 = vmatpush.bf16.msra.mxu0 %v3572_v60  ;;  %v787_v60 = vrot.slane %v785_v63, 1  ;;  %v1099_v63 = vshll.u32 %v937_v48, 16  ;;  %v1448_v48 = vrot.slane %v3668_v20, 3 }
  0x92   : >>> { %v791_v2 = vor.u32 %v789_v25, %v787_v60  ;;  %v1285_v25 = vrot.slane %v3650_v9, 2  ;;  %v1107_v9 = vrot.slane %v3591_v7, 1 }
  0x94   : >>> { %1017 = vmatpush.bf16.msra.mxu0 %v3587_v5  ;;  %v788_v5 = vsel %vm728_vm3, %v783_v10, %v787_v60  ;;  %v1443_v10 = vshll.u32 %v1281_v43, 16  ;;  %v2537_v60 = vld [vmem:[%s3560_s3] sm:$0x8] }
  0x96   : >>> { %v1445_v47 = vrot.slane %v1443_v10, 3  ;;  %v2662_v10 = vld [vmem:[%s3560_s3 + $0x10] sm:$0xff] }
  0x98   : >>> { %1018 = vmatpush.bf16.msra.mxu0 %v3603_v11  ;;  %v2648_v11 = vld [vmem:[%s3510_s18 + $0x120] sm:$0xff] }
  0x9a   : >>> { %683 = vmatmul.bf16.gmra.mxu3 %v3690_v58 }
  0x9b   : >>> { %886 = vmatmul.bf16.gmra.mxu1 %v788_v5  ;;  %1019 = vmatmul.bf16.vlgmr.msra.gmra.mxu0 %v942_v50  ;;  %v1101_v5 = vrot.slane %v1099_v63, 2  ;;  %v1103_v50 = vrot.slane %v3697_v44, 1  ;;  %v1451_v63 = vrot.slane %v3591_v7, 2  ;;  %v1112_v7 = vrot.slane %v3594_v8, 2 }
  0x9c   : >>> { %1355 = vmatpush.bf16.msrb.mxu0 %v2651_v49  ;;  %1049 = vmatmul.bf16.gmra.mxu2 %v954_v17  ;;  %v1440_v49 = vshrl.u32 %v1281_v43, 16  ;;  %v1447_v17 = vrot.slane %v3697_v44, 2 }
  0x9d   : >>> { %v1105_v22 = vor.u32 %v1104_v14, %v1103_v50 }
  0xa0   : >>> { %1356 = vmatpush.bf16.msrb.mxu0 %v2650_v15  ;;  %v2660_v15 = vld [vmem:[%s3560_s3] sm:$0xf0] }
  0xa4   : >>> { %1357 = vmatpush.bf16.msrb.mxu0 %v2649_v19  ;;  %v2661_v19 = vld [vmem:[%s3560_s3 + $0x8] sm:$0xff] }
  0xa8   : >>> { %1358 = vmatpush.bf16.msrb.mxu0 %v2648_v11  ;;  %v1102_v11 = vor.u32 %v1101_v5, %v1098_v59  ;;  %v1679_v59 = vrot.slane %v2662_v10, 3 }
  0xaa   : >>> { %688 = vmatmul.bf16.gmra.mxu3 %v588_v6  ;;  %v1442_v6 = vrot.slane %v1440_v49, 2  ;;  %v1106_v44 = vsel %vm1094_vm5, %v1102_v11, %v1105_v22  ;;  %v1452_v49 = vrot.slane %v3578_v62, 3 }
  0xab   : >>> { %891 = vmatmul.bf16.gmra.mxu1 %v791_v2  ;;  %1024 = vmatmul.bf16.gmra.mxu0 %v944_v51  ;;  %v1677_v51 = vrot.slane %v2661_v19, 3  ;;  %v1289_v19 = vrot.slane %v3575_v61, 2 }
  0xac   : >>> { %1359 = vmatpush.bf16.msrb.mxu0 %v2647_v24  ;;  %1054 = vmatmul.bf16.gmra.mxu2 %v953_v52  ;;  %v2538_v52 = vor.u32 %v2660_v15, %v2537_v60  ;;  %v1284_v24 = vrot.slane %v1281_v43, 2  ;;  %v1446_v53 = vor.u32 %v1445_v47, %v1442_v6  ;;  %v1108_v43 = vrot.slane %v3578_v62, 2 }
  0xad   : >>> { %v1287_v60 = vrot.slane %v3563_v57, 2  ;;  %v1453_v15 = vor.u32 %v1452_v49, %v1451_v63  ;;  %v1680_v6 = vsel %vm1675_vm8, %v1677_v51, %v1679_v59  ;;  %v1111_v62 = vrot.slane %v3636_v42, 1  ;;  %v2664_v63 = vld [vmem:[%s3560_s3 + $0x20] sm:$0xff] }
  0xae   : >>> { %v1676_v2 = vrot.slane %v2538_v52, 3  ;;  %v1286_v20 = vsel %vm1283_vm6, %v1284_v24, %v1285_v25  ;;  %v1455_v57 = vrot.slane %v3636_v42, 2  ;;  %v1456_v47 = vrot.slane %v3594_v8, 3 }
  0xaf   : >>> { %v1288_v50 = vsel %vm1283_vm6, %v1285_v25, %v1287_v60 }
  0xb0   : >>> { %1360 = vmatpush.bf16.msrb.mxu0 %v2646_v26  ;;  %v1449_v26 = vor.u32 %v1448_v48, %v1447_v17  ;;  %v1678_v56 = vsel %vm1675_vm8, %v1676_v2, %v1677_v51  ;;  %v2663_v17 = vld [vmem:[%s3560_s3 + $0x18] sm:$0xff]  ;;  %v1113_v48 = vor.u32 %v1112_v7, %v1111_v62  ;;  %v1457_v52 = vor.u32 %v1456_v47, %v1455_v57 }
  0xb1   : >>> { %v1681_v11 = vrot.slane %v2663_v17, 3 }
  0xb2   : >>> { %v1454_v14 = vsel %vm1438_vm7, %v1449_v26, %v1453_v15 }
  0xb3   : >>> { %v1682_v2 = vsel %vm1675_vm8, %v1679_v59, %v1681_v11 }
  0xb4   : >>> { %1361 = vmatpush.bf16.msrb.mxu0 %v2645_v54  ;;  %v1450_v54 = vsel %vm1438_vm7, %v1446_v53, %v1449_v26  ;;  %v1290_v53 = vsel %vm1283_vm6, %v1287_v60, %v1289_v19  ;;  %v1458_v26 = vsel %vm1438_vm7, %v1453_v15, %v1457_v52  ;;  %v1683_v15 = vrot.slane %v2664_v63, 3 }
  0xb6   : >>> { %v1684_v7 = vsel %vm1675_vm8, %v1681_v11, %v1683_v15  ;;  %v1463_v11 = vrot.slane %v3700_v46, 2 }
  0xb8   : >>> { %1362 = vmatpush.bf16.msrb.mxu0 %v2644_v13  ;;  %v1109_v13 = vor.u32 %v1108_v43, %v1107_v9  ;;  %v1459_v9 = vrot.slane %v3671_v21, 2  ;;  %v1460_v43 = vrot.slane %v3639_v45, 3 }
  0xba   : >>> { %1200 = vmatmul.bf16.vlgmr.msrb.gmra.mxu3 %v1106_v44  ;;  %v1110_v5 = vsel %vm1094_vm5, %v1105_v22, %v1109_v13  ;;  %v1114_v24 = vsel %vm1094_vm5, %v1109_v13, %v1113_v48  ;;  %v1115_v44 = vrot.slane %v3671_v21, 1  ;;  %v1291_v13 = vrot.slane %v3629_v23, 2 }
  0xbb   : >>> { %1363 = vmatmul.bf16.vlgmr.msrb.gmra.mxu0 %v1286_v20  ;;  %1544 = vmatmul.bf16.vlgmr.msrb.gmra.mxu1 %v1450_v54  ;;  %v1116_v20 = vrot.slane %v3639_v45, 2 }
  0xbc   : >>> { %1755 = vmatmul.bf16.vlgmr.msrb.gmra.mxu2 %v1678_v56  ;;  %v1292_v45 = vsel %vm1283_vm6, %v1289_v19, %v1291_v13  ;;  %v1120_v19 = vrot.slane %v3674_v55, 2 }
  0xbd   : >>> { %v1117_v10 = vor.u32 %v1116_v20, %v1115_v44 }
  0xca   : >>> { %1205 = vmatmul.bf16.gmra.mxu3 %v1110_v5 }
  0xcb   : >>> { %1368 = vmatmul.bf16.gmra.mxu0 %v1288_v50  ;;  %1549 = vmatmul.bf16.gmra.mxu1 %v1454_v14  ;;  %v1118_v14 = vsel %vm1094_vm5, %v1113_v48, %v1117_v10  ;;  %v1119_v48 = vrot.slane %v3700_v46, 1 }
  0xcc   : >>> { %1760 = vmatmul.bf16.gmra.mxu2 %v1680_v6 }
  0xd7   : >>> { %v654_v22 = vpop.f32.mrf.mxu0 }
  0xd8   : >>> { %v867_v25 = vpop.f32.mrf.mxu1 }
  0xda   : >>> { %1210 = vmatmul.bf16.gmra.mxu3 %v1114_v24 }
  0xdb   : >>> { %1373 = vmatmul.bf16.gmra.mxu0 %v1290_v53  ;;  %1554 = vmatmul.bf16.gmra.mxu1 %v1458_v26  ;;  %v2665_v53 = vld [vmem:[%s3560_s3 + $0x28] sm:$0xff] }
  0xdc   : >>> { %1765 = vmatmul.bf16.gmra.mxu2 %v1682_v2  ;;  %v1121_v2 = vor.u32 %v1120_v19, %v1119_v48 }
  0xdd   : >>> { %v664_v8 = vpop.f32.mrf.mxu3 }
  0xde   : >>> { %v697_v61 = vadd.f32 %v3203_v37, %v664_v8  ;;  %v1461_v37 = vor.u32 %v1460_v43, %v1459_v9  ;;  %v1293_v8 = vrot.slane %v3660_v16, 2 }
  0xdf   : >>> { %v1030_v42 = vpop.f32.mrf.mxu2  ;;  %v3786_v51 = vpop.f32.mrf.mxu0 }
  0xe0   : >>> { %v900_v54 = vadd.f32 %v867_v25, %v697_v61  ;;  %v869_v56 = vpop.f32.mrf.mxu1  ;;  %v1462_v62 = vsel %vm1438_vm7, %v1457_v52, %v1461_v37  ;;  %v1464_v25 = vrot.slane %v3674_v55, 3  ;;  %v1294_v55 = vsel %vm1283_vm6, %v1291_v13, %v1293_v8 }
  0xe1   : >>> { %v1123_v13 = vrot.slane %v3728_v3, 1 }
  0xe2   : >>> { %v3793_v49 = vadd.f32 %v1030_v42, %v900_v54  ;;  %v1685_v42 = vrot.slane %v2665_v53, 3  ;;  %v693_v54 = vadd.f32 %v3219_v41, %v654_v22  ;;  %v694_v22 = vadd.f32 %v3215_v40, %v3786_v51 }
  0xe3   : >>> { %v1295_v40 = vrot.slane %v3690_v58, 2 }
  0xe4   : >>> { %v1686_v16 = vsel %vm1675_vm8, %v1683_v15, %v1685_v42 }
  0xe5   : >>> { %v666_v60 = vpop.f32.mrf.mxu3 }
  0xe6   : >>> { %v698_v59 = vadd.f32 %v3199_v36, %v666_v60 }
  0xe7   : >>> { %v1032_v5 = vpop.f32.mrf.mxu2  ;;  %v3797_v50 = vpop.f32.mrf.mxu0 }
  0xe8   : >>> { %v901_v6 = vadd.f32 %v869_v56, %v698_v59  ;;  %v872_v21 = vpop.f32.mrf.mxu1  ;;  %v1122_v56 = vsel %vm1094_vm5, %v1117_v10, %v1121_v2 }
  0xea   : >>> { %v3803_v23 = vadd.f32 %v1032_v5, %v901_v6  ;;  %1215 = vmatmul.bf16.gmra.mxu3 %v1118_v14  ;;  %v1467_v6 = vrot.slane %v3728_v3, 2  ;;  %v695_v3 = vadd.f32 %v3211_v39, %v3797_v50  ;;  %v1128_v39 = vshrl.u32 %v3731_v18, 16 }
  0xeb   : >>> { %1378 = vmatmul.bf16.gmra.mxu0 %v1292_v45  ;;  %1559 = vmatmul.bf16.gmra.mxu1 %v1462_v62  ;;  %v2666_v62 = vld [vmem:[%s3560_s3 + $0x30] sm:$0xff]  ;;  %v1131_v50 = vshll.u32 %v3731_v18, 16 }
  0xec   : >>> { %1770 = vmatmul.bf16.gmra.mxu2 %v1684_v7  ;;  %v1256_v7 = vld [vmem:[%s3560_s3 + $0x38] sm:$0xf]  ;;  %v1687_v48 = vrot.slane %v2666_v62, 3 }
  0xed   : >>> { %v669_v36 = vpop.f32.mrf.mxu3 }
  0xee   : >>> { %v699_v57 = vadd.f32 %v3195_v35, %v669_v36  ;;  %v1465_v35 = vor.u32 %v1464_v25, %v1463_v11 }
  0xef   : >>> { %v1035_v47 = vpop.f32.mrf.mxu2  ;;  %v3806_v17 = vpop.f32.mrf.mxu0 }
  0xf0   : >>> { %v902_v52 = vadd.f32 %v872_v21, %v699_v57  ;;  %v874_v24 = vpop.f32.mrf.mxu1  ;;  %v1466_v63 = vsel %vm1438_vm7, %v1461_v37, %v1465_v35  ;;  %v1124_v37 = vrot.slane %v3703_v12, 2  ;;  %v1468_v21 = vrot.slane %v3703_v12, 3 }
  0xf1   : >>> { %v1280_v57 = vunpack.c.l.b16 %v1256_v7 }
  0xf2   : >>> { %v3813_v26 = vadd.f32 %v1035_v47, %v902_v52  ;;  %v1125_v36 = vor.u32 %v1124_v37, %v1123_v13  ;;  %v1469_v51 = vor.u32 %v1468_v21, %v1467_v6 }
  0xf4   : >>> { %v1126_v12 = vsel %vm1094_vm5, %v1121_v2, %v1125_v36  ;;  %v1470_v58 = vsel %vm1438_vm7, %v1465_v35, %v1469_v51 }
  0xf5   : >>> { %v671_v61 = vpop.f32.mrf.mxu3 }
  0xf6   : >>> { %v700_v44 = vadd.f32 %v3191_v34, %v671_v61  ;;  %v3846_v61 = vpack.c.b16 %v1280_v57, %v1280_v57 }
  0xf7   : >>> { %v1037_v20 = vpop.f32.mrf.mxu2 }
  0xf8   : >>> { %v903_v9 = vadd.f32 %v874_v24, %v700_v44  ;;  %v857_v46 = vpop.f32.mrf.mxu0  ;;  %v877_v43 = vpop.f32.mrf.mxu1  ;;  %v1296_v24 = vsel %vm1283_vm6, %v1293_v8, %v1295_v40  ;;  %v1472_v2 = vshrl.u32 %v3846_v61, 16  ;;  %v1475_v8 = vshll.u32 %v3846_v61, 16 }
  0xf9   : >>> { %v3821_v60 = vadd.f32 %v857_v46, %v693_v54 }
  0xfa   : >>> { %v3824_v59 = vadd.f32 %v1037_v20, %v903_v9  ;;  %1220 = vmatmul.bf16.gmra.mxu3 %v1122_v56  ;;  %v2565_v56 = vld [vmem:[%s3560_s3 + $0x38] sm:$0xf]  ;;  %v2667_v9 = vld [vmem:[%s3560_s3 + $0x38] sm:$0x10]  ;;  %v1474_v18 = vrot.slane %v1472_v2, 2 }
  0xfb   : >>> { %1383 = vmatmul.bf16.gmra.mxu0 %v1294_v55  ;;  %1564 = vmatmul.bf16.gmra.mxu1 %v1466_v63  ;;  %v1133_v55 = vrot.slane %v1131_v50, 2 }
  0xfc   : >>> { %1775 = vmatmul.bf16.gmra.mxu2 %v1686_v16 }
  0xfd   : >>> { %v674_v34 = vpop.f32.mrf.mxu3 }
  0xfe   : >>> { %v701_v41 = vadd.f32 %v3187_v33, %v674_v34 }
  0xff   : >>> { %v1040_v10 = vpop.f32.mrf.mxu2 }
 0x100   : >>> { %v904_v15 = vadd.f32 %v877_v43, %v701_v41  ;;  %v859_v5 = vpop.f32.mrf.mxu0  ;;  %v879_v14 = vpop.f32.mrf.mxu1  ;;  %v1130_v43 = vrot.slane %v1128_v39, 1  ;;  %v1477_v41 = vrot.slane %v1475_v8, 3 }
 0x101   : >>> { %v3833_v45 = vadd.f32 %v859_v5, %v694_v22 }
 0x102   : >>> { %v3837_v33 = vadd.f32 %v1040_v10, %v904_v15  ;;  %v2566_v10 = vor.u32 %v2667_v9, %v2565_v56  ;;  %v1134_v37 = vor.u32 %v1133_v55, %v1130_v43  ;;  %v1478_v15 = vor.u32 %v1477_v41, %v1474_v18 }
 0x104   : >>> { %v1135_v6 = vsel %vm1094_vm5, %v1125_v36, %v1134_v37 }
 0x105   : >>> { %v676_v47 = vpop.f32.mrf.mxu3 }
 0x106   : >>> { %v702_v19 = vadd.f32 %v3183_v32, %v676_v47  ;;  %v1688_v32 = vsel %vm1675_vm8, %v1685_v42, %v1687_v48  ;;  %v696_v42 = vadd.f32 %v3207_v38, %v3806_v17  ;;  %v1479_v47 = vsel %vm1438_vm7, %v1469_v51, %v1478_v15 }
 0x107   : >>> { %v1042_v52 = vpop.f32.mrf.mxu2 }
 0x108   : >>> { %v905_v11 = vadd.f32 %v879_v14, %v702_v19  ;;  %v862_v25 = vpop.f32.mrf.mxu0  ;;  %v882_v53 = vpop.f32.mrf.mxu1  ;;  %v1689_v14 = vrot.slane %v2566_v10, 3 }
 0x109   : >>> { %v898_v44 = vadd.f32 %v862_v25, %v695_v3 }
 0x10a   : >>> { %v3849_v20 = vadd.f32 %v1042_v52, %v905_v11  ;;  %1225 = vmatmul.bf16.gmra.mxu3 %v1126_v12  ;;  %v1690_v3 = vsel %vm1675_vm8, %v1687_v48, %v1689_v14 }
 0x10b   : >>> { %1388 = vmatmul.bf16.gmra.mxu0 %v1296_v24  ;;  %1569 = vmatmul.bf16.gmra.mxu1 %v1470_v58 }
 0x10c   : >>> { %1780 = vmatmul.bf16.gmra.mxu2 %v1688_v32 }
 0x10d   : >>> { %v679_v35 = vpop.f32.mrf.mxu3 }
 0x10e   : >>> { %v703_v54 = vadd.f32 %v3179_v31, %v679_v35  ;;  %v1297_v31 = vrot.slane %v3846_v61, 2 }
 0x10f   : >>> { %v1045_v46 = vpop.f32.mrf.mxu2 }
 0x110   : >>> { %v906_v63 = vadd.f32 %v882_v53, %v703_v54  ;;  %v864_v16 = vpop.f32.mrf.mxu0  ;;  %v884_v34 = vpop.f32.mrf.mxu1  ;;  %v1298_v57 = vsel %vm1283_vm6, %v1295_v40, %v1297_v31 }
 0x111   : >>> { %v899_v22 = vadd.f32 %v864_v16, %v696_v42 }
 0x112   : >>> { %v3860_v13 = vadd.f32 %v1045_v46, %v906_v63 }
 0x115   : >>> { %v681_v5 = vpop.f32.mrf.mxu3 }
 0x116   : >>> { %v704_v38 = vadd.f32 %v3175_v30, %v681_v5 }
 0x117   : >>> { %v1047_v17 = vpop.f32.mrf.mxu2 }
 0x118   : >>> { %v907_v21 = vadd.f32 %v884_v34, %v704_v38  ;;  %v887_v62 = vpop.f32.mrf.mxu1  ;;  %v1020_v7 = vpop.f32.mrf.mxu0 }
 0x119   : >>> { %v1059_v19 = vadd.f32 %v1020_v7, %v3821_v60 }
 0x11a   : >>> { %v3869_v52 = vadd.f32 %v1047_v17, %v907_v21  ;;  %1230 = vmatmul.bf16.gmra.mxu3 %v1135_v6 }
 0x11b   : >>> { %1393 = vmatmul.bf16.gmra.mxu0 %v1298_v57  ;;  %1574 = vmatmul.bf16.gmra.mxu1 %v1479_v47 }
 0x11c   : >>> { %1785 = vmatmul.bf16.gmra.mxu2 %v1690_v3 }
 0x11d   : >>> { %v684_v30 = vpop.f32.mrf.mxu3 }
 0x11e   : >>> { %v705_v36 = vadd.f32 %v3171_v29, %v684_v30 }
 0x11f   : >>> { %v1050_v12 = vpop.f32.mrf.mxu2 }
 0x120   : >>> { %v908_v24 = vadd.f32 %v887_v62, %v705_v36  ;;  %v889_v11 = vpop.f32.mrf.mxu1  ;;  %v1022_v25 = vpop.f32.mrf.mxu0 }
 0x121   : >>> { %v1060_v40 = vadd.f32 %v1022_v25, %v3833_v45 }
 0x122   : >>> { %v3873_v51 = vadd.f32 %v1050_v12, %v908_v24 }
 0x125   : >>> { %v686_v60 = vpop.f32.mrf.mxu3 }
 0x126   : >>> { %v706_v48 = vadd.f32 %v3167_v1, %v686_v60 }
 0x127   : >>> { %v1052_v53 = vpop.f32.mrf.mxu2 }
 0x128   : >>> { %v909_v58 = vadd.f32 %v889_v11, %v706_v48  ;;  %v892_v61 = vpop.f32.mrf.mxu1  ;;  %v1025_v32 = vpop.f32.mrf.mxu0 }
 0x129   : >>> { %v1061_v39 = vadd.f32 %v1025_v32, %v898_v44 }
 0x12a   : >>> { %v3876_v50 = vadd.f32 %v1052_v53, %v909_v58  ;;  %1235 = vmatmul.bf16.gmra.mxu3 %v1134_v37 }
 0x12b   : >>> { %1398 = vmatmul.bf16.gmra.mxu0 %v1297_v31  ;;  %1579 = vmatmul.bf16.gmra.mxu1 %v1478_v15 }
 0x12c   : >>> { %1790 = vmatmul.bf16.gmra.mxu2 %v1689_v14 }
 0x12d   : >>> { %v689_v29 = vpop.f32.mrf.mxu3 }
 0x12e   : >>> { %v707_v2 = vadd.f32 %v3163_v0, %v689_v29 }
 0x12f   : >>> { %v1055_v45 = vpop.f32.mrf.mxu2 }
 0x130   : >>> { %v910_v8 = vadd.f32 %v892_v61, %v707_v2  ;;  %v894_v35 = vpop.f32.mrf.mxu1  ;;  %v1027_v54 = vpop.f32.mrf.mxu0 }
 0x131   : >>> { %v1062_v56 = vadd.f32 %v1027_v54, %v899_v22 }
 0x132   : >>> { %v3879_v1 = vadd.f32 %v1055_v45, %v910_v8 }
 0x135   : >>> { %v691_v9 = vpop.f32.mrf.mxu3 }
 0x137   : >>> { %v1057_v42 = vpop.f32.mrf.mxu2 }
 0x138   : >>> { %v1364_v46 = vpop.f32.mrf.mxu0  ;;  %v1545_v44 = vpop.f32.mrf.mxu1 }
 0x13d   : >>> { %v1201_v43 = vpop.f32.mrf.mxu3 }
 0x13e   : >>> { %v1240_v55 = vadd.f32 %v1201_v43, %v1059_v19 }
 0x13f   : >>> { %v1756_v63 = vpop.f32.mrf.mxu2 }
 0x140   : >>> { %v1403_v16 = vadd.f32 %v1364_v46, %v1240_v55  ;;  %v1366_v34 = vpop.f32.mrf.mxu0  ;;  %v1547_v18 = vpop.f32.mrf.mxu1 }
 0x142   : >>> { %v1584_v41 = vadd.f32 %v1545_v44, %v1403_v16 }
 0x144   : >>> { %v3881_v41 = vadd.f32 %v1756_v63, %v1584_v41  }
 0x145   : >>> { %v1203_v0 = vpop.f32.mrf.mxu3 }
 0x146   : >>> { %v4049_v10 = vmov %v3881_v41  ;;  %v1241_v37 = vadd.f32 %v1203_v0, %v1060_v40 }
 0x147   : >>> { %v1758_v31 = vpop.f32.mrf.mxu2 }
 0x148   : >>> { %v1404_v15 = vadd.f32 %v1366_v34, %v1241_v37  ;;  %v1369_v22 = vpop.f32.mrf.mxu0  ;;  %v1550_v5 = vpop.f32.mrf.mxu1 }
 0x14a   : >>> { %v1585_v14 = vadd.f32 %v1547_v18, %v1404_v15 }
 0x14c   : >>> { %v3883_v40 = vadd.f32 %v1758_v31, %v1585_v14  }
 0x14d   : >>> { %v1206_v38 = vpop.f32.mrf.mxu3 }
 0x14e   : >>> { %v4050_v17 = vmov %v3883_v40  ;;  %v1242_v6 = vadd.f32 %v1206_v38, %v1061_v39 }
 0x14f   : >>> { %v1761_v21 = vpop.f32.mrf.mxu2 }
 0x150   : >>> { %v1405_v62 = vadd.f32 %v1369_v22, %v1242_v6  ;;  %v1371_v7 = vpop.f32.mrf.mxu0  ;;  %v1552_v57 = vpop.f32.mrf.mxu1 }
 0x152   : >>> { %v1586_v47 = vadd.f32 %v1550_v5, %v1405_v62 }
 0x154   : >>> { %v3885_v39 = vadd.f32 %v1761_v21, %v1586_v47  }
 0x155   : >>> { %v1208_v3 = vpop.f32.mrf.mxu3 }
 0x156   : >>> { %v4051_v19 = vmov %v3885_v39  ;;  %v1243_v30 = vadd.f32 %v1208_v3, %v1062_v56 }
 0x157   : >>> { %v1763_v36 = vpop.f32.mrf.mxu2 }
 0x158   : >>> { %v1406_v12 = vadd.f32 %v1371_v7, %v1243_v30  ;;  %v1374_v24 = vpop.f32.mrf.mxu0  ;;  %v1555_v11 = vpop.f32.mrf.mxu1 }
 0x15a   : >>> { %v1587_v25 = vadd.f32 %v1552_v57, %v1406_v12 }
 0x15c   : >>> { %v3887_v38 = vadd.f32 %v1763_v36, %v1587_v25  }
 0x15d   : >>> { %v1211_v48 = vpop.f32.mrf.mxu3 }
 0x15e   : >>> { %v4052_v60 = vmov %v3887_v38  ;;  %v1244_v40 = vadd.f32 %v1211_v48, %v3793_v49 }
 0x15f   : >>> { %v1766_v53 = vpop.f32.mrf.mxu2 }
 0x160   : >>> { %v1407_v58 = vadd.f32 %v1374_v24, %v1244_v40  ;;  %v1376_v61 = vpop.f32.mrf.mxu0  ;;  %v1557_v32 = vpop.f32.mrf.mxu1 }
 0x162   : >>> { %v1588_v29 = vadd.f32 %v1555_v11, %v1407_v58 }
 0x164   : >>> { %v3890_v37 = vadd.f32 %v1766_v53, %v1588_v29  }
 0x165   : >>> { %v1213_v39 = vpop.f32.mrf.mxu3 }
 0x166   : >>> { %v4053_v2 = vmov %v3890_v37  ;;  %v1245_v45 = vadd.f32 %v1213_v39, %v3803_v23 }
 0x167   : >>> { %v1768_v8 = vpop.f32.mrf.mxu2 }
 0x168   : >>> { %v1408_v35 = vadd.f32 %v1376_v61, %v1245_v45  ;;  %v1379_v54 = vpop.f32.mrf.mxu0  ;;  %v1560_v56 = vpop.f32.mrf.mxu1 }
 0x16a   : >>> { %v1589_v9 = vadd.f32 %v1557_v32, %v1408_v35 }
 0x16c   : >>> { %v3893_v36 = vadd.f32 %v1768_v8, %v1589_v9  }
 0x16d   : >>> { %v1216_v46 = vpop.f32.mrf.mxu3 }
 0x16e   : >>> { %v4054_v42 = vmov %v3893_v36  ;;  %v1246_v49 = vadd.f32 %v1216_v46, %v3813_v26 }
 0x16f   : >>> { %v1771_v44 = vpop.f32.mrf.mxu2 }
 0x170   : >>> { %v1409_v43 = vadd.f32 %v1379_v54, %v1246_v49  ;;  %v1381_v55 = vpop.f32.mrf.mxu0  ;;  %v1562_v63 = vpop.f32.mrf.mxu1 }
 0x172   : >>> { %v1590_v16 = vadd.f32 %v1560_v56, %v1409_v43 }
 0x174   : >>> { %v3896_v35 = vadd.f32 %v1771_v44, %v1590_v16  }
 0x175   : >>> { %v1218_v34 = vpop.f32.mrf.mxu3 }
 0x176   : >>> { %v4055_v18 = vmov %v3896_v35  ;;  %v1247_v23 = vadd.f32 %v1218_v34, %v3824_v59 }
 0x177   : >>> { %v1773_v41 = vpop.f32.mrf.mxu2 }
 0x178   : >>> { %v1410_v0 = vadd.f32 %v1381_v55, %v1247_v23  ;;  %v1384_v37 = vpop.f32.mrf.mxu0  ;;  %v1565_v31 = vpop.f32.mrf.mxu1 }
 0x17a   : >>> { %v1591_v15 = vadd.f32 %v1562_v63, %v1410_v0 }
 0x17c   : >>> { %v3899_v34 = vadd.f32 %v1773_v41, %v1591_v15  }
 0x17d   : >>> { %v1221_v5 = vpop.f32.mrf.mxu3 }
 0x17e   : >>> { %v4056_v22 = vmov %v3899_v34  ;;  %v1248_v26 = vadd.f32 %v1221_v5, %v3837_v33 }
 0x17f   : >>> { %v1776_v14 = vpop.f32.mrf.mxu2 }
 0x180   : >>> { %v1411_v38 = vadd.f32 %v1384_v37, %v1248_v26  ;;  %v1386_v6 = vpop.f32.mrf.mxu0  ;;  %v1567_v21 = vpop.f32.mrf.mxu1 }
 0x182   : >>> { %v1592_v62 = vadd.f32 %v1565_v31, %v1411_v38 }
 0x184   : >>> { %v3902_v33 = vadd.f32 %v1776_v14, %v1592_v62  }
 0x185   : >>> { %v1223_v57 = vpop.f32.mrf.mxu3 }
 0x186   : >>> { %v4057_v7 = vmov %v3902_v33  ;;  %v1249_v59 = vadd.f32 %v1223_v57, %v3849_v20 }
 0x187   : >>> { %v1778_v47 = vpop.f32.mrf.mxu2 }
 0x188   : >>> { %v1412_v3 = vadd.f32 %v1386_v6, %v1249_v59  ;;  %v1389_v30 = vpop.f32.mrf.mxu0  ;;  %v1570_v36 = vpop.f32.mrf.mxu1 }
 0x18a   : >>> { %v1593_v12 = vadd.f32 %v1567_v21, %v1412_v3 }
 0x18c   : >>> { %v3905_v32 = vadd.f32 %v1778_v47, %v1593_v12  }
 0x18d   : >>> { %v1226_v11 = vpop.f32.mrf.mxu3 }
 0x18e   : >>> { %v4058_v24 = vmov %v3905_v32  ;;  %v1250_v25 = vadd.f32 %v1226_v11, %v3860_v13 }
 0x18f   : >>> { %v1781_v48 = vpop.f32.mrf.mxu2 }
 0x190   : >>> { %v1413_v40 = vadd.f32 %v1389_v30, %v1250_v25  ;;  %v1391_v53 = vpop.f32.mrf.mxu0  ;;  %v1572_v58 = vpop.f32.mrf.mxu1 }
 0x192   : >>> { %v1594_v61 = vadd.f32 %v1570_v36, %v1413_v40  ;;  %v4074_v36 = vmov %v4054_v42  ;;  %v4078_v40 = vmov %v4050_v17 }
 0x194   : >>> { %v3908_v31 = vadd.f32 %v1781_v48, %v1594_v61  }
 0x195   : >>> { %v1228_v33 = vpop.f32.mrf.mxu3 }
 0x196   : >>> { %v4059_v45 = vmov %v3908_v31  ;;  %v1251_v20 = vadd.f32 %v1228_v33, %v3869_v52  ;;  %v4071_v33 = vmov %v4057_v7 }
 0x197   : >>> { %v1783_v29 = vpop.f32.mrf.mxu2 }
 0x198   : >>> { %v1414_v39 = vadd.f32 %v1391_v53, %v1251_v20  ;;  %v1394_v8 = vpop.f32.mrf.mxu0  ;;  %v1575_v35 = vpop.f32.mrf.mxu1 }
 0x19a   : >>> { %v1595_v54 = vadd.f32 %v1572_v58, %v1414_v39  ;;  %v4077_v39 = vmov %v4051_v19 }
 0x19c   : >>> { %v3911_v30 = vadd.f32 %v1783_v29, %v1595_v54  }
 0x19d   : >>> { %v1231_v32 = vpop.f32.mrf.mxu3 }
 0x19e   : >>> { %v4060_v56 = vmov %v3911_v30  ;;  %v1252_v13 = vadd.f32 %v1231_v32, %v3873_v51  ;;  %v4070_v32 = vmov %v4058_v24 }
 0x19f   : >>> { %v1786_v9 = vpop.f32.mrf.mxu2  ;;  %v4068_v30 = vmov %v4060_v56 }
 0x1a0   : >>> { %v1415_v46 = vadd.f32 %v1394_v8, %v1252_v13  ;;  %v1396_v49 = vpop.f32.mrf.mxu0  ;;  %v1577_v44 = vpop.f32.mrf.mxu1 }
 0x1a2   : >>> { %v1596_v43 = vadd.f32 %v1575_v35, %v1415_v46  ;;  %v4073_v35 = vmov %v4055_v18 }
 0x1a4   : >>> { %v3914_v29 = vadd.f32 %v1786_v9, %v1596_v43  }
 0x1a5   : >>> { %v1233_v63 = vpop.f32.mrf.mxu3 }
 0x1a6   : >>> { %v4061_v55 = vmov %v3914_v29  ;;  %v1253_v52 = vadd.f32 %v1233_v63, %v3876_v50  ;;  %v1811_v50 = vperm.slane (%p3923_p9), %v3407_v4, 0  ;;  %v1863_v63 = vld [vmem:[%s3986_s22 + $0x38] sm:$0x3] (%p3923_p9) }
 0x1a7   : >>> { %v1788_v16 = vpop.f32.mrf.mxu2  ;;  %v4067_v29 = vmov %v4061_v55 }
 0x1a8   : >>> { %v1416_v34 = vadd.f32 %v1396_v49, %v1253_v52  ;;  %v1399_v23 = vpop.f32.mrf.mxu0  ;;  %v1580_v41 = vpop.f32.mrf.mxu1  ;;  %v1813_v59 = vadd.f32 (%p3923_p9), %v1811_v50, %v4049_v10  ;;  %v1814_v47 = vadd.f32 (%p3923_p9), %v1811_v50, %v4050_v17  ;;  %v1815_v3 = vadd.f32 (%p3923_p9), %v1811_v50, %v4051_v19 }
 0x1a9   : >> { %v1816_v12 = vadd.f32 (%p3923_p9), %v1811_v50, %v4052_v60  ;;  %v1817_v11 = vadd.f32 (%p3923_p9), %v1811_v50, %v4053_v2  ;;  %v1818_v25 = vadd.f32 (%p3923_p9), %v1811_v50, %v4054_v42  ;;  %v1819_v48 = vadd.f32 (%p3923_p9), %v1811_v50, %v4055_v18 }
 0x1aa   : >>> { %v1597_v0 = vadd.f32 %v1577_v44, %v1416_v34  ;;  %v4072_v34 = vmov %v4056_v22  ;;  %v2747_v53 = vpack.c.bf16 (%p3923_p9), %v1814_v47, %v1813_v59  ;;  %v1889_v30 = vmul.f32 (%p3923_p9), %v1813_v59, %v1813_v59 }
 0x1ab   : >> { %v1890_v36 = vmul.f32 (%p3923_p9), %v1814_v47, %v1814_v47  ;;  %v1891_v17 = vmul.f32 (%p3923_p9), %v1815_v3, %v1815_v3  ;;  %v2757_v19 = vpack.c.bf16 (%p3923_p9), %v1818_v25, %v1817_v11  ;;  %v1892_v40 = vmul.f32 (%p3923_p9), %v1816_v12, %v1816_v12 }
 0x1ac   : >>> { %v3917_v37 = vadd.f32 %v1788_v16, %v1597_v0   ;;  %2748 = vst [vmem:[%s3986_s22] sm:$0xff] (%p3923_p9), %v2747_v53   ;;  %v1893_v18 = vmul.f32 (%p3923_p9), %v1817_v11, %v1817_v11  ;;  %v1821_v20 = vadd.f32 (%p3923_p9), %v1811_v50, %v4057_v7  ;;  %v1822_v29 = vadd.f32 (%p3923_p9), %v1811_v50, %v4058_v24 }
 0x1ad   : >>> { %v1236_v31 = vpop.f32.mrf.mxu3  ;;  %2792 = vst [vmem:[%s3986_s22 + $0x10] sm:$0xff] (%p3923_p9), %v2757_v19   ;;  %v1823_v39 = vadd.f32 (%p3923_p9), %v1811_v50, %v4059_v45  ;;  %v1825_v8 = vadd.f32 (%p3923_p9), %v1811_v50, %v4061_v55  ;;  %v1894_v13 = vmul.f32 (%p3923_p9), %v1818_v25, %v1818_v25 }
 0x1ae   : >>> { %v4062_v15 = vmov %v3917_v37  ;;  %v1254_v51 = vadd.f32 %v1236_v31, %v3879_v1  ;;  %v4069_v31 = vmov %v4059_v45  ;;  %v4075_v37 = vmov %v4053_v2 }
 0x1af   : >>> { %v1791_v5 = vpop.f32.mrf.mxu2  ;;  %v4066_v1 = vmov %v4062_v15  ;;  %v1904_v2 = vadd.f32 (%p3923_p9), %v1890_v36, %v1889_v30  ;;  %v1826_v35 = vadd.f32 (%p3923_p9), %v1811_v50, %v4062_v15  ;;  %v2767_v9 = vpack.c.bf16 (%p3923_p9), %v1822_v29, %v1821_v20 }
 0x1b0   : >>> { %v1417_v26 = vadd.f32 %v1399_v23, %v1254_v51  ;;  %v1401_v14 = vpop.f32.mrf.mxu0  ;;  %v1582_v38 = vpop.f32.mrf.mxu1  ;;  %v1866_v1 = vadd.f32 (%p3923_p9), %v1814_v47, %v1813_v59  ;;  %v1895_v45 = vmul.f32 (%p3923_p9), %v1819_v48, %v1819_v48  ;;  %v1897_v23 = vmul.f32 (%p3923_p9), %v1821_v20, %v1821_v20 }
 0x1b1   : >>> { %v4076_v38 = vmov %v4052_v60  ;;  %v1820_v60 = vadd.f32 (%p3923_p9), %v1811_v50, %v4056_v22  ;;  %v1905_v33 = vadd.f32 (%p3923_p9), %v1904_v2, %v1891_v17  ;;  %v1824_v22 = vadd.f32 (%p3923_p9), %v1811_v50, %v4060_v56  ;;  %2794 = vst [vmem:[%s3986_s22 + $0x20] sm:$0xff] (%p3923_p9), %v2767_v9  }
 0x1b2   : >>> { %v1598_v6 = vadd.f32 %v1580_v41, %v1417_v26  ;;  %v4079_v41 = vmov %v4049_v10  ;;  %v2752_v10 = vpack.c.bf16 (%p3923_p9), %v1816_v12, %v1815_v3  ;;  %v1867_v42 = vadd.f32 (%p3923_p9), %v1866_v1, %v1815_v3 }
 0x1b3   : >> { %494 = sbr.rel (!%p3923_p9) target bundleno = 55 (0x37), region = 137  ;;  %v2762_v58 = vpack.c.bf16 (%p3923_p9), %v1820_v60, %v1819_v48  ;;  %v1906_v54 = vadd.f32 (%p3923_p9), %v1905_v33, %v1892_v40  ;;  %v2772_v7 = vpack.c.bf16 (%p3923_p9), %v1824_v22, %v1823_v39  ;;  %v2777_v46 = vpack.c.bf16 (%p3923_p9), %v1826_v35, %v1825_v8 }
 0x1b4   : >>> { %v3920_v0 = vadd.f32 %v1791_v5, %v1598_v6   ;;  %2791 = vst [vmem:[%s3986_s22 + $0x8] sm:$0xff] (%p3923_p9), %v2752_v10   ;;  %v1868_v61 = vadd.f32 (%p3923_p9), %v1867_v42, %v1816_v12  ;;  %v1896_v55 = vmul.f32 (%p3923_p9), %v1820_v60, %v1820_v60  ;;  %v1898_v15 = vmul.f32 (%p3923_p9), %v1822_v29, %v1822_v29 }
 0x1b5   : >>> { %v1238_v62 = vpop.f32.mrf.mxu3  ;;  %2793 = vst [vmem:[%s3986_s22 + $0x18] sm:$0xff] (%p3923_p9), %v2762_v58   ;;  %v1907_v49 = vadd.f32 (%p3923_p9), %v1906_v54, %v1893_v18  ;;  %v1899_v5 = vmul.f32 (%p3923_p9), %v1823_v39, %v1823_v39  ;;  %v1900_v38 = vmul.f32 (%p3923_p9), %v1824_v22, %v1824_v22  ;;  %v1902_v47 = vmul.f32 (%p3923_p9), %v1826_v35, %v1826_v35 }
 0x1b6   : >>> { %v4063_v21 = vmov %v3920_v0  ;;  %v1869_v32 = vadd.f32 (%p3923_p9), %v1868_v61, %v1817_v11  ;;  %2795 = vst [vmem:[%s3986_s22 + $0x28] sm:$0xff] (%p3923_p9), %v2772_v7   ;;  %v1901_v62 = vmul.f32 (%p3923_p9), %v1825_v8, %v1825_v8 }
 0x1b7   : >>> { %v1793_v57 = vpop.f32.mrf.mxu2  ;;  %v4065_v0 = vmov %v4063_v21  ;;  %v1827_v56 = vadd.f32 (%p3923_p9), %v1811_v50, %v4063_v21  ;;  %v1908_v44 = vadd.f32 (%p3923_p9), %v1907_v49, %v1894_v13  ;;  %2796 = vst [vmem:[%s3986_s22 + $0x30] sm:$0xff] (%p3923_p9), %v2777_v46  }
 0x1b8   : >> { %v1870_v24 = vadd.f32 %v1869_v32, %v1818_v25 }
 0x1b9   : >> { %v1842_v52 = vpack.c.bf16 %v1827_v56, %v1827_v56  ;;  %v1909_v34 = vadd.f32 %v1908_v44, %v1895_v45  ;;  %v1903_v57 = vmul.f32 %v1827_v56, %v1827_v56  ;;  %v1880_v3 = vsel %vm1879_vm12, %v1827_v56, 0.0 }
 0x1ba   : >> { %v1871_v43 = vadd.f32 %v1870_v24, %v1819_v48 }
 0x1bb   : >> { %v1864_v41 = vsel %vm1862_vm11, %v1842_v52, %v1863_v63  ;;  %v1910_v0 = vadd.f32 %v1909_v34, %v1896_v55  ;;  %v1917_v25 = vsel %vm1879_vm12, %v1903_v57, 0.0 }
 0x1bc   : >> { %v1872_v16 = vadd.f32 %v1871_v43, %v1820_v60  ;;  %1865 = vst [vmem:[%s3986_s22 + $0x38] sm:$0x3] %v1864_v41 }
 0x1bd   : >> { %v1911_v51 = vadd.f32 %v1910_v0, %v1897_v23 }
 0x1be   : >> { %v1873_v37 = vadd.f32 %v1872_v16, %v1821_v20 }
 0x1bf   : >> { %v1912_v26 = vadd.f32 %v1911_v51, %v1898_v15 }
 0x1c0   : >> { %v1874_v31 = vadd.f32 %v1873_v37, %v1822_v29 }
 0x1c1   : >> { %v1913_v21 = vadd.f32 %v1912_v26, %v1899_v5 }
 0x1c2   : >> { %v1875_v14 = vadd.f32 %v1874_v31, %v1823_v39 }
 0x1c3   : >> { %v1914_v50 = vadd.f32 %v1913_v21, %v1900_v38 }
 0x1c4   : >> { %v1876_v6 = vadd.f32 %v1875_v14, %v1824_v22 }
 0x1c5   : >> { %v1915_v11 = vadd.f32 %v1914_v50, %v1901_v62 }
 0x1c6   : >> { %v1877_v59 = vadd.f32 %v1876_v6, %v1825_v8 }
 0x1c7   : >> { %v1916_v48 = vadd.f32 %v1915_v11, %v1902_v47 }
 0x1c8   : >> { %v1878_v12 = vadd.f32 %v1877_v59, %v1826_v35 }
 0x1c9   : >> { %v1918_v30 = vadd.f32 %v1917_v25, %v1916_v48 }
 0x1ca   : >> { %v1881_v53 = vadd.f32 %v1880_v3, %v1878_v12 }
 0x1cb   : >> { %v1919_v10 = vrot.slane %v1918_v30, 4 }
 0x1cc   : >> { %v1882_v1 = vrot.slane %v1881_v53, 4 }
 0x1cd   : >> { %v1920_v19 = vadd.f32 %v1919_v10, %v1918_v30 }
 0x1ce   : >> { %v1883_v36 = vadd.f32 %v1882_v1, %v1881_v53 }
 0x1cf   : >> { %v1921_v2 = vrot.slane %v1920_v19, 2 }
 0x1d0   : >> { %v1884_v17 = vrot.slane %v1883_v36, 2 }
 0x1d1   : >> { %v1922_v40 = vadd.f32 %v1921_v2, %v1920_v19 }
 0x1d2   : >> { %v1885_v60 = vadd.f32 %v1884_v17, %v1883_v36 }
 0x1d3   : >> { %v1923_v58 = vrot.slane %v1922_v40, 1 }
 0x1d4   : >> { %v1886_v42 = vrot.slane %v1885_v60, 1 }
 0x1d5   : >> { %v1924_v33 = vadd.f32 %v1923_v58, %v1922_v40 }
 0x1d6   : >> { %v1887_v18 = vadd.f32 %v1886_v42, %v1885_v60  ;;  %485 = sbr.rel (!%p483_p10) target bundleno = 51 (0x33), region = 148 }
 0x1d7   : >> { %v1925_v20 = vadd.f32 %v3151_v27, %v1924_v33  }
 0x1d8   : >> { %v1888_v61 = vadd.f32 %v3155_v28, %v1887_v18  }
 0x1d9   : >> { %v4080_v27 = vmov %v1925_v20  ;;  %1927 = vst [vmem:[%s340_s14] sm:$0x1] (%p483_p10), %v1925_v20 }
 0x1da   : >> { %v4081_v28 = vmov %v1888_v61  ;;  %1926 = vst [vmem:[%s333_s13] sm:$0x1] (%p483_p10), %v1888_v61 }
 0x1db PF: > { %s18_s28 = sadd.s32 1, %s3143_s28   ;;  %s4082_s24 = smov %s3135_s26 }
 0x1dc   : > { %p15_p11 = scmp.ge.s32.totalorder %s18_s28, 12   ;;  %s4083_s25 = smov %s3139_s27 }
 0x1dd   : > { %s4084_s26 = smov %s4087_s29  ;;  %s4085_s27 = smov %s4091_s30 }
 0x1de   :  { %17 = sbr.rel (!%p15_p11) target bundleno = 3 (0x3), region = 159 }

// kernel: forward.11
= control target key start
LH: loop header
LB: loop body
LE: loop exit
PB: predicated region body
PF: predicated region fallthrough
CT: control target
= control target key end

     0   :  { %s2243_s24 = smov 0   ;;  %s2245_s25 = smov 0   ;;  %s2523_s0 = inlined_call_operand.vmem [shape: bf16[2,38,38,128], index: 0, kind: input, shape index: {}]   ;;  %s2524_s1 = inlined_call_operand.vmem [shape: bf16[64,128,128], index: 1, kind: input, shape index: {}]   ;;  %s2525_s2 = inlined_call_operand.vmem [shape: f32[1,128], index: 2, kind: input, shape index: {}]   ;;  %s2526_s3 = inlined_call_operand.vmem [shape: f32[1,128], index: 3, kind: input, shape index: {}]   ;;  %s2527_s4 = inlined_call_operand.vmem [shape: f32[1,128], index: 4, kind: input, shape index: {}]   ;;  %s2528_s5 = inlined_call_operand.vmem [shape: bf16[2,31,31,128], index: 5, kind: output, shape index: {0}]   ;;  %s2529_s6 = inlined_call_operand.vmem [shape: f32[2,1,1,128], index: 6, kind: output, shape index: {1}]   ;;  %s2530_s7 = inlined_call_operand.vmem [shape: f32[2,1,1,128], index: 7, kind: output, shape index: {2}]  }
   0x1   :  { %s2247_s26 = smov 0  }
   0x2 LB: > { %s30_s3 = sadd.s32 1, %s2165_s25  ;;  %p1537_p0 = scmp.ge.s32.totalorder %s2169_s26, 1  ;;  %s2169_s26 = sphi %s2247_s26, %s18_s26   ;;  %s2165_s25 = sphi %s2245_s25, %s2538_s25   ;;  %s2161_s24 = sphi %s2243_s24, %s2537_s24  }
   0x3   : > { %p32_p1 = scmp.ge.s32.totalorder %s30_s3, 2  ;;  %p260_p2 = scmp.lt.s32.totalorder %s2169_s26, 3 }
   0x5   : > { %s2540_s3 = smov (%p32_p1, %s30_s3), 0  ;;  %p261_p3 = pnand %p1537_p0, %p260_p2 }
   0x6   : > { %p309_p4 = scmp.lt.s32.totalorder (!%p261_p3), %s2161_s24, 1  ;;  %s2292_s19 = smov (!%p261_p3), 0  }
   0x7   : > { %264 = sbr.rel (%p261_p3) target bundleno = 268 (0x10c), region = 40 }
   0xc   : > { %v2264_v0 = vld [vmem:[%s2525_s2] sm:$0x1]  ;;  %s2542_s24 = smov (!%p309_p4, %s2161_s24), 1  ;;  %v2288_v1 = vmov 0.0   ;;  %v2290_v2 = vmov 0.0  }
   0xd   : > { %s2025_s28 = smul.u32 760, %s2542_s24  ;;  %s330_s8 = scalar_lea.vmem %s2529_s6, %s2542_s24 }
   0xe   : > { %s2026_s9 = smul.u32 496, %s2542_s24  ;;  %s336_s12 = scalar_lea.vmem %s2530_s7, %s2542_s24 }
   0xf   : > { %s2281_s15 = scalar_lea.vmem %s2523_s0, %s2025_s28 }
  0x10   : > { %s2286_s18 = scalar_lea.vmem %s2528_s5, %s2026_s9 }
  0x11 LB: >> { %v2303_v3 = vmov 0.0   ;;  %v2305_v4 = vmov 0.0   ;;  %v2307_v5 = vmov 0.0   ;;  %v2309_v6 = vmov 0.0   ;;  %s2311_s20 = smov 0   ;;  %s2181_s19 = sphi %s2292_s19, %s344_s19   ;;  %v2177_v2 = vphi %v2290_v2, %v2536_v2   ;;  %v2173_v1 = vphi %v2288_v1, %v2535_v1  }
  0x12 LB: >>> { %s1946_s21 = sshll.u32 %s2201_s20, 9  ;;  %s358_s27 = sadd.s32 %s2201_s20, %s2181_s19  ;;  %vm489_vm0 = vsmask.f32 7424  ;;  %vm616_vm1 = vcmask 1046528   ;;  %vm715_vm2 = vsmask.f32 6400  ;;  %s2201_s20 = sphi %s2311_s20, %s353_s20   ;;  %v2197_v6 = vphi %v2309_v6, %v2534_v6   ;;  %v2193_v5 = vphi %v2307_v5, %v2533_v5   ;;  %v2189_v4 = vphi %v2305_v4, %v2532_v4   ;;  %v2185_v3 = vphi %v2303_v3, %v2531_v3  }
  0x13   : >>> { %s2332_s4 = scalar_lea.vmem %s2524_s1, %s1946_s21  ;;  %s1942_s28 = smul.u32 20, %s358_s27  ;;  %vm843_vm3 = vcmask 1045504   ;;  %vm942_vm4 = vsmask.f32 5376  ;;  %vm1065_vm5 = vcmask 1044480  }
  0x14   : >>> { %v1954_v7 = vld [vmem:[%s2332_s4 + $0x38] sm:$0xff]  ;;  %v1953_v11 = vld [vmem:[%s2332_s4 + $0x30] sm:$0xff]  ;;  %v1952_v15 = vld [vmem:[%s2332_s4 + $0x28] sm:$0xff]  ;;  %vm1164_vm6 = vsmask.f32 4352  ;;  %s353_s20 = sadd.s32 1, %s2201_s20  }
  0x15   : >>> { %v1963_v8 = vld [vmem:[%s2332_s4 + $0x78] sm:$0xff]  ;;  %446 = vmatpush.bf16.msra.mxu0 %v1954_v7  ;;  %v1962_v12 = vld [vmem:[%s2332_s4 + $0x70] sm:$0xff]  ;;  %v1961_v16 = vld [vmem:[%s2332_s4 + $0x68] sm:$0xff]  ;;  %s2349_s29 = scalar_lea.vmem %s2281_s15, %s1942_s28  ;;  %p350_p5 = scmp.ge.s32.totalorder %s353_s20, 8  }
  0x16   : >>> { %v1973_v9 = vld [vmem:[%s2332_s4 + $0xb8] sm:$0xff]  ;;  %555 = vmatpush.bf16.msra.mxu1 %v1963_v8  ;;  %v1972_v13 = vld [vmem:[%s2332_s4 + $0xb0] sm:$0xff]  ;;  %v1971_v17 = vld [vmem:[%s2332_s4 + $0xa8] sm:$0xff]  ;;  %s2019_s30 = sshll.u32 (%p350_p5), %s2181_s19, 4  ;;  %vm1276_vm7 = vcmask (%p350_p5), 1043456   ;;  %s344_s19 = sadd.s32 (%p350_p5), 1, %s2181_s19  }
  0x17   : >>> { %v1982_v10 = vld [vmem:[%s2332_s4 + $0xf8] sm:$0xff]  ;;  %672 = vmatpush.bf16.msra.mxu2 %v1973_v9  ;;  %v1981_v14 = vld [vmem:[%s2332_s4 + $0xf0] sm:$0xff]  ;;  %v1980_v18 = vld [vmem:[%s2332_s4 + $0xe8] sm:$0xff]  ;;  %s1272_s9 = scalar_lea.vmem (%p350_p5), %s2286_s18, %s2019_s30  ;;  %vm1277_vm8 = vsmask.f32 (%p350_p5), 3328  ;;  %p341_p6 = scmp.ge.s32.totalorder (%p350_p5), %s344_s19, 31  }
  0x18   : >>> { %792 = vmatpush.bf16.msra.mxu3 %v1982_v10  ;;  %v1951_v19 = vld [vmem:[%s2332_s4 + $0x20] sm:$0xff]  ;;  %v1950_v27 = vld [vmem:[%s2332_s4 + $0x18] sm:$0xff]  ;;  %v2367_v32 = vld [vmem:[%s2349_s29 + $0x8] sm:$0xff] }
  0x19   : >>> { %447 = vmatpush.bf16.msra.mxu0 %v1953_v11  ;;  %v1960_v20 = vld [vmem:[%s2332_s4 + $0x60] sm:$0xff]  ;;  %v1959_v28 = vld [vmem:[%s2332_s4 + $0x58] sm:$0xff]  ;;  %v1949_v34 = vld [vmem:[%s2332_s4 + $0x10] sm:$0xff]  ;;  %v2379_v42 = vshrl.u32 %v2367_v32, 16  ;;  %v2382_v43 = vshll.u32 %v2367_v32, 16  ;;  %v618_v60 = vrot.slane %v2367_v32, 1 }
  0x1a   : >>> { %556 = vmatpush.bf16.msra.mxu1 %v1962_v12  ;;  %v1970_v21 = vld [vmem:[%s2332_s4 + $0xa0] sm:$0xff]  ;;  %v1969_v30 = vld [vmem:[%s2332_s4 + $0x98] sm:$0xff]  ;;  %v1958_v35 = vld [vmem:[%s2332_s4 + $0x50] sm:$0xff] }
  0x1b   : >>> { %673 = vmatpush.bf16.msra.mxu2 %v1972_v13  ;;  %v1979_v22 = vld [vmem:[%s2332_s4 + $0xe0] sm:$0xff]  ;;  %v1978_v31 = vld [vmem:[%s2332_s4 + $0xd8] sm:$0xff]  ;;  %v2373_v36 = vld [vmem:[%s2349_s29 + $0x8] sm:$0xff]  ;;  %v727_v53 = vrot.slane %v2379_v42, 1  ;;  %v730_v54 = vrot.slane %v2382_v43, 2 }
  0x1c   : >>> { %793 = vmatpush.bf16.msra.mxu3 %v1981_v14  ;;  %v578_v23 = vld [vmem:[%s2349_s29] sm:$0xe]  ;;  %v579_v24 = vld [vmem:[%s2349_s29 + $0x4] sm:$0xf]  ;;  %v1968_v38 = vld [vmem:[%s2332_s4 + $0x90] sm:$0xff]  ;;  %v498_v48 = vshll.u32 %v2373_v36, 16 }
  0x1d   : >>> { %448 = vmatpush.bf16.msra.mxu0 %v1952_v15  ;;  %v608_v25 = vunpack.c.l.b16 %v578_v23  ;;  %v2357_v26 = vunpack.c.l.b16 %v579_v24  ;;  %v2362_v29 = vld [vmem:[%s2349_s29] sm:$0xff]  ;;  %v1977_v39 = vld [vmem:[%s2332_s4 + $0xd0] sm:$0xff]  ;;  %v1948_v44 = vld [vmem:[%s2332_s4 + $0x8] sm:$0xff]  ;;  %v2400_v8 = vor.u32 %v730_v54, %v727_v53 }
  0x1e   : >>> { %557 = vmatpush.bf16.msra.mxu1 %v1961_v16  ;;  %v493_v37 = vshll.u32 %v2362_v29, 16  ;;  %v1957_v45 = vld [vmem:[%s2332_s4 + $0x48] sm:$0xff]  ;;  %v491_v46 = vshrl.u32 %v2362_v29, 16  ;;  %v582_v55 = vld [vmem:[%s2349_s29 + $0x10] sm:$0x1]  ;;  %v1947_v56 = vld [vmem:[%s2332_s4] sm:$0xff] }
  0x1f   : >>> { %674 = vmatpush.bf16.msra.mxu2 %v1971_v17  ;;  %v613_v33 = vpack.c.b16 %v2357_v26, %v608_v25  ;;  %v1967_v49 = vld [vmem:[%s2332_s4 + $0x88] sm:$0xff]  ;;  %v1956_v57 = vld [vmem:[%s2332_s4 + $0x40] sm:$0xff]  ;;  %v2395_v59 = vrot.slane %v498_v48, 1  ;;  %v612_v9 = vunpack.c.l.b16 %v582_v55  ;;  %v2009_v10 = vld [vmem:[%s2332_s4 + $0x1b8] sm:$0xff] }
  0x20   : >>> { %794 = vmatpush.bf16.msra.mxu3 %v1980_v18  ;;  %v495_v47 = vrot.slane %v493_v37, 1  ;;  %v1976_v50 = vld [vmem:[%s2332_s4 + $0xc8] sm:$0xff]  ;;  %v1966_v61 = vld [vmem:[%s2332_s4 + $0x80] sm:$0xff]  ;;  %v1991_v11 = vld [vmem:[%s2332_s4 + $0x138] sm:$0xff] }
  0x21   : >>> { %449 = vmatpush.bf16.msra.mxu0 %v1951_v19  ;;  %v717_v40 = vshrl.u32 %v613_v33, 16  ;;  %v720_v41 = vshll.u32 %v613_v33, 16  ;;  %v1975_v62 = vld [vmem:[%s2332_s4 + $0xc0] sm:$0xff]  ;;  %v617_v63 = vrot.slane %v613_v33, 1  ;;  %v2000_v15 = vld [vmem:[%s2332_s4 + $0x178] sm:$0xff]  ;;  %v615_v17 = vpack.c.b16 %v612_v9, %v612_v9  ;;  %v2008_v18 = vld [vmem:[%s2332_s4 + $0x1b0] sm:$0xff] }
  0x22   : >>> { %558 = vmatpush.bf16.msra.mxu1 %v1960_v20  ;;  %v496_v58 = vor.u32 %v495_v47, %v491_v46  ;;  %v2018_v16 = vld [vmem:[%s2332_s4 + $0x1f8] sm:$0xff]  ;;  %v1990_v19 = vld [vmem:[%s2332_s4 + $0x130] sm:$0xff]  ;;  %v2007_v24 = vld [vmem:[%s2332_s4 + $0x1a8] sm:$0xff] }
  0x23   : >>> { %675 = vmatpush.bf16.msra.mxu2 %v1970_v21  ;;  %v719_v51 = vrot.slane %v717_v40, 1  ;;  %v722_v52 = vrot.slane %v720_v41, 2  ;;  %v619_v13 = vsel %vm616_vm1, %v617_v63, %v618_v60  ;;  %v1999_v20 = vld [vmem:[%s2332_s4 + $0x170] sm:$0xff]  ;;  %v737_v23 = vshll.u32 %v615_v17, 16  ;;  %v1989_v25 = vld [vmem:[%s2332_s4 + $0x128] sm:$0xff]  ;;  %v2006_v33 = vld [vmem:[%s2332_s4 + $0x1a0] sm:$0xff] }
  0x24   : >>> { %795 = vmatpush.bf16.msra.mxu3 %v1979_v22  ;;  %v501_v12 = vsel %vm489_vm0, %v496_v58, %v2395_v59  ;;  %v2017_v21 = vld [vmem:[%s2332_s4 + $0x1f0] sm:$0xff]  ;;  %v734_v22 = vshrl.u32 %v615_v17, 16  ;;  %v1037_v37 = vld [vmem:[%s2349_s29] sm:$0x8]  ;;  %v620_v41 = vrot.slane %v615_v17, 1  ;;  %v1987_v46 = vld [vmem:[%s2332_s4 + $0x118] sm:$0xff] }
  0x25   : >>> { %450 = vmatpush.bf16.msra.mxu0 %v1950_v27  ;;  %v723_v7 = vor.u32 %v722_v52, %v719_v51  ;;  %v1998_v27 = vld [vmem:[%s2332_s4 + $0x168] sm:$0xff]  ;;  %v2015_v40 = vld [vmem:[%s2332_s4 + $0x1e0] sm:$0xff]  ;;  %v1061_v47 = vunpack.c.l.b16 %v1037_v37  ;;  %v1996_v52 = vld [vmem:[%s2332_s4 + $0x158] sm:$0xff]  ;;  %v1174_v17 = vrot.slane %v2382_v43, 4 }
  0x26   : >>> { %559 = vmatpush.bf16.msra.mxu1 %v1959_v28  ;;  %v2016_v28 = vld [vmem:[%s2332_s4 + $0x1e8] sm:$0xff]  ;;  %v2014_v53 = vld [vmem:[%s2332_s4 + $0x1d8] sm:$0xff]  ;;  %v2004_v54 = vld [vmem:[%s2332_s4 + $0x190] sm:$0xff] }
  0x27   : >>> { %676 = vmatpush.bf16.msra.mxu2 %v1969_v30  ;;  %v732_v14 = vsel %vm715_vm2, %v723_v7, %v2400_v8  ;;  %v739_v30 = vrot.slane %v737_v23, 2  ;;  %v1986_v55 = vld [vmem:[%s2332_s4 + $0x110] sm:$0xff]  ;;  %v1994_v63 = vld [vmem:[%s2332_s4 + $0x148] sm:$0xff]  ;;  %v1993_v23 = vld [vmem:[%s2332_s4 + $0x140] sm:$0xff] }
  0x28   : >>> { %796 = vmatpush.bf16.msra.mxu3 %v1978_v31  ;;  %v815_v31 = vld [vmem:[%s2349_s29] sm:$0xc]  ;;  %v2012_v9 = vld [vmem:[%s2332_s4 + $0x1c8] sm:$0xff]  ;;  %vm1278_vm9 = vmand (%p350_p5), %vm1276_vm7, %vm1277_vm8 }
  0x29   : >>> { %451 = vmatpush.bf16.msra.mxu0 %v1949_v34  ;;  %v1988_v34 = vld [vmem:[%s2332_s4 + $0x120] sm:$0xff] }
  0x2a   : >>> { %560 = vmatpush.bf16.msra.mxu1 %v1958_v35  ;;  %v502_v35 = vshrl.u32 %v2373_v36, 16 }
  0x2b   : >>> { %677 = vmatpush.bf16.msra.mxu2 %v1968_v38  ;;  %v839_v38 = vunpack.c.l.b16 %v815_v31 }
  0x2c   : >>> { %797 = vmatpush.bf16.msra.mxu3 %v1977_v39  ;;  %v1997_v39 = vld [vmem:[%s2332_s4 + $0x160] sm:$0xff]  ;;  %v504_v48 = vor.u32 %v502_v35, %v2395_v59  ;;  %v1995_v59 = vld [vmem:[%s2332_s4 + $0x150] sm:$0xff] }
  0x2d   : >>> { %452 = vmatpush.bf16.msra.mxu0 %v1948_v44 }
  0x2e   : >>> { %561 = vmatpush.bf16.msra.mxu1 %v1957_v45  ;;  %v2005_v45 = vld [vmem:[%s2332_s4 + $0x198] sm:$0xff] }
  0x2f   : >>> { %678 = vmatpush.bf16.msra.mxu2 %v1967_v49  ;;  %v2433_v49 = vpack.c.b16 %v2357_v26, %v839_v38 }
  0x30   : >>> { %798 = vmatpush.bf16.msra.mxu3 %v1976_v50  ;;  %v621_v50 = vsel %vm616_vm1, %v618_v60, %v620_v41  ;;  %v2013_v60 = vld [vmem:[%s2332_s4 + $0x1d0] sm:$0xff] }
  0x31   : >>> { %453 = vmatpush.bf16.msra.mxu0 %v1947_v56  ;;  %v1063_v56 = vpack.c.b16 %v2357_v26, %v1061_v47  ;;  %v947_v58 = vshll.u32 %v2433_v49, 16  ;;  %v2003_v26 = vld [vmem:[%s2332_s4 + $0x188] sm:$0xff] }
  0x32   : >>> { %562 = vmatpush.bf16.msra.mxu1 %v1956_v57  ;;  %v944_v57 = vshrl.u32 %v2433_v49, 16 }
  0x33   : >>> { %679 = vmatpush.bf16.msra.mxu2 %v1966_v61  ;;  %v1985_v61 = vld [vmem:[%s2332_s4 + $0x108] sm:$0xff] }
  0x34   : >>> { %799 = vmatpush.bf16.msra.mxu3 %v1975_v62  ;;  %454 = vmatmul.bf16.vlgmr.msra.gmra.mxu0 %v2362_v29  ;;  %v736_v29 = vrot.slane %v734_v22, 1  ;;  %v1169_v62 = vshll.u32 %v1063_v56, 16  ;;  %v946_v7 = vrot.slane %v944_v57, 2 }
  0x35   : >>> { %899 = vmatpush.bf16.msrb.mxu0 %v1991_v11  ;;  %563 = vmatmul.bf16.vlgmr.msra.gmra.mxu1 %v501_v12  ;;  %v1984_v11 = vld [vmem:[%s2332_s4 + $0x100] sm:$0xff]  ;;  %v951_v12 = vrot.slane %v2379_v42, 2 }
  0x36   : >>> { %680 = vmatmul.bf16.vlgmr.msra.gmra.mxu2 %v619_v13  ;;  %1014 = vmatpush.bf16.msrb.mxu1 %v2000_v15  ;;  %v740_v44 = vor.u32 %v739_v30, %v736_v29  ;;  %v952_v13 = vrot.slane %v2382_v43, 3  ;;  %v1171_v15 = vrot.slane %v1169_v62, 4 }
  0x37   : >>> { %1121 = vmatpush.bf16.msrb.mxu2 %v2009_v10  ;;  %800 = vmatmul.bf16.vlgmr.msra.gmra.mxu3 %v732_v14  ;;  %v2002_v10 = vld [vmem:[%s2332_s4 + $0x180] sm:$0xff] }
  0x38   : >>> { %1236 = vmatpush.bf16.msrb.mxu3 %v2018_v16  ;;  %v741_v51 = vsel %vm715_vm2, %v2400_v8, %v740_v44  ;;  %v949_v8 = vrot.slane %v947_v58, 3  ;;  %v1173_v16 = vrot.slane %v2379_v42, 3 }
  0x39   : >>> { %900 = vmatpush.bf16.msrb.mxu0 %v1990_v19  ;;  %v1038_v19 = vld [vmem:[%s2349_s29 + $0x10] sm:$0x7] }
  0x3a   : >>> { %1015 = vmatpush.bf16.msrb.mxu1 %v1999_v20  ;;  %v844_v20 = vrot.slane %v2433_v49, 2  ;;  %v950_v22 = vor.u32 %v949_v8, %v946_v7  ;;  %v1175_v29 = vor.u32 %v1174_v17, %v1173_v16  ;;  %v1062_v30 = vunpack.c.l.b16 %v1038_v19 }
  0x3b   : >>> { %1122 = vmatpush.bf16.msrb.mxu2 %v2008_v18  ;;  %v816_v18 = vld [vmem:[%s2349_s29 + $0x10] sm:$0x3] }
  0x3c   : >>> { %1237 = vmatpush.bf16.msrb.mxu3 %v2017_v21  ;;  %v845_v21 = vrot.slane %v2367_v32, 2  ;;  %v840_v42 = vunpack.c.l.b16 %v816_v18 }
  0x3d   : >>> { %901 = vmatpush.bf16.msrb.mxu0 %v1989_v25  ;;  %v953_v25 = vor.u32 %v952_v13, %v951_v12 }
  0x3e   : >>> { %1016 = vmatpush.bf16.msrb.mxu1 %v1998_v27  ;;  %v1066_v27 = vrot.slane %v1063_v56, 3  ;;  %v846_v31 = vsel %vm843_vm3, %v844_v20, %v845_v21  ;;  %v842_v35 = vpack.c.b16 %v840_v42, %v840_v42 }
  0x3f   : >>> { %1123 = vmatpush.bf16.msrb.mxu2 %v2007_v24  ;;  %v2011_v24 = vld [vmem:[%s2332_s4 + $0x1c0] sm:$0xff] }
  0x40   : >>> { %1238 = vmatpush.bf16.msrb.mxu3 %v2016_v28  ;;  %v1067_v28 = vrot.slane %v2367_v32, 3  ;;  %v1064_v32 = vpack.c.b16 %v1062_v30, %v1062_v30  ;;  %v956_v38 = vshrl.u32 %v842_v35, 16 }
  0x41   : >>> { %902 = vmatpush.bf16.msrb.mxu0 %v1988_v34 }
  0x42   : >>> { %1017 = vmatpush.bf16.msrb.mxu1 %v1997_v39  ;;  %v1068_v34 = vsel %vm1065_vm5, %v1066_v27, %v1067_v28  ;;  %v959_v39 = vshll.u32 %v842_v35, 16  ;;  %v1181_v41 = vshll.u32 %v1064_v32, 16  ;;  %v958_v44 = vrot.slane %v956_v38, 2 }
  0x43   : >>> { %1124 = vmatpush.bf16.msrb.mxu2 %v2006_v33  ;;  %v954_v33 = vsel %vm942_vm4, %v950_v22, %v953_v25 }
  0x44   : >>> { %1239 = vmatpush.bf16.msrb.mxu3 %v2015_v40  ;;  %459 = vmatmul.bf16.gmra.mxu0 %v2373_v36  ;;  %v1166_v36 = vshrl.u32 %v1063_v56, 16  ;;  %v1178_v40 = vshrl.u32 %v1064_v32, 16  ;;  %v1183_v47 = vrot.slane %v1181_v41, 4 }
  0x45   : >>> { %903 = vmatpush.bf16.msrb.mxu0 %v1987_v46  ;;  %568 = vmatmul.bf16.gmra.mxu1 %v504_v48  ;;  %v847_v48 = vrot.slane %v842_v35, 2 }
  0x46   : >>> { %685 = vmatmul.bf16.gmra.mxu2 %v621_v50  ;;  %1018 = vmatpush.bf16.msrb.mxu1 %v1996_v52  ;;  %v1168_v14 = vrot.slane %v1166_v36, 3  ;;  %v1180_v46 = vrot.slane %v1178_v40, 3  ;;  %v1069_v50 = vrot.slane %v1064_v32, 3 }
  0x47   : >>> { %1125 = vmatpush.bf16.msrb.mxu2 %v2005_v45  ;;  %805 = vmatmul.bf16.gmra.mxu3 %v741_v51  ;;  %v961_v45 = vrot.slane %v959_v39, 3  ;;  %v848_v52 = vsel %vm843_vm3, %v845_v21, %v847_v48 }
  0x48   : >>> { %1240 = vmatpush.bf16.msrb.mxu3 %v2014_v53  ;;  %v1172_v43 = vor.u32 %v1171_v15, %v1168_v14  ;;  %v1184_v51 = vor.u32 %v1183_v47, %v1180_v46 }
  0x49   : >>> { %904 = vmatpush.bf16.msrb.mxu0 %v1986_v55  ;;  %v962_v49 = vor.u32 %v961_v45, %v958_v44 }
  0x4a   : >>> { %1019 = vmatpush.bf16.msrb.mxu1 %v1995_v59  ;;  %v1176_v37 = vsel %vm1164_vm6, %v1172_v43, %v1175_v29  ;;  %v1185_v55 = vsel %vm1164_vm6, %v1175_v29, %v1184_v51 }
  0x4b   : >>> { %1126 = vmatpush.bf16.msrb.mxu2 %v2004_v54  ;;  %v963_v53 = vsel %vm942_vm4, %v953_v25, %v962_v49  ;;  %v1070_v54 = vsel %vm1065_vm5, %v1067_v28, %v1069_v50 }
  0x4c   : >>> { %1241 = vmatpush.bf16.msrb.mxu3 %v2013_v60 }
  0x4d   : >>> { %905 = vmatpush.bf16.msrb.mxu0 %v1985_v61 }
  0x4e   : >>> { %1020 = vmatpush.bf16.msrb.mxu1 %v1994_v63 }
  0x4f   : >>> { %1127 = vmatpush.bf16.msrb.mxu2 %v2003_v26 }
  0x50   : >>> { %1242 = vmatpush.bf16.msrb.mxu3 %v2012_v9 }
  0x51   : >>> { %906 = vmatpush.bf16.msrb.mxu0 %v1984_v11 }
  0x52   : >>> { %1021 = vmatpush.bf16.msrb.mxu1 %v1993_v23 }
  0x53   : >>> { %1128 = vmatpush.bf16.msrb.mxu2 %v2002_v10 }
  0x54   : >>> { %1243 = vmatpush.bf16.msrb.mxu3 %v2011_v24  ;;  %907 = vmatmul.bf16.vlgmr.msrb.gmra.mxu0 %v846_v31 }
  0x55   : >>> { %1022 = vmatmul.bf16.vlgmr.msrb.gmra.mxu1 %v954_v33 }
  0x56   : >>> { %1129 = vmatmul.bf16.vlgmr.msrb.gmra.mxu2 %v1068_v34 }
  0x57   : >>> { %1244 = vmatmul.bf16.vlgmr.msrb.gmra.mxu3 %v1176_v37 }
  0x64   : >>> { %912 = vmatmul.bf16.gmra.mxu0 %v848_v52 }
  0x65   : >>> { %1027 = vmatmul.bf16.gmra.mxu1 %v963_v53 }
  0x66   : >>> { %1134 = vmatmul.bf16.gmra.mxu2 %v1070_v54 }
  0x67   : >>> { %1249 = vmatmul.bf16.gmra.mxu3 %v1185_v55 }
  0xb1   : >>> { %v455_v56 = vpop.f32.mrf.mxu0 }
  0xb2   : >>> { %v564_v57 = vpop.f32.mrf.mxu1  ;;  %v465_v7 = vadd.f32 %v2197_v6, %v455_v56 }
  0xb4   : >>> { %v574_v10 = vadd.f32 %v564_v57, %v465_v7 }
  0xb9   : >>> { %v681_v58 = vpop.f32.mrf.mxu2  ;;  %v457_v60 = vpop.f32.mrf.mxu0 }
  0xba   : >>> { %v801_v59 = vpop.f32.mrf.mxu3  ;;  %v566_v26 = vpop.f32.mrf.mxu1  ;;  %v691_v13 = vadd.f32 %v681_v58, %v574_v10  ;;  %v466_v14 = vadd.f32 %v2193_v5, %v457_v60 }
  0xbc   : >>> { %v811_v17 = vadd.f32 %v801_v59, %v691_v13  ;;  %v575_v20 = vadd.f32 %v566_v26, %v466_v14  ;;  %v1260_v59 = vperm.slane (%p350_p5), %v2264_v0, 0 }
  0xc1   : >>> { %v683_v61 = vpop.f32.mrf.mxu2  ;;  %v460_v62 = vpop.f32.mrf.mxu0 }
  0xc2   : >>> { %v803_v36 = vpop.f32.mrf.mxu3  ;;  %v569_v63 = vpop.f32.mrf.mxu1  ;;  %v692_v22 = vadd.f32 %v683_v61, %v575_v20  ;;  %v467_v23 = vadd.f32 %v2189_v4, %v460_v62 }
  0xc4   : >>> { %v812_v25 = vadd.f32 %v803_v36, %v692_v22  ;;  %v576_v27 = vadd.f32 %v569_v63, %v467_v23 }
  0xc9   : >>> { %v686_v8 = vpop.f32.mrf.mxu2  ;;  %v462_v11 = vpop.f32.mrf.mxu0 }
  0xca   : >>> { %v806_v9 = vpop.f32.mrf.mxu3  ;;  %v571_v12 = vpop.f32.mrf.mxu1  ;;  %v693_v31 = vadd.f32 %v686_v8, %v576_v27  ;;  %v468_v33 = vadd.f32 %v2185_v3, %v462_v11 }
  0xcc   : >>> { %v813_v37 = vadd.f32 %v806_v9, %v693_v31  ;;  %v577_v4 = vadd.f32 %v571_v12, %v468_v33  ;;  %v1279_v9 = vld [vmem:[%s1272_s9 + $0xc] sm:$0xf] (%p350_p5) }
  0xd1   : >>> { %v688_v15 = vpop.f32.mrf.mxu2  ;;  %v908_v18 = vpop.f32.mrf.mxu0 }
  0xd2   : >>> { %v808_v16 = vpop.f32.mrf.mxu3  ;;  %v1023_v19 = vpop.f32.mrf.mxu1  ;;  %v918_v21 = vadd.f32 %v908_v18, %v811_v17  ;;  %v694_v45 = vadd.f32 %v688_v15, %v577_v4 }
  0xd4   : >>> { %v1033_v24 = vadd.f32 %v1023_v19, %v918_v21  ;;  %v814_v48 = vadd.f32 %v808_v16, %v694_v45 }
  0xd9   : >>> { %v1130_v6 = vpop.f32.mrf.mxu2  ;;  %v910_v43 = vpop.f32.mrf.mxu0 }
  0xda   : >>> { %v1140_v28 = vadd.f32 %v1130_v6, %v1033_v24  ;;  %v1245_v42 = vpop.f32.mrf.mxu3  ;;  %v1025_v29 = vpop.f32.mrf.mxu1  ;;  %v919_v5 = vadd.f32 %v910_v43, %v812_v25 }
  0xdc   : >>> { %v1255_v30 = vadd.f32 %v1245_v42, %v1140_v28   ;;  %v1034_v34 = vadd.f32 %v1025_v29, %v919_v5 }
  0xde   : >>> { %v2534_v6 = vmov %v1255_v30  ;;  %v1262_v60 = vadd.f32 (%p350_p5), %v1260_v59, %v1255_v30 }
  0xe0   : >> { %v1294_v7 = vmul.f32 (%p350_p5), %v1262_v60, %v1262_v60 }
  0xe1   : >>> { %v1132_v35 = vpop.f32.mrf.mxu2  ;;  %v913_v39 = vpop.f32.mrf.mxu0 }
  0xe2   : >>> { %v1141_v32 = vadd.f32 %v1132_v35, %v1034_v34  ;;  %v1247_v38 = vpop.f32.mrf.mxu3  ;;  %v920_v41 = vadd.f32 %v913_v39, %v813_v37  ;;  %v1028_v44 = vpop.f32.mrf.mxu1 }
  0xe4   : >>> { %v1256_v40 = vadd.f32 %v1247_v38, %v1141_v32   ;;  %v1035_v46 = vadd.f32 %v1028_v44, %v920_v41 }
  0xe6   : >>> { %v2533_v5 = vmov %v1256_v40  ;;  %v1263_v26 = vadd.f32 (%p350_p5), %v1260_v59, %v1256_v40 }
  0xe8   : >> { %v2023_v62 = vpack.c.bf16 (%p350_p5), %v1263_v26, %v1262_v60  ;;  %v1282_v63 = vadd.f32 (%p350_p5), %v1263_v26, %v1262_v60  ;;  %v1295_v8 = vmul.f32 (%p350_p5), %v1263_v26, %v1263_v26 }
  0xe9   : >>> { %v1135_v47 = vpop.f32.mrf.mxu2  ;;  %v915_v51 = vpop.f32.mrf.mxu0 }
  0xea   : >>> { %v1142_v49 = vadd.f32 %v1135_v47, %v1035_v46  ;;  %v1250_v50 = vpop.f32.mrf.mxu3  ;;  %v921_v53 = vadd.f32 %v915_v51, %v814_v48  ;;  %v1030_v3 = vpop.f32.mrf.mxu1  ;;  %2024 = vst [vmem:[%s1272_s9] sm:$0xff] (%p350_p5), %v2023_v62   ;;  %v1298_v14 = vadd.f32 (%p350_p5), %v1295_v8, %v1294_v7 }
  0xec   : >>> { %v1257_v52 = vadd.f32 %v1250_v50, %v1142_v49   ;;  %v1036_v54 = vadd.f32 %v1030_v3, %v921_v53 }
  0xee   : >>> { %v2532_v4 = vmov %v1257_v52  ;;  %v1264_v61 = vadd.f32 (%p350_p5), %v1260_v59, %v1257_v52 }
  0xf0   : >> { %v1268_v10 = vpack.c.bf16 (%p350_p5), %v1264_v61, %v1264_v61  ;;  %v1296_v11 = vmul.f32 (%p350_p5), %v1264_v61, %v1264_v61  ;;  %v1283_v15 = vadd.f32 (%p350_p5), %v1282_v63, %v1264_v61 }
  0xf1   : >>> { %v1137_v55 = vpop.f32.mrf.mxu2 }
  0xf2   : >>> { %v1143_v56 = vadd.f32 %v1137_v55, %v1036_v54  ;;  %v1252_v57 = vpop.f32.mrf.mxu3  ;;  %352 = sbr.rel (!%p350_p5) target bundleno = 18 (0x12), region = 118  ;;  %1275 = vst [vmem:[%s1272_s9 + $0x8] sm:$0xf] (%p350_p5), %v1268_v10  ;;  %v1299_v18 = vadd.f32 (%p350_p5), %v1298_v14, %v1296_v11 }
  0xf4   : >>> { %v1258_v58 = vadd.f32 %v1252_v57, %v1143_v56  }
  0xf6   : >>> { %v2531_v3 = vmov %v1258_v58  ;;  %v1265_v36 = vadd.f32 (%p350_p5), %v1260_v59, %v1258_v58 }
  0xf8   : >> { %v1269_v12 = vpack.c.bf16 %v1265_v36, %v1265_v36  ;;  %v1285_v13 = vsel %vm616_vm1, %v1265_v36, 0.0  ;;  %v1297_v16 = vmul.f32 %v1265_v36, %v1265_v36 }
  0xf9   : >> { %v1286_v19 = vadd.f32 %v1285_v13, %v1283_v15 }
  0xfa   : >> { %v1280_v17 = vsel %vm1278_vm9, %v1269_v12, %v1279_v9  ;;  %v1300_v20 = vsel %vm616_vm1, %v1297_v16, 0.0 }
  0xfb   : >> { %1281 = vst [vmem:[%s1272_s9 + $0xc] sm:$0xf] %v1280_v17  ;;  %v1287_v21 = vrot.slane %v1286_v19, 4  ;;  %v1301_v22 = vadd.f32 %v1300_v20, %v1299_v18 }
  0xfd   : >> { %v1288_v23 = vadd.f32 %v1287_v21, %v1286_v19  ;;  %v1302_v24 = vrot.slane %v1301_v22, 4 }
  0xff   : >> { %v1289_v6 = vrot.slane %v1288_v23, 2  ;;  %v1303_v25 = vadd.f32 %v1302_v24, %v1301_v22 }
 0x101   : >> { %v1290_v27 = vadd.f32 %v1289_v6, %v1288_v23  ;;  %v1304_v28 = vrot.slane %v1303_v25, 2 }
 0x103   : >> { %v1291_v42 = vrot.slane %v1290_v27, 1  ;;  %v1305_v43 = vadd.f32 %v1304_v28, %v1303_v25 }
 0x105   : >> { %v1292_v29 = vadd.f32 %v1291_v42, %v1290_v27  ;;  %v1306_v30 = vrot.slane %v1305_v43, 1 }
 0x107   : >> { %v1293_v5 = vadd.f32 %v2177_v2, %v1292_v29   ;;  %v1307_v31 = vadd.f32 %v1306_v30, %v1305_v43  ;;  %343 = sbr.rel (!%p341_p6) target bundleno = 17 (0x11), region = 129 }
 0x109   : >> { %v1308_v33 = vadd.f32 %v2173_v1, %v1307_v31   ;;  %v2536_v2 = vmov %v1293_v5  ;;  %1309 = vst [vmem:[%s330_s8] sm:$0x1] (%p341_p6), %v1293_v5 }
 0x10b   : >> { %v2535_v1 = vmov %v1308_v33  ;;  %1310 = vst [vmem:[%s336_s12] sm:$0x1] (%p341_p6), %v1308_v33 }
 0x10c PF: > { %s18_s26 = sadd.s32 1, %s2169_s26   ;;  %s2537_s24 = smov %s2165_s25 }
 0x10d   : > { %p15_p7 = scmp.ge.s32.totalorder %s18_s26, 4   ;;  %s2538_s25 = smov %s2540_s3 }
 0x10f   :  { %17 = sbr.rel (!%p15_p7) target bundleno = 2 (0x2), region = 140 }

// kernel: forward.13
= control target key start
LH: loop header
LB: loop body
LE: loop exit
PB: predicated region body
PF: predicated region fallthrough
CT: control target
= control target key end

     0   :  { %s454_s12 = smov 0   ;;  %s506_s0 = inlined_call_operand.vmem [shape: bf16[2,25,25,128], index: 0, kind: input, shape index: {}]   ;;  %s507_s1 = inlined_call_operand.vmem [shape: f32[1,128], index: 1, kind: input, shape index: {}]   ;;  %s508_s2 = inlined_call_operand.vmem [shape: f32[1,128], index: 2, kind: input, shape index: {}]   ;;  %s509_s3 = inlined_call_operand.vmem [shape: bf16[2,8,8,128], index: 3, kind: output, shape index: {}]  }
   0x1 LB: > { %s368_s13 = sadd.s32 4294967295, %s427_s12   ;;  %p372_p0 = scmp.ge.s32.totalorder %s427_s12, 1  ;;  %s427_s12 = sphi %s454_s12, %s13_s12  }
   0x2   : > { %p137_p1 = scmp.lt.s32.totalorder %s427_s12, 3 }
   0x4   : > { %p138_p2 = pnand %p372_p0, %p137_p1 }
   0x5   : > { %p161_p3 = scmp.lt.s32.totalorder (!%p138_p2), %s368_s13, 1  ;;  %s486_s26 = smov (!%p138_p2), 0  }
   0x6   : > { %141 = sbr.rel (%p138_p2) target bundleno = 186 (0xba), region = 32 }
   0xb   : > { %v465_v0 = vld [vmem:[%s507_s1] sm:$0x1]  ;;  %v174_v2 = vlaneseq  ;;  %s511_s13 = smov (!%p161_p3, %s368_s13), 1  ;;  %v433_v6 = vmov 0.0  }
   0xc   : > { %v470_v1 = vld [vmem:[%s508_s2] sm:$0x1]  ;;  %s399_s18 = smul.u32 400, %s511_s13  ;;  %s383_s19 = sshll.u32 %s511_s13, 5 }
   0xd   : > { %v175_v3 = vshrl.u32 %v174_v2, 7  ;;  %v177_v4 = vand.u32 127, %v174_v2  ;;  %s475_s22 = scalar_lea.vmem %s509_s3, %s383_s19 }
   0xe   : > { %s480_s25 = scalar_lea.vmem %s506_s0, %s399_s18 }
   0xf   : > { %v178_v5 = vmul.u32 3, %v175_v3 }
  0x11   : > { %vm179_vm0 = vcmp.eq.s32.totalorder %v177_v4, %v178_v5 }
  0x12   : > { %v482_v7 = vsel %vm179_vm0, 1.0, %v433_v6 }
  0x13   : > { %v182_v8 = vpack.c.bf16 %v482_v7, %v482_v7 }
  0x14 LB: >> { %s384_s27 = smul.u32 48, %s431_s26  ;;  %v212_v9 = vperm.slane %v465_v0, 0  ;;  %v224_v16 = vperm.slane %v470_v1, 0  ;;  %vm253_vm1 = vcmask 1046528   ;;  %vm265_vm2 = vcmask 1045504   ;;  %s380_s29 = sshll.u32 %s431_s26, 2  ;;  %s431_s26 = sphi %s486_s26, %s188_s26  }
  0x15   : >> { %vm283_vm3 = vcmask 1042432   ;;  %vm279_vm4 = vcmask 179200   ;;  %s302_s30 = scalar_lea.vmem %s475_s22, %s380_s29  ;;  %s188_s26 = sadd.s32 1, %s431_s26  }
  0x16   : >> { %s192_s28 = scalar_lea.vmem %s480_s25, %s384_s27  ;;  %p185_p4 = scmp.ge.s32.totalorder %s188_s26, 8  }
  0x17   : >> { %v195_v10 = vld [vmem:[%s192_s28 + $0x8] sm:$0xf]  ;;  %v198_v11 = vld [vmem:[%s192_s28 + $0x18] sm:$0xf]  ;;  %v386_v17 = vld [vmem:[%s192_s28] sm:$0xff]  }
  0x18   : >> { %v201_v12 = vld [vmem:[%s192_s28 + $0x28] sm:$0xf]  ;;  %v204_v13 = vunpack.c.l.bf16 %v195_v10  ;;  %v207_v14 = vunpack.c.l.bf16 %v198_v11  ;;  %v397_v18 = vld [vmem:[%s192_s28 + $0x10] sm:$0xff]   ;;  %v398_v19 = vld [vmem:[%s192_s28 + $0x20] sm:$0xff]   ;;  %v387_v20 = vunpack.c.l.bf16 %v386_v17  ;;  %v388_v21 = vunpack.c.h.bf16 %v386_v17 }
  0x19   : >> { %v210_v15 = vunpack.c.l.bf16 %v201_v12  ;;  %v391_v22 = vunpack.c.l.bf16 %v397_v18  ;;  %v392_v23 = vunpack.c.h.bf16 %v397_v18  ;;  %v395_v27 = vunpack.c.l.bf16 %v398_v19 }
  0x1a   : >> { %v216_v24 = vmul.f32 %v212_v9, %v204_v13  ;;  %v219_v25 = vmul.f32 %v212_v9, %v207_v14  ;;  %v396_v28 = vunpack.c.h.bf16 %v398_v19  ;;  %v214_v29 = vmul.f32 %v387_v20, %v212_v9 }
  0x1b   : >> { %v222_v26 = vmul.f32 %v212_v9, %v210_v15  ;;  %v215_v30 = vmul.f32 %v388_v21, %v212_v9  ;;  %v217_v31 = vmul.f32 %v391_v22, %v212_v9  ;;  %v218_v35 = vmul.f32 %v392_v23, %v212_v9 }
  0x1c   : >> { %v228_v32 = vadd.f32 %v224_v16, %v216_v24  ;;  %v231_v33 = vadd.f32 %v224_v16, %v219_v25  ;;  %v220_v36 = vmul.f32 %v395_v27, %v212_v9  ;;  %v221_v37 = vmul.f32 %v396_v28, %v212_v9 }
  0x1d   : >> { %v234_v34 = vadd.f32 %v224_v16, %v222_v26  ;;  %v226_v38 = vadd.f32 %v224_v16, %v214_v29  ;;  %v227_v39 = vadd.f32 %v224_v16, %v215_v30  ;;  %v229_v43 = vadd.f32 %v224_v16, %v217_v31 }
  0x1e   : >> { %v237_v40 = vmax.f32 %v228_v32, 0.0  ;;  %v240_v41 = vmax.f32 %v231_v33, 0.0  ;;  %v230_v44 = vadd.f32 %v224_v16, %v218_v35  ;;  %v232_v45 = vadd.f32 %v224_v16, %v220_v36 }
  0x1f   : >> { %v243_v42 = vmax.f32 %v234_v34, 0.0  ;;  %v233_v46 = vadd.f32 %v224_v16, %v221_v37  ;;  %v235_v47 = vmax.f32 %v226_v38, 0.0  ;;  %v236_v49 = vmax.f32 %v227_v39, 0.0 }
  0x20   : >> { %v248_v48 = vmax.f32 %v237_v40, %v240_v41  ;;  %v238_v50 = vmax.f32 %v229_v43, 0.0  ;;  %v239_v51 = vmax.f32 %v230_v44, 0.0  ;;  %v241_v52 = vmax.f32 %v232_v45, 0.0 }
  0x21   : >> { %v242_v53 = vmax.f32 %v233_v46, 0.0 }
  0x22   : >> { %v249_v54 = vmax.f32 %v248_v48, %v243_v42  ;;  %v244_v55 = vmax.f32 %v235_v47, %v238_v50  ;;  %v246_v56 = vmax.f32 %v236_v49, %v239_v51 }
  0x24   : >> { %v257_v57 = vrot.slane %v249_v54, 1  ;;  %v269_v58 = vrot.slane %v249_v54, 2  ;;  %v245_v59 = vmax.f32 %v244_v55, %v241_v52  ;;  %v247_v60 = vmax.f32 %v246_v56, %v242_v53 }
  0x26   : >> { %v264_v61 = vmax.f32 %v249_v54, %v257_v57  ;;  %v254_v62 = vrot.slane %v245_v59, 1  ;;  %v266_v63 = vrot.slane %v245_v59, 2  ;;  %v255_v2 = vrot.slane %v247_v60, 1 }
  0x27   : >> { %v267_v3 = vrot.slane %v247_v60, 2 }
  0x28   : >> { %v276_v4 = vmax.f32 %v264_v61, %v269_v58  ;;  %v256_v5 = vsel %vm253_vm1, %v254_v62, %v255_v2  ;;  %v258_v6 = vsel %vm253_vm1, %v255_v2, %v257_v57 }
  0x29   : >> { %v268_v9 = vsel %vm265_vm2, %v266_v63, %v267_v3  ;;  %v270_v10 = vsel %vm265_vm2, %v267_v3, %v269_v58  ;;  %v262_v12 = vmax.f32 %v245_v59, %v256_v5  ;;  %v263_v13 = vmax.f32 %v247_v60, %v258_v6 }
  0x2a   : >> { %v278_v11 = vpack.c.bf16 %v276_v4, %v276_v4 }
  0x2b   : >> { %v274_v15 = vmax.f32 %v262_v12, %v268_v9  ;;  %v275_v16 = vmax.f32 %v263_v13, %v270_v10 }
  0x2c   : >> { %v285_v14 = vsel %vm283_vm3, %v278_v11, 0 }
  0x2d   : >> { %293 = vmatpush.bf16.msra.mxu0 %v285_v14  ;;  %v277_v17 = vpack.c.bf16 %v275_v16, %v274_v15 }
  0x31   : >> { %294 = vmatpush.bf16.msra.mxu0 %v277_v17 }
  0x34   : >> { %379 = vmatmul.msk.bf16.vlgmr.msra.gmra.mxu0 %vm279_vm4, %v182_v8 }
  0xb1   : >> { %v296_v18 = vpop.f32.mrf.mxu0 }
  0xb2   : >> { %v300_v19 = vpack.c.bf16 %v296_v18, %v296_v18 }
  0xb4   : >> { %303 = vst [vmem:[%s302_s30] sm:$0xf] %v300_v19 }
  0xb5   : > { %187 = sbr.rel (!%p185_p4) target bundleno = 20 (0x14), region = 71 }
  0xb9   : >> { %v298_v20 = vpop.f32.mrf.mxu0 }
  0xba PF: > { %s13_s12 = sadd.s32 1, %s427_s12  }
  0xbb   : > { %p10_p5 = scmp.ge.s32.totalorder %s13_s12, 4  }
  0xbd   :  { %12 = sbr.rel (!%p10_p5) target bundleno = 1 (0x1), region = 82 }

// kernel: forward.14
= control target key start
LH: loop header
LB: loop body
LE: loop exit
PB: predicated region body
PF: predicated region fallthrough
CT: control target
= control target key end

     0   :  { %s1632_s24 = smov 0   ;;  %s1634_s25 = smov 0   ;;  %s1801_s0 = inlined_call_operand.vmem [shape: bf16[2,8,8,128], index: 0, kind: input, shape index: {}]   ;;  %s1802_s1 = inlined_call_operand.vmem [shape: bf16[36,128,128], index: 1, kind: input, shape index: {}]   ;;  %s1803_s2 = inlined_call_operand.vmem [shape: f32[1,128], index: 2, kind: input, shape index: {}]   ;;  %s1804_s3 = inlined_call_operand.vmem [shape: f32[1,128], index: 3, kind: input, shape index: {}]   ;;  %s1805_s4 = inlined_call_operand.vmem [shape: f32[1,128], index: 4, kind: input, shape index: {}]   ;;  %s1806_s5 = inlined_call_operand.vmem [shape: bf16[2,3,3,128], index: 5, kind: output, shape index: {0}]   ;;  %s1807_s6 = inlined_call_operand.vmem [shape: f32[2,1,1,128], index: 6, kind: output, shape index: {1}]   ;;  %s1808_s7 = inlined_call_operand.vmem [shape: f32[2,1,1,128], index: 7, kind: output, shape index: {2}]  }
   0x1   :  { %s1636_s26 = smov 0  }
   0x2 LB: > { %s30_s3 = sadd.s32 1, %s1566_s25  ;;  %p1126_p0 = scmp.ge.s32.totalorder %s1570_s26, 1  ;;  %s1570_s26 = sphi %s1636_s26, %s18_s26   ;;  %s1566_s25 = sphi %s1634_s25, %s1813_s25   ;;  %s1562_s24 = sphi %s1632_s24, %s1812_s24  }
   0x3   : > { %p32_p1 = scmp.ge.s32.totalorder %s30_s3, 2  ;;  %p260_p2 = scmp.lt.s32.totalorder %s1570_s26, 3 }
   0x5   : > { %s1815_s3 = smov (%p32_p1, %s30_s3), 0  ;;  %p261_p3 = pnand %p1126_p0, %p260_p2 }
   0x6   : > { %p308_p4 = scmp.lt.s32.totalorder (!%p261_p3), %s1562_s24, 1  ;;  %s1681_s19 = smov (!%p261_p3), 0  }
   0x7   : > { %264 = sbr.rel (%p261_p3) target bundleno = 237 (0xed), region = 40 }
   0xc   : > { %v1653_v0 = vld [vmem:[%s1803_s2] sm:$0x1]  ;;  %s1817_s24 = smov (!%p308_p4, %s1562_s24), 1  ;;  %v1677_v1 = vmov 0.0   ;;  %v1679_v2 = vmov 0.0  }
   0xd   : > { %s1413_s28 = sshll.u32 %s1817_s24, 5  ;;  %s1463_s29 = smul.u32 6, %s1817_s24 }
   0xe   : > { %s1662_s9 = scalar_lea.vmem %s1801_s0, %s1413_s28  ;;  %s328_s12 = scalar_lea.vmem %s1807_s6, %s1817_s24 }
   0xf   : > { %s1671_s15 = scalar_lea.vmem %s1806_s5, %s1463_s29  ;;  %s334_s18 = scalar_lea.vmem %s1808_s7, %s1817_s24 }
  0x10 LB: >> { %v1692_v3 = vmov 0.0   ;;  %s1694_s20 = smov 0   ;;  %s1582_s19 = sphi %s1681_s19, %s342_s19   ;;  %v1578_v2 = vphi %v1679_v2, %v1811_v2   ;;  %v1574_v1 = vphi %v1677_v1, %v1810_v1  }
  0x11 LB: >>> { %s1414_s21 = smul.u32 384, %s1590_s20  ;;  %s353_s27 = sadd.s32 %s1590_s20, %s1582_s19  ;;  %s1590_s20 = sphi %s1694_s20, %s351_s20   ;;  %v1586_v3 = vphi %v1692_v3, %v1809_v3  }
  0x12   : >>> { %s1130_s28 = sshll.u32 %s353_s27, 2  ;;  %s351_s20 = sadd.s32 1, %s1590_s20  }
  0x13   : >>> { %s1706_s4 = scalar_lea.vmem %s1802_s1, %s1414_s21  ;;  %s1723_s29 = scalar_lea.vmem %s1662_s9, %s1130_s28 }
  0x14   : >>> { %v1422_v4 = vld [vmem:[%s1706_s4 + $0x38] sm:$0xff]  ;;  %v1421_v6 = vld [vmem:[%s1706_s4 + $0x30] sm:$0xff]  ;;  %v1420_v12 = vld [vmem:[%s1706_s4 + $0x28] sm:$0xff]  ;;  %p348_p5 = scmp.ge.s32.totalorder %s351_s20, 6  }
  0x15   : >>> { %v1430_v5 = vld [vmem:[%s1706_s4 + $0x78] sm:$0xff]  ;;  %425 = vmatpush.bf16.msra.mxu0 %v1422_v4  ;;  %v1429_v7 = vld [vmem:[%s1706_s4 + $0x70] sm:$0xff]  ;;  %v1428_v13 = vld [vmem:[%s1706_s4 + $0x68] sm:$0xff]  ;;  %s1410_s30 = sshll.u32 (%p348_p5), %s1582_s19, 1  ;;  %vm897_vm0 = vcmask (%p348_p5), 1041408   ;;  %vm903_vm2 = vcmask (%p348_p5), 1042432  }
  0x16   : >>> { %518 = vmatpush.bf16.msra.mxu1 %v1430_v5  ;;  %v1438_v8 = vld [vmem:[%s1706_s4 + $0xb8] sm:$0xff]  ;;  %v1437_v10 = vld [vmem:[%s1706_s4 + $0xb0] sm:$0xff]  ;;  %v1436_v14 = vld [vmem:[%s1706_s4 + $0xa8] sm:$0xff]  ;;  %vm898_vm1 = vsmask.f32 (%p348_p5), 1280  ;;  %s896_s8 = scalar_lea.vmem (%p348_p5), %s1671_s15, %s1410_s30  ;;  %s342_s19 = sadd.s32 (%p348_p5), 1, %s1582_s19  }
  0x17   : >>> { %v1446_v9 = vld [vmem:[%s1706_s4 + $0xf8] sm:$0xff]  ;;  %606 = vmatpush.bf16.msra.mxu2 %v1438_v8  ;;  %v1445_v11 = vld [vmem:[%s1706_s4 + $0xf0] sm:$0xff]  ;;  %v1444_v15 = vld [vmem:[%s1706_s4 + $0xe8] sm:$0xff]  ;;  %p339_p6 = scmp.ge.s32.totalorder (%p348_p5), %s342_s19, 3  }
  0x18   : >>> { %697 = vmatpush.bf16.msra.mxu3 %v1446_v9  ;;  %v1419_v16 = vld [vmem:[%s1706_s4 + $0x20] sm:$0xff]  ;;  %v1418_v23 = vld [vmem:[%s1706_s4 + $0x18] sm:$0xff]  ;;  %v1417_v29 = vld [vmem:[%s1706_s4 + $0x10] sm:$0xff] }
  0x19   : >>> { %426 = vmatpush.bf16.msra.mxu0 %v1421_v6  ;;  %v1427_v17 = vld [vmem:[%s1706_s4 + $0x60] sm:$0xff]  ;;  %v1426_v24 = vld [vmem:[%s1706_s4 + $0x58] sm:$0xff]  ;;  %v1425_v30 = vld [vmem:[%s1706_s4 + $0x50] sm:$0xff] }
  0x1a   : >>> { %519 = vmatpush.bf16.msra.mxu1 %v1429_v7  ;;  %v356_v18 = vld [vmem:[%s1723_s29] sm:$0x3]  ;;  %v1434_v25 = vld [vmem:[%s1706_s4 + $0x98] sm:$0xff]  ;;  %v1433_v31 = vld [vmem:[%s1706_s4 + $0x90] sm:$0xff] }
  0x1b   : >>> { %607 = vmatpush.bf16.msra.mxu2 %v1437_v10  ;;  %v1435_v19 = vld [vmem:[%s1706_s4 + $0xa0] sm:$0xff]  ;;  %v460_v21 = vunpack.c.l.b16 %v356_v18  ;;  %v1442_v26 = vld [vmem:[%s1706_s4 + $0xd8] sm:$0xff]  ;;  %v1441_v32 = vld [vmem:[%s1706_s4 + $0xd0] sm:$0xff] }
  0x1c   : >>> { %698 = vmatpush.bf16.msra.mxu3 %v1445_v11  ;;  %v1443_v20 = vld [vmem:[%s1706_s4 + $0xe0] sm:$0xff]  ;;  %v1416_v35 = vld [vmem:[%s1706_s4 + $0x8] sm:$0xff]  ;;  %v1454_v45 = vld [vmem:[%s1706_s4 + $0x138] sm:$0xff] }
  0x1d   : >>> { %427 = vmatpush.bf16.msra.mxu0 %v1420_v12  ;;  %v532_v22 = vld [vmem:[%s1723_s29] sm:$0x6]  ;;  %v461_v28 = vpack.c.b16 %v460_v21, %v460_v21  ;;  %v1424_v36 = vld [vmem:[%s1706_s4 + $0x48] sm:$0xff]  ;;  %v1462_v46 = vld [vmem:[%s1706_s4 + $0x178] sm:$0xff] }
  0x1e   : >>> { %520 = vmatpush.bf16.msra.mxu1 %v1428_v13  ;;  %v554_v27 = vunpack.c.l.b16 %v532_v22  ;;  %v1432_v37 = vld [vmem:[%s1706_s4 + $0x88] sm:$0xff]  ;;  %v1415_v43 = vld [vmem:[%s1706_s4] sm:$0xff]  ;;  %v1453_v52 = vld [vmem:[%s1706_s4 + $0x130] sm:$0xff] }
  0x1f   : >>> { %608 = vmatpush.bf16.msra.mxu2 %v1436_v14  ;;  %v465_v34 = vshll.u32 %v461_v28, 16  ;;  %v1440_v38 = vld [vmem:[%s1706_s4 + $0xc8] sm:$0xff]  ;;  %v463_v41 = vshrl.u32 %v461_v28, 16  ;;  %v1423_v44 = vld [vmem:[%s1706_s4 + $0x40] sm:$0xff]  ;;  %v1461_v53 = vld [vmem:[%s1706_s4 + $0x170] sm:$0xff] }
  0x20   : >>> { %699 = vmatpush.bf16.msra.mxu3 %v1444_v15  ;;  %v555_v33 = vpack.c.b16 %v554_v27, %v554_v27  ;;  %v1431_v47 = vld [vmem:[%s1706_s4 + $0x80] sm:$0xff]  ;;  %v1452_v56 = vld [vmem:[%s1706_s4 + $0x128] sm:$0xff]  ;;  %v1450_v62 = vld [vmem:[%s1706_s4 + $0x118] sm:$0xff] }
  0x21   : >>> { %428 = vmatpush.bf16.msra.mxu0 %v1419_v16  ;;  %v467_v42 = vrot.slane %v465_v34, 1  ;;  %v1439_v48 = vld [vmem:[%s1706_s4 + $0xc0] sm:$0xff]  ;;  %v1460_v57 = vld [vmem:[%s1706_s4 + $0x168] sm:$0xff]  ;;  %v1458_v63 = vld [vmem:[%s1706_s4 + $0x158] sm:$0xff] }
  0x22   : >>> { %521 = vmatpush.bf16.msra.mxu1 %v1427_v17  ;;  %v641_v39 = vshrl.u32 %v555_v33, 16  ;;  %v644_v40 = vshll.u32 %v555_v33, 16  ;;  %v556_v54 = vrot.slane %v555_v33, 1  ;;  %v711_v58 = vld [vmem:[%s1723_s29] sm:$0xc]  ;;  %v1449_v5 = vld [vmem:[%s1706_s4 + $0x110] sm:$0xff]  ;;  %vm899_vm3 = vmand (%p348_p5), %vm897_vm0, %vm898_vm1 }
  0x23   : >>> { %609 = vmatpush.bf16.msra.mxu2 %v1435_v19  ;;  %v468_v51 = vor.u32 %v467_v42, %v463_v41  ;;  %v1451_v59 = vld [vmem:[%s1706_s4 + $0x120] sm:$0xff]  ;;  %v733_v61 = vunpack.c.l.b16 %v711_v58  ;;  %v1457_v6 = vld [vmem:[%s1706_s4 + $0x150] sm:$0xff]  ;;  %v1448_v9 = vld [vmem:[%s1706_s4 + $0x108] sm:$0xff] }
  0x24   : >>> { %700 = vmatpush.bf16.msra.mxu3 %v1443_v20  ;;  %v643_v49 = vrot.slane %v641_v39, 1  ;;  %v646_v50 = vrot.slane %v644_v40, 2  ;;  %v1459_v60 = vld [vmem:[%s1706_s4 + $0x160] sm:$0xff]  ;;  %v1456_v10 = vld [vmem:[%s1706_s4 + $0x148] sm:$0xff] }
  0x25   : >>> { %429 = vmatpush.bf16.msra.mxu0 %v1418_v23  ;;  %v734_v4 = vpack.c.b16 %v733_v61, %v733_v61  ;;  %v1447_v13 = vld [vmem:[%s1706_s4 + $0x100] sm:$0xff] }
  0x26   : >>> { %522 = vmatpush.bf16.msra.mxu1 %v1426_v24  ;;  %v647_v55 = vor.u32 %v646_v50, %v643_v49  ;;  %v1455_v14 = vld [vmem:[%s1706_s4 + $0x140] sm:$0xff] }
  0x27   : >>> { %610 = vmatpush.bf16.msra.mxu2 %v1434_v25  ;;  %v820_v7 = vshrl.u32 %v734_v4, 16  ;;  %v823_v8 = vshll.u32 %v734_v4, 16  ;;  %v735_v15 = vrot.slane %v734_v4, 2 }
  0x28   : >>> { %701 = vmatpush.bf16.msra.mxu3 %v1442_v26 }
  0x29   : >>> { %430 = vmatpush.bf16.msra.mxu0 %v1417_v29  ;;  %v822_v11 = vrot.slane %v820_v7, 2  ;;  %v825_v12 = vrot.slane %v823_v8, 3 }
  0x2a   : >>> { %523 = vmatpush.bf16.msra.mxu1 %v1425_v30 }
  0x2b   : >>> { %611 = vmatpush.bf16.msra.mxu2 %v1433_v31  ;;  %v826_v16 = vor.u32 %v825_v12, %v822_v11 }
  0x2c   : >>> { %702 = vmatpush.bf16.msra.mxu3 %v1441_v32 }
  0x2d   : >>> { %431 = vmatpush.bf16.msra.mxu0 %v1416_v35 }
  0x2e   : >>> { %524 = vmatpush.bf16.msra.mxu1 %v1424_v36  ;;  %v900_v36 = vld [vmem:[%s896_s8] sm:$0x3] (%p348_p5) }
  0x2f   : >>> { %612 = vmatpush.bf16.msra.mxu2 %v1432_v37 }
  0x30   : >>> { %703 = vmatpush.bf16.msra.mxu3 %v1440_v38 }
  0x31   : >>> { %432 = vmatpush.bf16.msra.mxu0 %v1415_v43 }
  0x32   : >>> { %525 = vmatpush.bf16.msra.mxu1 %v1423_v44 }
  0x33   : >>> { %613 = vmatpush.bf16.msra.mxu2 %v1431_v47 }
  0x34   : >>> { %704 = vmatpush.bf16.msra.mxu3 %v1439_v48  ;;  %433 = vmatmul.bf16.vlgmr.msra.gmra.mxu0 %v356_v18 }
  0x35   : >>> { %785 = vmatpush.bf16.msrb.mxu0 %v1454_v45  ;;  %526 = vmatmul.bf16.vlgmr.msra.gmra.mxu1 %v468_v51 }
  0x36   : >>> { %876 = vmatpush.bf16.msrb.mxu1 %v1462_v46  ;;  %614 = vmatmul.bf16.vlgmr.msra.gmra.mxu2 %v556_v54 }
  0x37   : >>> { %705 = vmatmul.bf16.vlgmr.msra.gmra.mxu3 %v647_v55 }
  0x39   : >>> { %786 = vmatpush.bf16.msrb.mxu0 %v1453_v52 }
  0x3a   : >>> { %877 = vmatpush.bf16.msrb.mxu1 %v1461_v53 }
  0x3d   : >>> { %787 = vmatpush.bf16.msrb.mxu0 %v1452_v56 }
  0x3e   : >>> { %878 = vmatpush.bf16.msrb.mxu1 %v1460_v57 }
  0x41   : >>> { %788 = vmatpush.bf16.msrb.mxu0 %v1451_v59 }
  0x42   : >>> { %879 = vmatpush.bf16.msrb.mxu1 %v1459_v60 }
  0x45   : >>> { %789 = vmatpush.bf16.msrb.mxu0 %v1450_v62 }
  0x46   : >>> { %880 = vmatpush.bf16.msrb.mxu1 %v1458_v63 }
  0x49   : >>> { %790 = vmatpush.bf16.msrb.mxu0 %v1449_v5 }
  0x4a   : >>> { %881 = vmatpush.bf16.msrb.mxu1 %v1457_v6 }
  0x4d   : >>> { %791 = vmatpush.bf16.msrb.mxu0 %v1448_v9 }
  0x4e   : >>> { %882 = vmatpush.bf16.msrb.mxu1 %v1456_v10 }
  0x51   : >>> { %792 = vmatpush.bf16.msrb.mxu0 %v1447_v13 }
  0x52   : >>> { %883 = vmatpush.bf16.msrb.mxu1 %v1455_v14 }
  0x54   : >>> { %793 = vmatmul.bf16.vlgmr.msrb.gmra.mxu0 %v735_v15 }
  0x55   : >>> { %884 = vmatmul.bf16.vlgmr.msrb.gmra.mxu1 %v826_v16 }
  0xb1   : >>> { %v434_v17 = vpop.f32.mrf.mxu0 }
  0xb2   : >>> { %v527_v18 = vpop.f32.mrf.mxu1  ;;  %v438_v23 = vadd.f32 %v1586_v3, %v434_v17 }
  0xb4   : >>> { %v531_v26 = vadd.f32 %v527_v18, %v438_v23 }
  0xb9   : >>> { %v436_v19 = vpop.f32.mrf.mxu0  ;;  %v615_v21 = vpop.f32.mrf.mxu2 }
  0xba   : >>> { %v529_v20 = vpop.f32.mrf.mxu1  ;;  %v706_v22 = vpop.f32.mrf.mxu3  ;;  %v619_v27 = vadd.f32 %v615_v21, %v531_v26 }
  0xbc   : >>> { %v710_v28 = vadd.f32 %v706_v22, %v619_v27 }
  0xc1   : >>> { %v617_v24 = vpop.f32.mrf.mxu2 }
  0xc2   : >>> { %v708_v25 = vpop.f32.mrf.mxu3 }
  0xd1   : >>> { %v794_v29 = vpop.f32.mrf.mxu0 }
  0xd2   : >>> { %v885_v30 = vpop.f32.mrf.mxu1  ;;  %v798_v31 = vadd.f32 %v794_v29, %v710_v28 }
  0xd4   : >>> { %v889_v32 = vadd.f32 %v885_v30, %v798_v31  }
  0xd6   : >>> { %v1809_v3 = vmov %v889_v32  ;;  %350 = sbr.rel (!%p348_p5) target bundleno = 17 (0x11), region = 116 }
  0xd7   : >> { %v891_v3 = vperm.slane (%p348_p5), %v1653_v0, 0 }
  0xd9   : >>> { %v796_v33 = vpop.f32.mrf.mxu0  ;;  %v893_v35 = vadd.f32 (%p348_p5), %v891_v3, %v889_v32 }
  0xda   : >>> { %v887_v34 = vpop.f32.mrf.mxu1 }
  0xdb   : >> { %v894_v37 = vpack.c.bf16 %v893_v35, %v893_v35  ;;  %v904_v38 = vsel %vm903_vm2, %v893_v35, 0.0  ;;  %v912_v39 = vmul.f32 %v893_v35, %v893_v35 }
  0xdc   : >> { %v905_v40 = vrot.slane %v904_v38, 4 }
  0xdd   : >> { %v901_v41 = vsel %vm899_vm3, %v894_v37, %v900_v36  ;;  %v913_v42 = vsel %vm903_vm2, %v912_v39, 0.0 }
  0xde   : >> { %902 = vst [vmem:[%s896_s8] sm:$0x3] %v901_v41  ;;  %v906_v43 = vadd.f32 %v905_v40, %v904_v38  ;;  %v914_v44 = vrot.slane %v913_v42, 4 }
  0xe0   : >> { %v907_v45 = vrot.slane %v906_v43, 2  ;;  %v915_v46 = vadd.f32 %v914_v44, %v913_v42 }
  0xe2   : >> { %v908_v47 = vadd.f32 %v907_v45, %v906_v43  ;;  %v916_v48 = vrot.slane %v915_v46, 2 }
  0xe4   : >> { %v909_v49 = vrot.slane %v908_v47, 1  ;;  %v917_v50 = vadd.f32 %v916_v48, %v915_v46 }
  0xe6   : >> { %v910_v51 = vadd.f32 %v909_v49, %v908_v47  ;;  %v918_v52 = vrot.slane %v917_v50, 1 }
  0xe8   : >> { %v911_v53 = vadd.f32 %v1578_v2, %v910_v51   ;;  %v919_v54 = vadd.f32 %v918_v52, %v917_v50  ;;  %341 = sbr.rel (!%p339_p6) target bundleno = 16 (0x10), region = 127 }
  0xea   : >> { %v920_v55 = vadd.f32 %v1574_v1, %v919_v54   ;;  %v1811_v2 = vmov %v911_v53  ;;  %921 = vst [vmem:[%s328_s12] sm:$0x1] (%p339_p6), %v911_v53 }
  0xec   : >> { %v1810_v1 = vmov %v920_v55  ;;  %922 = vst [vmem:[%s334_s18] sm:$0x1] (%p339_p6), %v920_v55 }
  0xed PF: > { %s18_s26 = sadd.s32 1, %s1570_s26   ;;  %s1812_s24 = smov %s1566_s25 }
  0xee   : > { %p15_p7 = scmp.ge.s32.totalorder %s18_s26, 4   ;;  %s1813_s25 = smov %s1815_s3 }
  0xf0   :  { %17 = sbr.rel (!%p15_p7) target bundleno = 2 (0x2), region = 138 }

// kernel: forward.12
= control target key start
LH: loop header
LB: loop body
LE: loop exit
PB: predicated region body
PF: predicated region fallthrough
CT: control target
= control target key end

     0   :  { %s2119_s24 = smov 0   ;;  %s2121_s25 = smov 0   ;;  %s2374_s0 = inlined_call_operand.vmem [shape: bf16[2,31,31,128], index: 0, kind: input, shape index: {}]   ;;  %s2375_s1 = inlined_call_operand.vmem [shape: bf16[49,128,128], index: 1, kind: input, shape index: {}]   ;;  %s2376_s2 = inlined_call_operand.vmem [shape: f32[1,128], index: 2, kind: input, shape index: {}]   ;;  %s2377_s3 = inlined_call_operand.vmem [shape: f32[1,128], index: 3, kind: input, shape index: {}]   ;;  %s2378_s4 = inlined_call_operand.vmem [shape: f32[1,128], index: 4, kind: input, shape index: {}]   ;;  %s2379_s5 = inlined_call_operand.vmem [shape: bf16[2,25,25,128], index: 5, kind: output, shape index: {0}]   ;;  %s2380_s6 = inlined_call_operand.vmem [shape: f32[2,1,1,128], index: 6, kind: output, shape index: {1}]   ;;  %s2381_s7 = inlined_call_operand.vmem [shape: f32[2,1,1,128], index: 7, kind: output, shape index: {2}]  }
   0x1   :  { %s2123_s26 = smov 0  }
   0x2 LB: > { %s30_s27 = sadd.s32 1, %s2037_s25  ;;  %p1452_p0 = scmp.ge.s32.totalorder %s2041_s26, 1  ;;  %s2041_s26 = sphi %s2123_s26, %s18_s26   ;;  %s2037_s25 = sphi %s2121_s25, %s2389_s25   ;;  %s2033_s24 = sphi %s2119_s24, %s2388_s24  }
   0x3   : > { %p32_p1 = scmp.ge.s32.totalorder %s30_s27, 2  ;;  %p260_p2 = scmp.lt.s32.totalorder %s2041_s26, 3 }
   0x5   : > { %s2391_s27 = smov (%p32_p1, %s30_s27), 0  ;;  %p261_p3 = pnand %p1452_p0, %p260_p2 }
   0x6   : > { %p309_p4 = scmp.lt.s32.totalorder (!%p261_p3), %s2033_s24, 1  ;;  %s2165_s23 = smov (!%p261_p3), 0  }
   0x7   : > { %264 = sbr.rel (%p261_p3) target bundleno = 283 (0x11b), region = 40 }
   0xc   : > { %v338_v0 = vld [vmem:[%s2377_s3] sm:$0x1]  ;;  %s2393_s24 = smov (!%p309_p4, %s2033_s24), 1 }
   0xd   : > { %v339_v1 = vld [vmem:[%s2378_s4] sm:$0x1]  ;;  %s1885_s9 = smul.u32 496, %s2393_s24  ;;  %s330_s12 = scalar_lea.vmem %s2380_s6, %s2393_s24 }
   0xe   : > { %s1886_s13 = smul.u32 400, %s2393_s24  ;;  %s336_s16 = scalar_lea.vmem %s2381_s7, %s2393_s24 }
   0xf   : > { %s2158_s19 = scalar_lea.vmem %s2374_s0, %s1885_s9 }
  0x10   : > { %s2163_s22 = scalar_lea.vmem %s2379_s5, %s1886_s13 }
  0x11 LB: >> { %s1793_s28 = sshll.u32 %s2045_s23, 4  ;;  %v359_v2 = vperm.slane %v338_v0, 0  ;;  %v366_v5 = vperm.slane %v339_v1, 0  ;;  %vm386_vm0 = vcmask 1043456   ;;  %vm387_vm1 = vsmask.f32 3328  ;;  %s2045_s23 = sphi %s2165_s23, %s345_s23  }
  0x12   : >> { %s349_s29 = scalar_lea.vmem %s2158_s19, %s1793_s28  ;;  %vm388_vm2 = vmand %vm386_vm0, %vm387_vm1  ;;  %s382_s30 = scalar_lea.vmem [#allocation2], %s1793_s28 }
  0x13   : >> { %v1855_v3 = vld [vmem:[%s349_s29] sm:$0xff]   ;;  %v1876_v4 = vld [vmem:[%s349_s29 + $0x8] sm:$0xff]   ;;  %s345_s23 = sadd.s32 1, %s2045_s23  }
  0x14   : >> { %v1856_v6 = vunpack.c.l.bf16 %v1855_v3  ;;  %v1857_v7 = vunpack.c.h.bf16 %v1855_v3  ;;  %v1861_v8 = vunpack.c.h.bf16 %v1876_v4  ;;  %v1860_v9 = vunpack.c.l.bf16 %v1876_v4  ;;  %v389_v22 = vld [vmem:[%s382_s30 + $0xc] sm:$0xf]  ;;  %p342_p5 = scmp.ge.s32.totalorder %s345_s23, 31  }
  0x15   : > { %v2178_v27 = vld [vmem:[%s2376_s2] sm:$0x1] (%p342_p5)  ;;  %v2180_v28 = vmov (%p342_p5), 0.0   ;;  %v2182_v29 = vmov (%p342_p5), 0.0   ;;  %s2184_s10 = smov (%p342_p5), 0  }
  0x16   : >> { %v361_v10 = vmul.f32 %v1856_v6, %v359_v2  ;;  %v362_v11 = vmul.f32 %v1857_v7, %v359_v2  ;;  %v363_v12 = vmul.f32 %v1860_v9, %v359_v2  ;;  %v364_v13 = vmul.f32 %v1861_v8, %v359_v2 }
  0x18   : >> { %v368_v14 = vadd.f32 %v366_v5, %v361_v10  ;;  %v369_v15 = vadd.f32 %v366_v5, %v362_v11  ;;  %v370_v16 = vadd.f32 %v366_v5, %v363_v12  ;;  %v371_v17 = vadd.f32 %v366_v5, %v364_v13 }
  0x1a   : >> { %v372_v18 = vmax.f32 %v368_v14, 0.0  ;;  %v373_v19 = vmax.f32 %v369_v15, 0.0  ;;  %v374_v20 = vmax.f32 %v370_v16, 0.0  ;;  %v375_v21 = vmax.f32 %v371_v17, 0.0 }
  0x1c   : >> { %v1865_v23 = vpack.c.bf16 %v373_v19, %v372_v18  ;;  %v378_v24 = vpack.c.bf16 %v374_v20, %v374_v20  ;;  %v379_v25 = vpack.c.bf16 %v375_v21, %v375_v21  ;;  %344 = sbr.rel (!%p342_p5) target bundleno = 17 (0x11), region = 126 }
  0x1e   : >> { %1866 = vst [vmem:[%s382_s30] sm:$0xff] %v1865_v23   ;;  %v390_v26 = vsel %vm388_vm2, %v379_v25, %v389_v22 }
  0x1f   : >> { %385 = vst [vmem:[%s382_s30 + $0x8] sm:$0xf] %v378_v24 }
  0x20   : >> { %391 = vst [vmem:[%s382_s30 + $0xc] sm:$0xf] %v390_v26 }
  0x21 LB: >> { %v2195_v30 = vmov 0.0   ;;  %v2197_v31 = vmov 0.0   ;;  %v2199_v32 = vmov 0.0   ;;  %v2201_v33 = vmov 0.0   ;;  %s2203_s11 = smov 0   ;;  %s2057_s10 = sphi %s2184_s10, %s398_s10   ;;  %v2053_v29 = vphi %v2182_v29, %v2387_v29   ;;  %v2049_v28 = vphi %v2180_v28, %v2386_v28  }
  0x22 LB: >>> { %s1796_s13 = smul.u32 448, %s2077_s11  ;;  %s412_s18 = sadd.s32 %s2077_s11, %s2057_s10  ;;  %vm544_vm3 = vsmask.f32 7424  ;;  %vm661_vm4 = vcmask 1046528   ;;  %vm758_vm5 = vsmask.f32 6400  ;;  %s2077_s11 = sphi %s2203_s11, %s407_s11   ;;  %v2073_v33 = vphi %v2201_v33, %v2385_v33   ;;  %v2069_v32 = vphi %v2199_v32, %v2384_v32   ;;  %v2065_v31 = vphi %v2197_v31, %v2383_v31   ;;  %v2061_v30 = vphi %v2195_v30, %v2382_v30  }
  0x23   : >>> { %s1795_s19 = sshll.u32 %s412_s18, 4  ;;  %vm877_vm6 = vcmask 1045504   ;;  %vm974_vm7 = vsmask.f32 5376  ;;  %vm1093_vm8 = vcmask 1044480   ;;  %s407_s11 = sadd.s32 1, %s2077_s11  }
  0x24   : >>> { %s2224_s17 = scalar_lea.vmem %s2375_s1, %s1796_s13  ;;  %s2243_s20 = scalar_lea.vmem [#allocation2], %s1795_s19 }
  0x25   : >>> { %v1804_v34 = vld [vmem:[%s2224_s17 + $0x38] sm:$0xff]  ;;  %v1803_v38 = vld [vmem:[%s2224_s17 + $0x30] sm:$0xff]  ;;  %v1802_v42 = vld [vmem:[%s2224_s17 + $0x28] sm:$0xff]  ;;  %p404_p6 = scmp.ge.s32.totalorder %s407_s11, 7  }
  0x26   : >>> { %v1812_v35 = vld [vmem:[%s2224_s17 + $0x78] sm:$0xff]  ;;  %501 = vmatpush.bf16.msra.mxu0 %v1804_v34  ;;  %v1811_v39 = vld [vmem:[%s2224_s17 + $0x70] sm:$0xff]  ;;  %v1810_v43 = vld [vmem:[%s2224_s17 + $0x68] sm:$0xff]  ;;  %s1853_s21 = sshll.u32 (%p404_p6), %s2057_s10, 4  ;;  %vm1187_vm9 = vcmask (%p404_p6), 1040384   ;;  %s398_s10 = sadd.s32 (%p404_p6), 1, %s2057_s10  }
  0x27   : >>> { %v1820_v36 = vld [vmem:[%s2224_s17 + $0xb8] sm:$0xff]  ;;  %610 = vmatpush.bf16.msra.mxu1 %v1812_v35  ;;  %v1819_v40 = vld [vmem:[%s2224_s17 + $0xb0] sm:$0xff]  ;;  %v1818_v44 = vld [vmem:[%s2224_s17 + $0xa8] sm:$0xff]  ;;  %s1183_s23 = scalar_lea.vmem (%p404_p6), %s2163_s22, %s1853_s21  ;;  %vm1188_vm10 = vsmask.f32 (%p404_p6), 256  ;;  %p395_p7 = scmp.ge.s32.totalorder (%p404_p6), %s398_s10, 25  }
  0x28   : >>> { %v1828_v37 = vld [vmem:[%s2224_s17 + $0xf8] sm:$0xff]  ;;  %715 = vmatpush.bf16.msra.mxu2 %v1820_v36  ;;  %v1827_v41 = vld [vmem:[%s2224_s17 + $0xf0] sm:$0xff]  ;;  %v1826_v45 = vld [vmem:[%s2224_s17 + $0xe8] sm:$0xff] }
  0x29   : >>> { %826 = vmatpush.bf16.msra.mxu3 %v1828_v37  ;;  %v1801_v46 = vld [vmem:[%s2224_s17 + $0x20] sm:$0xff]  ;;  %v2253_v52 = vld [vmem:[%s2243_s20 + $0x8] sm:$0xff]   ;;  %v1800_v59 = vld [vmem:[%s2224_s17 + $0x18] sm:$0xff] }
  0x2a   : >>> { %502 = vmatpush.bf16.msra.mxu0 %v1803_v38  ;;  %v1809_v47 = vld [vmem:[%s2224_s17 + $0x60] sm:$0xff]  ;;  %v420_v53 = vld [vmem:[%s2243_s20 + $0xc] sm:$0x1]  ;;  %v2257_v54 = vunpack.c.l.b16 %v2253_v52  ;;  %v1808_v60 = vld [vmem:[%s2224_s17 + $0x58] sm:$0xff] }
  0x2b   : >>> { %611 = vmatpush.bf16.msra.mxu1 %v1811_v39  ;;  %v1817_v48 = vld [vmem:[%s2224_s17 + $0xa0] sm:$0xff]  ;;  %v634_v56 = vld [vmem:[%s2243_s20 + $0xc] sm:$0x3]  ;;  %v448_v61 = vunpack.c.l.b16 %v420_v53  ;;  %v1816_v62 = vld [vmem:[%s2224_s17 + $0x98] sm:$0xff] }
  0x2c   : >>> { %716 = vmatpush.bf16.msra.mxu2 %v1819_v40  ;;  %v2246_v49 = vld [vmem:[%s2243_s20] sm:$0xff]   ;;  %v658_v58 = vunpack.c.l.b16 %v634_v56  ;;  %v1824_v63 = vld [vmem:[%s2224_s17 + $0xd8] sm:$0xff]  ;;  %v1799_v2 = vld [vmem:[%s2224_s17 + $0x10] sm:$0xff] }
  0x2d   : >>> { %827 = vmatpush.bf16.msra.mxu3 %v1827_v41  ;;  %v1825_v50 = vld [vmem:[%s2224_s17 + $0xe0] sm:$0xff]  ;;  %v2250_v51 = vunpack.c.h.b16 %v2246_v49  ;;  %v1807_v3 = vld [vmem:[%s2224_s17 + $0x50] sm:$0xff]  ;;  %v2272_v4 = vpack.c.b16 %v448_v61, %v2257_v54  ;;  %v548_v5 = vshll.u32 %v2246_v49, 16  ;;  %v1798_v12 = vld [vmem:[%s2224_s17 + $0x8] sm:$0xff]  ;;  %v546_v14 = vshrl.u32 %v2246_v49, 16 }
  0x2e   : >>> { %503 = vmatpush.bf16.msra.mxu0 %v1802_v42  ;;  %v633_v55 = vld [vmem:[%s2243_s20] sm:$0xe]  ;;  %v2267_v1 = vpack.c.b16 %v658_v58, %v2257_v54  ;;  %v1815_v6 = vld [vmem:[%s2224_s17 + $0x90] sm:$0xff]  ;;  %v1806_v13 = vld [vmem:[%s2224_s17 + $0x48] sm:$0xff] }
  0x2f   : >>> { %612 = vmatpush.bf16.msra.mxu1 %v1810_v43  ;;  %v657_v57 = vunpack.c.l.b16 %v633_v55  ;;  %v1823_v7 = vld [vmem:[%s2224_s17 + $0xd0] sm:$0xff]  ;;  %v550_v15 = vrot.slane %v548_v5, 1  ;;  %v553_v16 = vshll.u32 %v2272_v4, 16  ;;  %v1814_v17 = vld [vmem:[%s2224_s17 + $0x88] sm:$0xff]  ;;  %v1797_v23 = vld [vmem:[%s2224_s17] sm:$0xff] }
  0x30   : >>> { %717 = vmatpush.bf16.msra.mxu2 %v1818_v44  ;;  %v768_v10 = vshrl.u32 %v2267_v1, 16  ;;  %v771_v11 = vshll.u32 %v2267_v1, 16  ;;  %v1822_v18 = vld [vmem:[%s2224_s17 + $0xc8] sm:$0xff]  ;;  %v1805_v24 = vld [vmem:[%s2224_s17 + $0x40] sm:$0xff]  ;;  %v663_v37 = vrot.slane %v2267_v1, 1  ;;  %v1852_v40 = vld [vmem:[%s2224_s17 + $0x1b8] sm:$0xff] }
  0x31   : >>> { %828 = vmatpush.bf16.msra.mxu3 %v1826_v45  ;;  %v659_v0 = vpack.c.b16 %v2250_v51, %v657_v57  ;;  %v551_v25 = vor.u32 %v550_v15, %v546_v14  ;;  %v555_v26 = vrot.slane %v553_v16, 1  ;;  %v1813_v34 = vld [vmem:[%s2224_s17 + $0x80] sm:$0xff]  ;;  %v1836_v41 = vld [vmem:[%s2224_s17 + $0x138] sm:$0xff]  ;;  %v1834_v53 = vld [vmem:[%s2224_s17 + $0x128] sm:$0xff] }
  0x32   : >>> { %504 = vmatpush.bf16.msra.mxu0 %v1801_v46  ;;  %v770_v21 = vrot.slane %v768_v10, 1  ;;  %v773_v22 = vrot.slane %v771_v11, 2  ;;  %v1821_v35 = vld [vmem:[%s2224_s17 + $0xc0] sm:$0xff]  ;;  %v1844_v45 = vld [vmem:[%s2224_s17 + $0x178] sm:$0xff]  ;;  %v1851_v46 = vld [vmem:[%s2224_s17 + $0x1b0] sm:$0xff] }
  0x33   : >>> { %613 = vmatpush.bf16.msra.mxu1 %v1809_v47  ;;  %v760_v8 = vshrl.u32 %v659_v0, 16  ;;  %v763_v9 = vshll.u32 %v659_v0, 16  ;;  %v662_v36 = vrot.slane %v659_v0, 1  ;;  %v556_v42 = vsel %vm544_vm3, %v551_v25, %v555_v26  ;;  %v1835_v47 = vld [vmem:[%s2224_s17 + $0x130] sm:$0xff]  ;;  %v1842_v55 = vld [vmem:[%s2224_s17 + $0x168] sm:$0xff]  ;;  %v1833_v56 = vld [vmem:[%s2224_s17 + $0x120] sm:$0xff] }
  0x34   : >>> { %718 = vmatpush.bf16.msra.mxu2 %v1817_v48  ;;  %v774_v39 = vor.u32 %v773_v22, %v770_v21  ;;  %v1843_v48 = vld [vmem:[%s2224_s17 + $0x170] sm:$0xff]  ;;  %v849_v57 = vld [vmem:[%s2243_s20] sm:$0xc]  ;;  %v850_v58 = vld [vmem:[%s2243_s20 + $0xc] sm:$0x7] }
  0x35   : >>> { %829 = vmatpush.bf16.msra.mxu3 %v1825_v50  ;;  %v762_v19 = vrot.slane %v760_v8, 1  ;;  %v765_v20 = vrot.slane %v763_v9, 2  ;;  %v664_v43 = vsel %vm661_vm4, %v662_v36, %v663_v37  ;;  %v1850_v50 = vld [vmem:[%s2224_s17 + $0x1a8] sm:$0xff]  ;;  %v873_v61 = vunpack.c.l.b16 %v849_v57  ;;  %v1832_v0 = vld [vmem:[%s2224_s17 + $0x118] sm:$0xff]  ;;  %v1065_v8 = vld [vmem:[%s2243_s20] sm:$0x8] }
  0x36   : >>> { %505 = vmatpush.bf16.msra.mxu0 %v1800_v59  ;;  %v557_v59 = vshrl.u32 %v2272_v4, 16  ;;  %v1839_v9 = vld [vmem:[%s2224_s17 + $0x150] sm:$0xff]  ;;  %v1830_v14 = vld [vmem:[%s2224_s17 + $0x108] sm:$0xff]  ;;  %v1089_v15 = vunpack.c.l.b16 %v1065_v8  ;;  %v1829_v21 = vld [vmem:[%s2224_s17 + $0x100] sm:$0xff]  ;;  %v1095_v36 = vrot.slane %v2253_v52, 3 }
  0x37   : >>> { %614 = vmatpush.bf16.msra.mxu1 %v1808_v60  ;;  %v766_v38 = vor.u32 %v765_v20, %v762_v19  ;;  %v1841_v60 = vld [vmem:[%s2224_s17 + $0x160] sm:$0xff]  ;;  %vm1189_vm11 = vmand (%p404_p6), %vm1187_vm9, %vm1188_vm10 }
  0x38   : >>> { %719 = vmatpush.bf16.msra.mxu2 %v1816_v62  ;;  %v874_v62 = vunpack.c.l.b16 %v850_v58  ;;  %v559_v1 = vor.u32 %v557_v59, %v555_v26  ;;  %v1845_v20 = vld [vmem:[%s2224_s17 + $0x180] sm:$0xff]  ;;  %v1091_v22 = vpack.c.b16 %v2250_v51, %v1089_v15 }
  0x39   : >>> { %830 = vmatpush.bf16.msra.mxu3 %v1824_v63  ;;  %v775_v44 = vsel %vm758_vm5, %v766_v38, %v774_v39  ;;  %v1848_v63 = vld [vmem:[%s2224_s17 + $0x198] sm:$0xff]  ;;  %v1837_v25 = vld [vmem:[%s2224_s17 + $0x140] sm:$0xff] }
  0x3a   : >>> { %506 = vmatpush.bf16.msra.mxu0 %v1799_v2  ;;  %v1840_v2 = vld [vmem:[%s2224_s17 + $0x158] sm:$0xff]  ;;  %v876_v5 = vpack.c.b16 %v874_v62, %v2257_v54 }
  0x3b   : >>> { %615 = vmatpush.bf16.msra.mxu1 %v1807_v3  ;;  %v875_v3 = vpack.c.b16 %v2250_v51, %v873_v61 }
  0x3c   : >>> { %720 = vmatpush.bf16.msra.mxu2 %v1815_v6  ;;  %v1847_v6 = vld [vmem:[%s2224_s17 + $0x190] sm:$0xff]  ;;  %v987_v54 = vshll.u32 %v876_v5, 16 }
  0x3d   : >>> { %831 = vmatpush.bf16.msra.mxu3 %v1823_v7  ;;  %v1831_v7 = vld [vmem:[%s2224_s17 + $0x110] sm:$0xff]  ;;  %v976_v10 = vshrl.u32 %v875_v3, 16  ;;  %v979_v11 = vshll.u32 %v875_v3, 16 }
  0x3e   : >>> { %507 = vmatpush.bf16.msra.mxu0 %v1798_v12  ;;  %v984_v12 = vshrl.u32 %v876_v5, 16  ;;  %v989_v19 = vrot.slane %v987_v54, 3 }
  0x3f   : >>> { %616 = vmatpush.bf16.msra.mxu1 %v1806_v13  ;;  %v1846_v13 = vld [vmem:[%s2224_s17 + $0x188] sm:$0xff]  ;;  %v978_v16 = vrot.slane %v976_v10, 2 }
  0x40   : >>> { %721 = vmatpush.bf16.msra.mxu2 %v1814_v17  ;;  %v981_v17 = vrot.slane %v979_v11, 3 }
  0x41   : >>> { %832 = vmatpush.bf16.msra.mxu3 %v1822_v18  ;;  %v986_v18 = vrot.slane %v984_v12, 2 }
  0x42   : >>> { %508 = vmatpush.bf16.msra.mxu0 %v1797_v23  ;;  %v878_v23 = vrot.slane %v875_v3, 2  ;;  %v982_v26 = vor.u32 %v981_v17, %v978_v16 }
  0x43   : >>> { %617 = vmatpush.bf16.msra.mxu1 %v1805_v24  ;;  %v879_v24 = vrot.slane %v876_v5, 2 }
  0x44   : >>> { %722 = vmatpush.bf16.msra.mxu2 %v1813_v34  ;;  %v990_v34 = vor.u32 %v989_v19, %v986_v18 }
  0x45   : >>> { %833 = vmatpush.bf16.msra.mxu3 %v1821_v35  ;;  %509 = vmatmul.bf16.vlgmr.msra.gmra.mxu0 %v2246_v49  ;;  %v1849_v49 = vld [vmem:[%s2224_s17 + $0x1a0] sm:$0xff]  ;;  %v1094_v35 = vrot.slane %v1091_v22, 3 }
  0x46   : >>> { %931 = vmatpush.bf16.msrb.mxu0 %v1836_v41  ;;  %618 = vmatmul.bf16.vlgmr.msra.gmra.mxu1 %v556_v42  ;;  %v991_v38 = vsel %vm974_vm7, %v982_v26, %v990_v34 }
  0x47   : >>> { %723 = vmatmul.bf16.vlgmr.msra.gmra.mxu2 %v664_v43  ;;  %1042 = vmatpush.bf16.msrb.mxu1 %v1844_v45  ;;  %v1096_v51 = vsel %vm1093_vm8, %v1094_v35, %v1095_v36 }
  0x48   : >>> { %1147 = vmatpush.bf16.msrb.mxu2 %v1852_v40  ;;  %834 = vmatmul.bf16.vlgmr.msra.gmra.mxu3 %v775_v44 }
  0x49   : >>> { %1877 = vmatpush.bf16.msrb.mxu3 %v1836_v41 }
  0x4a   : >>> { %932 = vmatpush.bf16.msrb.mxu0 %v1835_v47 }
  0x4b   : >>> { %1043 = vmatpush.bf16.msrb.mxu1 %v1843_v48 }
  0x4c   : >>> { %1148 = vmatpush.bf16.msrb.mxu2 %v1851_v46 }
  0x4d   : >>> { %1878 = vmatpush.bf16.msrb.mxu3 %v1835_v47 }
  0x4e   : >>> { %933 = vmatpush.bf16.msrb.mxu0 %v1834_v53 }
  0x4f   : >>> { %1044 = vmatpush.bf16.msrb.mxu1 %v1842_v55 }
  0x50   : >>> { %1149 = vmatpush.bf16.msrb.mxu2 %v1850_v50 }
  0x51   : >>> { %1879 = vmatpush.bf16.msrb.mxu3 %v1834_v53 }
  0x52   : >>> { %934 = vmatpush.bf16.msrb.mxu0 %v1833_v56 }
  0x53   : >>> { %1045 = vmatpush.bf16.msrb.mxu1 %v1841_v60 }
  0x54   : >>> { %1150 = vmatpush.bf16.msrb.mxu2 %v1849_v49 }
  0x55   : >>> { %1880 = vmatpush.bf16.msrb.mxu3 %v1833_v56  ;;  %514 = vmatmul.bf16.gmra.mxu0 %v2272_v4  ;;  %v1838_v4 = vld [vmem:[%s2224_s17 + $0x148] sm:$0xff] }
  0x56   : >>> { %935 = vmatpush.bf16.msrb.mxu0 %v1832_v0  ;;  %623 = vmatmul.bf16.gmra.mxu1 %v559_v1 }
  0x57   : >>> { %728 = vmatmul.bf16.gmra.mxu2 %v663_v37  ;;  %1046 = vmatpush.bf16.msrb.mxu1 %v1840_v2  ;;  %v880_v37 = vsel %vm877_vm6, %v878_v23, %v879_v24 }
  0x58   : >>> { %1151 = vmatpush.bf16.msrb.mxu2 %v1848_v63  ;;  %839 = vmatmul.bf16.gmra.mxu3 %v774_v39 }
  0x59   : >>> { %1881 = vmatpush.bf16.msrb.mxu3 %v1832_v0 }
  0x5a   : >>> { %936 = vmatpush.bf16.msrb.mxu0 %v1831_v7 }
  0x5b   : >>> { %1047 = vmatpush.bf16.msrb.mxu1 %v1839_v9 }
  0x5c   : >>> { %1152 = vmatpush.bf16.msrb.mxu2 %v1847_v6 }
  0x5d   : >>> { %1882 = vmatpush.bf16.msrb.mxu3 %v1831_v7 }
  0x5e   : >>> { %937 = vmatpush.bf16.msrb.mxu0 %v1830_v14 }
  0x5f   : >>> { %1048 = vmatpush.bf16.msrb.mxu1 %v1838_v4 }
  0x60   : >>> { %1153 = vmatpush.bf16.msrb.mxu2 %v1846_v13 }
  0x61   : >>> { %1883 = vmatpush.bf16.msrb.mxu3 %v1830_v14 }
  0x62   : >>> { %938 = vmatpush.bf16.msrb.mxu0 %v1829_v21 }
  0x63   : >>> { %1049 = vmatpush.bf16.msrb.mxu1 %v1837_v25 }
  0x64   : >>> { %1154 = vmatpush.bf16.msrb.mxu2 %v1845_v20 }
  0x65   : >>> { %1884 = vmatpush.bf16.msrb.mxu3 %v1829_v21  ;;  %939 = vmatmul.bf16.vlgmr.msrb.gmra.mxu0 %v880_v37 }
  0x66   : >>> { %1050 = vmatmul.bf16.vlgmr.msrb.gmra.mxu1 %v991_v38 }
  0x67   : >>> { %1155 = vmatmul.bf16.vlgmr.msrb.gmra.mxu2 %v1096_v51 }
  0x68   : >>> { %944 = vmatmul.bf16.vlgmr.msrb.gmra.mxu3 %v879_v24 }
  0x76   : >>> { %1055 = vmatmul.bf16.gmra.mxu1 %v990_v34 }
  0x77   : >>> { %1160 = vmatmul.bf16.gmra.mxu2 %v1095_v36  ;;  %v1171_v36 = vperm.slane (%p404_p6), %v2178_v27, 0 }
  0xc2   : >>> { %v510_v39 = vpop.f32.mrf.mxu0 }
  0xc3   : >>> { %v619_v40 = vpop.f32.mrf.mxu1  ;;  %v520_v48 = vadd.f32 %v2073_v33, %v510_v39 }
  0xc5   : >>> { %v629_v49 = vadd.f32 %v619_v40, %v520_v48 }
  0xca   : >>> { %v724_v41 = vpop.f32.mrf.mxu2  ;;  %v512_v43 = vpop.f32.mrf.mxu0 }
  0xcb   : >>> { %v835_v42 = vpop.f32.mrf.mxu3  ;;  %v621_v44 = vpop.f32.mrf.mxu1  ;;  %v734_v57 = vadd.f32 %v724_v41, %v629_v49  ;;  %v521_v58 = vadd.f32 %v2069_v32, %v512_v43 }
  0xcd   : >>> { %v845_v61 = vadd.f32 %v835_v42, %v734_v57  ;;  %v630_v63 = vadd.f32 %v621_v44, %v521_v58  ;;  %v1190_v44 = vld [vmem:[%s1183_s23 + $0xc] sm:$0x1] (%p404_p6) }
  0xd2   : >>> { %v726_v45 = vpop.f32.mrf.mxu2  ;;  %v515_v52 = vpop.f32.mrf.mxu0 }
  0xd3   : >>> { %v624_v46 = vpop.f32.mrf.mxu1  ;;  %v837_v47 = vpop.f32.mrf.mxu3  ;;  %v735_v1 = vadd.f32 %v726_v45, %v630_v63  ;;  %v522_v3 = vadd.f32 %v2065_v31, %v515_v52 }
  0xd5   : >>> { %v846_v7 = vadd.f32 %v837_v47, %v735_v1  ;;  %v631_v10 = vadd.f32 %v624_v46, %v522_v3 }
  0xda   : >>> { %v729_v50 = vpop.f32.mrf.mxu2  ;;  %v517_v53 = vpop.f32.mrf.mxu0 }
  0xdb   : >>> { %v626_v55 = vpop.f32.mrf.mxu1  ;;  %v840_v56 = vpop.f32.mrf.mxu3  ;;  %v736_v12 = vadd.f32 %v729_v50, %v631_v10  ;;  %v523_v14 = vadd.f32 %v2061_v30, %v517_v53 }
  0xdd   : >>> { %v847_v16 = vadd.f32 %v840_v56, %v736_v12  ;;  %v632_v17 = vadd.f32 %v626_v55, %v523_v14 }
  0xe2   : >>> { %v731_v59 = vpop.f32.mrf.mxu2  ;;  %v940_v60 = vpop.f32.mrf.mxu0 }
  0xe3   : >>> { %v1051_v62 = vpop.f32.mrf.mxu1  ;;  %v950_v0 = vadd.f32 %v940_v60, %v845_v61  ;;  %v842_v2 = vpop.f32.mrf.mxu3  ;;  %v737_v31 = vadd.f32 %v731_v59, %v632_v17 }
  0xe5   : >>> { %v1061_v5 = vadd.f32 %v1051_v62, %v950_v0  ;;  %v848_v23 = vadd.f32 %v842_v2, %v737_v31 }
  0xea   : >>> { %v1156_v33 = vpop.f32.mrf.mxu2  ;;  %v942_v6 = vpop.f32.mrf.mxu0 }
  0xeb   : >>> { %v1166_v8 = vadd.f32 %v1156_v33, %v1061_v5   ;;  %v1053_v9 = vpop.f32.mrf.mxu1  ;;  %v951_v11 = vadd.f32 %v942_v6, %v846_v7  ;;  %v945_v54 = vpop.f32.mrf.mxu3 }
  0xec   : >>> { %v952_v18 = vadd.f32 %v945_v54, %v847_v16 }
  0xed   : >>> { %v1062_v32 = vadd.f32 %v1053_v9, %v951_v11  ;;  %v2385_v33 = vmov %v1166_v8  ;;  %v1173_v37 = vadd.f32 (%p404_p6), %v1171_v36, %v1166_v8 }
  0xef   : >> { %v1205_v42 = vmul.f32 (%p404_p6), %v1173_v37, %v1173_v37 }
  0xf2   : >>> { %v1158_v13 = vpop.f32.mrf.mxu2 }
  0xf3   : >>> { %v1167_v15 = vadd.f32 %v1158_v13, %v1062_v32   ;;  %v1056_v4 = vpop.f32.mrf.mxu1  ;;  %v947_v22 = vpop.f32.mrf.mxu3 }
  0xf4   : >>> { %v1063_v19 = vadd.f32 %v1056_v4, %v952_v18  ;;  %v953_v25 = vadd.f32 %v947_v22, %v848_v23 }
  0xf5   : >>> { %v2384_v32 = vmov %v1167_v15  ;;  %v1174_v38 = vadd.f32 (%p404_p6), %v1171_v36, %v1167_v15 }
  0xf7   : >> { %v1874_v40 = vpack.c.bf16 (%p404_p6), %v1174_v38, %v1173_v37  ;;  %v1193_v41 = vadd.f32 (%p404_p6), %v1174_v38, %v1173_v37  ;;  %v1206_v43 = vmul.f32 (%p404_p6), %v1174_v38, %v1174_v38 }
  0xf9   : >> { %1875 = vst [vmem:[%s1183_s23] sm:$0xff] (%p404_p6), %v1874_v40   ;;  %v1209_v47 = vadd.f32 (%p404_p6), %v1206_v43, %v1205_v42 }
  0xfa   : >>> { %v1161_v20 = vpop.f32.mrf.mxu2 }
  0xfb   : >>> { %v1168_v21 = vadd.f32 %v1161_v20, %v1063_v19   ;;  %v1058_v24 = vpop.f32.mrf.mxu1 }
  0xfc   : >>> { %v1064_v26 = vadd.f32 %v1058_v24, %v953_v25 }
  0xfd   : >>> { %v2383_v31 = vmov %v1168_v21  ;;  %v1175_v51 = vadd.f32 (%p404_p6), %v1171_v36, %v1168_v21 }
  0xff   : >> { %v1179_v45 = vpack.c.bf16 (%p404_p6), %v1175_v51, %v1175_v51  ;;  %v1194_v48 = vadd.f32 (%p404_p6), %v1193_v41, %v1175_v51 }
 0x101   : >> { %406 = sbr.rel (!%p404_p6) target bundleno = 34 (0x22), region = 137  ;;  %1186 = vst [vmem:[%s1183_s23 + $0x8] sm:$0xf] (%p404_p6), %v1179_v45 }
 0x102   : >>> { %v1163_v34 = vpop.f32.mrf.mxu2 }
 0x103   : >>> { %v1169_v35 = vadd.f32 %v1163_v34, %v1064_v26  }
 0x105   : >>> { %v2382_v30 = vmov %v1169_v35  ;;  %v1176_v39 = vadd.f32 (%p404_p6), %v1171_v36, %v1169_v35 }
 0x106   : >> { %v1207_v30 = vmul.f32 %v1175_v51, %v1175_v51 }
 0x107   : >> { %v1180_v52 = vpack.c.bf16 %v1176_v39, %v1176_v39  ;;  %v1196_v46 = vsel %vm1187_vm9, %v1176_v39, 0.0  ;;  %v1208_v50 = vmul.f32 %v1176_v39, %v1176_v39 }
 0x108   : >> { %v1197_v55 = vadd.f32 %v1196_v46, %v1194_v48  ;;  %v1210_v49 = vadd.f32 %v1209_v47, %v1207_v30 }
 0x109   : >> { %v1191_v53 = vsel %vm1189_vm11, %v1180_v52, %v1190_v44  ;;  %v1211_v56 = vsel %vm1187_vm9, %v1208_v50, 0.0 }
 0x10a   : >> { %1192 = vst [vmem:[%s1183_s23 + $0xc] sm:$0x1] %v1191_v53  ;;  %v1198_v57 = vrot.slane %v1197_v55, 4  ;;  %v1212_v58 = vadd.f32 %v1211_v56, %v1210_v49 }
 0x10c   : >> { %v1199_v59 = vadd.f32 %v1198_v57, %v1197_v55  ;;  %v1213_v60 = vrot.slane %v1212_v58, 4 }
 0x10e   : >> { %v1200_v61 = vrot.slane %v1199_v59, 2  ;;  %v1214_v62 = vadd.f32 %v1213_v60, %v1212_v58 }
 0x110   : >> { %v1201_v63 = vadd.f32 %v1200_v61, %v1199_v59  ;;  %v1215_v0 = vrot.slane %v1214_v62, 2 }
 0x112   : >> { %v1202_v1 = vrot.slane %v1201_v63, 1  ;;  %v1216_v2 = vadd.f32 %v1215_v0, %v1214_v62 }
 0x114   : >> { %v1203_v3 = vadd.f32 %v1202_v1, %v1201_v63  ;;  %v1217_v5 = vrot.slane %v1216_v2, 1 }
 0x116   : >> { %v1204_v33 = vadd.f32 %v2053_v29, %v1203_v3   ;;  %v1218_v6 = vadd.f32 %v1217_v5, %v1216_v2  ;;  %397 = sbr.rel (!%p395_p7) target bundleno = 33 (0x21), region = 148 }
 0x118   : >> { %v1219_v7 = vadd.f32 %v2049_v28, %v1218_v6   ;;  %v2387_v29 = vmov %v1204_v33  ;;  %1220 = vst [vmem:[%s330_s12] sm:$0x1] (%p395_p7), %v1204_v33 }
 0x11a   : >> { %v2386_v28 = vmov %v1219_v7  ;;  %1221 = vst [vmem:[%s336_s16] sm:$0x1] (%p395_p7), %v1219_v7 }
 0x11b PF: > { %s18_s26 = sadd.s32 1, %s2041_s26   ;;  %s2388_s24 = smov %s2037_s25 }
 0x11c   : > { %p15_p8 = scmp.ge.s32.totalorder %s18_s26, 4   ;;  %s2389_s25 = smov %s2391_s27 }
 0x11e   :  { %17 = sbr.rel (!%p15_p8) target bundleno = 2 (0x2), region = 159 }

// kernel: forward.15
= control target key start
LH: loop header
LB: loop body
LE: loop exit
PB: predicated region body
PF: predicated region fallthrough
CT: control target
= control target key end

     0   :  { %14 = vsyncpa [#allocation3], 0  ;;  %s1818_s0 = inlined_call_operand.vmem [shape: bf16[2,1152], index: 0, kind: input, shape index: {}]   ;;  %s1819_s1 = inlined_call_operand.vmem [shape: f32[1,1152], index: 1, kind: input, shape index: {}]   ;;  %s1820_s2 = inlined_call_operand.vmem [shape: f32[1,1152], index: 2, kind: input, shape index: {}]   ;;  %s1821_s3 = inlined_call_operand.vmem [shape: bf16[1152,128], index: 3, kind: input, shape index: {}]   ;;  %s1822_s4 = inlined_call_operand.vmem [shape: f32[1,128], index: 4, kind: input, shape index: {}]   ;;  %s1823_s5 = inlined_call_operand.vmem [shape: f32[1,128], index: 5, kind: input, shape index: {}]   ;;  %s1824_s6 = inlined_call_operand.vmem [shape: f32[1,128], index: 6, kind: input, shape index: {}]   ;;  %s1825_s7 = inlined_call_operand.vmem [shape: bf16[128,14], index: 7, kind: input, shape index: {}]   ;;  %s1826_s8 = inlined_call_operand.hbm [shape: f32[1,14], index: 8, kind: input, shape index: {}]   ;;  %s1827_s9 = inlined_call_operand.hbm [shape: f32[2,14], index: 9, kind: output, shape index: {}]  }
   0x1   :  { %15 = vsyncpa [#allocation4], 0  ;;  %s37_s11 = sshll.u32 %s1826_s8, 4  ;;  %s1455_s12 = smov [#allocation2]   ;;  %s38_s11 = int_to_ptr.hbm [resolvable:$true] %s37_s11 }
   0x2   :  { %s39_s13 = sshll.u32 %s1455_s12, 4  ;;  %s40_s13 = int_to_ptr.vmem [resolvable:$true] %s39_s13 }
   0x3   :  { %42 = dma.hbm_to_vmem [thread:$0]  %s38_s11, 16, %s40_s13, [#allocation3]  }
   0x4   :  { %1451 = dma.done.wait [#allocation3], 16  }
   0x5   :  { %1452 = vsyncadd [#allocation3], 4294967280  ;;  %v1322_v0 = vld [vmem:[%s1821_s3 + $0x38] sm:$0xff]  ;;  %v1321_v4 = vld [vmem:[%s1821_s3 + $0x30] sm:$0xff]  ;;  %vm72_vm0 = vcmask 1041408   ;;  %vm74_vm1 = vcmask 1045508  }
   0x6   :  { %v1338_v1 = vld [vmem:[%s1821_s3 + $0xb8] sm:$0xff]  ;;  %734 = vmatpush.bf16.msra.mxu0 %v1322_v0  ;;  %v1337_v5 = vld [vmem:[%s1821_s3 + $0xb0] sm:$0xff]  ;;  %v1320_v8 = vld [vmem:[%s1821_s3 + $0x28] sm:$0xff]  ;;  %vm76_vm2 = vcmask 1043456   ;;  %s985_s23 = sshll.u32 %s1827_s9, 4  ;;  %vm976_vm6 = vcmask 107520   ;;  %s986_s23 = int_to_ptr.hbm [resolvable:$true] %s985_s23 }
   0x7   :  { %v1346_v2 = vld [vmem:[%s1821_s3 + $0xf8] sm:$0xff]  ;;  %760 = vmatpush.bf16.msra.mxu2 %v1338_v1  ;;  %v1345_v6 = vld [vmem:[%s1821_s3 + $0xf0] sm:$0xff]  ;;  %v1336_v9 = vld [vmem:[%s1821_s3 + $0xa8] sm:$0xff] }
   0x8   :  { %v1330_v3 = vld [vmem:[%s1821_s3 + $0x78] sm:$0xff]  ;;  %773 = vmatpush.bf16.msra.mxu3 %v1346_v2  ;;  %v1329_v7 = vld [vmem:[%s1821_s3 + $0x70] sm:$0xff]  ;;  %v1344_v10 = vld [vmem:[%s1821_s3 + $0xe8] sm:$0xff] }
   0x9   :  { %747 = vmatpush.bf16.msra.mxu1 %v1330_v3  ;;  %v1328_v11 = vld [vmem:[%s1821_s3 + $0x68] sm:$0xff]  ;;  %v1319_v12 = vld [vmem:[%s1821_s3 + $0x20] sm:$0xff]  ;;  %v1318_v16 = vld [vmem:[%s1821_s3 + $0x18] sm:$0xff] }
   0xa   :  { %735 = vmatpush.bf16.msra.mxu0 %v1321_v4  ;;  %v1335_v13 = vld [vmem:[%s1821_s3 + $0xa0] sm:$0xff]  ;;  %v1334_v17 = vld [vmem:[%s1821_s3 + $0x98] sm:$0xff]  ;;  %v1317_v22 = vld [vmem:[%s1821_s3 + $0x10] sm:$0xff] }
   0xb   :  { %761 = vmatpush.bf16.msra.mxu2 %v1337_v5  ;;  %v1343_v14 = vld [vmem:[%s1821_s3 + $0xe0] sm:$0xff]  ;;  %v1342_v18 = vld [vmem:[%s1821_s3 + $0xd8] sm:$0xff]  ;;  %v1333_v27 = vld [vmem:[%s1821_s3 + $0x90] sm:$0xff] }
   0xc   :  { %774 = vmatpush.bf16.msra.mxu3 %v1345_v6  ;;  %v1327_v15 = vld [vmem:[%s1821_s3 + $0x60] sm:$0xff]  ;;  %v1326_v19 = vld [vmem:[%s1821_s3 + $0x58] sm:$0xff]  ;;  %v1341_v28 = vld [vmem:[%s1821_s3 + $0xd0] sm:$0xff] }
   0xd   :  { %748 = vmatpush.bf16.msra.mxu1 %v1329_v7  ;;  %v1573_v20 = vld [vmem:[%s1819_s1] sm:$0xff]  ;;  %v1325_v33 = vld [vmem:[%s1821_s3 + $0x50] sm:$0xff]  ;;  %v48_v37 = vld [vmem:[%s1818_s0 + $0x8] sm:$0x1] }
   0xe   :  { %736 = vmatpush.bf16.msra.mxu0 %v1320_v8  ;;  %v1578_v21 = vld [vmem:[%s1820_s2] sm:$0xff]  ;;  %v56_v24 = vperm.slane %v1573_v20, 0  ;;  %v57_v25 = vperm.slane %v1573_v20, 1  ;;  %v58_v26 = vperm.slane %v1573_v20, 2  ;;  %v59_v29 = vperm.slane %v1573_v20, 3  ;;  %v1316_v44 = vld [vmem:[%s1821_s3 + $0x8] sm:$0xff] }
   0xf   :  { %762 = vmatpush.bf16.msra.mxu2 %v1336_v9  ;;  %v1586_v23 = vld [vmem:[%s1818_s0] sm:$0xff]  ;;  %v90_v30 = vperm.slane %v1578_v21, 0  ;;  %v91_v31 = vperm.slane %v1578_v21, 1  ;;  %v92_v32 = vperm.slane %v1578_v21, 2  ;;  %v93_v36 = vperm.slane %v1578_v21, 3  ;;  %v1332_v45 = vld [vmem:[%s1821_s3 + $0x88] sm:$0xff] }
  0x10   :  { %775 = vmatpush.bf16.msra.mxu3 %v1344_v10  ;;  %v66_v34 = vrot.slane %v57_v25, 6  ;;  %v67_v35 = vrot.slane %v58_v26, 4  ;;  %v49_v38 = vunpack.c.l.bf16 %v1586_v23  ;;  %v68_v39 = vrot.slane %v59_v29, 2  ;;  %v1340_v50 = vld [vmem:[%s1821_s3 + $0xc8] sm:$0xff]  ;;  %v1315_v1 = vld [vmem:[%s1821_s3] sm:$0xff]  ;;  %v1354_v7 = vld [vmem:[%s1821_s3 + $0x138] sm:$0xff] }
  0x11   :  { %749 = vmatpush.bf16.msra.mxu1 %v1328_v11  ;;  %v100_v40 = vrot.slane %v91_v31, 6  ;;  %v101_v41 = vrot.slane %v92_v32, 4  ;;  %v102_v43 = vrot.slane %v93_v36, 2  ;;  %v60_v48 = vperm.slane %v1573_v20, 4  ;;  %v1324_v51 = vld [vmem:[%s1821_s3 + $0x48] sm:$0xff]  ;;  %v1331_v2 = vld [vmem:[%s1821_s3 + $0x80] sm:$0xff] }
  0x12   :  { %737 = vmatpush.bf16.msra.mxu0 %v1319_v12  ;;  %v73_v42 = vsel %vm72_vm0, %v56_v24, %v66_v34  ;;  %v75_v46 = vsel %vm74_vm1, %v67_v35, %v68_v39  ;;  %v61_v49 = vperm.slane %v1573_v20, 5  ;;  %v51_v54 = vunpack.c.l.bf16 %v48_v37  ;;  %v1397_v55 = vld [vmem:[%s1819_s1 + $0x8] ss:$0 sm:$0xff]  ;;  %v1370_v8 = vld [vmem:[%s1821_s3 + $0x1b8] sm:$0xff]  ;;  %v1353_v24 = vld [vmem:[%s1821_s3 + $0x130] sm:$0xff] }
  0x13   :  { %763 = vmatpush.bf16.msra.mxu2 %v1335_v13  ;;  %v106_v47 = vsel %vm72_vm0, %v90_v30, %v100_v40  ;;  %v77_v52 = vsel %vm76_vm2, %v73_v42, %v75_v46  ;;  %v107_v53 = vsel %vm74_vm1, %v101_v41, %v102_v43  ;;  %v62_v56 = vperm.slane %v1573_v20, 6  ;;  %v1398_v10 = vld [vmem:[%s1820_s2 + $0x8] ss:$0 sm:$0xff]  ;;  %v1339_v13 = vld [vmem:[%s1821_s3 + $0xc0] sm:$0xff]  ;;  %v1369_v25 = vld [vmem:[%s1821_s3 + $0x1b0] sm:$0xff] }
  0x14   :  { %776 = vmatpush.bf16.msra.mxu3 %v1343_v14  ;;  %v83_v57 = vmul.f32 %v77_v52, %v49_v38  ;;  %v108_v58 = vsel %vm76_vm2, %v106_v47, %v107_v53  ;;  %v63_v59 = vperm.slane %v1573_v20, 7  ;;  %v69_v60 = vrot.slane %v61_v49, 6  ;;  %v1323_v14 = vld [vmem:[%s1821_s3 + $0x40] sm:$0xff]  ;;  %v1377_v29 = vld [vmem:[%s1821_s3 + $0x1f0] sm:$0xff]  ;;  %v1352_v32 = vld [vmem:[%s1821_s3 + $0x128] sm:$0xff] }
  0x15   :  { %750 = vmatpush.bf16.msra.mxu1 %v1327_v15  ;;  %v50_v61 = vunpack.c.h.bf16 %v1586_v23  ;;  %v70_v62 = vrot.slane %v62_v56, 4  ;;  %v94_v63 = vperm.slane %v1578_v21, 4  ;;  %v95_v0 = vperm.slane %v1578_v21, 5  ;;  %v1361_v30 = vld [vmem:[%s1821_s3 + $0x170] sm:$0xff]  ;;  %v1376_v35 = vld [vmem:[%s1821_s3 + $0x1e8] sm:$0xff]  ;;  %v1359_v49 = vld [vmem:[%s1821_s3 + $0x160] sm:$0xff] }
  0x16   :  { %738 = vmatpush.bf16.msra.mxu0 %v1318_v16  ;;  %v114_v3 = vadd.f32 %v108_v58, %v83_v57  ;;  %v71_v4 = vrot.slane %v63_v59, 2  ;;  %v78_v5 = vsel %vm72_vm0, %v60_v48, %v69_v60  ;;  %v96_v6 = vperm.slane %v1578_v21, 6  ;;  %v1360_v36 = vld [vmem:[%s1821_s3 + $0x168] sm:$0xff]  ;;  %v1375_v48 = vld [vmem:[%s1821_s3 + $0x1e0] sm:$0xff]  ;;  %v1374_v52 = vld [vmem:[%s1821_s3 + $0x1d8] sm:$0xff] }
  0x17   :  { %764 = vmatpush.bf16.msra.mxu2 %v1334_v17  ;;  %v85_v9 = vmul.f32 %v1397_v55, %v51_v54  ;;  %v97_v11 = vperm.slane %v1578_v21, 7  ;;  %v103_v12 = vrot.slane %v95_v0, 6  ;;  %v1358_v53 = vld [vmem:[%s1821_s3 + $0x158] sm:$0xff]  ;;  %v1349_v54 = vld [vmem:[%s1821_s3 + $0x110] sm:$0xff]  ;;  %v1348_v58 = vld [vmem:[%s1821_s3 + $0x108] sm:$0xff] }
  0x18   :  { %777 = vmatpush.bf16.msra.mxu3 %v1342_v18  ;;  %v117_v15 = vmax.f32 %v114_v3, 0.0  ;;  %v79_v16 = vsel %vm74_vm1, %v70_v62, %v71_v4  ;;  %v104_v17 = vrot.slane %v96_v6, 4  ;;  %v1378_v18 = vld [vmem:[%s1821_s3 + $0x1f8] sm:$0xff]  ;;  %v1365_v55 = vld [vmem:[%s1821_s3 + $0x190] sm:$0xff]  ;;  %v1364_v59 = vld [vmem:[%s1821_s3 + $0x188] sm:$0xff] }
  0x19   :  { %751 = vmatpush.bf16.msra.mxu1 %v1326_v19  ;;  %v1362_v19 = vld [vmem:[%s1821_s3 + $0x178] sm:$0xff]  ;;  %v80_v20 = vsel %vm76_vm2, %v78_v5, %v79_v16  ;;  %v105_v21 = vrot.slane %v97_v11, 2  ;;  %v116_v26 = vadd.f32 %v1398_v10, %v85_v9  ;;  %v1373_v56 = vld [vmem:[%s1821_s3 + $0x1d0] sm:$0xff]  ;;  %v1372_v60 = vld [vmem:[%s1821_s3 + $0x1c8] sm:$0xff] }
  0x1a   :  { %739 = vmatpush.bf16.msra.mxu0 %v1317_v22  ;;  %v109_v22 = vsel %vm72_vm0, %v94_v63, %v103_v12  ;;  %123 = vst [vmem:[#allocation1] ss:$4 sm:$0xff] %v117_v15  ;;  %v84_v23 = vmul.f32 %v80_v20, %v50_v61  ;;  %v1357_v57 = vld [vmem:[%s1821_s3 + $0x150] sm:$0xff]  ;;  %v1356_v61 = vld [vmem:[%s1821_s3 + $0x148] sm:$0xff]  ;;  %v1347_v62 = vld [vmem:[%s1821_s3 + $0x100] sm:$0xff] }
  0x1b   :  { %765 = vmatpush.bf16.msra.mxu2 %v1333_v27  ;;  %v110_v27 = vsel %vm74_vm1, %v104_v17, %v105_v21  ;;  %v119_v34 = vmax.f32 %v116_v26, 0.0  ;;  %v1363_v63 = vld [vmem:[%s1821_s3 + $0x180] sm:$0xff]  ;;  %v1385_v9 = vld [vmem:[%s1821_s3 + $0x230] sm:$0xff]  ;;  %v1384_v12 = vld [vmem:[%s1821_s3 + $0x228] sm:$0xff] }
  0x1c   :  { %778 = vmatpush.bf16.msra.mxu3 %v1341_v28  ;;  %v111_v28 = vsel %vm76_vm2, %v109_v22, %v110_v27  ;;  %v1371_v3 = vld [vmem:[%s1821_s3 + $0x1c0] sm:$0xff]  ;;  %v1381_v15 = vld [vmem:[%s1821_s3 + $0x210] sm:$0xff]  ;;  %v1380_v16 = vld [vmem:[%s1821_s3 + $0x208] sm:$0xff] }
  0x1d   :  { %752 = vmatpush.bf16.msra.mxu1 %v1325_v33  ;;  %v115_v31 = vadd.f32 %v111_v28, %v84_v23  ;;  %v1368_v33 = vld [vmem:[%s1821_s3 + $0x1a8] sm:$0xff]  ;;  %v1355_v4 = vld [vmem:[%s1821_s3 + $0x140] sm:$0xff] }
  0x1e   :  { %740 = vmatpush.bf16.msra.mxu0 %v1316_v44  ;;  %v1351_v44 = vld [vmem:[%s1821_s3 + $0x120] sm:$0xff] }
  0x1f   :  { %766 = vmatpush.bf16.msra.mxu2 %v1332_v45  ;;  %v118_v37 = vmax.f32 %v115_v31, 0.0  ;;  %v1367_v45 = vld [vmem:[%s1821_s3 + $0x1a0] sm:$0xff] }
  0x20   :  { %779 = vmatpush.bf16.msra.mxu3 %v1340_v50  ;;  %v1350_v50 = vld [vmem:[%s1821_s3 + $0x118] sm:$0xff]  ;;  %v1379_v17 = vld [vmem:[%s1821_s3 + $0x200] sm:$0xff] }
  0x21   :  { %753 = vmatpush.bf16.msra.mxu1 %v1324_v51  ;;  %v128_v38 = vld.sshfl [vmem:[#allocation1 + $0x10] sm:$0xff pattern:$0x73625140]  ;;  %v126_v39 = vld.sshfl [vmem:[#allocation1] sm:$0xff pattern:$0x73625140] }
  0x22   :  { %741 = vmatpush.bf16.msra.mxu0 %v1315_v1  ;;  %v147_v40 = vpack.c.bf16 %v128_v38, %v128_v38  ;;  %v145_v41 = vpack.c.bf16 %v126_v39, %v126_v39  ;;  %v129_v42 = vld.sshfl [vmem:[#allocation1 + $0x18] sm:$0xff pattern:$0x73625140]  ;;  %v127_v43 = vld.sshfl [vmem:[#allocation1 + $0x8] sm:$0xff pattern:$0x73625140] }
  0x23   :  { %767 = vmatpush.bf16.msra.mxu2 %v1331_v2  ;;  %v148_v46 = vpack.c.bf16 %v129_v42, %v129_v42  ;;  %134 = vst [vmem:[#allocation1] ss:$4 sm:$0xff] %v119_v34  ;;  %v146_v47 = vpack.c.bf16 %v127_v43, %v127_v43  ;;  %v1366_v51 = vld [vmem:[%s1821_s3 + $0x198] sm:$0xff]  ;;  %v1399_v28 = vld [vmem:[%s1822_s4] ss:$0 sm:$0xff] }
  0x24   :  { %780 = vmatpush.bf16.msra.mxu3 %v1339_v13  ;;  %125 = vst [vmem:[#allocation1 + $0x20] ss:$4 sm:$0xff] %v118_v37  ;;  %v1386_v2 = vld [vmem:[%s1821_s3 + $0x238] sm:$0xff]  ;;  %v1383_v13 = vld [vmem:[%s1821_s3 + $0x220] sm:$0xff] }
  0x25   :  { %754 = vmatpush.bf16.msra.mxu1 %v1323_v14  ;;  %742 = vmatmul.bf16.vlgmr.msra.gmra.mxu0 %v145_v41  ;;  %v1382_v14 = vld [vmem:[%s1821_s3 + $0x218] sm:$0xff] }
  0x26   :  { %786 = vmatpush.bf16.msrb.mxu0 %v1354_v7  ;;  %768 = vmatmul.bf16.vlgmr.msra.gmra.mxu2 %v147_v40 }
  0x27   :  { %812 = vmatpush.bf16.msrb.mxu2 %v1370_v8  ;;  %781 = vmatmul.bf16.vlgmr.msra.gmra.mxu3 %v148_v46 }
  0x28   :  { %825 = vmatpush.bf16.msrb.mxu3 %v1378_v18  ;;  %755 = vmatmul.bf16.vlgmr.msra.gmra.mxu1 %v146_v47 }
  0x29   :  { %799 = vmatpush.bf16.msrb.mxu1 %v1362_v19 }
  0x2a   :  { %787 = vmatpush.bf16.msrb.mxu0 %v1353_v24  ;;  %v135_v18 = vld.sshfl [vmem:[#allocation1] sm:$0xff pattern:$0x73625140] }
  0x2b   :  { %813 = vmatpush.bf16.msrb.mxu2 %v1369_v25  ;;  %v132_v0 = vld.sshfl [vmem:[#allocation1 + $0x30] sm:$0xff pattern:$0x73625140]  ;;  %v130_v1 = vld.sshfl [vmem:[#allocation1 + $0x20] sm:$0xff pattern:$0x73625140]  ;;  %v153_v19 = vpack.c.bf16 %v135_v18, %v135_v18 }
  0x2c   :  { %826 = vmatpush.bf16.msrb.mxu3 %v1377_v29  ;;  %v133_v5 = vld.sshfl [vmem:[#allocation1 + $0x38] sm:$0xff pattern:$0x73625140]  ;;  %v151_v6 = vpack.c.bf16 %v132_v0, %v132_v0  ;;  %v149_v7 = vpack.c.bf16 %v130_v1, %v130_v1  ;;  %v131_v8 = vld.sshfl [vmem:[#allocation1 + $0x28] sm:$0xff pattern:$0x73625140] }
  0x2d   :  { %800 = vmatpush.bf16.msrb.mxu1 %v1361_v30  ;;  %v152_v10 = vpack.c.bf16 %v133_v5, %v133_v5  ;;  %v150_v11 = vpack.c.bf16 %v131_v8, %v131_v8  ;;  %v1388_v5 = vld [vmem:[%s1825_s7 + $0x8] sm:$0xff]  ;;  %v1387_v8 = vld [vmem:[%s1825_s7] sm:$0xff] }
  0x2e   :  { %788 = vmatpush.bf16.msrb.mxu0 %v1352_v32 }
  0x2f   :  { %814 = vmatpush.bf16.msrb.mxu2 %v1368_v33 }
  0x30   :  { %827 = vmatpush.bf16.msrb.mxu3 %v1376_v35 }
  0x31   :  { %801 = vmatpush.bf16.msrb.mxu1 %v1360_v36 }
  0x32   :  { %789 = vmatpush.bf16.msrb.mxu0 %v1351_v44 }
  0x33   :  { %815 = vmatpush.bf16.msrb.mxu2 %v1367_v45 }
  0x34   :  { %828 = vmatpush.bf16.msrb.mxu3 %v1375_v48 }
  0x35   :  { %802 = vmatpush.bf16.msrb.mxu1 %v1359_v49 }
  0x36   :  { %790 = vmatpush.bf16.msrb.mxu0 %v1350_v50  ;;  %v1394_v50 = vld [vmem:[%s1825_s7 + $0x38] sm:$0xff] }
  0x37   :  { %816 = vmatpush.bf16.msrb.mxu2 %v1366_v51 }
  0x38   :  { %829 = vmatpush.bf16.msrb.mxu3 %v1374_v52 }
  0x39   :  { %803 = vmatpush.bf16.msrb.mxu1 %v1358_v53 }
  0x3a   :  { %791 = vmatpush.bf16.msrb.mxu0 %v1349_v54  ;;  %v1393_v54 = vld [vmem:[%s1825_s7 + $0x30] sm:$0xff] }
  0x3b   :  { %817 = vmatpush.bf16.msrb.mxu2 %v1365_v55 }
  0x3c   :  { %830 = vmatpush.bf16.msrb.mxu3 %v1373_v56 }
  0x3d   :  { %804 = vmatpush.bf16.msrb.mxu1 %v1357_v57  ;;  %v1392_v57 = vld [vmem:[%s1825_s7 + $0x28] sm:$0xff] }
  0x3e   :  { %792 = vmatpush.bf16.msrb.mxu0 %v1348_v58 }
  0x3f   :  { %818 = vmatpush.bf16.msrb.mxu2 %v1364_v59 }
  0x40   :  { %831 = vmatpush.bf16.msrb.mxu3 %v1372_v60  ;;  %v1391_v60 = vld [vmem:[%s1825_s7 + $0x20] sm:$0xff] }
  0x41   :  { %805 = vmatpush.bf16.msrb.mxu1 %v1356_v61 }
  0x42   :  { %793 = vmatpush.bf16.msrb.mxu0 %v1347_v62 }
  0x43   :  { %819 = vmatpush.bf16.msrb.mxu2 %v1363_v63  ;;  %v1390_v63 = vld [vmem:[%s1825_s7 + $0x18] sm:$0xff] }
  0x44   :  { %832 = vmatpush.bf16.msrb.mxu3 %v1371_v3 }
  0x45   :  { %806 = vmatpush.bf16.msrb.mxu1 %v1355_v4  ;;  %794 = vmatmul.bf16.vlgmr.msrb.gmra.mxu0 %v149_v7 }
  0x46   :  { %838 = vmatpush.bf16.msra.mxu0 %v1386_v2  ;;  %820 = vmatmul.bf16.vlgmr.msrb.gmra.mxu2 %v151_v6  ;;  %v1389_v2 = vld [vmem:[%s1825_s7 + $0x10] sm:$0xff] }
  0x47   :  { %833 = vmatmul.bf16.vlgmr.msrb.gmra.mxu3 %v152_v10 }
  0x48   :  { %807 = vmatmul.bf16.vlgmr.msrb.gmra.mxu1 %v150_v11 }
  0x49   :  { %963 = vmatpush.bf16.msra.mxu1 %v1394_v50 }
  0x4a   :  { %839 = vmatpush.bf16.msra.mxu0 %v1385_v9 }
  0x4d   :  { %964 = vmatpush.bf16.msra.mxu1 %v1393_v54 }
  0x4e   :  { %840 = vmatpush.bf16.msra.mxu0 %v1384_v12 }
  0x51   :  { %965 = vmatpush.bf16.msra.mxu1 %v1392_v57 }
  0x52   :  { %841 = vmatpush.bf16.msra.mxu0 %v1383_v13 }
  0x55   :  { %966 = vmatpush.bf16.msra.mxu1 %v1391_v60 }
  0x56   :  { %842 = vmatpush.bf16.msra.mxu0 %v1382_v14 }
  0x59   :  { %967 = vmatpush.bf16.msra.mxu1 %v1390_v63 }
  0x5a   :  { %843 = vmatpush.bf16.msra.mxu0 %v1381_v15 }
  0x5d   :  { %968 = vmatpush.bf16.msra.mxu1 %v1389_v2 }
  0x5e   :  { %844 = vmatpush.bf16.msra.mxu0 %v1380_v16  ;;  %v869_v16 = vld [vmem:[%s1823_s5] sm:$0x1]  ;;  %s1456_s5 = smov [#allocation5]  }
  0x5f   :  { %s983_s20 = sshll.u32 %s1456_s5, 4  ;;  %s984_s20 = int_to_ptr.vmem [resolvable:$true] %s983_s20 }
  0x61   :  { %969 = vmatpush.bf16.msra.mxu1 %v1388_v5 }
  0x62   :  { %845 = vmatpush.bf16.msra.mxu0 %v1379_v17 }
  0x65   :  { %846 = vmatmul.bf16.vlgmr.msra.gmra.mxu0 %v153_v19  ;;  %970 = vmatpush.bf16.msra.mxu1 %v1387_v8 }
  0xa2   :  { %v743_v20 = vpop.f32.mrf.mxu0 }
  0xa3   :  { %v744_v29 = vadd.f32 %v1399_v28, %v743_v20  ;;  %v882_v20 = vld [vmem:[%s1824_s6] sm:$0x1] }
  0xa5   :  { %v756_v21 = vpop.f32.mrf.mxu1 }
  0xa6   :  { %v757_v32 = vadd.f32 %v756_v21, %v744_v29  ;;  %v1400_v29 = vld [vmem:[#allocation2] ss:$0 sm:$0xff] }
  0xa9   :  { %v769_v22 = vpop.f32.mrf.mxu2 }
  0xaa   :  { %v782_v23 = vpop.f32.mrf.mxu3  ;;  %v745_v24 = vpop.f32.mrf.mxu0  ;;  %v770_v34 = vadd.f32 %v769_v22, %v757_v32 }
  0xac   :  { %v783_v38 = vadd.f32 %v782_v23, %v770_v34 }
  0xad   :  { %v758_v25 = vpop.f32.mrf.mxu1 }
  0xb1   :  { %v771_v26 = vpop.f32.mrf.mxu2 }
  0xb2   :  { %v784_v27 = vpop.f32.mrf.mxu3 }
  0xc2   :  { %v795_v30 = vpop.f32.mrf.mxu0 }
  0xc3   :  { %v796_v40 = vadd.f32 %v795_v30, %v783_v38 }
  0xc5   :  { %v808_v31 = vpop.f32.mrf.mxu1 }
  0xc6   :  { %v809_v42 = vadd.f32 %v808_v31, %v796_v40 }
  0xc9   :  { %v821_v33 = vpop.f32.mrf.mxu2 }
  0xca   :  { %v834_v35 = vpop.f32.mrf.mxu3  ;;  %v797_v36 = vpop.f32.mrf.mxu0  ;;  %v822_v43 = vadd.f32 %v821_v33, %v809_v42 }
  0xcc   :  { %v835_v44 = vadd.f32 %v834_v35, %v822_v43 }
  0xcd   :  { %v810_v37 = vpop.f32.mrf.mxu1 }
  0xd1   :  { %v823_v39 = vpop.f32.mrf.mxu2 }
  0xd2   :  { %v836_v41 = vpop.f32.mrf.mxu3 }
  0xe2   :  { %v847_v45 = vpop.f32.mrf.mxu0 }
  0xe3   :  { %v848_v46 = vadd.f32 %v847_v45, %v835_v44 }
  0xe5   :  { %v851_v47 = vsel %vm72_vm0, %v848_v46, 0.0 }
  0xe6   :  { %v852_v48 = vrot.slane %v851_v47, 4 }
  0xe8   :  { %v853_v49 = vadd.f32 %v852_v48, %v851_v47 }
  0xea   :  { %v854_v51 = vrot.slane %v853_v49, 2  ;;  %v849_v52 = vpop.f32.mrf.mxu0 }
  0xec   :  { %v855_v53 = vadd.f32 %v854_v51, %v853_v49 }
  0xee   :  { %v856_v55 = vrot.slane %v855_v53, 1 }
  0xf0   :  { %v857_v56 = vadd.f32 %v856_v55, %v855_v53 }
  0xf2   :  { %v858_v58 = vmul.f32 0.5, %v857_v56 }
  0xf4   :  { %v859_v59 = vsub.f32 %v848_v46, %v858_v58 }
  0xf6   :  { %v860_v61 = vmul.f32 %v859_v59, %v859_v59 }
  0xf8   :  { %v861_v62 = vsel %vm72_vm0, %v860_v61, 0.0 }
  0xf9   :  { %v862_v0 = vrot.slane %v861_v62, 4 }
  0xfb   :  { %v863_v1 = vadd.f32 %v862_v0, %v861_v62 }
  0xfd   :  { %v864_v3 = vrot.slane %v863_v1, 2 }
  0xff   :  { %v865_v4 = vadd.f32 %v864_v3, %v863_v1 }
 0x101   :  { %v866_v6 = vrot.slane %v865_v4, 1 }
 0x103   :  { %v867_v7 = vadd.f32 %v866_v6, %v865_v4 }
 0x105   :  { %v868_v9 = vmul.f32 0.5, %v867_v7 }
 0x107   :  { %v870_v10 = vadd.f32 1e-05, %v868_v9 }
 0x109   :  { %1401 = vrsqrt.f32 %v870_v10  ;;  %vm877_vm4 = vweird.f32 %v870_v10 }
 0x10f   :  { %v1402_v11 = vpop.eup %1401 }
 0x110   :  { %v872_v12 = vmul.f32 %v1402_v11, %v870_v10  ;;  %vm878_vm3 = vweird.f32 %v1402_v11 }
 0x111   :  { %vm879_vm5 = vmor %vm877_vm4, %vm878_vm3 }
 0x112   :  { %v873_v13 = vmul.f32 %v1402_v11, %v872_v12 }
 0x114   :  { %v874_v14 = vmul.f32 0.5, %v873_v13 }
 0x116   :  { %v875_v15 = vsub.f32 1.5, %v874_v14 }
 0x118   :  { %v876_v17 = vmul.f32 %v1402_v11, %v875_v15 }
 0x11a   :  { %v880_v18 = vsel %vm879_vm5, %v1402_v11, %v876_v17 }
 0x11b   :  { %v881_v19 = vmul.f32 %v880_v18, %v869_v16 }
 0x11d   :  { %v883_v21 = vmul.f32 %v881_v19, %v858_v58  ;;  %v886_v22 = vperm.slane %v881_v19, 0 }
 0x11f   :  { %v884_v23 = vsub.f32 %v882_v20, %v883_v21  ;;  %v888_v24 = vmul.f32 %v886_v22, %v848_v46 }
 0x121   :  { %v890_v25 = vperm.slane %v884_v23, 0 }
 0x123   :  { %v892_v26 = vadd.f32 %v890_v25, %v888_v24 }
 0x125   :  { %v893_v27 = vmax.f32 %v892_v26, 0.0 }
 0x127   :  { %v894_v28 = vpack.c.bf16 %v893_v27, %v893_v27 }
 0x129   :  { %971 = vmatmul.bf16.vlgmr.msra.gmra.mxu1 %v894_v28 }
 0x1a6   :  { %v972_v30 = vpop.f32.mrf.mxu1 }
 0x1a7   :  { %v973_v31 = vadd.f32 %v1400_v29, %v972_v30 }
 0x1a9   :  { %977 = vst.msk [vmem:[#allocation5] sm:$0x3] %vm976_vm6, %v973_v31 }
 0x1aa   :  { %988 = dma.vmem_to_hbm [thread:$0]  %s984_s20, 32, %s986_s23, [#allocation4]  }
 0x1ae   :  { %v974_v32 = vpop.f32.mrf.mxu1 }
 0x1af   :  { %1453 = dma.done.wait [#allocation4], 32  }
 0x1b0   :  { %1454 = vsyncadd [#allocation4], 4294967264 }
 0x1b1   :  { %993 = vsyncpa [#allocation3], 1 }
 0x1b2   :  { %994 = vsyncpa [#allocation4], 1 }

</bundles_post_ra>
